<compile_context>
chip_gen: v5e
topology: v5e:2x2
jax: 0.10.0
libtpu: 0.0.40
codegen_flags: <defaults>
</compile_context>

<pallas_src>
import functools

import jax
import jax.numpy as jnp
from jax.experimental import pallas as pl
from jax.experimental.pallas import tpu as pltpu

CPAD = 128  # lane-padded channel width for all internal activations


def _round_up(x, m):
    return ((x + m - 1) // m) * m


# ----------------------------------------------------------------------------
# Pallas kernels
# ----------------------------------------------------------------------------
def _conv_taps_kernel(x_ref, w_ref, b_ref, m_ref, o_ref, *, tap_offsets,
                      k_per_tap, activation):
    """Fused conv: accumulate kh*kw shifted taps (statically offset row slices
    of the flat padded input) on the MXU, add bias, optional ReLU, zero the
    invalid (pad) columns via the mask input."""
    mout, tn = o_ref.shape
    acc = jnp.zeros((mout, tn), jnp.float32)
    for t, off in enumerate(tap_offsets):
        a = x_ref[pl.ds(off, mout), :]                       # bf16 (mout, C)
        w = w_ref[pl.ds(t * k_per_tap, k_per_tap), :]        # bf16 (C, tn)
        acc = acc + jnp.dot(a, w, preferred_element_type=jnp.float32)
    acc = acc + b_ref[...]
    if activation == "relu":
        acc = jnp.maximum(acc, 0.0)
    acc = acc * m_ref[...]                                    # (mout,1) mask
    o_ref[...] = acc.astype(o_ref.dtype)


def _resblock_kernel(x_ref, w1_ref, b1_ref, w2_ref, b2_ref, m_ref, o_ref, *,
                     k_per_tap, wp, final_relu):
    """Residual block, fully fused:
       x + [relu -> 3x3 conv -> relu -> 1x1 conv], optional stack-final relu.
       ReLU of the input is applied per tap; the residual term is the raw
       center tap of the padded input (no separate x stream)."""
    mout, cp = o_ref.shape
    rp = w1_ref.shape[1]
    h = jnp.zeros((mout, rp), jnp.float32)
    t = 0
    for dh in range(3):
        for dw in range(3):
            a = jnp.maximum(x_ref[pl.ds(dh * wp + dw, mout), :], 0)
            w = w1_ref[pl.ds(t * k_per_tap, k_per_tap), :]
            h = h + jnp.dot(a, w, preferred_element_type=jnp.float32)
            t += 1
    h = jnp.maximum(h + b1_ref[...], 0.0)
    r = jnp.dot(h.astype(jnp.bfloat16), w2_ref[...],
                preferred_element_type=jnp.float32)
    r = r + b2_ref[...] + x_ref[pl.ds(wp + 1, mout), :].astype(jnp.float32)
    if final_relu:
        r = jnp.maximum(r, 0.0)
    r = r * m_ref[...]
    o_ref[...] = r.astype(o_ref.dtype)


def _vq_kernel(z_ref, e_ref, e2_ref, m_ref, q_ref, enc_ref, sse_ref, cnt_ref,
               *, n_emb):
    """Per-image vector quantization.  bf16 MXU for z@e^T and onehot@e; f32
    distances / argmin; emits quantized latents, one-hot codes, and per-image
    partial SSE / code counts (finalized in XLA)."""
    z = z_ref[...]                                            # (M, D128) bf16
    m, _ = z.shape
    ep = e_ref.shape[0]
    zf = z.astype(jnp.float32)
    z2 = jnp.sum(zf * zf, axis=1, keepdims=True)              # (M, 1)
    ze = jax.lax.dot_general(z, e_ref[...], (((1,), (1,)), ((), ())),
                             preferred_element_type=jnp.float32)  # (M, Ep)
    dist = z2 + e2_ref[...] - 2.0 * ze
    col = jax.lax.broadcasted_iota(jnp.int32, (m, ep), 1)
    dist = jnp.where(col < n_emb, dist, 1e30)                 # mask padded codes
    colf = col.astype(jnp.float32)
    dmin = jnp.min(dist, axis=1, keepdims=True)
    idx = jnp.min(jnp.where(dist <= dmin, colf, float(ep)),
                  axis=1, keepdims=True)                      # first argmin
    enc = (colf == idx).astype(jnp.float32)                   # (M, Ep) one-hot
    quant = jax.lax.dot_general(enc.astype(jnp.bfloat16), e_ref[...],
                                (((1,), (0,)), ((), ())),
                                preferred_element_type=jnp.float32)  # (M, D)
    valid = m_ref[...]                                        # (M, 1) 0/1
    quant = quant * valid
    enc = enc * valid
    d2 = jnp.sum((quant - zf) * (quant - zf), axis=1, keepdims=True) * valid
    sse = jnp.sum(d2, axis=0, keepdims=True)                  # (1, 1)
    sse_ref[...] = jnp.broadcast_to(sse, sse_ref.shape)
    cnt_ref[...] = jnp.sum(enc, axis=0, keepdims=True)        # (1, Ep)
    q_ref[...] = quant.astype(q_ref.dtype)
    enc_ref[...] = enc.astype(enc_ref.dtype)


# ----------------------------------------------------------------------------
# Wrapper-side layout helpers (cheap XLA pad / reshape passes only)
# ----------------------------------------------------------------------------
def _col_mask(h, wrow, wvalid):
    """(h*wrow, 1) f32 mask: 1 on the first `wvalid` columns of each row."""
    m = (jnp.arange(wrow) < wvalid).astype(jnp.float32)
    return jnp.tile(m, h).reshape(h * wrow, 1)


def _s2d_prep(x4, h, w, wrow):
    """Pad (1,*) spatially and space-to-depth 2x2 so a 4x4/s2 conv becomes a
    2x2 stride-1 tap conv.  Returns flat (B, Hq*Wq, 4C) and Wq."""
    b = x4.shape[0]
    c = x4.shape[-1]
    right = (w + 2) - wrow - 1
    assert right >= 0
    xp = jnp.pad(x4, ((0, 0), (1, 3), (1, right), (0, 0)))
    hp, wpd = h + 4, w + 2
    xq = xp.reshape(b, hp // 2, 2, wpd // 2, 2, c)
    xq = jnp.transpose(xq, (0, 1, 3, 2, 4, 5))
    xq = xq.reshape(b, (hp // 2) * (wpd // 2), 4 * c)
    return xq, wpd // 2


def _pad_3x3(x_flat, h, w, wrow):
    """Build the flat padded input for a 3x3/pad-1 stride-1 conv.  If the
    stored row width already equals w+2 (our chained layout with zeroed pad
    columns) this is a pure flat shift-pad; otherwise go through a 4-D pad."""
    bsz, _, c = x_flat.shape
    wp = w + 2
    need = h * wp + 2 * wp + 2
    if wrow == wp:
        xp = jnp.pad(x_flat, ((0, 0), (wp + 1, wp + 1), (0, 0)))
    else:
        x4 = x_flat.reshape(bsz, h, wrow, c)
        right = wp - 1 - wrow
        assert right >= 0
        hp = -(-need // wp)
        x4 = jnp.pad(x4, ((0, 0), (1, hp - h - 1), (1, right), (0, 0)))
        xp = x4.reshape(bsz, hp * wp, c)
    return xp, wp


# ----------------------------------------------------------------------------
# pallas_call wrappers
# ----------------------------------------------------------------------------
def _conv_call(x_flat, packed, mask, *, kh, kw, mout, wp, activation,
               out_dtype=jnp.bfloat16):
    wmat, bias = packed
    bsz, min_len, c = x_flat.shape
    ktot, n_p = wmat.shape
    assert ktot == kh * kw * c, (ktot, kh, kw, c)
    offs = tuple(dh * wp + dw for dh in range(kh) for dw in range(kw))
    if n_p <= 512:
        tn = n_p
    elif n_p % 256 == 0:
        tn = 256
    else:
        tn = 128
    nj = n_p // tn
    kernel = functools.partial(_conv_taps_kernel, tap_offsets=offs,
                               k_per_tap=c, activation=activation)
    return pl.pallas_call(
        kernel,
        out_shape=jax.ShapeDtypeStruct((bsz, mout, n_p), out_dtype),
        grid_spec=pltpu.PrefetchScalarGridSpec(
            num_scalar_prefetch=0,
            grid=(nj, bsz),
            in_specs=[
                pl.BlockSpec((None, min_len, c), lambda j, b: (b, 0, 0)),
                pl.BlockSpec((ktot, tn), lambda j, b: (0, j)),
                pl.BlockSpec((1, tn), lambda j, b: (0, j)),
                pl.BlockSpec((mout, 1), lambda j, b: (0, 0)),
            ],
            out_specs=pl.BlockSpec((None, mout, tn), lambda j, b: (b, 0, j)),
        ),
        compiler_params=pltpu.CompilerParams(
            dimension_semantics=("parallel", "parallel")),
    )(x_flat, wmat, bias, mask)


def _resblock_call(xp_flat, packed, mask, *, mout, wp, final_relu,
                   out_dtype=jnp.bfloat16):
    w1, b1, w2, b2 = packed
    bsz, min_len, c = xp_flat.shape
    rp = w1.shape[1]
    cp = w2.shape[1]
    assert w1.shape[0] == 9 * c and cp == c
    kernel = functools.partial(_resblock_kernel, k_per_tap=c, wp=wp,
                               final_relu=final_relu)
    return pl.pallas_call(
        kernel,
        out_shape=jax.ShapeDtypeStruct((bsz, mout, cp), out_dtype),
        grid_spec=pltpu.PrefetchScalarGridSpec(
            num_scalar_prefetch=0,
            grid=(bsz,),
            in_specs=[
                pl.BlockSpec((None, min_len, c), lambda b: (b, 0, 0)),
                pl.BlockSpec((9 * c, rp), lambda b: (0, 0)),
                pl.BlockSpec((1, rp), lambda b: (0, 0)),
                pl.BlockSpec((rp, cp), lambda b: (0, 0)),
                pl.BlockSpec((1, cp), lambda b: (0, 0)),
                pl.BlockSpec((mout, 1), lambda b: (0, 0)),
            ],
            out_specs=pl.BlockSpec((None, mout, cp), lambda b: (b, 0, 0)),
        ),
        compiler_params=pltpu.CompilerParams(
            dimension_semantics=("parallel",)),
    )(xp_flat, w1, b1, w2, b2, mask)


def _residual_stack(x_flat, h, w, wrow, res_packed):
    if not res_packed:
        return jnp.maximum(x_flat, 0)
    n = len(res_packed)
    for li, pk in enumerate(res_packed):
        xp, wp = _pad_3x3(x_flat, h, w, wrow)
        mask = _col_mask(h, wp, w)
        x_flat = _resblock_call(xp, pk, mask, mout=h * wp, wp=wp,
                                final_relu=(li == n - 1))
        wrow = wp
    return x_flat


def _vq_call(z_flat, e_b, e2, mask, *, n_emb):
    bsz, m, d = z_flat.shape
    ep = e_b.shape[0]
    return pl.pallas_call(
        functools.partial(_vq_kernel, n_emb=n_emb),
        out_shape=(
            jax.ShapeDtypeStruct((bsz, m, d), jnp.bfloat16),
            jax.ShapeDtypeStruct((bsz, m, ep), jnp.bfloat16),
            jax.ShapeDtypeStruct((bsz, 1, 128), jnp.float32),
            jax.ShapeDtypeStruct((bsz, 1, ep), jnp.float32),
        ),
        grid_spec=pltpu.PrefetchScalarGridSpec(
            num_scalar_prefetch=0,
            grid=(bsz,),
            in_specs=[
                pl.BlockSpec((None, m, d), lambda b: (b, 0, 0)),
                pl.BlockSpec((ep, d), lambda b: (0, 0)),
                pl.BlockSpec((1, ep), lambda b: (0, 0)),
                pl.BlockSpec((m, 1), lambda b: (0, 0)),
            ],
            out_specs=(
                pl.BlockSpec((None, m, d), lambda b: (b, 0, 0)),
                pl.BlockSpec((None, m, ep), lambda b: (b, 0, 0)),
                pl.BlockSpec((None, 1, 128), lambda b: (b, 0, 0)),
                pl.BlockSpec((None, 1, ep), lambda b: (b, 0, 0)),
            ),
        ),
        compiler_params=pltpu.CompilerParams(
            dimension_semantics=("parallel",)),
    )(z_flat, e_b, e2, mask)


# ----------------------------------------------------------------------------
# Parameter init (synthetic) and one-time packing to MXU-ready layout
# ----------------------------------------------------------------------------
def init_params(key, input_dim, hidden, res_hidden, n_res, n_emb, emb_dim):
    def nrm(k, shape, scale=0.1):
        return scale * jax.random.normal(k, shape, jnp.float32)

    ks = iter(jax.random.split(key, 64))
    p = {}
    p["enc_w1"] = nrm(next(ks), (4, 4, input_dim, hidden // 2))
    p["enc_b1"] = nrm(next(ks), (hidden // 2,), 0.01)
    p["enc_w2"] = nrm(next(ks), (4, 4, hidden // 2, hidden))
    p["enc_b2"] = nrm(next(ks), (hidden,), 0.01)
    p["enc_w3"] = nrm(next(ks), (3, 3, hidden, hidden))
    p["enc_b3"] = nrm(next(ks), (hidden,), 0.01)
    p["enc_res"] = [dict(w1=nrm(next(ks), (3, 3, hidden, res_hidden)),
                         b1=nrm(next(ks), (res_hidden,), 0.01),
                         w2=nrm(next(ks), (1, 1, res_hidden, hidden)),
                         b2=nrm(next(ks), (hidden,), 0.01))
                    for _ in range(n_res)]
    p["prevq_w"] = nrm(next(ks), (1, 1, hidden, emb_dim))
    p["prevq_b"] = nrm(next(ks), (emb_dim,), 0.01)
    p["emb"] = jax.random.uniform(next(ks), (n_emb, emb_dim), jnp.float32,
                                  -1.0 / n_emb, 1.0 / n_emb)
    p["dec_w1"] = nrm(next(ks), (3, 3, emb_dim, hidden))
    p["dec_b1"] = nrm(next(ks), (hidden,), 0.01)
    p["dec_res"] = [dict(w1=nrm(next(ks), (3, 3, hidden, res_hidden)),
                         b1=nrm(next(ks), (res_hidden,), 0.01),
                         w2=nrm(next(ks), (1, 1, res_hidden, hidden)),
                         b2=nrm(next(ks), (hidden,), 0.01))
                    for _ in range(n_res)]
    p["dec_tw1"] = nrm(next(ks), (4, 4, hidden, hidden // 2))
    p["dec_tb1"] = nrm(next(ks), (hidden // 2,), 0.01)
    p["dec_tw2"] = nrm(next(ks), (4, 4, hidden // 2, input_dim))
    p["dec_tb2"] = nrm(next(ks), (input_dim,), 0.01)
    return p


def _pack_taps_conv(w_hwio, bias, cin_pad):
    """HWIO conv weight -> tap-major [kh*kw*cin_pad, Np] bf16 + [1,Np] f32."""
    kh, kw, cin, cout = w_hwio.shape
    n_p = _round_up(cout, 128)
    w = jnp.zeros((kh * kw, cin_pad, cout), jnp.float32)
    w = w.at[:, :cin, :].set(w_hwio.reshape(kh * kw, cin, cout))
    w = jnp.pad(w.reshape(kh * kw * cin_pad, cout),
                ((0, 0), (0, n_p - cout))).astype(jnp.bfloat16)
    b = jnp.pad(bias.reshape(1, cout),
                ((0, 0), (0, n_p - cout))).astype(jnp.float32)
    return w, b


def _pack_s2d_conv(w_hwio, bias, cin_pad):
    """4x4 stride-2 conv weight -> 2x2 tap weight over space-to-depth input."""
    _, _, cin, cout = w_hwio.shape
    n_p = _round_up(cout, 128)
    w = w_hwio.reshape(2, 2, 2, 2, cin, cout)       # (dh, sh, dw, sw, ci, co)
    w = jnp.transpose(w, (0, 2, 1, 3, 4, 5))         # (dh, dw, sh, sw, ci, co)
    wz = jnp.zeros((2, 2, 2, 2, cin_pad, cout), jnp.float32)
    wz = wz.at[:, :, :, :, :cin, :].set(w)
    wz = jnp.pad(wz.reshape(16 * cin_pad, cout),
                 ((0, 0), (0, n_p - cout))).astype(jnp.bfloat16)
    b = jnp.pad(bias.reshape(1, cout),
                ((0, 0), (0, n_p - cout))).astype(jnp.float32)
    return wz, b


def _pack_resblock(w1, b1, w2, b2, c_pad):
    _, _, c, r = w1.shape
    rp = _round_up(r, 128)
    w1m = jnp.zeros((9, c_pad, r), jnp.float32).at[:, :c, :].set(
        w1.reshape(9, c, r))
    w1m = jnp.pad(w1m.reshape(9 * c_pad, r),
                  ((0, 0), (0, rp - r))).astype(jnp.bfloat16)
    b1m = jnp.pad(b1.reshape(1, r), ((0, 0), (0, rp - r))).astype(jnp.float32)
    _, _, _, cout = w2.shape
    cp = _round_up(cout, 128)
    w2m = jnp.zeros((rp, cout), jnp.float32).at[:r, :].set(w2.reshape(r, cout))
    w2m = jnp.pad(w2m, ((0, 0), (0, cp - cout))).astype(jnp.bfloat16)
    b2m = jnp.pad(b2.reshape(1, cout),
                  ((0, 0), (0, cp - cout))).astype(jnp.float32)
    return w1m, b1m, w2m, b2m


# output phase eh/ew -> ConvT kernel index used at 3x3 window offset d (None=unused)
_SUBPIX_TAPS = {0: (3, 1, None), 1: (None, 2, 0)}


def _subpixel_combined_weight(w_hwio):
    """ConvTranspose2d(k=4,s=2,p=1) weight [4,4,cin,cout] -> stride-1 3x3
    weight whose 4*cout output channels are the 4 output phases."""
    kh, kw, cin, cout = w_hwio.shape
    assert kh == 4 and kw == 4
    w_comb = jnp.zeros((3, 3, cin, 4 * cout), w_hwio.dtype)
    for eh in (0, 1):
        for ew in (0, 1):
            ph = eh * 2 + ew
            for dh in range(3):
                ki = _SUBPIX_TAPS[eh][dh]
                if ki is None:
                    continue
                for dw in range(3):
                    kj = _SUBPIX_TAPS[ew][dw]
                    if kj is None:
                        continue
                    w_comb = w_comb.at[dh, dw, :, ph * cout:(ph + 1) * cout].set(
                        w_hwio[ki, kj, :, :])
    return w_comb


def _pack_codebook(emb):
    n_emb, d = emb.shape
    ep = _round_up(n_emb, 128)
    dp = _round_up(d, 128)
    e = jnp.zeros((ep, dp), jnp.float32).at[:n_emb, :d].set(emb)
    e_b = e.astype(jnp.bfloat16)
    e2 = jnp.sum(e_b.astype(jnp.float32) ** 2, axis=1).reshape(1, ep)
    return e_b, e2


def pack_params(raw, in_dim):
    hidden = raw["enc_w3"].shape[-1]
    emb_dim = raw["prevq_w"].shape[-1]
    assert hidden <= 128 and emb_dim <= 128  # TODO(synk): N-tile resblock / VQ for wider models
    p = {}
    p["enc1"] = _pack_s2d_conv(raw["enc_w1"], raw["enc_b1"], cin_pad=in_dim)
    p["enc2"] = _pack_s2d_conv(raw["enc_w2"], raw["enc_b2"], cin_pad=CPAD)
    p["enc3"] = _pack_taps_conv(raw["enc_w3"], raw["enc_b3"], cin_pad=CPAD)
    p["enc_res"] = [_pack_resblock(r["w1"], r["b1"], r["w2"], r["b2"], CPAD)
                    for r in raw["enc_res"]]
    p["prevq"] = _pack_taps_conv(raw["prevq_w"], raw["prevq_b"], cin_pad=CPAD)
    p["emb"], p["emb_sq"] = _pack_codebook(raw["emb"])
    p["dec1"] = _pack_taps_conv(raw["dec_w1"], raw["dec_b1"], cin_pad=CPAD)
    p["dec_res"] = [_pack_resblock(r["w1"], r["b1"], r["w2"], r["b2"], CPAD)
                    for r in raw["dec_res"]]
    p["dect1"] = _pack_taps_conv(_subpixel_combined_weight(raw["dec_tw1"]),
                                 jnp.tile(raw["dec_tb1"], 4), cin_pad=CPAD)
    p["dect2"] = _pack_taps_conv(_subpixel_combined_weight(raw["dec_tw2"]),
                                 jnp.tile(raw["dec_tb2"], 4), cin_pad=CPAD)
    return p


# ----------------------------------------------------------------------------
# Full VQVAE forward
# ----------------------------------------------------------------------------
def vqvae_forward(params, x_nchw, *, beta, hidden, emb_dim, n_emb, in_dim):
    p = params
    bsz, _, H, W = x_nchw.shape
    assert H % 4 == 0 and W % 4 == 0
    x = jnp.transpose(x_nchw, (0, 2, 3, 1)).astype(jnp.bfloat16)  # NHWC bf16

    # ---------------- Encoder ----------------
    # conv1: 4x4/s2 + ReLU (space-to-depth -> fused 2x2 tap conv)
    xq, wq1 = _s2d_prep(x, H, W, W)
    h1, w1 = H // 2, W // 2
    y = _conv_call(xq, p["enc1"], _col_mask(h1, wq1, w1),
                   kh=2, kw=2, mout=h1 * wq1, wp=wq1, activation="relu")
    # conv2: 4x4/s2 + ReLU
    xq, wq2 = _s2d_prep(y.reshape(bsz, h1, wq1, CPAD), h1, w1, wq1)
    h2, w2 = h1 // 2, w1 // 2
    y = _conv_call(xq, p["enc2"], _col_mask(h2, wq2, w2),
                   kh=2, kw=2, mout=h2 * wq2, wp=wq2, activation="relu")
    # conv3: 3x3/s1
    xp, wrow = _pad_3x3(y, h2, w2, wq2)
    y = _conv_call(xp, p["enc3"], _col_mask(h2, wrow, w2),
                   kh=3, kw=3, mout=h2 * wrow, wp=wrow, activation=None)
    # residual stack (fused blocks, final ReLU fused into last block)
    y = _residual_stack(y, h2, w2, wrow, p["enc_res"])

    # pre-VQ 1x1 conv (fused tap kernel, single tap) + vector quantizer
    lat_mask = _col_mask(h2, wrow, w2)
    z = _conv_call(y, p["prevq"], lat_mask,
                   kh=1, kw=1, mout=h2 * wrow, wp=wrow, activation=None)
    quant, enc_oh, sse, cnt = _vq_call(z, p["emb"], p["emb_sq"], lat_mask,
                                       n_emb=n_emb)
    n_lat = bsz * h2 * w2
    sse_total = jnp.sum(sse[:, 0, 0])
    counts = jnp.sum(cnt[:, 0, :n_emb], axis=0)
    # forward value of q_latent_loss + beta * e_latent_loss == (1+beta) * MSE
    loss = (1.0 + beta) * sse_total / jnp.float32(n_lat * emb_dim)
    avg = counts / jnp.float32(n_lat)
    perp = jnp.exp(-jnp.sum(avg * jnp.log(avg + 1e-10)))
    encodings = enc_oh.reshape(bsz, h2, wrow, -1)[:, :, :w2, :n_emb]
    encodings = encodings.reshape(n_lat, n_emb).astype(jnp.float32)

    # ---------------- Decoder ----------------
    # dec conv1: 3x3/s1
    xp, wrow = _pad_3x3(quant, h2, w2, wrow)
    y = _conv_call(xp, p["dec1"], _col_mask(h2, wrow, w2),
                   kh=3, kw=3, mout=h2 * wrow, wp=wrow, activation=None)
    y = _residual_stack(y, h2, w2, wrow, p["dec_res"])
    # convT1 (sub-pixel, ReLU fused)
    xp, wrow = _pad_3x3(y, h2, w2, wrow)
    y = _conv_call(xp, p["dect1"], _col_mask(h2, wrow, w2),
                   kh=3, kw=3, mout=h2 * wrow, wp=wrow, activation="relu")
    ch1 = hidden // 2
    # TODO(synk): fold this phase interleave into the dect1 kernel's output
    # index_map (Element offsets) so phases are stored directly interleaved.
    y4 = y.reshape(bsz, h2, wrow, -1)[:, :, :w2, :4 * ch1]
    y4 = y4.reshape(bsz, h2, w2, 2, 2, ch1).transpose(0, 1, 3, 2, 4, 5)
    y4 = y4.reshape(bsz, 2 * h2, 2 * w2, ch1)
    y4 = jnp.pad(y4, ((0, 0), (0, 0), (0, 0), (0, CPAD - ch1)))
    # convT2 (sub-pixel, bf16 output -> halves the padded final write)
    h3, w3 = 2 * h2, 2 * w2
    xp, wrow2 = _pad_3x3(y4.reshape(bsz, h3 * w3, CPAD), h3, w3, w3)
    y = _conv_call(xp, p["dect2"], _col_mask(h3, wrow2, w3),
                   kh=3, kw=3, mout=h3 * wrow2, wp=wrow2, activation=None)
    y4 = y.reshape(bsz, h3, wrow2, -1)[:, :, :w3, :4 * in_dim]
    y4 = y4.reshape(bsz, h3, w3, 2, 2, in_dim).transpose(0, 1, 3, 2, 4, 5)
    recon = y4.reshape(bsz, H, W, in_dim)
    recon_nchw = jnp.transpose(recon, (0, 3, 1, 2)).astype(jnp.float32)

    return {"recon": recon_nchw, "partial_loss": loss,
            "num_active_dims": perp, "encodings": encodings}


if __name__ == "__main__":
    # Small shapes consistent with the module (RGB image, spatial multiple of 4)
    B, C, H, W = 2, 3, 16, 16
    hidden_dim, residual_hiddens, num_residual_layers = 32, 8, 2
    num_embeddings, embedding_dim, commitment_cost = 16, 8, 0.25

    key = jax.random.PRNGKey(0)
    k_x, k_p, k_t = jax.random.split(key, 3)
    x = jax.random.normal(k_x, (B, C, H, W), jnp.float32)
    raw = init_params(k_p, C, hidden_dim, residual_hiddens,
                      num_residual_layers, num_embeddings, embedding_dim)

    # Validate the sub-pixel ConvTranspose2d(k=4,s=2,p=1) lowering against a
    # dense fractionally-strided-conv reference (f32, XLA only).
    kt = jax.random.split(k_t, 3)
    xt = jax.random.normal(kt[0], (1, 6, 6, 5), jnp.float32)
    wt = 0.1 * jax.random.normal(kt[1], (4, 4, 5, 7), jnp.float32)
    bt = 0.1 * jax.random.normal(kt[2], (7,), jnp.float32)
    ref = jax.lax.conv_general_dilated(
        xt, jnp.flip(wt, (0, 1)), (1, 1), ((2, 2), (2, 2)),
        lhs_dilation=(2, 2), dimension_numbers=("NHWC", "HWIO", "NHWC"),
        precision=jax.lax.Precision.HIGHEST) + bt
    got = jax.lax.conv_general_dilated(
        jnp.pad(xt, ((0, 0), (1, 1), (1, 1), (0, 0))),
        _subpixel_combined_weight(wt), (1, 1), "VALID",
        dimension_numbers=("NHWC", "HWIO", "NHWC"),
        precision=jax.lax.Precision.HIGHEST) + jnp.tile(bt, 4)
    got = got.reshape(1, 6, 6, 2, 2, 7).transpose(0, 1, 3, 2, 4, 5)
    got = got.reshape(1, 12, 12, 7)
    assert float(jnp.max(jnp.abs(got - ref))) < 2e-4, "sub-pixel ConvT mismatch"

    params = pack_params(raw, C)   # weights padded/cast/rearranged ONCE
    fwd = jax.jit(functools.partial(
        vqvae_forward, beta=float(commitment_cost), hidden=hidden_dim,
        emb_dim=embedding_dim, n_emb=num_embeddings, in_dim=C))

    out = fwd(params, x)
    jax.block_until_ready(out["recon"])
    jax.block_until_ready(out["encodings"])
    jax.block_until_ready(out["partial_loss"])
    jax.block_until_ready(out["num_active_dims"])

    assert out["recon"].shape == (B, C, H, W)
    assert out["encodings"].shape == (B * (H // 4) * (W // 4), num_embeddings)
    assert bool(jnp.isfinite(out["partial_loss"]))
    assert bool(jnp.isfinite(out["num_active_dims"]))
    print("KERNEL_OK")
</pallas_src>

<mosaic_0001>
module attributes {stable_mosaic.version = 11 : i64} {
  func.func @_conv_taps_kernel(%arg0: i32, %arg1: i32, %arg2: memref<1x90x12xbf16, #tpu.memory_space<vmem>>, %arg3: memref<48x128xbf16, #tpu.memory_space<vmem>>, %arg4: memref<1x128xf32, #tpu.memory_space<vmem>>, %arg5: memref<72x1xf32, #tpu.memory_space<vmem>>, %arg6: memref<1x72x128xbf16, #tpu.memory_space<vmem>>) attributes {dimension_semantics = [#tpu.dimension_semantics<parallel>, #tpu.dimension_semantics<parallel>], iteration_bounds = array<i64: 1, 2>, scalar_prefetch = 0 : i64, scratch_operands = 0 : i64, tpu.core_type = #tpu.core_type<tc>, window_params = [{transform_indices = @transform_0, window_bounds = array<i64: 1, 90, 12>}, {transform_indices = @transform_1, window_bounds = array<i64: 48, 128>}, {transform_indices = @transform_2, window_bounds = array<i64: 1, 128>}, {pipeline_mode = #tpu.pipeline_mode<synchronous>, transform_indices = @transform_3, window_bounds = array<i64: 72, 1>}, {transform_indices = @transform_4, window_bounds = array<i64: 1, 72, 128>}]} {
    %cst = arith.constant 0.000000e+00 : f32
    %0 = vector.broadcast %cst : f32 to vector<72x128xf32>
    %c0 = arith.constant 0 : index
    %c0_0 = arith.constant 0 : index
    %c0_1 = arith.constant 0 : index
    %1 = vector.load %arg2[%c0, %c0_0, %c0_1] : memref<1x90x12xbf16, #tpu.memory_space<vmem>>, vector<1x72x12xbf16>
    %2 = vector.shape_cast %1 : vector<1x72x12xbf16> to vector<72x12xbf16>
    %c0_2 = arith.constant 0 : index
    %c0_3 = arith.constant 0 : index
    %3 = vector.load %arg3[%c0_2, %c0_3] : memref<48x128xbf16, #tpu.memory_space<vmem>>, vector<12x128xbf16>
    %cst_4 = arith.constant dense<0.000000e+00> : vector<72x128xf32>
    %4 = tpu.matmul %2, %3, %cst_4 {dimension_numbers = #tpu.dot_dimension_numbers<[1], [0], [0], [1], [0, 0, 1, 1], [], []>} : vector<72x12xbf16>, vector<12x128xbf16>, vector<72x128xf32> -> vector<72x128xf32>
    %5 = arith.addf %0, %4 : vector<72x128xf32>
    %c0_5 = arith.constant 0 : index
    %c1 = arith.constant 1 : index
    %c0_6 = arith.constant 0 : index
    %6 = vector.load %arg2[%c0_5, %c1, %c0_6] : memref<1x90x12xbf16, #tpu.memory_space<vmem>>, vector<1x72x12xbf16>
    %7 = vector.shape_cast %6 : vector<1x72x12xbf16> to vector<72x12xbf16>
    %c12 = arith.constant 12 : index
    %c0_7 = arith.constant 0 : index
    %8 = vector.load %arg3[%c12, %c0_7] : memref<48x128xbf16, #tpu.memory_space<vmem>>, vector<12x128xbf16>
    %cst_8 = arith.constant dense<0.000000e+00> : vector<72x128xf32>
    %9 = tpu.matmul %7, %8, %cst_8 {dimension_numbers = #tpu.dot_dimension_numbers<[1], [0], [0], [1], [0, 0, 1, 1], [], []>} : vector<72x12xbf16>, vector<12x128xbf16>, vector<72x128xf32> -> vector<72x128xf32>
    %10 = arith.addf %5, %9 : vector<72x128xf32>
    %c0_9 = arith.constant 0 : index
    %c9 = arith.constant 9 : index
    %c0_10 = arith.constant 0 : index
    %11 = vector.load %arg2[%c0_9, %c9, %c0_10] : memref<1x90x12xbf16, #tpu.memory_space<vmem>>, vector<1x72x12xbf16>
    %12 = vector.shape_cast %11 : vector<1x72x12xbf16> to vector<72x12xbf16>
    %c24 = arith.constant 24 : index
    %c0_11 = arith.constant 0 : index
    %13 = vector.load %arg3[%c24, %c0_11] : memref<48x128xbf16, #tpu.memory_space<vmem>>, vector<12x128xbf16>
    %cst_12 = arith.constant dense<0.000000e+00> : vector<72x128xf32>
    %14 = tpu.matmul %12, %13, %cst_12 {dimension_numbers = #tpu.dot_dimension_numbers<[1], [0], [0], [1], [0, 0, 1, 1], [], []>} : vector<72x12xbf16>, vector<12x128xbf16>, vector<72x128xf32> -> vector<72x128xf32>
    %15 = arith.addf %10, %14 : vector<72x128xf32>
    %c0_13 = arith.constant 0 : index
    %c10 = arith.constant 10 : index
    %c0_14 = arith.constant 0 : index
    %16 = vector.load %arg2[%c0_13, %c10, %c0_14] : memref<1x90x12xbf16, #tpu.memory_space<vmem>>, vector<1x72x12xbf16>
    %17 = vector.shape_cast %16 : vector<1x72x12xbf16> to vector<72x12xbf16>
    %c36 = arith.constant 36 : index
    %c0_15 = arith.constant 0 : index
    %18 = vector.load %arg3[%c36, %c0_15] : memref<48x128xbf16, #tpu.memory_space<vmem>>, vector<12x128xbf16>
    %cst_16 = arith.constant dense<0.000000e+00> : vector<72x128xf32>
    %19 = tpu.matmul %17, %18, %cst_16 {dimension_numbers = #tpu.dot_dimension_numbers<[1], [0], [0], [1], [0, 0, 1, 1], [], []>} : vector<72x12xbf16>, vector<12x128xbf16>, vector<72x128xf32> -> vector<72x128xf32>
    %20 = arith.addf %15, %19 : vector<72x128xf32>
    %c0_17 = arith.constant 0 : index
    %c0_18 = arith.constant 0 : index
    %21 = vector.load %arg4[%c0_17, %c0_18] : memref<1x128xf32, #tpu.memory_space<vmem>>, vector<1x128xf32>
    %22 = vector.broadcast %21 : vector<1x128xf32> to vector<72x128xf32>
    %23 = arith.addf %20, %22 : vector<72x128xf32>
    %cst_19 = arith.constant 0.000000e+00 : f32
    %24 = vector.broadcast %cst_19 : f32 to vector<72x128xf32>
    %25 = arith.maximumf %23, %24 : vector<72x128xf32>
    %c0_20 = arith.constant 0 : index
    %c0_21 = arith.constant 0 : index
    %26 = vector.load %arg5[%c0_20, %c0_21] : memref<72x1xf32, #tpu.memory_space<vmem>>, vector<72x1xf32>
    %27 = vector.broadcast %26 : vector<72x1xf32> to vector<72x128xf32>
    %28 = arith.mulf %25, %27 : vector<72x128xf32>
    %29 = arith.truncf %28 : vector<72x128xf32> to vector<72x128xbf16>
    %c0_22 = arith.constant 0 : index
    %c0_23 = arith.constant 0 : index
    %c0_24 = arith.constant 0 : index
    %30 = vector.load %arg6[%c0_22, %c0_23, %c0_24] : memref<1x72x128xbf16, #tpu.memory_space<vmem>>, vector<1x72x128xbf16>
    %31 = vector.shape_cast %30 : vector<1x72x128xbf16> to vector<72x128xbf16>
    %32 = vector.shape_cast %29 : vector<72x128xbf16> to vector<1x72x128xbf16>
    tpu.vector_store %arg6[%c0_22, %c0_23, %c0_24], %32 {strides = array<i32>} : memref<1x72x128xbf16, #tpu.memory_space<vmem>>, vector<1x72x128xbf16>,
    return
  }
  func.func @transform_0(%arg0: i32, %arg1: i32) -> (i32, i32, i32) {
    %c0_i32 = arith.constant 0 : i32
    %c0_i32_0 = arith.constant 0 : i32
    %c0_i32_1 = arith.constant 0 : i32
    return %arg1, %c0_i32, %c0_i32_0 : i32, i32, i32
  }
  func.func @transform_1(%arg0: i32, %arg1: i32) -> (i32, i32) {
    %c0_i32 = arith.constant 0 : i32
    %c0_i32_0 = arith.constant 0 : i32
    return %c0_i32, %arg0 : i32, i32
  }
  func.func @transform_2(%arg0: i32, %arg1: i32) -> (i32, i32) {
    %c0_i32 = arith.constant 0 : i32
    %c0_i32_0 = arith.constant 0 : i32
    return %c0_i32, %arg0 : i32, i32
  }
  func.func @transform_3(%arg0: i32, %arg1: i32) -> (i32, i32) {
    %c0_i32 = arith.constant 0 : i32
    %c0_i32_0 = arith.constant 0 : i32
    %c0_i32_1 = arith.constant 0 : i32
    return %c0_i32, %c0_i32_0 : i32, i32
  }
  func.func @transform_4(%arg0: i32, %arg1: i32) -> (i32, i32, i32) {
    %c0_i32 = arith.constant 0 : i32
    %c0_i32_0 = arith.constant 0 : i32
    return %arg1, %c0_i32, %arg0 : i32, i32, i32
  }
}

module attributes {stable_mosaic.version = 11 : i64} {
  func.func @_conv_taps_kernel(%arg0: i32, %arg1: i32, %arg2: memref<1x30x512xbf16, #tpu.memory_space<vmem>>, %arg3: memref<2048x128xbf16, #tpu.memory_space<vmem>>, %arg4: memref<1x128xf32, #tpu.memory_space<vmem>>, %arg5: memref<20x1xf32, #tpu.memory_space<vmem>>, %arg6: memref<1x20x128xbf16, #tpu.memory_space<vmem>>) attributes {dimension_semantics = [#tpu.dimension_semantics<parallel>, #tpu.dimension_semantics<parallel>], iteration_bounds = array<i64: 1, 2>, scalar_prefetch = 0 : i64, scratch_operands = 0 : i64, tpu.core_type = #tpu.core_type<tc>, window_params = [{transform_indices = @transform_0, window_bounds = array<i64: 1, 30, 512>}, {transform_indices = @transform_1, window_bounds = array<i64: 2048, 128>}, {transform_indices = @transform_2, window_bounds = array<i64: 1, 128>}, {pipeline_mode = #tpu.pipeline_mode<synchronous>, transform_indices = @transform_3, window_bounds = array<i64: 20, 1>}, {transform_indices = @transform_4, window_bounds = array<i64: 1, 20, 128>}]} {
    %cst = arith.constant 0.000000e+00 : f32
    %0 = vector.broadcast %cst : f32 to vector<20x128xf32>
    %c0 = arith.constant 0 : index
    %c0_0 = arith.constant 0 : index
    %c0_1 = arith.constant 0 : index
    %1 = vector.load %arg2[%c0, %c0_0, %c0_1] : memref<1x30x512xbf16, #tpu.memory_space<vmem>>, vector<1x20x512xbf16>
    %2 = vector.shape_cast %1 : vector<1x20x512xbf16> to vector<20x512xbf16>
    %c0_2 = arith.constant 0 : index
    %c0_3 = arith.constant 0 : index
    %3 = vector.load %arg3[%c0_2, %c0_3] : memref<2048x128xbf16, #tpu.memory_space<vmem>>, vector<512x128xbf16>
    %cst_4 = arith.constant dense<0.000000e+00> : vector<20x128xf32>
    %4 = tpu.matmul %2, %3, %cst_4 {dimension_numbers = #tpu.dot_dimension_numbers<[1], [0], [0], [1], [0, 0, 1, 1], [], []>} : vector<20x512xbf16>, vector<512x128xbf16>, vector<20x128xf32> -> vector<20x128xf32>
    %5 = arith.addf %0, %4 : vector<20x128xf32>
    %c0_5 = arith.constant 0 : index
    %c1 = arith.constant 1 : index
    %c0_6 = arith.constant 0 : index
    %6 = vector.load %arg2[%c0_5, %c1, %c0_6] : memref<1x30x512xbf16, #tpu.memory_space<vmem>>, vector<1x20x512xbf16>
    %7 = vector.shape_cast %6 : vector<1x20x512xbf16> to vector<20x512xbf16>
    %c512 = arith.constant 512 : index
    %c0_7 = arith.constant 0 : index
    %8 = vector.load %arg3[%c512, %c0_7] : memref<2048x128xbf16, #tpu.memory_space<vmem>>, vector<512x128xbf16>
    %cst_8 = arith.constant dense<0.000000e+00> : vector<20x128xf32>
    %9 = tpu.matmul %7, %8, %cst_8 {dimension_numbers = #tpu.dot_dimension_numbers<[1], [0], [0], [1], [0, 0, 1, 1], [], []>} : vector<20x512xbf16>, vector<512x128xbf16>, vector<20x128xf32> -> vector<20x128xf32>
    %10 = arith.addf %5, %9 : vector<20x128xf32>
    %c0_9 = arith.constant 0 : index
    %c5 = arith.constant 5 : index
    %c0_10 = arith.constant 0 : index
    %11 = vector.load %arg2[%c0_9, %c5, %c0_10] : memref<1x30x512xbf16, #tpu.memory_space<vmem>>, vector<1x20x512xbf16>
    %12 = vector.shape_cast %11 : vector<1x20x512xbf16> to vector<20x512xbf16>
    %c1024 = arith.constant 1024 : index
    %c0_11 = arith.constant 0 : index
    %13 = vector.load %arg3[%c1024, %c0_11] : memref<2048x128xbf16, #tpu.memory_space<vmem>>, vector<512x128xbf16>
    %cst_12 = arith.constant dense<0.000000e+00> : vector<20x128xf32>
    %14 = tpu.matmul %12, %13, %cst_12 {dimension_numbers = #tpu.dot_dimension_numbers<[1], [0], [0], [1], [0, 0, 1, 1], [], []>} : vector<20x512xbf16>, vector<512x128xbf16>, vector<20x128xf32> -> vector<20x128xf32>
    %15 = arith.addf %10, %14 : vector<20x128xf32>
    %c0_13 = arith.constant 0 : index
    %c6 = arith.constant 6 : index
    %c0_14 = arith.constant 0 : index
    %16 = vector.load %arg2[%c0_13, %c6, %c0_14] : memref<1x30x512xbf16, #tpu.memory_space<vmem>>, vector<1x20x512xbf16>
    %17 = vector.shape_cast %16 : vector<1x20x512xbf16> to vector<20x512xbf16>
    %c1536 = arith.constant 1536 : index
    %c0_15 = arith.constant 0 : index
    %18 = vector.load %arg3[%c1536, %c0_15] : memref<2048x128xbf16, #tpu.memory_space<vmem>>, vector<512x128xbf16>
    %cst_16 = arith.constant dense<0.000000e+00> : vector<20x128xf32>
    %19 = tpu.matmul %17, %18, %cst_16 {dimension_numbers = #tpu.dot_dimension_numbers<[1], [0], [0], [1], [0, 0, 1, 1], [], []>} : vector<20x512xbf16>, vector<512x128xbf16>, vector<20x128xf32> -> vector<20x128xf32>
    %20 = arith.addf %15, %19 : vector<20x128xf32>
    %c0_17 = arith.constant 0 : index
    %c0_18 = arith.constant 0 : index
    %21 = vector.load %arg4[%c0_17, %c0_18] : memref<1x128xf32, #tpu.memory_space<vmem>>, vector<1x128xf32>
    %22 = vector.broadcast %21 : vector<1x128xf32> to vector<20x128xf32>
    %23 = arith.addf %20, %22 : vector<20x128xf32>
    %cst_19 = arith.constant 0.000000e+00 : f32
    %24 = vector.broadcast %cst_19 : f32 to vector<20x128xf32>
    %25 = arith.maximumf %23, %24 : vector<20x128xf32>
    %c0_20 = arith.constant 0 : index
    %c0_21 = arith.constant 0 : index
    %26 = vector.load %arg5[%c0_20, %c0_21] : memref<20x1xf32, #tpu.memory_space<vmem>>, vector<20x1xf32>
    %27 = vector.broadcast %26 : vector<20x1xf32> to vector<20x128xf32>
    %28 = arith.mulf %25, %27 : vector<20x128xf32>
    %29 = arith.truncf %28 : vector<20x128xf32> to vector<20x128xbf16>
    %c0_22 = arith.constant 0 : index
    %c0_23 = arith.constant 0 : index
    %c0_24 = arith.constant 0 : index
    %30 = vector.load %arg6[%c0_22, %c0_23, %c0_24] : memref<1x20x128xbf16, #tpu.memory_space<vmem>>, vector<1x20x128xbf16>
    %31 = vector.shape_cast %30 : vector<1x20x128xbf16> to vector<20x128xbf16>
    %32 = vector.shape_cast %29 : vector<20x128xbf16> to vector<1x20x128xbf16>
    tpu.vector_store %arg6[%c0_22, %c0_23, %c0_24], %32 {strides = array<i32>} : memref<1x20x128xbf16, #tpu.memory_space<vmem>>, vector<1x20x128xbf16>,
    return
  }
  func.func @transform_0(%arg0: i32, %arg1: i32) -> (i32, i32, i32) {
    %c0_i32 = arith.constant 0 : i32
    %c0_i32_0 = arith.constant 0 : i32
    %c0_i32_1 = arith.constant 0 : i32
    return %arg1, %c0_i32, %c0_i32_0 : i32, i32, i32
  }
  func.func @transform_1(%arg0: i32, %arg1: i32) -> (i32, i32) {
    %c0_i32 = arith.constant 0 : i32
    %c0_i32_0 = arith.constant 0 : i32
    return %c0_i32, %arg0 : i32, i32
  }
  func.func @transform_2(%arg0: i32, %arg1: i32) -> (i32, i32) {
    %c0_i32 = arith.constant 0 : i32
    %c0_i32_0 = arith.constant 0 : i32
    return %c0_i32, %arg0 : i32, i32
  }
  func.func @transform_3(%arg0: i32, %arg1: i32) -> (i32, i32) {
    %c0_i32 = arith.constant 0 : i32
    %c0_i32_0 = arith.constant 0 : i32
    %c0_i32_1 = arith.constant 0 : i32
    return %c0_i32, %c0_i32_0 : i32, i32
  }
  func.func @transform_4(%arg0: i32, %arg1: i32) -> (i32, i32, i32) {
    %c0_i32 = arith.constant 0 : i32
    %c0_i32_0 = arith.constant 0 : i32
    return %arg1, %c0_i32, %arg0 : i32, i32, i32
  }
}

module attributes {stable_mosaic.version = 11 : i64} {
  func.func @_conv_taps_kernel(%arg0: i32, %arg1: i32, %arg2: memref<1x42x128xbf16, #tpu.memory_space<vmem>>, %arg3: memref<1152x128xbf16, #tpu.memory_space<vmem>>, %arg4: memref<1x128xf32, #tpu.memory_space<vmem>>, %arg5: memref<24x1xf32, #tpu.memory_space<vmem>>, %arg6: memref<1x24x128xbf16, #tpu.memory_space<vmem>>) attributes {dimension_semantics = [#tpu.dimension_semantics<parallel>, #tpu.dimension_semantics<parallel>], iteration_bounds = array<i64: 1, 2>, scalar_prefetch = 0 : i64, scratch_operands = 0 : i64, tpu.core_type = #tpu.core_type<tc>, window_params = [{transform_indices = @transform_0, window_bounds = array<i64: 1, 42, 128>}, {transform_indices = @transform_1, window_bounds = array<i64: 1152, 128>}, {transform_indices = @transform_2, window_bounds = array<i64: 1, 128>}, {pipeline_mode = #tpu.pipeline_mode<synchronous>, transform_indices = @transform_3, window_bounds = array<i64: 24, 1>}, {transform_indices = @transform_4, window_bounds = array<i64: 1, 24, 128>}]} {
    %cst = arith.constant 0.000000e+00 : f32
    %0 = vector.broadcast %cst : f32 to vector<24x128xf32>
    %c0 = arith.constant 0 : index
    %c0_0 = arith.constant 0 : index
    %c0_1 = arith.constant 0 : index
    %1 = vector.load %arg2[%c0, %c0_0, %c0_1] : memref<1x42x128xbf16, #tpu.memory_space<vmem>>, vector<1x24x128xbf16>
    %2 = vector.shape_cast %1 : vector<1x24x128xbf16> to vector<24x128xbf16>
    %c0_2 = arith.constant 0 : index
    %c0_3 = arith.constant 0 : index
    %3 = vector.load %arg3[%c0_2, %c0_3] : memref<1152x128xbf16, #tpu.memory_space<vmem>>, vector<128x128xbf16>
    %cst_4 = arith.constant dense<0.000000e+00> : vector<24x128xf32>
    %4 = tpu.matmul %2, %3, %cst_4 {dimension_numbers = #tpu.dot_dimension_numbers<[1], [0], [0], [1], [0, 0, 1, 1], [], []>} : vector<24x128xbf16>, vector<128x128xbf16>, vector<24x128xf32> -> vector<24x128xf32>
    %5 = arith.addf %0, %4 : vector<24x128xf32>
    %c0_5 = arith.constant 0 : index
    %c1 = arith.constant 1 : index
    %c0_6 = arith.constant 0 : index
    %6 = vector.load %arg2[%c0_5, %c1, %c0_6] : memref<1x42x128xbf16, #tpu.memory_space<vmem>>, vector<1x24x128xbf16>
    %7 = vector.shape_cast %6 : vector<1x24x128xbf16> to vector<24x128xbf16>
    %c128 = arith.constant 128 : index
    %c0_7 = arith.constant 0 : index
    %8 = vector.load %arg3[%c128, %c0_7] : memref<1152x128xbf16, #tpu.memory_space<vmem>>, vector<128x128xbf16>
    %cst_8 = arith.constant dense<0.000000e+00> : vector<24x128xf32>
    %9 = tpu.matmul %7, %8, %cst_8 {dimension_numbers = #tpu.dot_dimension_numbers<[1], [0], [0], [1], [0, 0, 1, 1], [], []>} : vector<24x128xbf16>, vector<128x128xbf16>, vector<24x128xf32> -> vector<24x128xf32>
    %10 = arith.addf %5, %9 : vector<24x128xf32>
    %c0_9 = arith.constant 0 : index
    %c2 = arith.constant 2 : index
    %c0_10 = arith.constant 0 : index
    %11 = vector.load %arg2[%c0_9, %c2, %c0_10] : memref<1x42x128xbf16, #tpu.memory_space<vmem>>, vector<1x24x128xbf16>
    %12 = vector.shape_cast %11 : vector<1x24x128xbf16> to vector<24x128xbf16>
    %c256 = arith.constant 256 : index
    %c0_11 = arith.constant 0 : index
    %13 = vector.load %arg3[%c256, %c0_11] : memref<1152x128xbf16, #tpu.memory_space<vmem>>, vector<128x128xbf16>
    %cst_12 = arith.constant dense<0.000000e+00> : vector<24x128xf32>
    %14 = tpu.matmul %12, %13, %cst_12 {dimension_numbers = #tpu.dot_dimension_numbers<[1], [0], [0], [1], [0, 0, 1, 1], [], []>} : vector<24x128xbf16>, vector<128x128xbf16>, vector<24x128xf32> -> vector<24x128xf32>
    %15 = arith.addf %10, %14 : vector<24x128xf32>
    %c0_13 = arith.constant 0 : index
    %c6 = arith.constant 6 : index
    %c0_14 = arith.constant 0 : index
    %16 = vector.load %arg2[%c0_13, %c6, %c0_14] : memref<1x42x128xbf16, #tpu.memory_space<vmem>>, vector<1x24x128xbf16>
    %17 = vector.shape_cast %16 : vector<1x24x128xbf16> to vector<24x128xbf16>
    %c384 = arith.constant 384 : index
    %c0_15 = arith.constant 0 : index
    %18 = vector.load %arg3[%c384, %c0_15] : memref<1152x128xbf16, #tpu.memory_space<vmem>>, vector<128x128xbf16>
    %cst_16 = arith.constant dense<0.000000e+00> : vector<24x128xf32>
    %19 = tpu.matmul %17, %18, %cst_16 {dimension_numbers = #tpu.dot_dimension_numbers<[1], [0], [0], [1], [0, 0, 1, 1], [], []>} : vector<24x128xbf16>, vector<128x128xbf16>, vector<24x128xf32> -> vector<24x128xf32>
    %20 = arith.addf %15, %19 : vector<24x128xf32>
    %c0_17 = arith.constant 0 : index
    %c7 = arith.constant 7 : index
    %c0_18 = arith.constant 0 : index
    %21 = vector.load %arg2[%c0_17, %c7, %c0_18] : memref<1x42x128xbf16, #tpu.memory_space<vmem>>, vector<1x24x128xbf16>
    %22 = vector.shape_cast %21 : vector<1x24x128xbf16> to vector<24x128xbf16>
    %c512 = arith.constant 512 : index
    %c0_19 = arith.constant 0 : index
    %23 = vector.load %arg3[%c512, %c0_19] : memref<1152x128xbf16, #tpu.memory_space<vmem>>, vector<128x128xbf16>
    %cst_20 = arith.constant dense<0.000000e+00> : vector<24x128xf32>
    %24 = tpu.matmul %22, %23, %cst_20 {dimension_numbers = #tpu.dot_dimension_numbers<[1], [0], [0], [1], [0, 0, 1, 1], [], []>} : vector<24x128xbf16>, vector<128x128xbf16>, vector<24x128xf32> -> vector<24x128xf32>
    %25 = arith.addf %20, %24 : vector<24x128xf32>
    %c0_21 = arith.constant 0 : index
    %c8 = arith.constant 8 : index
    %c0_22 = arith.constant 0 : index
    %26 = vector.load %arg2[%c0_21, %c8, %c0_22] : memref<1x42x128xbf16, #tpu.memory_space<vmem>>, vector<1x24x128xbf16>
    %27 = vector.shape_cast %26 : vector<1x24x128xbf16> to vector<24x128xbf16>
    %c640 = arith.constant 640 : index
    %c0_23 = arith.constant 0 : index
    %28 = vector.load %arg3[%c640, %c0_23] : memref<1152x128xbf16, #tpu.memory_space<vmem>>, vector<128x128xbf16>
    %cst_24 = arith.constant dense<0.000000e+00> : vector<24x128xf32>
    %29 = tpu.matmul %27, %28, %cst_24 {dimension_numbers = #tpu.dot_dimension_numbers<[1], [0], [0], [1], [0, 0, 1, 1], [], []>} : vector<24x128xbf16>, vector<128x128xbf16>, vector<24x128xf32> -> vector<24x128xf32>
    %30 = arith.addf %25, %29 : vector<24x128xf32>
    %c0_25 = arith.constant 0 : index
    %c12 = arith.constant 12 : index
    %c0_26 = arith.constant 0 : index
    %31 = vector.load %arg2[%c0_25, %c12, %c0_26] : memref<1x42x128xbf16, #tpu.memory_space<vmem>>, vector<1x24x128xbf16>
    %32 = vector.shape_cast %31 : vector<1x24x128xbf16> to vector<24x128xbf16>
    %c768 = arith.constant 768 : index
    %c0_27 = arith.constant 0 : index
    %33 = vector.load %arg3[%c768, %c0_27] : memref<1152x128xbf16, #tpu.memory_space<vmem>>, vector<128x128xbf16>
    %cst_28 = arith.constant dense<0.000000e+00> : vector<24x128xf32>
    %34 = tpu.matmul %32, %33, %cst_28 {dimension_numbers = #tpu.dot_dimension_numbers<[1], [0], [0], [1], [0, 0, 1, 1], [], []>} : vector<24x128xbf16>, vector<128x128xbf16>, vector<24x128xf32> -> vector<24x128xf32>
    %35 = arith.addf %30, %34 : vector<24x128xf32>
    %c0_29 = arith.constant 0 : index
    %c13 = arith.constant 13 : index
    %c0_30 = arith.constant 0 : index
    %36 = vector.load %arg2[%c0_29, %c13, %c0_30] : memref<1x42x128xbf16, #tpu.memory_space<vmem>>, vector<1x24x128xbf16>
    %37 = vector.shape_cast %36 : vector<1x24x128xbf16> to vector<24x128xbf16>
    %c896 = arith.constant 896 : index
    %c0_31 = arith.constant 0 : index
    %38 = vector.load %arg3[%c896, %c0_31] : memref<1152x128xbf16, #tpu.memory_space<vmem>>, vector<128x128xbf16>
    %cst_32 = arith.constant dense<0.000000e+00> : vector<24x128xf32>
    %39 = tpu.matmul %37, %38, %cst_32 {dimension_numbers = #tpu.dot_dimension_numbers<[1], [0], [0], [1], [0, 0, 1, 1], [], []>} : vector<24x128xbf16>, vector<128x128xbf16>, vector<24x128xf32> -> vector<24x128xf32>
    %40 = arith.addf %35, %39 : vector<24x128xf32>
    %c0_33 = arith.constant 0 : index
    %c14 = arith.constant 14 : index
    %c0_34 = arith.constant 0 : index
    %41 = vector.load %arg2[%c0_33, %c14, %c0_34] : memref<1x42x128xbf16, #tpu.memory_space<vmem>>, vector<1x24x128xbf16>
    %42 = vector.shape_cast %41 : vector<1x24x128xbf16> to vector<24x128xbf16>
    %c1024 = arith.constant 1024 : index
    %c0_35 = arith.constant 0 : index
    %43 = vector.load %arg3[%c1024, %c0_35] : memref<1152x128xbf16, #tpu.memory_space<vmem>>, vector<128x128xbf16>
    %cst_36 = arith.constant dense<0.000000e+00> : vector<24x128xf32>
    %44 = tpu.matmul %42, %43, %cst_36 {dimension_numbers = #tpu.dot_dimension_numbers<[1], [0], [0], [1], [0, 0, 1, 1], [], []>} : vector<24x128xbf16>, vector<128x128xbf16>, vector<24x128xf32> -> vector<24x128xf32>
    %45 = arith.addf %40, %44 : vector<24x128xf32>
    %c0_37 = arith.constant 0 : index
    %c0_38 = arith.constant 0 : index
    %46 = vector.load %arg4[%c0_37, %c0_38] : memref<1x128xf32, #tpu.memory_space<vmem>>, vector<1x128xf32>
    %47 = vector.broadcast %46 : vector<1x128xf32> to vector<24x128xf32>
    %48 = arith.addf %45, %47 : vector<24x128xf32>
    %c0_39 = arith.constant 0 : index
    %c0_40 = arith.constant 0 : index
    %49 = vector.load %arg5[%c0_39, %c0_40] : memref<24x1xf32, #tpu.memory_space<vmem>>, vector<24x1xf32>
    %50 = vector.broadcast %49 : vector<24x1xf32> to vector<24x128xf32>
    %51 = arith.mulf %48, %50 : vector<24x128xf32>
    %52 = arith.truncf %51 : vector<24x128xf32> to vector<24x128xbf16>
    %c0_41 = arith.constant 0 : index
    %c0_42 = arith.constant 0 : index
    %c0_43 = arith.constant 0 : index
    %53 = vector.load %arg6[%c0_41, %c0_42, %c0_43] : memref<1x24x128xbf16, #tpu.memory_space<vmem>>, vector<1x24x128xbf16>
    %54 = vector.shape_cast %53 : vector<1x24x128xbf16> to vector<24x128xbf16>
    %55 = vector.shape_cast %52 : vector<24x128xbf16> to vector<1x24x128xbf16>
    tpu.vector_store %arg6[%c0_41, %c0_42, %c0_43], %55 {strides = array<i32>} : memref<1x24x128xbf16, #tpu.memory_space<vmem>>, vector<1x24x128xbf16>,
    return
  }
  func.func @transform_0(%arg0: i32, %arg1: i32) -> (i32, i32, i32) {
    %c0_i32 = arith.constant 0 : i32
    %c0_i32_0 = arith.constant 0 : i32
    %c0_i32_1 = arith.constant 0 : i32
    return %arg1, %c0_i32, %c0_i32_0 : i32, i32, i32
  }
  func.func @transform_1(%arg0: i32, %arg1: i32) -> (i32, i32) {
    %c0_i32 = arith.constant 0 : i32
    %c0_i32_0 = arith.constant 0 : i32
    return %c0_i32, %arg0 : i32, i32
  }
  func.func @transform_2(%arg0: i32, %arg1: i32) -> (i32, i32) {
    %c0_i32 = arith.constant 0 : i32
    %c0_i32_0 = arith.constant 0 : i32
    return %c0_i32, %arg0 : i32, i32
  }
  func.func @transform_3(%arg0: i32, %arg1: i32) -> (i32, i32) {
    %c0_i32 = arith.constant 0 : i32
    %c0_i32_0 = arith.constant 0 : i32
    %c0_i32_1 = arith.constant 0 : i32
    return %c0_i32, %c0_i32_0 : i32, i32
  }
  func.func @transform_4(%arg0: i32, %arg1: i32) -> (i32, i32, i32) {
    %c0_i32 = arith.constant 0 : i32
    %c0_i32_0 = arith.constant 0 : i32
    return %arg1, %c0_i32, %arg0 : i32, i32, i32
  }
}

module attributes {stable_mosaic.version = 11 : i64} {
  func.func @_resblock_kernel(%arg0: i32, %arg1: memref<1x38x128xbf16, #tpu.memory_space<vmem>>, %arg2: memref<1152x128xbf16, #tpu.memory_space<vmem>>, %arg3: memref<1x128xf32, #tpu.memory_space<vmem>>, %arg4: memref<128x128xbf16, #tpu.memory_space<vmem>>, %arg5: memref<1x128xf32, #tpu.memory_space<vmem>>, %arg6: memref<24x1xf32, #tpu.memory_space<vmem>>, %arg7: memref<1x24x128xbf16, #tpu.memory_space<vmem>>) attributes {dimension_semantics = [#tpu.dimension_semantics<parallel>], iteration_bounds = array<i64: 2>, scalar_prefetch = 0 : i64, scratch_operands = 0 : i64, tpu.core_type = #tpu.core_type<tc>, window_params = [{transform_indices = @transform_0, window_bounds = array<i64: 1, 38, 128>}, {pipeline_mode = #tpu.pipeline_mode<synchronous>, transform_indices = @transform_1, window_bounds = array<i64: 1152, 128>}, {pipeline_mode = #tpu.pipeline_mode<synchronous>, transform_indices = @transform_2, window_bounds = array<i64: 1, 128>}, {pipeline_mode = #tpu.pipeline_mode<synchronous>, transform_indices = @transform_3, window_bounds = array<i64: 128, 128>}, {pipeline_mode = #tpu.pipeline_mode<synchronous>, transform_indices = @transform_4, window_bounds = array<i64: 1, 128>}, {pipeline_mode = #tpu.pipeline_mode<synchronous>, transform_indices = @transform_5, window_bounds = array<i64: 24, 1>}, {transform_indices = @transform_6, window_bounds = array<i64: 1, 24, 128>}]} {
    %cst = arith.constant 0.000000e+00 : f32
    %0 = vector.broadcast %cst : f32 to vector<24x128xf32>
    %c0 = arith.constant 0 : index
    %c0_0 = arith.constant 0 : index
    %c0_1 = arith.constant 0 : index
    %1 = vector.load %arg1[%c0, %c0_0, %c0_1] : memref<1x38x128xbf16, #tpu.memory_space<vmem>>, vector<1x24x128xbf16>
    %2 = vector.shape_cast %1 : vector<1x24x128xbf16> to vector<24x128xbf16>
    %cst_2 = arith.constant 0.000000e+00 : bf16
    %3 = vector.broadcast %cst_2 : bf16 to vector<24x128xbf16>
    %4 = arith.maximumf %2, %3 : vector<24x128xbf16>
    %c0_3 = arith.constant 0 : index
    %c0_4 = arith.constant 0 : index
    %5 = vector.load %arg2[%c0_3, %c0_4] : memref<1152x128xbf16, #tpu.memory_space<vmem>>, vector<128x128xbf16>
    %cst_5 = arith.constant dense<0.000000e+00> : vector<24x128xf32>
    %6 = tpu.matmul %4, %5, %cst_5 {dimension_numbers = #tpu.dot_dimension_numbers<[1], [0], [0], [1], [0, 0, 1, 1], [], []>} : vector<24x128xbf16>, vector<128x128xbf16>, vector<24x128xf32> -> vector<24x128xf32>
    %7 = arith.addf %0, %6 : vector<24x128xf32>
    %c0_6 = arith.constant 0 : index
    %c1 = arith.constant 1 : index
    %c0_7 = arith.constant 0 : index
    %8 = vector.load %arg1[%c0_6, %c1, %c0_7] : memref<1x38x128xbf16, #tpu.memory_space<vmem>>, vector<1x24x128xbf16>
    %9 = vector.shape_cast %8 : vector<1x24x128xbf16> to vector<24x128xbf16>
    %cst_8 = arith.constant 0.000000e+00 : bf16
    %10 = vector.broadcast %cst_8 : bf16 to vector<24x128xbf16>
    %11 = arith.maximumf %9, %10 : vector<24x128xbf16>
    %c128 = arith.constant 128 : index
    %c0_9 = arith.constant 0 : index
    %12 = vector.load %arg2[%c128, %c0_9] : memref<1152x128xbf16, #tpu.memory_space<vmem>>, vector<128x128xbf16>
    %cst_10 = arith.constant dense<0.000000e+00> : vector<24x128xf32>
    %13 = tpu.matmul %11, %12, %cst_10 {dimension_numbers = #tpu.dot_dimension_numbers<[1], [0], [0], [1], [0, 0, 1, 1], [], []>} : vector<24x128xbf16>, vector<128x128xbf16>, vector<24x128xf32> -> vector<24x128xf32>
    %14 = arith.addf %7, %13 : vector<24x128xf32>
    %c0_11 = arith.constant 0 : index
    %c2 = arith.constant 2 : index
    %c0_12 = arith.constant 0 : index
    %15 = vector.load %arg1[%c0_11, %c2, %c0_12] : memref<1x38x128xbf16, #tpu.memory_space<vmem>>, vector<1x24x128xbf16>
    %16 = vector.shape_cast %15 : vector<1x24x128xbf16> to vector<24x128xbf16>
    %cst_13 = arith.constant 0.000000e+00 : bf16
    %17 = vector.broadcast %cst_13 : bf16 to vector<24x128xbf16>
    %18 = arith.maximumf %16, %17 : vector<24x128xbf16>
    %c256 = arith.constant 256 : index
    %c0_14 = arith.constant 0 : index
    %19 = vector.load %arg2[%c256, %c0_14] : memref<1152x128xbf16, #tpu.memory_space<vmem>>, vector<128x128xbf16>
    %cst_15 = arith.constant dense<0.000000e+00> : vector<24x128xf32>
    %20 = tpu.matmul %18, %19, %cst_15 {dimension_numbers = #tpu.dot_dimension_numbers<[1], [0], [0], [1], [0, 0, 1, 1], [], []>} : vector<24x128xbf16>, vector<128x128xbf16>, vector<24x128xf32> -> vector<24x128xf32>
    %21 = arith.addf %14, %20 : vector<24x128xf32>
    %c0_16 = arith.constant 0 : index
    %c6 = arith.constant 6 : index
    %c0_17 = arith.constant 0 : index
    %22 = vector.load %arg1[%c0_16, %c6, %c0_17] : memref<1x38x128xbf16, #tpu.memory_space<vmem>>, vector<1x24x128xbf16>
    %23 = vector.shape_cast %22 : vector<1x24x128xbf16> to vector<24x128xbf16>
    %cst_18 = arith.constant 0.000000e+00 : bf16
    %24 = vector.broadcast %cst_18 : bf16 to vector<24x128xbf16>
    %25 = arith.maximumf %23, %24 : vector<24x128xbf16>
    %c384 = arith.constant 384 : index
    %c0_19 = arith.constant 0 : index
    %26 = vector.load %arg2[%c384, %c0_19] : memref<1152x128xbf16, #tpu.memory_space<vmem>>, vector<128x128xbf16>
    %cst_20 = arith.constant dense<0.000000e+00> : vector<24x128xf32>
    %27 = tpu.matmul %25, %26, %cst_20 {dimension_numbers = #tpu.dot_dimension_numbers<[1], [0], [0], [1], [0, 0, 1, 1], [], []>} : vector<24x128xbf16>, vector<128x128xbf16>, vector<24x128xf32> -> vector<24x128xf32>
    %28 = arith.addf %21, %27 : vector<24x128xf32>
    %c0_21 = arith.constant 0 : index
    %c7 = arith.constant 7 : index
    %c0_22 = arith.constant 0 : index
    %29 = vector.load %arg1[%c0_21, %c7, %c0_22] : memref<1x38x128xbf16, #tpu.memory_space<vmem>>, vector<1x24x128xbf16>
    %30 = vector.shape_cast %29 : vector<1x24x128xbf16> to vector<24x128xbf16>
    %cst_23 = arith.constant 0.000000e+00 : bf16
    %31 = vector.broadcast %cst_23 : bf16 to vector<24x128xbf16>
    %32 = arith.maximumf %30, %31 : vector<24x128xbf16>
    %c512 = arith.constant 512 : index
    %c0_24 = arith.constant 0 : index
    %33 = vector.load %arg2[%c512, %c0_24] : memref<1152x128xbf16, #tpu.memory_space<vmem>>, vector<128x128xbf16>
    %cst_25 = arith.constant dense<0.000000e+00> : vector<24x128xf32>
    %34 = tpu.matmul %32, %33, %cst_25 {dimension_numbers = #tpu.dot_dimension_numbers<[1], [0], [0], [1], [0, 0, 1, 1], [], []>} : vector<24x128xbf16>, vector<128x128xbf16>, vector<24x128xf32> -> vector<24x128xf32>
    %35 = arith.addf %28, %34 : vector<24x128xf32>
    %c0_26 = arith.constant 0 : index
    %c8 = arith.constant 8 : index
    %c0_27 = arith.constant 0 : index
    %36 = vector.load %arg1[%c0_26, %c8, %c0_27] : memref<1x38x128xbf16, #tpu.memory_space<vmem>>, vector<1x24x128xbf16>
    %37 = vector.shape_cast %36 : vector<1x24x128xbf16> to vector<24x128xbf16>
    %cst_28 = arith.constant 0.000000e+00 : bf16
    %38 = vector.broadcast %cst_28 : bf16 to vector<24x128xbf16>
    %39 = arith.maximumf %37, %38 : vector<24x128xbf16>
    %c640 = arith.constant 640 : index
    %c0_29 = arith.constant 0 : index
    %40 = vector.load %arg2[%c640, %c0_29] : memref<1152x128xbf16, #tpu.memory_space<vmem>>, vector<128x128xbf16>
    %cst_30 = arith.constant dense<0.000000e+00> : vector<24x128xf32>
    %41 = tpu.matmul %39, %40, %cst_30 {dimension_numbers = #tpu.dot_dimension_numbers<[1], [0], [0], [1], [0, 0, 1, 1], [], []>} : vector<24x128xbf16>, vector<128x128xbf16>, vector<24x128xf32> -> vector<24x128xf32>
    %42 = arith.addf %35, %41 : vector<24x128xf32>
    %c0_31 = arith.constant 0 : index
    %c12 = arith.constant 12 : index
    %c0_32 = arith.constant 0 : index
    %43 = vector.load %arg1[%c0_31, %c12, %c0_32] : memref<1x38x128xbf16, #tpu.memory_space<vmem>>, vector<1x24x128xbf16>
    %44 = vector.shape_cast %43 : vector<1x24x128xbf16> to vector<24x128xbf16>
    %cst_33 = arith.constant 0.000000e+00 : bf16
    %45 = vector.broadcast %cst_33 : bf16 to vector<24x128xbf16>
    %46 = arith.maximumf %44, %45 : vector<24x128xbf16>
    %c768 = arith.constant 768 : index
    %c0_34 = arith.constant 0 : index
    %47 = vector.load %arg2[%c768, %c0_34] : memref<1152x128xbf16, #tpu.memory_space<vmem>>, vector<128x128xbf16>
    %cst_35 = arith.constant dense<0.000000e+00> : vector<24x128xf32>
    %48 = tpu.matmul %46, %47, %cst_35 {dimension_numbers = #tpu.dot_dimension_numbers<[1], [0], [0], [1], [0, 0, 1, 1], [], []>} : vector<24x128xbf16>, vector<128x128xbf16>, vector<24x128xf32> -> vector<24x128xf32>
    %49 = arith.addf %42, %48 : vector<24x128xf32>
    %c0_36 = arith.constant 0 : index
    %c13 = arith.constant 13 : index
    %c0_37 = arith.constant 0 : index
    %50 = vector.load %arg1[%c0_36, %c13, %c0_37] : memref<1x38x128xbf16, #tpu.memory_space<vmem>>, vector<1x24x128xbf16>
    %51 = vector.shape_cast %50 : vector<1x24x128xbf16> to vector<24x128xbf16>
    %cst_38 = arith.constant 0.000000e+00 : bf16
    %52 = vector.broadcast %cst_38 : bf16 to vector<24x128xbf16>
    %53 = arith.maximumf %51, %52 : vector<24x128xbf16>
    %c896 = arith.constant 896 : index
    %c0_39 = arith.constant 0 : index
    %54 = vector.load %arg2[%c896, %c0_39] : memref<1152x128xbf16, #tpu.memory_space<vmem>>, vector<128x128xbf16>
    %cst_40 = arith.constant dense<0.000000e+00> : vector<24x128xf32>
    %55 = tpu.matmul %53, %54, %cst_40 {dimension_numbers = #tpu.dot_dimension_numbers<[1], [0], [0], [1], [0, 0, 1, 1], [], []>} : vector<24x128xbf16>, vector<128x128xbf16>, vector<24x128xf32> -> vector<24x128xf32>
    %56 = arith.addf %49, %55 : vector<24x128xf32>
    %c0_41 = arith.constant 0 : index
    %c14 = arith.constant 14 : index
    %c0_42 = arith.constant 0 : index
    %57 = vector.load %arg1[%c0_41, %c14, %c0_42] : memref<1x38x128xbf16, #tpu.memory_space<vmem>>, vector<1x24x128xbf16>
    %58 = vector.shape_cast %57 : vector<1x24x128xbf16> to vector<24x128xbf16>
    %cst_43 = arith.constant 0.000000e+00 : bf16
    %59 = vector.broadcast %cst_43 : bf16 to vector<24x128xbf16>
    %60 = arith.maximumf %58, %59 : vector<24x128xbf16>
    %c1024 = arith.constant 1024 : index
    %c0_44 = arith.constant 0 : index
    %61 = vector.load %arg2[%c1024, %c0_44] : memref<1152x128xbf16, #tpu.memory_space<vmem>>, vector<128x128xbf16>
    %cst_45 = arith.constant dense<0.000000e+00> : vector<24x128xf32>
    %62 = tpu.matmul %60, %61, %cst_45 {dimension_numbers = #tpu.dot_dimension_numbers<[1], [0], [0], [1], [0, 0, 1, 1], [], []>} : vector<24x128xbf16>, vector<128x128xbf16>, vector<24x128xf32> -> vector<24x128xf32>
    %63 = arith.addf %56, %62 : vector<24x128xf32>
    %c0_46 = arith.constant 0 : index
    %c0_47 = arith.constant 0 : index
    %64 = vector.load %arg3[%c0_46, %c0_47] : memref<1x128xf32, #tpu.memory_space<vmem>>, vector<1x128xf32>
    %65 = vector.broadcast %64 : vector<1x128xf32> to vector<24x128xf32>
    %66 = arith.addf %63, %65 : vector<24x128xf32>
    %cst_48 = arith.constant 0.000000e+00 : f32
    %67 = vector.broadcast %cst_48 : f32 to vector<24x128xf32>
    %68 = arith.maximumf %66, %67 : vector<24x128xf32>
    %69 = arith.truncf %68 : vector<24x128xf32> to vector<24x128xbf16>
    %c0_49 = arith.constant 0 : index
    %c0_50 = arith.constant 0 : index
    %70 = vector.load %arg4[%c0_49, %c0_50] : memref<128x128xbf16, #tpu.memory_space<vmem>>, vector<128x128xbf16>
    %cst_51 = arith.constant dense<0.000000e+00> : vector<24x128xf32>
    %71 = tpu.matmul %69, %70, %cst_51 {dimension_numbers = #tpu.dot_dimension_numbers<[1], [0], [0], [1], [0, 0, 1, 1], [], []>} : vector<24x128xbf16>, vector<128x128xbf16>, vector<24x128xf32> -> vector<24x128xf32>
    %c0_52 = arith.constant 0 : index
    %c0_53 = arith.constant 0 : index
    %72 = vector.load %arg5[%c0_52, %c0_53] : memref<1x128xf32, #tpu.memory_space<vmem>>, vector<1x128xf32>
    %73 = vector.broadcast %72 : vector<1x128xf32> to vector<24x128xf32>
    %74 = arith.addf %71, %73 : vector<24x128xf32>
    %c0_54 = arith.constant 0 : index
    %c7_55 = arith.constant 7 : index
    %c0_56 = arith.constant 0 : index
    %75 = vector.load %arg1[%c0_54, %c7_55, %c0_56] : memref<1x38x128xbf16, #tpu.memory_space<vmem>>, vector<1x24x128xbf16>
    %76 = vector.shape_cast %75 : vector<1x24x128xbf16> to vector<24x128xbf16>
    %77 = arith.extf %76 : vector<24x128xbf16> to vector<24x128xf32>
    %78 = arith.addf %74, %77 : vector<24x128xf32>
    %c0_57 = arith.constant 0 : index
    %c0_58 = arith.constant 0 : index
    %79 = vector.load %arg6[%c0_57, %c0_58] : memref<24x1xf32, #tpu.memory_space<vmem>>, vector<24x1xf32>
    %80 = vector.broadcast %79 : vector<24x1xf32> to vector<24x128xf32>
    %81 = arith.mulf %78, %80 : vector<24x128xf32>
    %82 = arith.truncf %81 : vector<24x128xf32> to vector<24x128xbf16>
    %c0_59 = arith.constant 0 : index
    %c0_60 = arith.constant 0 : index
    %c0_61 = arith.constant 0 : index
    %83 = vector.load %arg7[%c0_59, %c0_60, %c0_61] : memref<1x24x128xbf16, #tpu.memory_space<vmem>>, vector<1x24x128xbf16>
    %84 = vector.shape_cast %83 : vector<1x24x128xbf16> to vector<24x128xbf16>
    %85 = vector.shape_cast %82 : vector<24x128xbf16> to vector<1x24x128xbf16>
    tpu.vector_store %arg7[%c0_59, %c0_60, %c0_61], %85 {strides = array<i32>} : memref<1x24x128xbf16, #tpu.memory_space<vmem>>, vector<1x24x128xbf16>,
    return
  }
  func.func @transform_0(%arg0: i32) -> (i32, i32, i32) {
    %c0_i32 = arith.constant 0 : i32
    %c0_i32_0 = arith.constant 0 : i32
    %c0_i32_1 = arith.constant 0 : i32
    return %arg0, %c0_i32, %c0_i32_0 : i32, i32, i32
  }
  func.func @transform_1(%arg0: i32) -> (i32, i32) {
    %c0_i32 = arith.constant 0 : i32
    %c0_i32_0 = arith.constant 0 : i32
    %c0_i32_1 = arith.constant 0 : i32
    return %c0_i32, %c0_i32_0 : i32, i32
  }
  func.func @transform_2(%arg0: i32) -> (i32, i32) {
    %c0_i32 = arith.constant 0 : i32
    %c0_i32_0 = arith.constant 0 : i32
    %c0_i32_1 = arith.constant 0 : i32
    return %c0_i32, %c0_i32_0 : i32, i32
  }
  func.func @transform_3(%arg0: i32) -> (i32, i32) {
    %c0_i32 = arith.constant 0 : i32
    %c0_i32_0 = arith.constant 0 : i32
    %c0_i32_1 = arith.constant 0 : i32
    return %c0_i32, %c0_i32_0 : i32, i32
  }
  func.func @transform_4(%arg0: i32) -> (i32, i32) {
    %c0_i32 = arith.constant 0 : i32
    %c0_i32_0 = arith.constant 0 : i32
    %c0_i32_1 = arith.constant 0 : i32
    return %c0_i32, %c0_i32_0 : i32, i32
  }
  func.func @transform_5(%arg0: i32) -> (i32, i32) {
    %c0_i32 = arith.constant 0 : i32
    %c0_i32_0 = arith.constant 0 : i32
    %c0_i32_1 = arith.constant 0 : i32
    return %c0_i32, %c0_i32_0 : i32, i32
  }
  func.func @transform_6(%arg0: i32) -> (i32, i32, i32) {
    %c0_i32 = arith.constant 0 : i32
    %c0_i32_0 = arith.constant 0 : i32
    %c0_i32_1 = arith.constant 0 : i32
    return %arg0, %c0_i32, %c0_i32_0 : i32, i32, i32
  }
}

module attributes {stable_mosaic.version = 11 : i64} {
  func.func @_resblock_kernel(%arg0: i32, %arg1: memref<1x38x128xbf16, #tpu.memory_space<vmem>>, %arg2: memref<1152x128xbf16, #tpu.memory_space<vmem>>, %arg3: memref<1x128xf32, #tpu.memory_space<vmem>>, %arg4: memref<128x128xbf16, #tpu.memory_space<vmem>>, %arg5: memref<1x128xf32, #tpu.memory_space<vmem>>, %arg6: memref<24x1xf32, #tpu.memory_space<vmem>>, %arg7: memref<1x24x128xbf16, #tpu.memory_space<vmem>>) attributes {dimension_semantics = [#tpu.dimension_semantics<parallel>], iteration_bounds = array<i64: 2>, scalar_prefetch = 0 : i64, scratch_operands = 0 : i64, tpu.core_type = #tpu.core_type<tc>, window_params = [{transform_indices = @transform_0, window_bounds = array<i64: 1, 38, 128>}, {pipeline_mode = #tpu.pipeline_mode<synchronous>, transform_indices = @transform_1, window_bounds = array<i64: 1152, 128>}, {pipeline_mode = #tpu.pipeline_mode<synchronous>, transform_indices = @transform_2, window_bounds = array<i64: 1, 128>}, {pipeline_mode = #tpu.pipeline_mode<synchronous>, transform_indices = @transform_3, window_bounds = array<i64: 128, 128>}, {pipeline_mode = #tpu.pipeline_mode<synchronous>, transform_indices = @transform_4, window_bounds = array<i64: 1, 128>}, {pipeline_mode = #tpu.pipeline_mode<synchronous>, transform_indices = @transform_5, window_bounds = array<i64: 24, 1>}, {transform_indices = @transform_6, window_bounds = array<i64: 1, 24, 128>}]} {
    %cst = arith.constant 0.000000e+00 : f32
    %0 = vector.broadcast %cst : f32 to vector<24x128xf32>
    %c0 = arith.constant 0 : index
    %c0_0 = arith.constant 0 : index
    %c0_1 = arith.constant 0 : index
    %1 = vector.load %arg1[%c0, %c0_0, %c0_1] : memref<1x38x128xbf16, #tpu.memory_space<vmem>>, vector<1x24x128xbf16>
    %2 = vector.shape_cast %1 : vector<1x24x128xbf16> to vector<24x128xbf16>
    %cst_2 = arith.constant 0.000000e+00 : bf16
    %3 = vector.broadcast %cst_2 : bf16 to vector<24x128xbf16>
    %4 = arith.maximumf %2, %3 : vector<24x128xbf16>
    %c0_3 = arith.constant 0 : index
    %c0_4 = arith.constant 0 : index
    %5 = vector.load %arg2[%c0_3, %c0_4] : memref<1152x128xbf16, #tpu.memory_space<vmem>>, vector<128x128xbf16>
    %cst_5 = arith.constant dense<0.000000e+00> : vector<24x128xf32>
    %6 = tpu.matmul %4, %5, %cst_5 {dimension_numbers = #tpu.dot_dimension_numbers<[1], [0], [0], [1], [0, 0, 1, 1], [], []>} : vector<24x128xbf16>, vector<128x128xbf16>, vector<24x128xf32> -> vector<24x128xf32>
    %7 = arith.addf %0, %6 : vector<24x128xf32>
    %c0_6 = arith.constant 0 : index
    %c1 = arith.constant 1 : index
    %c0_7 = arith.constant 0 : index
    %8 = vector.load %arg1[%c0_6, %c1, %c0_7] : memref<1x38x128xbf16, #tpu.memory_space<vmem>>, vector<1x24x128xbf16>
    %9 = vector.shape_cast %8 : vector<1x24x128xbf16> to vector<24x128xbf16>
    %cst_8 = arith.constant 0.000000e+00 : bf16
    %10 = vector.broadcast %cst_8 : bf16 to vector<24x128xbf16>
    %11 = arith.maximumf %9, %10 : vector<24x128xbf16>
    %c128 = arith.constant 128 : index
    %c0_9 = arith.constant 0 : index
    %12 = vector.load %arg2[%c128, %c0_9] : memref<1152x128xbf16, #tpu.memory_space<vmem>>, vector<128x128xbf16>
    %cst_10 = arith.constant dense<0.000000e+00> : vector<24x128xf32>
    %13 = tpu.matmul %11, %12, %cst_10 {dimension_numbers = #tpu.dot_dimension_numbers<[1], [0], [0], [1], [0, 0, 1, 1], [], []>} : vector<24x128xbf16>, vector<128x128xbf16>, vector<24x128xf32> -> vector<24x128xf32>
    %14 = arith.addf %7, %13 : vector<24x128xf32>
    %c0_11 = arith.constant 0 : index
    %c2 = arith.constant 2 : index
    %c0_12 = arith.constant 0 : index
    %15 = vector.load %arg1[%c0_11, %c2, %c0_12] : memref<1x38x128xbf16, #tpu.memory_space<vmem>>, vector<1x24x128xbf16>
    %16 = vector.shape_cast %15 : vector<1x24x128xbf16> to vector<24x128xbf16>
    %cst_13 = arith.constant 0.000000e+00 : bf16
    %17 = vector.broadcast %cst_13 : bf16 to vector<24x128xbf16>
    %18 = arith.maximumf %16, %17 : vector<24x128xbf16>
    %c256 = arith.constant 256 : index
    %c0_14 = arith.constant 0 : index
    %19 = vector.load %arg2[%c256, %c0_14] : memref<1152x128xbf16, #tpu.memory_space<vmem>>, vector<128x128xbf16>
    %cst_15 = arith.constant dense<0.000000e+00> : vector<24x128xf32>
    %20 = tpu.matmul %18, %19, %cst_15 {dimension_numbers = #tpu.dot_dimension_numbers<[1], [0], [0], [1], [0, 0, 1, 1], [], []>} : vector<24x128xbf16>, vector<128x128xbf16>, vector<24x128xf32> -> vector<24x128xf32>
    %21 = arith.addf %14, %20 : vector<24x128xf32>
    %c0_16 = arith.constant 0 : index
    %c6 = arith.constant 6 : index
    %c0_17 = arith.constant 0 : index
    %22 = vector.load %arg1[%c0_16, %c6, %c0_17] : memref<1x38x128xbf16, #tpu.memory_space<vmem>>, vector<1x24x128xbf16>
    %23 = vector.shape_cast %22 : vector<1x24x128xbf16> to vector<24x128xbf16>
    %cst_18 = arith.constant 0.000000e+00 : bf16
    %24 = vector.broadcast %cst_18 : bf16 to vector<24x128xbf16>
    %25 = arith.maximumf %23, %24 : vector<24x128xbf16>
    %c384 = arith.constant 384 : index
    %c0_19 = arith.constant 0 : index
    %26 = vector.load %arg2[%c384, %c0_19] : memref<1152x128xbf16, #tpu.memory_space<vmem>>, vector<128x128xbf16>
    %cst_20 = arith.constant dense<0.000000e+00> : vector<24x128xf32>
    %27 = tpu.matmul %25, %26, %cst_20 {dimension_numbers = #tpu.dot_dimension_numbers<[1], [0], [0], [1], [0, 0, 1, 1], [], []>} : vector<24x128xbf16>, vector<128x128xbf16>, vector<24x128xf32> -> vector<24x128xf32>
    %28 = arith.addf %21, %27 : vector<24x128xf32>
    %c0_21 = arith.constant 0 : index
    %c7 = arith.constant 7 : index
    %c0_22 = arith.constant 0 : index
    %29 = vector.load %arg1[%c0_21, %c7, %c0_22] : memref<1x38x128xbf16, #tpu.memory_space<vmem>>, vector<1x24x128xbf16>
    %30 = vector.shape_cast %29 : vector<1x24x128xbf16> to vector<24x128xbf16>
    %cst_23 = arith.constant 0.000000e+00 : bf16
    %31 = vector.broadcast %cst_23 : bf16 to vector<24x128xbf16>
    %32 = arith.maximumf %30, %31 : vector<24x128xbf16>
    %c512 = arith.constant 512 : index
    %c0_24 = arith.constant 0 : index
    %33 = vector.load %arg2[%c512, %c0_24] : memref<1152x128xbf16, #tpu.memory_space<vmem>>, vector<128x128xbf16>
    %cst_25 = arith.constant dense<0.000000e+00> : vector<24x128xf32>
    %34 = tpu.matmul %32, %33, %cst_25 {dimension_numbers = #tpu.dot_dimension_numbers<[1], [0], [0], [1], [0, 0, 1, 1], [], []>} : vector<24x128xbf16>, vector<128x128xbf16>, vector<24x128xf32> -> vector<24x128xf32>
    %35 = arith.addf %28, %34 : vector<24x128xf32>
    %c0_26 = arith.constant 0 : index
    %c8 = arith.constant 8 : index
    %c0_27 = arith.constant 0 : index
    %36 = vector.load %arg1[%c0_26, %c8, %c0_27] : memref<1x38x128xbf16, #tpu.memory_space<vmem>>, vector<1x24x128xbf16>
    %37 = vector.shape_cast %36 : vector<1x24x128xbf16> to vector<24x128xbf16>
    %cst_28 = arith.constant 0.000000e+00 : bf16
    %38 = vector.broadcast %cst_28 : bf16 to vector<24x128xbf16>
    %39 = arith.maximumf %37, %38 : vector<24x128xbf16>
    %c640 = arith.constant 640 : index
    %c0_29 = arith.constant 0 : index
    %40 = vector.load %arg2[%c640, %c0_29] : memref<1152x128xbf16, #tpu.memory_space<vmem>>, vector<128x128xbf16>
    %cst_30 = arith.constant dense<0.000000e+00> : vector<24x128xf32>
    %41 = tpu.matmul %39, %40, %cst_30 {dimension_numbers = #tpu.dot_dimension_numbers<[1], [0], [0], [1], [0, 0, 1, 1], [], []>} : vector<24x128xbf16>, vector<128x128xbf16>, vector<24x128xf32> -> vector<24x128xf32>
    %42 = arith.addf %35, %41 : vector<24x128xf32>
    %c0_31 = arith.constant 0 : index
    %c12 = arith.constant 12 : index
    %c0_32 = arith.constant 0 : index
    %43 = vector.load %arg1[%c0_31, %c12, %c0_32] : memref<1x38x128xbf16, #tpu.memory_space<vmem>>, vector<1x24x128xbf16>
    %44 = vector.shape_cast %43 : vector<1x24x128xbf16> to vector<24x128xbf16>
    %cst_33 = arith.constant 0.000000e+00 : bf16
    %45 = vector.broadcast %cst_33 : bf16 to vector<24x128xbf16>
    %46 = arith.maximumf %44, %45 : vector<24x128xbf16>
    %c768 = arith.constant 768 : index
    %c0_34 = arith.constant 0 : index
    %47 = vector.load %arg2[%c768, %c0_34] : memref<1152x128xbf16, #tpu.memory_space<vmem>>, vector<128x128xbf16>
    %cst_35 = arith.constant dense<0.000000e+00> : vector<24x128xf32>
    %48 = tpu.matmul %46, %47, %cst_35 {dimension_numbers = #tpu.dot_dimension_numbers<[1], [0], [0], [1], [0, 0, 1, 1], [], []>} : vector<24x128xbf16>, vector<128x128xbf16>, vector<24x128xf32> -> vector<24x128xf32>
    %49 = arith.addf %42, %48 : vector<24x128xf32>
    %c0_36 = arith.constant 0 : index
    %c13 = arith.constant 13 : index
    %c0_37 = arith.constant 0 : index
    %50 = vector.load %arg1[%c0_36, %c13, %c0_37] : memref<1x38x128xbf16, #tpu.memory_space<vmem>>, vector<1x24x128xbf16>
    %51 = vector.shape_cast %50 : vector<1x24x128xbf16> to vector<24x128xbf16>
    %cst_38 = arith.constant 0.000000e+00 : bf16
    %52 = vector.broadcast %cst_38 : bf16 to vector<24x128xbf16>
    %53 = arith.maximumf %51, %52 : vector<24x128xbf16>
    %c896 = arith.constant 896 : index
    %c0_39 = arith.constant 0 : index
    %54 = vector.load %arg2[%c896, %c0_39] : memref<1152x128xbf16, #tpu.memory_space<vmem>>, vector<128x128xbf16>
    %cst_40 = arith.constant dense<0.000000e+00> : vector<24x128xf32>
    %55 = tpu.matmul %53, %54, %cst_40 {dimension_numbers = #tpu.dot_dimension_numbers<[1], [0], [0], [1], [0, 0, 1, 1], [], []>} : vector<24x128xbf16>, vector<128x128xbf16>, vector<24x128xf32> -> vector<24x128xf32>
    %56 = arith.addf %49, %55 : vector<24x128xf32>
    %c0_41 = arith.constant 0 : index
    %c14 = arith.constant 14 : index
    %c0_42 = arith.constant 0 : index
    %57 = vector.load %arg1[%c0_41, %c14, %c0_42] : memref<1x38x128xbf16, #tpu.memory_space<vmem>>, vector<1x24x128xbf16>
    %58 = vector.shape_cast %57 : vector<1x24x128xbf16> to vector<24x128xbf16>
    %cst_43 = arith.constant 0.000000e+00 : bf16
    %59 = vector.broadcast %cst_43 : bf16 to vector<24x128xbf16>
    %60 = arith.maximumf %58, %59 : vector<24x128xbf16>
    %c1024 = arith.constant 1024 : index
    %c0_44 = arith.constant 0 : index
    %61 = vector.load %arg2[%c1024, %c0_44] : memref<1152x128xbf16, #tpu.memory_space<vmem>>, vector<128x128xbf16>
    %cst_45 = arith.constant dense<0.000000e+00> : vector<24x128xf32>
    %62 = tpu.matmul %60, %61, %cst_45 {dimension_numbers = #tpu.dot_dimension_numbers<[1], [0], [0], [1], [0, 0, 1, 1], [], []>} : vector<24x128xbf16>, vector<128x128xbf16>, vector<24x128xf32> -> vector<24x128xf32>
    %63 = arith.addf %56, %62 : vector<24x128xf32>
    %c0_46 = arith.constant 0 : index
    %c0_47 = arith.constant 0 : index
    %64 = vector.load %arg3[%c0_46, %c0_47] : memref<1x128xf32, #tpu.memory_space<vmem>>, vector<1x128xf32>
    %65 = vector.broadcast %64 : vector<1x128xf32> to vector<24x128xf32>
    %66 = arith.addf %63, %65 : vector<24x128xf32>
    %cst_48 = arith.constant 0.000000e+00 : f32
    %67 = vector.broadcast %cst_48 : f32 to vector<24x128xf32>
    %68 = arith.maximumf %66, %67 : vector<24x128xf32>
    %69 = arith.truncf %68 : vector<24x128xf32> to vector<24x128xbf16>
    %c0_49 = arith.constant 0 : index
    %c0_50 = arith.constant 0 : index
    %70 = vector.load %arg4[%c0_49, %c0_50] : memref<128x128xbf16, #tpu.memory_space<vmem>>, vector<128x128xbf16>
    %cst_51 = arith.constant dense<0.000000e+00> : vector<24x128xf32>
    %71 = tpu.matmul %69, %70, %cst_51 {dimension_numbers = #tpu.dot_dimension_numbers<[1], [0], [0], [1], [0, 0, 1, 1], [], []>} : vector<24x128xbf16>, vector<128x128xbf16>, vector<24x128xf32> -> vector<24x128xf32>
    %c0_52 = arith.constant 0 : index
    %c0_53 = arith.constant 0 : index
    %72 = vector.load %arg5[%c0_52, %c0_53] : memref<1x128xf32, #tpu.memory_space<vmem>>, vector<1x128xf32>
    %73 = vector.broadcast %72 : vector<1x128xf32> to vector<24x128xf32>
    %74 = arith.addf %71, %73 : vector<24x128xf32>
    %c0_54 = arith.constant 0 : index
    %c7_55 = arith.constant 7 : index
    %c0_56 = arith.constant 0 : index
    %75 = vector.load %arg1[%c0_54, %c7_55, %c0_56] : memref<1x38x128xbf16, #tpu.memory_space<vmem>>, vector<1x24x128xbf16>
    %76 = vector.shape_cast %75 : vector<1x24x128xbf16> to vector<24x128xbf16>
    %77 = arith.extf %76 : vector<24x128xbf16> to vector<24x128xf32>
    %78 = arith.addf %74, %77 : vector<24x128xf32>
    %cst_57 = arith.constant 0.000000e+00 : f32
    %79 = vector.broadcast %cst_57 : f32 to vector<24x128xf32>
    %80 = arith.maximumf %78, %79 : vector<24x128xf32>
    %c0_58 = arith.constant 0 : index
    %c0_59 = arith.constant 0 : index
    %81 = vector.load %arg6[%c0_58, %c0_59] : memref<24x1xf32, #tpu.memory_space<vmem>>, vector<24x1xf32>
    %82 = vector.broadcast %81 : vector<24x1xf32> to vector<24x128xf32>
    %83 = arith.mulf %80, %82 : vector<24x128xf32>
    %84 = arith.truncf %83 : vector<24x128xf32> to vector<24x128xbf16>
    %c0_60 = arith.constant 0 : index
    %c0_61 = arith.constant 0 : index
    %c0_62 = arith.constant 0 : index
    %85 = vector.load %arg7[%c0_60, %c0_61, %c0_62] : memref<1x24x128xbf16, #tpu.memory_space<vmem>>, vector<1x24x128xbf16>
    %86 = vector.shape_cast %85 : vector<1x24x128xbf16> to vector<24x128xbf16>
    %87 = vector.shape_cast %84 : vector<24x128xbf16> to vector<1x24x128xbf16>
    tpu.vector_store %arg7[%c0_60, %c0_61, %c0_62], %87 {strides = array<i32>} : memref<1x24x128xbf16, #tpu.memory_space<vmem>>, vector<1x24x128xbf16>,
    return
  }
  func.func @transform_0(%arg0: i32) -> (i32, i32, i32) {
    %c0_i32 = arith.constant 0 : i32
    %c0_i32_0 = arith.constant 0 : i32
    %c0_i32_1 = arith.constant 0 : i32
    return %arg0, %c0_i32, %c0_i32_0 : i32, i32, i32
  }
  func.func @transform_1(%arg0: i32) -> (i32, i32) {
    %c0_i32 = arith.constant 0 : i32
    %c0_i32_0 = arith.constant 0 : i32
    %c0_i32_1 = arith.constant 0 : i32
    return %c0_i32, %c0_i32_0 : i32, i32
  }
  func.func @transform_2(%arg0: i32) -> (i32, i32) {
    %c0_i32 = arith.constant 0 : i32
    %c0_i32_0 = arith.constant 0 : i32
    %c0_i32_1 = arith.constant 0 : i32
    return %c0_i32, %c0_i32_0 : i32, i32
  }
  func.func @transform_3(%arg0: i32) -> (i32, i32) {
    %c0_i32 = arith.constant 0 : i32
    %c0_i32_0 = arith.constant 0 : i32
    %c0_i32_1 = arith.constant 0 : i32
    return %c0_i32, %c0_i32_0 : i32, i32
  }
  func.func @transform_4(%arg0: i32) -> (i32, i32) {
    %c0_i32 = arith.constant 0 : i32
    %c0_i32_0 = arith.constant 0 : i32
    %c0_i32_1 = arith.constant 0 : i32
    return %c0_i32, %c0_i32_0 : i32, i32
  }
  func.func @transform_5(%arg0: i32) -> (i32, i32) {
    %c0_i32 = arith.constant 0 : i32
    %c0_i32_0 = arith.constant 0 : i32
    %c0_i32_1 = arith.constant 0 : i32
    return %c0_i32, %c0_i32_0 : i32, i32
  }
  func.func @transform_6(%arg0: i32) -> (i32, i32, i32) {
    %c0_i32 = arith.constant 0 : i32
    %c0_i32_0 = arith.constant 0 : i32
    %c0_i32_1 = arith.constant 0 : i32
    return %arg0, %c0_i32, %c0_i32_0 : i32, i32, i32
  }
}

module attributes {stable_mosaic.version = 11 : i64} {
  func.func @_vq_kernel(%arg0: i32, %arg1: memref<1x24x128xbf16, #tpu.memory_space<vmem>>, %arg2: memref<128x128xbf16, #tpu.memory_space<vmem>>, %arg3: memref<1x128xf32, #tpu.memory_space<vmem>>, %arg4: memref<24x1xf32, #tpu.memory_space<vmem>>, %arg5: memref<1x24x128xbf16, #tpu.memory_space<vmem>>, %arg6: memref<1x24x128xbf16, #tpu.memory_space<vmem>>, %arg7: memref<1x1x128xf32, #tpu.memory_space<vmem>>, %arg8: memref<1x1x128xf32, #tpu.memory_space<vmem>>) attributes {dimension_semantics = [#tpu.dimension_semantics<parallel>], iteration_bounds = array<i64: 2>, scalar_prefetch = 0 : i64, scratch_operands = 0 : i64, tpu.core_type = #tpu.core_type<tc>, window_params = [{transform_indices = @transform_0, window_bounds = array<i64: 1, 24, 128>}, {pipeline_mode = #tpu.pipeline_mode<synchronous>, transform_indices = @transform_1, window_bounds = array<i64: 128, 128>}, {pipeline_mode = #tpu.pipeline_mode<synchronous>, transform_indices = @transform_2, window_bounds = array<i64: 1, 128>}, {pipeline_mode = #tpu.pipeline_mode<synchronous>, transform_indices = @transform_3, window_bounds = array<i64: 24, 1>}, {transform_indices = @transform_4, window_bounds = array<i64: 1, 24, 128>}, {transform_indices = @transform_5, window_bounds = array<i64: 1, 24, 128>}, {transform_indices = @transform_6, window_bounds = array<i64: 1, 1, 128>}, {transform_indices = @transform_7, window_bounds = array<i64: 1, 1, 128>}]} {
    %c0 = arith.constant 0 : index
    %c0_0 = arith.constant 0 : index
    %c0_1 = arith.constant 0 : index
    %0 = vector.load %arg1[%c0, %c0_0, %c0_1] : memref<1x24x128xbf16, #tpu.memory_space<vmem>>, vector<1x24x128xbf16>
    %1 = vector.shape_cast %0 : vector<1x24x128xbf16> to vector<24x128xbf16>
    %2 = arith.extf %1 : vector<24x128xbf16> to vector<24x128xf32>
    %3 = arith.mulf %2, %2 : vector<24x128xf32>
    %cst = arith.constant dense<0.000000e+00> : vector<24xf32>
    %4 = vector.multi_reduction <add>, %3, %cst [1] : vector<24x128xf32> to vector<24xf32>
    %5 = vector.shape_cast %4 : vector<24xf32> to vector<24x1xf32>
    %c0_2 = arith.constant 0 : index
    %c0_3 = arith.constant 0 : index
    %6 = vector.load %arg2[%c0_2, %c0_3] : memref<128x128xbf16, #tpu.memory_space<vmem>>, vector<128x128xbf16>
    %cst_4 = arith.constant dense<0.000000e+00> : vector<24x128xf32>
    %7 = tpu.matmul %1, %6, %cst_4 {dimension_numbers = #tpu.dot_dimension_numbers<[1], [1], [0], [0], [0, 0, 1, 0], [], []>} : vector<24x128xbf16>, vector<128x128xbf16>, vector<24x128xf32> -> vector<24x128xf32>
    %c0_5 = arith.constant 0 : index
    %c0_6 = arith.constant 0 : index
    %8 = vector.load %arg3[%c0_5, %c0_6] : memref<1x128xf32, #tpu.memory_space<vmem>>, vector<1x128xf32>
    %9 = vector.broadcast %5 : vector<24x1xf32> to vector<24x128xf32>
    %10 = vector.broadcast %8 : vector<1x128xf32> to vector<24x128xf32>
    %11 = arith.addf %9, %10 : vector<24x128xf32>
    %cst_7 = arith.constant 2.000000e+00 : f32
    %12 = vector.broadcast %cst_7 : f32 to vector<24x128xf32>
    %13 = arith.mulf %12, %7 : vector<24x128xf32>
    %14 = arith.subf %11, %13 : vector<24x128xf32>
    %15 = tpu.iota {dimensions = array<i32: 1>} : vector<24x128xi32>
    %c16_i32 = arith.constant 16 : i32
    %16 = vector.broadcast %c16_i32 : i32 to vector<24x128xi32>
    %17 = arith.cmpi slt, %15, %16 : vector<24x128xi32>
    %cst_8 = arith.constant 1.000000e+30 : f32
    %18 = vector.broadcast %cst_8 : f32 to vector<24x128xf32>
    %19 = arith.select %17, %14, %18 : vector<24x128xi1>, vector<24x128xf32>
    %20 = arith.sitofp %15 : vector<24x128xi32> to vector<24x128xf32>
    %cst_9 = arith.constant dense<0x7F800000> : vector<24xf32>
    %21 = vector.multi_reduction <minimumf>, %19, %cst_9 [1] : vector<24x128xf32> to vector<24xf32>
    %22 = vector.shape_cast %21 : vector<24xf32> to vector<24x1xf32>
    %23 = vector.broadcast %22 : vector<24x1xf32> to vector<24x128xf32>
    %24 = arith.cmpf ole, %19, %23 : vector<24x128xf32>
    %cst_10 = arith.constant 1.280000e+02 : f32
    %25 = vector.broadcast %cst_10 : f32 to vector<24x128xf32>
    %26 = arith.select %24, %20, %25 : vector<24x128xi1>, vector<24x128xf32>
    %cst_11 = arith.constant dense<0x7F800000> : vector<24xf32>
    %27 = vector.multi_reduction <minimumf>, %26, %cst_11 [1] : vector<24x128xf32> to vector<24xf32>
    %28 = vector.shape_cast %27 : vector<24xf32> to vector<24x1xf32>
    %29 = vector.broadcast %28 : vector<24x1xf32> to vector<24x128xf32>
    %30 = arith.cmpf oeq, %20, %29 : vector<24x128xf32>
    %31 = arith.extui %30 : vector<24x128xi1> to vector<24x128xi32>
    %32 = arith.sitofp %31 : vector<24x128xi32> to vector<24x128xf32>
    %33 = arith.truncf %32 : vector<24x128xf32> to vector<24x128xbf16>
    %c0_12 = arith.constant 0 : index
    %c0_13 = arith.constant 0 : index
    %34 = vector.load %arg2[%c0_12, %c0_13] : memref<128x128xbf16, #tpu.memory_space<vmem>>, vector<128x128xbf16>
    %cst_14 = arith.constant dense<0.000000e+00> : vector<24x128xf32>
    %35 = tpu.matmul %33, %34, %cst_14 {dimension_numbers = #tpu.dot_dimension_numbers<[1], [0], [0], [1], [0, 0, 1, 1], [], []>} : vector<24x128xbf16>, vector<128x128xbf16>, vector<24x128xf32> -> vector<24x128xf32>
    %c0_15 = arith.constant 0 : index
    %c0_16 = arith.constant 0 : index
    %36 = vector.load %arg4[%c0_15, %c0_16] : memref<24x1xf32, #tpu.memory_space<vmem>>, vector<24x1xf32>
    %37 = vector.broadcast %36 : vector<24x1xf32> to vector<24x128xf32>
    %38 = arith.mulf %35, %37 : vector<24x128xf32>
    %39 = vector.broadcast %36 : vector<24x1xf32> to vector<24x128xf32>
    %40 = arith.mulf %32, %39 : vector<24x128xf32>
    %41 = arith.subf %38, %2 : vector<24x128xf32>
    %42 = arith.subf %38, %2 : vector<24x128xf32>
    %43 = arith.mulf %41, %42 : vector<24x128xf32>
    %cst_17 = arith.constant dense<0.000000e+00> : vector<24xf32>
    %44 = vector.multi_reduction <add>, %43, %cst_17 [1] : vector<24x128xf32> to vector<24xf32>
    %45 = vector.shape_cast %44 : vector<24xf32> to vector<24x1xf32>
    %46 = arith.mulf %45, %36 : vector<24x1xf32>
    %cst_18 = arith.constant dense<0.000000e+00> : vector<1xf32>
    %47 = vector.multi_reduction <add>, %46, %cst_18 [0] : vector<24x1xf32> to vector<1xf32>
    %48 = vector.shape_cast %47 : vector<1xf32> to vector<1x1xf32>
    %49 = vector.shape_cast %48 : vector<1x1xf32> to vector<1x1xf32>
    %50 = vector.broadcast %49 : vector<1x1xf32> to vector<1x128xf32>
    %c0_19 = arith.constant 0 : index
    %c0_20 = arith.constant 0 : index
    %c0_21 = arith.constant 0 : index
    %51 = vector.load %arg7[%c0_19, %c0_20, %c0_21] : memref<1x1x128xf32, #tpu.memory_space<vmem>>, vector<1x1x128xf32>
    %52 = vector.shape_cast %51 : vector<1x1x128xf32> to vector<1x128xf32>
    %53 = vector.shape_cast %50 : vector<1x128xf32> to vector<1x1x128xf32>
    tpu.vector_store %arg7[%c0_19, %c0_20, %c0_21], %53 {strides = array<i32>} : memref<1x1x128xf32, #tpu.memory_space<vmem>>, vector<1x1x128xf32>,
    %cst_22 = arith.constant dense<0.000000e+00> : vector<128xf32>
    %54 = vector.multi_reduction <add>, %40, %cst_22 [0] : vector<24x128xf32> to vector<128xf32>
    %55 = vector.shape_cast %54 : vector<128xf32> to vector<1x128xf32>
    %c0_23 = arith.constant 0 : index
    %c0_24 = arith.constant 0 : index
    %c0_25 = arith.constant 0 : index
    %56 = vector.load %arg8[%c0_23, %c0_24, %c0_25] : memref<1x1x128xf32, #tpu.memory_space<vmem>>, vector<1x1x128xf32>
    %57 = vector.shape_cast %56 : vector<1x1x128xf32> to vector<1x128xf32>
    %58 = vector.shape_cast %55 : vector<1x128xf32> to vector<1x1x128xf32>
    tpu.vector_store %arg8[%c0_23, %c0_24, %c0_25], %58 {strides = array<i32>} : memref<1x1x128xf32, #tpu.memory_space<vmem>>, vector<1x1x128xf32>,
    %59 = arith.truncf %38 : vector<24x128xf32> to vector<24x128xbf16>
    %c0_26 = arith.constant 0 : index
    %c0_27 = arith.constant 0 : index
    %c0_28 = arith.constant 0 : index
    %60 = vector.load %arg5[%c0_26, %c0_27, %c0_28] : memref<1x24x128xbf16, #tpu.memory_space<vmem>>, vector<1x24x128xbf16>
    %61 = vector.shape_cast %60 : vector<1x24x128xbf16> to vector<24x128xbf16>
    %62 = vector.shape_cast %59 : vector<24x128xbf16> to vector<1x24x128xbf16>
    tpu.vector_store %arg5[%c0_26, %c0_27, %c0_28], %62 {strides = array<i32>} : memref<1x24x128xbf16, #tpu.memory_space<vmem>>, vector<1x24x128xbf16>,
    %63 = arith.truncf %40 : vector<24x128xf32> to vector<24x128xbf16>
    %c0_29 = arith.constant 0 : index
    %c0_30 = arith.constant 0 : index
    %c0_31 = arith.constant 0 : index
    %64 = vector.load %arg6[%c0_29, %c0_30, %c0_31] : memref<1x24x128xbf16, #tpu.memory_space<vmem>>, vector<1x24x128xbf16>
    %65 = vector.shape_cast %64 : vector<1x24x128xbf16> to vector<24x128xbf16>
    %66 = vector.shape_cast %63 : vector<24x128xbf16> to vector<1x24x128xbf16>
    tpu.vector_store %arg6[%c0_29, %c0_30, %c0_31], %66 {strides = array<i32>} : memref<1x24x128xbf16, #tpu.memory_space<vmem>>, vector<1x24x128xbf16>,
    return
  }
  func.func @transform_0(%arg0: i32) -> (i32, i32, i32) {
    %c0_i32 = arith.constant 0 : i32
    %c0_i32_0 = arith.constant 0 : i32
    %c0_i32_1 = arith.constant 0 : i32
    return %arg0, %c0_i32, %c0_i32_0 : i32, i32, i32
  }
  func.func @transform_1(%arg0: i32) -> (i32, i32) {
    %c0_i32 = arith.constant 0 : i32
    %c0_i32_0 = arith.constant 0 : i32
    %c0_i32_1 = arith.constant 0 : i32
    return %c0_i32, %c0_i32_0 : i32, i32
  }
  func.func @transform_2(%arg0: i32) -> (i32, i32) {
    %c0_i32 = arith.constant 0 : i32
    %c0_i32_0 = arith.constant 0 : i32
    %c0_i32_1 = arith.constant 0 : i32
    return %c0_i32, %c0_i32_0 : i32, i32
  }
  func.func @transform_3(%arg0: i32) -> (i32, i32) {
    %c0_i32 = arith.constant 0 : i32
    %c0_i32_0 = arith.constant 0 : i32
    %c0_i32_1 = arith.constant 0 : i32
    return %c0_i32, %c0_i32_0 : i32, i32
  }
  func.func @transform_4(%arg0: i32) -> (i32, i32, i32) {
    %c0_i32 = arith.constant 0 : i32
    %c0_i32_0 = arith.constant 0 : i32
    %c0_i32_1 = arith.constant 0 : i32
    return %arg0, %c0_i32, %c0_i32_0 : i32, i32, i32
  }
  func.func @transform_5(%arg0: i32) -> (i32, i32, i32) {
    %c0_i32 = arith.constant 0 : i32
    %c0_i32_0 = arith.constant 0 : i32
    %c0_i32_1 = arith.constant 0 : i32
    return %arg0, %c0_i32, %c0_i32_0 : i32, i32, i32
  }
  func.func @transform_6(%arg0: i32) -> (i32, i32, i32) {
    %c0_i32 = arith.constant 0 : i32
    %c0_i32_0 = arith.constant 0 : i32
    %c0_i32_1 = arith.constant 0 : i32
    return %arg0, %c0_i32, %c0_i32_0 : i32, i32, i32
  }
  func.func @transform_7(%arg0: i32) -> (i32, i32, i32) {
    %c0_i32 = arith.constant 0 : i32
    %c0_i32_0 = arith.constant 0 : i32
    %c0_i32_1 = arith.constant 0 : i32
    return %arg0, %c0_i32, %c0_i32_0 : i32, i32, i32
  }
}

module attributes {stable_mosaic.version = 11 : i64} {
  func.func @_conv_taps_kernel(%arg0: i32, %arg1: i32, %arg2: memref<1x24x128xbf16, #tpu.memory_space<vmem>>, %arg3: memref<128x128xbf16, #tpu.memory_space<vmem>>, %arg4: memref<1x128xf32, #tpu.memory_space<vmem>>, %arg5: memref<24x1xf32, #tpu.memory_space<vmem>>, %arg6: memref<1x24x128xbf16, #tpu.memory_space<vmem>>) attributes {dimension_semantics = [#tpu.dimension_semantics<parallel>, #tpu.dimension_semantics<parallel>], iteration_bounds = array<i64: 1, 2>, scalar_prefetch = 0 : i64, scratch_operands = 0 : i64, tpu.core_type = #tpu.core_type<tc>, window_params = [{transform_indices = @transform_0, window_bounds = array<i64: 1, 24, 128>}, {transform_indices = @transform_1, window_bounds = array<i64: 128, 128>}, {transform_indices = @transform_2, window_bounds = array<i64: 1, 128>}, {pipeline_mode = #tpu.pipeline_mode<synchronous>, transform_indices = @transform_3, window_bounds = array<i64: 24, 1>}, {transform_indices = @transform_4, window_bounds = array<i64: 1, 24, 128>}]} {
    %cst = arith.constant 0.000000e+00 : f32
    %0 = vector.broadcast %cst : f32 to vector<24x128xf32>
    %c0 = arith.constant 0 : index
    %c0_0 = arith.constant 0 : index
    %c0_1 = arith.constant 0 : index
    %1 = vector.load %arg2[%c0, %c0_0, %c0_1] : memref<1x24x128xbf16, #tpu.memory_space<vmem>>, vector<1x24x128xbf16>
    %2 = vector.shape_cast %1 : vector<1x24x128xbf16> to vector<24x128xbf16>
    %c0_2 = arith.constant 0 : index
    %c0_3 = arith.constant 0 : index
    %3 = vector.load %arg3[%c0_2, %c0_3] : memref<128x128xbf16, #tpu.memory_space<vmem>>, vector<128x128xbf16>
    %cst_4 = arith.constant dense<0.000000e+00> : vector<24x128xf32>
    %4 = tpu.matmul %2, %3, %cst_4 {dimension_numbers = #tpu.dot_dimension_numbers<[1], [0], [0], [1], [0, 0, 1, 1], [], []>} : vector<24x128xbf16>, vector<128x128xbf16>, vector<24x128xf32> -> vector<24x128xf32>
    %5 = arith.addf %0, %4 : vector<24x128xf32>
    %c0_5 = arith.constant 0 : index
    %c0_6 = arith.constant 0 : index
    %6 = vector.load %arg4[%c0_5, %c0_6] : memref<1x128xf32, #tpu.memory_space<vmem>>, vector<1x128xf32>
    %7 = vector.broadcast %6 : vector<1x128xf32> to vector<24x128xf32>
    %8 = arith.addf %5, %7 : vector<24x128xf32>
    %c0_7 = arith.constant 0 : index
    %c0_8 = arith.constant 0 : index
    %9 = vector.load %arg5[%c0_7, %c0_8] : memref<24x1xf32, #tpu.memory_space<vmem>>, vector<24x1xf32>
    %10 = vector.broadcast %9 : vector<24x1xf32> to vector<24x128xf32>
    %11 = arith.mulf %8, %10 : vector<24x128xf32>
    %12 = arith.truncf %11 : vector<24x128xf32> to vector<24x128xbf16>
    %c0_9 = arith.constant 0 : index
    %c0_10 = arith.constant 0 : index
    %c0_11 = arith.constant 0 : index
    %13 = vector.load %arg6[%c0_9, %c0_10, %c0_11] : memref<1x24x128xbf16, #tpu.memory_space<vmem>>, vector<1x24x128xbf16>
    %14 = vector.shape_cast %13 : vector<1x24x128xbf16> to vector<24x128xbf16>
    %15 = vector.shape_cast %12 : vector<24x128xbf16> to vector<1x24x128xbf16>
    tpu.vector_store %arg6[%c0_9, %c0_10, %c0_11], %15 {strides = array<i32>} : memref<1x24x128xbf16, #tpu.memory_space<vmem>>, vector<1x24x128xbf16>,
    return
  }
  func.func @transform_0(%arg0: i32, %arg1: i32) -> (i32, i32, i32) {
    %c0_i32 = arith.constant 0 : i32
    %c0_i32_0 = arith.constant 0 : i32
    %c0_i32_1 = arith.constant 0 : i32
    return %arg1, %c0_i32, %c0_i32_0 : i32, i32, i32
  }
  func.func @transform_1(%arg0: i32, %arg1: i32) -> (i32, i32) {
    %c0_i32 = arith.constant 0 : i32
    %c0_i32_0 = arith.constant 0 : i32
    return %c0_i32, %arg0 : i32, i32
  }
  func.func @transform_2(%arg0: i32, %arg1: i32) -> (i32, i32) {
    %c0_i32 = arith.constant 0 : i32
    %c0_i32_0 = arith.constant 0 : i32
    return %c0_i32, %arg0 : i32, i32
  }
  func.func @transform_3(%arg0: i32, %arg1: i32) -> (i32, i32) {
    %c0_i32 = arith.constant 0 : i32
    %c0_i32_0 = arith.constant 0 : i32
    %c0_i32_1 = arith.constant 0 : i32
    return %c0_i32, %c0_i32_0 : i32, i32
  }
  func.func @transform_4(%arg0: i32, %arg1: i32) -> (i32, i32, i32) {
    %c0_i32 = arith.constant 0 : i32
    %c0_i32_0 = arith.constant 0 : i32
    return %arg1, %c0_i32, %arg0 : i32, i32, i32
  }
}

module attributes {stable_mosaic.version = 11 : i64} {
  func.func @_conv_taps_kernel(%arg0: i32, %arg1: i32, %arg2: memref<1x38x128xbf16, #tpu.memory_space<vmem>>, %arg3: memref<1152x128xbf16, #tpu.memory_space<vmem>>, %arg4: memref<1x128xf32, #tpu.memory_space<vmem>>, %arg5: memref<24x1xf32, #tpu.memory_space<vmem>>, %arg6: memref<1x24x128xbf16, #tpu.memory_space<vmem>>) attributes {dimension_semantics = [#tpu.dimension_semantics<parallel>, #tpu.dimension_semantics<parallel>], iteration_bounds = array<i64: 1, 2>, scalar_prefetch = 0 : i64, scratch_operands = 0 : i64, tpu.core_type = #tpu.core_type<tc>, window_params = [{transform_indices = @transform_0, window_bounds = array<i64: 1, 38, 128>}, {transform_indices = @transform_1, window_bounds = array<i64: 1152, 128>}, {transform_indices = @transform_2, window_bounds = array<i64: 1, 128>}, {pipeline_mode = #tpu.pipeline_mode<synchronous>, transform_indices = @transform_3, window_bounds = array<i64: 24, 1>}, {transform_indices = @transform_4, window_bounds = array<i64: 1, 24, 128>}]} {
    %cst = arith.constant 0.000000e+00 : f32
    %0 = vector.broadcast %cst : f32 to vector<24x128xf32>
    %c0 = arith.constant 0 : index
    %c0_0 = arith.constant 0 : index
    %c0_1 = arith.constant 0 : index
    %1 = vector.load %arg2[%c0, %c0_0, %c0_1] : memref<1x38x128xbf16, #tpu.memory_space<vmem>>, vector<1x24x128xbf16>
    %2 = vector.shape_cast %1 : vector<1x24x128xbf16> to vector<24x128xbf16>
    %c0_2 = arith.constant 0 : index
    %c0_3 = arith.constant 0 : index
    %3 = vector.load %arg3[%c0_2, %c0_3] : memref<1152x128xbf16, #tpu.memory_space<vmem>>, vector<128x128xbf16>
    %cst_4 = arith.constant dense<0.000000e+00> : vector<24x128xf32>
    %4 = tpu.matmul %2, %3, %cst_4 {dimension_numbers = #tpu.dot_dimension_numbers<[1], [0], [0], [1], [0, 0, 1, 1], [], []>} : vector<24x128xbf16>, vector<128x128xbf16>, vector<24x128xf32> -> vector<24x128xf32>
    %5 = arith.addf %0, %4 : vector<24x128xf32>
    %c0_5 = arith.constant 0 : index
    %c1 = arith.constant 1 : index
    %c0_6 = arith.constant 0 : index
    %6 = vector.load %arg2[%c0_5, %c1, %c0_6] : memref<1x38x128xbf16, #tpu.memory_space<vmem>>, vector<1x24x128xbf16>
    %7 = vector.shape_cast %6 : vector<1x24x128xbf16> to vector<24x128xbf16>
    %c128 = arith.constant 128 : index
    %c0_7 = arith.constant 0 : index
    %8 = vector.load %arg3[%c128, %c0_7] : memref<1152x128xbf16, #tpu.memory_space<vmem>>, vector<128x128xbf16>
    %cst_8 = arith.constant dense<0.000000e+00> : vector<24x128xf32>
    %9 = tpu.matmul %7, %8, %cst_8 {dimension_numbers = #tpu.dot_dimension_numbers<[1], [0], [0], [1], [0, 0, 1, 1], [], []>} : vector<24x128xbf16>, vector<128x128xbf16>, vector<24x128xf32> -> vector<24x128xf32>
    %10 = arith.addf %5, %9 : vector<24x128xf32>
    %c0_9 = arith.constant 0 : index
    %c2 = arith.constant 2 : index
    %c0_10 = arith.constant 0 : index
    %11 = vector.load %arg2[%c0_9, %c2, %c0_10] : memref<1x38x128xbf16, #tpu.memory_space<vmem>>, vector<1x24x128xbf16>
    %12 = vector.shape_cast %11 : vector<1x24x128xbf16> to vector<24x128xbf16>
    %c256 = arith.constant 256 : index
    %c0_11 = arith.constant 0 : index
    %13 = vector.load %arg3[%c256, %c0_11] : memref<1152x128xbf16, #tpu.memory_space<vmem>>, vector<128x128xbf16>
    %cst_12 = arith.constant dense<0.000000e+00> : vector<24x128xf32>
    %14 = tpu.matmul %12, %13, %cst_12 {dimension_numbers = #tpu.dot_dimension_numbers<[1], [0], [0], [1], [0, 0, 1, 1], [], []>} : vector<24x128xbf16>, vector<128x128xbf16>, vector<24x128xf32> -> vector<24x128xf32>
    %15 = arith.addf %10, %14 : vector<24x128xf32>
    %c0_13 = arith.constant 0 : index
    %c6 = arith.constant 6 : index
    %c0_14 = arith.constant 0 : index
    %16 = vector.load %arg2[%c0_13, %c6, %c0_14] : memref<1x38x128xbf16, #tpu.memory_space<vmem>>, vector<1x24x128xbf16>
    %17 = vector.shape_cast %16 : vector<1x24x128xbf16> to vector<24x128xbf16>
    %c384 = arith.constant 384 : index
    %c0_15 = arith.constant 0 : index
    %18 = vector.load %arg3[%c384, %c0_15] : memref<1152x128xbf16, #tpu.memory_space<vmem>>, vector<128x128xbf16>
    %cst_16 = arith.constant dense<0.000000e+00> : vector<24x128xf32>
    %19 = tpu.matmul %17, %18, %cst_16 {dimension_numbers = #tpu.dot_dimension_numbers<[1], [0], [0], [1], [0, 0, 1, 1], [], []>} : vector<24x128xbf16>, vector<128x128xbf16>, vector<24x128xf32> -> vector<24x128xf32>
    %20 = arith.addf %15, %19 : vector<24x128xf32>
    %c0_17 = arith.constant 0 : index
    %c7 = arith.constant 7 : index
    %c0_18 = arith.constant 0 : index
    %21 = vector.load %arg2[%c0_17, %c7, %c0_18] : memref<1x38x128xbf16, #tpu.memory_space<vmem>>, vector<1x24x128xbf16>
    %22 = vector.shape_cast %21 : vector<1x24x128xbf16> to vector<24x128xbf16>
    %c512 = arith.constant 512 : index
    %c0_19 = arith.constant 0 : index
    %23 = vector.load %arg3[%c512, %c0_19] : memref<1152x128xbf16, #tpu.memory_space<vmem>>, vector<128x128xbf16>
    %cst_20 = arith.constant dense<0.000000e+00> : vector<24x128xf32>
    %24 = tpu.matmul %22, %23, %cst_20 {dimension_numbers = #tpu.dot_dimension_numbers<[1], [0], [0], [1], [0, 0, 1, 1], [], []>} : vector<24x128xbf16>, vector<128x128xbf16>, vector<24x128xf32> -> vector<24x128xf32>
    %25 = arith.addf %20, %24 : vector<24x128xf32>
    %c0_21 = arith.constant 0 : index
    %c8 = arith.constant 8 : index
    %c0_22 = arith.constant 0 : index
    %26 = vector.load %arg2[%c0_21, %c8, %c0_22] : memref<1x38x128xbf16, #tpu.memory_space<vmem>>, vector<1x24x128xbf16>
    %27 = vector.shape_cast %26 : vector<1x24x128xbf16> to vector<24x128xbf16>
    %c640 = arith.constant 640 : index
    %c0_23 = arith.constant 0 : index
    %28 = vector.load %arg3[%c640, %c0_23] : memref<1152x128xbf16, #tpu.memory_space<vmem>>, vector<128x128xbf16>
    %cst_24 = arith.constant dense<0.000000e+00> : vector<24x128xf32>
    %29 = tpu.matmul %27, %28, %cst_24 {dimension_numbers = #tpu.dot_dimension_numbers<[1], [0], [0], [1], [0, 0, 1, 1], [], []>} : vector<24x128xbf16>, vector<128x128xbf16>, vector<24x128xf32> -> vector<24x128xf32>
    %30 = arith.addf %25, %29 : vector<24x128xf32>
    %c0_25 = arith.constant 0 : index
    %c12 = arith.constant 12 : index
    %c0_26 = arith.constant 0 : index
    %31 = vector.load %arg2[%c0_25, %c12, %c0_26] : memref<1x38x128xbf16, #tpu.memory_space<vmem>>, vector<1x24x128xbf16>
    %32 = vector.shape_cast %31 : vector<1x24x128xbf16> to vector<24x128xbf16>
    %c768 = arith.constant 768 : index
    %c0_27 = arith.constant 0 : index
    %33 = vector.load %arg3[%c768, %c0_27] : memref<1152x128xbf16, #tpu.memory_space<vmem>>, vector<128x128xbf16>
    %cst_28 = arith.constant dense<0.000000e+00> : vector<24x128xf32>
    %34 = tpu.matmul %32, %33, %cst_28 {dimension_numbers = #tpu.dot_dimension_numbers<[1], [0], [0], [1], [0, 0, 1, 1], [], []>} : vector<24x128xbf16>, vector<128x128xbf16>, vector<24x128xf32> -> vector<24x128xf32>
    %35 = arith.addf %30, %34 : vector<24x128xf32>
    %c0_29 = arith.constant 0 : index
    %c13 = arith.constant 13 : index
    %c0_30 = arith.constant 0 : index
    %36 = vector.load %arg2[%c0_29, %c13, %c0_30] : memref<1x38x128xbf16, #tpu.memory_space<vmem>>, vector<1x24x128xbf16>
    %37 = vector.shape_cast %36 : vector<1x24x128xbf16> to vector<24x128xbf16>
    %c896 = arith.constant 896 : index
    %c0_31 = arith.constant 0 : index
    %38 = vector.load %arg3[%c896, %c0_31] : memref<1152x128xbf16, #tpu.memory_space<vmem>>, vector<128x128xbf16>
    %cst_32 = arith.constant dense<0.000000e+00> : vector<24x128xf32>
    %39 = tpu.matmul %37, %38, %cst_32 {dimension_numbers = #tpu.dot_dimension_numbers<[1], [0], [0], [1], [0, 0, 1, 1], [], []>} : vector<24x128xbf16>, vector<128x128xbf16>, vector<24x128xf32> -> vector<24x128xf32>
    %40 = arith.addf %35, %39 : vector<24x128xf32>
    %c0_33 = arith.constant 0 : index
    %c14 = arith.constant 14 : index
    %c0_34 = arith.constant 0 : index
    %41 = vector.load %arg2[%c0_33, %c14, %c0_34] : memref<1x38x128xbf16, #tpu.memory_space<vmem>>, vector<1x24x128xbf16>
    %42 = vector.shape_cast %41 : vector<1x24x128xbf16> to vector<24x128xbf16>
    %c1024 = arith.constant 1024 : index
    %c0_35 = arith.constant 0 : index
    %43 = vector.load %arg3[%c1024, %c0_35] : memref<1152x128xbf16, #tpu.memory_space<vmem>>, vector<128x128xbf16>
    %cst_36 = arith.constant dense<0.000000e+00> : vector<24x128xf32>
    %44 = tpu.matmul %42, %43, %cst_36 {dimension_numbers = #tpu.dot_dimension_numbers<[1], [0], [0], [1], [0, 0, 1, 1], [], []>} : vector<24x128xbf16>, vector<128x128xbf16>, vector<24x128xf32> -> vector<24x128xf32>
    %45 = arith.addf %40, %44 : vector<24x128xf32>
    %c0_37 = arith.constant 0 : index
    %c0_38 = arith.constant 0 : index
    %46 = vector.load %arg4[%c0_37, %c0_38] : memref<1x128xf32, #tpu.memory_space<vmem>>, vector<1x128xf32>
    %47 = vector.broadcast %46 : vector<1x128xf32> to vector<24x128xf32>
    %48 = arith.addf %45, %47 : vector<24x128xf32>
    %c0_39 = arith.constant 0 : index
    %c0_40 = arith.constant 0 : index
    %49 = vector.load %arg5[%c0_39, %c0_40] : memref<24x1xf32, #tpu.memory_space<vmem>>, vector<24x1xf32>
    %50 = vector.broadcast %49 : vector<24x1xf32> to vector<24x128xf32>
    %51 = arith.mulf %48, %50 : vector<24x128xf32>
    %52 = arith.truncf %51 : vector<24x128xf32> to vector<24x128xbf16>
    %c0_41 = arith.constant 0 : index
    %c0_42 = arith.constant 0 : index
    %c0_43 = arith.constant 0 : index
    %53 = vector.load %arg6[%c0_41, %c0_42, %c0_43] : memref<1x24x128xbf16, #tpu.memory_space<vmem>>, vector<1x24x128xbf16>
    %54 = vector.shape_cast %53 : vector<1x24x128xbf16> to vector<24x128xbf16>
    %55 = vector.shape_cast %52 : vector<24x128xbf16> to vector<1x24x128xbf16>
    tpu.vector_store %arg6[%c0_41, %c0_42, %c0_43], %55 {strides = array<i32>} : memref<1x24x128xbf16, #tpu.memory_space<vmem>>, vector<1x24x128xbf16>,
    return
  }
  func.func @transform_0(%arg0: i32, %arg1: i32) -> (i32, i32, i32) {
    %c0_i32 = arith.constant 0 : i32
    %c0_i32_0 = arith.constant 0 : i32
    %c0_i32_1 = arith.constant 0 : i32
    return %arg1, %c0_i32, %c0_i32_0 : i32, i32, i32
  }
  func.func @transform_1(%arg0: i32, %arg1: i32) -> (i32, i32) {
    %c0_i32 = arith.constant 0 : i32
    %c0_i32_0 = arith.constant 0 : i32
    return %c0_i32, %arg0 : i32, i32
  }
  func.func @transform_2(%arg0: i32, %arg1: i32) -> (i32, i32) {
    %c0_i32 = arith.constant 0 : i32
    %c0_i32_0 = arith.constant 0 : i32
    return %c0_i32, %arg0 : i32, i32
  }
  func.func @transform_3(%arg0: i32, %arg1: i32) -> (i32, i32) {
    %c0_i32 = arith.constant 0 : i32
    %c0_i32_0 = arith.constant 0 : i32
    %c0_i32_1 = arith.constant 0 : i32
    return %c0_i32, %c0_i32_0 : i32, i32
  }
  func.func @transform_4(%arg0: i32, %arg1: i32) -> (i32, i32, i32) {
    %c0_i32 = arith.constant 0 : i32
    %c0_i32_0 = arith.constant 0 : i32
    return %arg1, %c0_i32, %arg0 : i32, i32, i32
  }
}

module attributes {stable_mosaic.version = 11 : i64} {
  func.func @_resblock_kernel(%arg0: i32, %arg1: memref<1x38x128xbf16, #tpu.memory_space<vmem>>, %arg2: memref<1152x128xbf16, #tpu.memory_space<vmem>>, %arg3: memref<1x128xf32, #tpu.memory_space<vmem>>, %arg4: memref<128x128xbf16, #tpu.memory_space<vmem>>, %arg5: memref<1x128xf32, #tpu.memory_space<vmem>>, %arg6: memref<24x1xf32, #tpu.memory_space<vmem>>, %arg7: memref<1x24x128xbf16, #tpu.memory_space<vmem>>) attributes {dimension_semantics = [#tpu.dimension_semantics<parallel>], iteration_bounds = array<i64: 2>, scalar_prefetch = 0 : i64, scratch_operands = 0 : i64, tpu.core_type = #tpu.core_type<tc>, window_params = [{transform_indices = @transform_0, window_bounds = array<i64: 1, 38, 128>}, {pipeline_mode = #tpu.pipeline_mode<synchronous>, transform_indices = @transform_1, window_bounds = array<i64: 1152, 128>}, {pipeline_mode = #tpu.pipeline_mode<synchronous>, transform_indices = @transform_2, window_bounds = array<i64: 1, 128>}, {pipeline_mode = #tpu.pipeline_mode<synchronous>, transform_indices = @transform_3, window_bounds = array<i64: 128, 128>}, {pipeline_mode = #tpu.pipeline_mode<synchronous>, transform_indices = @transform_4, window_bounds = array<i64: 1, 128>}, {pipeline_mode = #tpu.pipeline_mode<synchronous>, transform_indices = @transform_5, window_bounds = array<i64: 24, 1>}, {transform_indices = @transform_6, window_bounds = array<i64: 1, 24, 128>}]} {
    %cst = arith.constant 0.000000e+00 : f32
    %0 = vector.broadcast %cst : f32 to vector<24x128xf32>
    %c0 = arith.constant 0 : index
    %c0_0 = arith.constant 0 : index
    %c0_1 = arith.constant 0 : index
    %1 = vector.load %arg1[%c0, %c0_0, %c0_1] : memref<1x38x128xbf16, #tpu.memory_space<vmem>>, vector<1x24x128xbf16>
    %2 = vector.shape_cast %1 : vector<1x24x128xbf16> to vector<24x128xbf16>
    %cst_2 = arith.constant 0.000000e+00 : bf16
    %3 = vector.broadcast %cst_2 : bf16 to vector<24x128xbf16>
    %4 = arith.maximumf %2, %3 : vector<24x128xbf16>
    %c0_3 = arith.constant 0 : index
    %c0_4 = arith.constant 0 : index
    %5 = vector.load %arg2[%c0_3, %c0_4] : memref<1152x128xbf16, #tpu.memory_space<vmem>>, vector<128x128xbf16>
    %cst_5 = arith.constant dense<0.000000e+00> : vector<24x128xf32>
    %6 = tpu.matmul %4, %5, %cst_5 {dimension_numbers = #tpu.dot_dimension_numbers<[1], [0], [0], [1], [0, 0, 1, 1], [], []>} : vector<24x128xbf16>, vector<128x128xbf16>, vector<24x128xf32> -> vector<24x128xf32>
    %7 = arith.addf %0, %6 : vector<24x128xf32>
    %c0_6 = arith.constant 0 : index
    %c1 = arith.constant 1 : index
    %c0_7 = arith.constant 0 : index
    %8 = vector.load %arg1[%c0_6, %c1, %c0_7] : memref<1x38x128xbf16, #tpu.memory_space<vmem>>, vector<1x24x128xbf16>
    %9 = vector.shape_cast %8 : vector<1x24x128xbf16> to vector<24x128xbf16>
    %cst_8 = arith.constant 0.000000e+00 : bf16
    %10 = vector.broadcast %cst_8 : bf16 to vector<24x128xbf16>
    %11 = arith.maximumf %9, %10 : vector<24x128xbf16>
    %c128 = arith.constant 128 : index
    %c0_9 = arith.constant 0 : index
    %12 = vector.load %arg2[%c128, %c0_9] : memref<1152x128xbf16, #tpu.memory_space<vmem>>, vector<128x128xbf16>
    %cst_10 = arith.constant dense<0.000000e+00> : vector<24x128xf32>
    %13 = tpu.matmul %11, %12, %cst_10 {dimension_numbers = #tpu.dot_dimension_numbers<[1], [0], [0], [1], [0, 0, 1, 1], [], []>} : vector<24x128xbf16>, vector<128x128xbf16>, vector<24x128xf32> -> vector<24x128xf32>
    %14 = arith.addf %7, %13 : vector<24x128xf32>
    %c0_11 = arith.constant 0 : index
    %c2 = arith.constant 2 : index
    %c0_12 = arith.constant 0 : index
    %15 = vector.load %arg1[%c0_11, %c2, %c0_12] : memref<1x38x128xbf16, #tpu.memory_space<vmem>>, vector<1x24x128xbf16>
    %16 = vector.shape_cast %15 : vector<1x24x128xbf16> to vector<24x128xbf16>
    %cst_13 = arith.constant 0.000000e+00 : bf16
    %17 = vector.broadcast %cst_13 : bf16 to vector<24x128xbf16>
    %18 = arith.maximumf %16, %17 : vector<24x128xbf16>
    %c256 = arith.constant 256 : index
    %c0_14 = arith.constant 0 : index
    %19 = vector.load %arg2[%c256, %c0_14] : memref<1152x128xbf16, #tpu.memory_space<vmem>>, vector<128x128xbf16>
    %cst_15 = arith.constant dense<0.000000e+00> : vector<24x128xf32>
    %20 = tpu.matmul %18, %19, %cst_15 {dimension_numbers = #tpu.dot_dimension_numbers<[1], [0], [0], [1], [0, 0, 1, 1], [], []>} : vector<24x128xbf16>, vector<128x128xbf16>, vector<24x128xf32> -> vector<24x128xf32>
    %21 = arith.addf %14, %20 : vector<24x128xf32>
    %c0_16 = arith.constant 0 : index
    %c6 = arith.constant 6 : index
    %c0_17 = arith.constant 0 : index
    %22 = vector.load %arg1[%c0_16, %c6, %c0_17] : memref<1x38x128xbf16, #tpu.memory_space<vmem>>, vector<1x24x128xbf16>
    %23 = vector.shape_cast %22 : vector<1x24x128xbf16> to vector<24x128xbf16>
    %cst_18 = arith.constant 0.000000e+00 : bf16
    %24 = vector.broadcast %cst_18 : bf16 to vector<24x128xbf16>
    %25 = arith.maximumf %23, %24 : vector<24x128xbf16>
    %c384 = arith.constant 384 : index
    %c0_19 = arith.constant 0 : index
    %26 = vector.load %arg2[%c384, %c0_19] : memref<1152x128xbf16, #tpu.memory_space<vmem>>, vector<128x128xbf16>
    %cst_20 = arith.constant dense<0.000000e+00> : vector<24x128xf32>
    %27 = tpu.matmul %25, %26, %cst_20 {dimension_numbers = #tpu.dot_dimension_numbers<[1], [0], [0], [1], [0, 0, 1, 1], [], []>} : vector<24x128xbf16>, vector<128x128xbf16>, vector<24x128xf32> -> vector<24x128xf32>
    %28 = arith.addf %21, %27 : vector<24x128xf32>
    %c0_21 = arith.constant 0 : index
    %c7 = arith.constant 7 : index
    %c0_22 = arith.constant 0 : index
    %29 = vector.load %arg1[%c0_21, %c7, %c0_22] : memref<1x38x128xbf16, #tpu.memory_space<vmem>>, vector<1x24x128xbf16>
    %30 = vector.shape_cast %29 : vector<1x24x128xbf16> to vector<24x128xbf16>
    %cst_23 = arith.constant 0.000000e+00 : bf16
    %31 = vector.broadcast %cst_23 : bf16 to vector<24x128xbf16>
    %32 = arith.maximumf %30, %31 : vector<24x128xbf16>
    %c512 = arith.constant 512 : index
    %c0_24 = arith.constant 0 : index
    %33 = vector.load %arg2[%c512, %c0_24] : memref<1152x128xbf16, #tpu.memory_space<vmem>>, vector<128x128xbf16>
    %cst_25 = arith.constant dense<0.000000e+00> : vector<24x128xf32>
    %34 = tpu.matmul %32, %33, %cst_25 {dimension_numbers = #tpu.dot_dimension_numbers<[1], [0], [0], [1], [0, 0, 1, 1], [], []>} : vector<24x128xbf16>, vector<128x128xbf16>, vector<24x128xf32> -> vector<24x128xf32>
    %35 = arith.addf %28, %34 : vector<24x128xf32>
    %c0_26 = arith.constant 0 : index
    %c8 = arith.constant 8 : index
    %c0_27 = arith.constant 0 : index
    %36 = vector.load %arg1[%c0_26, %c8, %c0_27] : memref<1x38x128xbf16, #tpu.memory_space<vmem>>, vector<1x24x128xbf16>
    %37 = vector.shape_cast %36 : vector<1x24x128xbf16> to vector<24x128xbf16>
    %cst_28 = arith.constant 0.000000e+00 : bf16
    %38 = vector.broadcast %cst_28 : bf16 to vector<24x128xbf16>
    %39 = arith.maximumf %37, %38 : vector<24x128xbf16>
    %c640 = arith.constant 640 : index
    %c0_29 = arith.constant 0 : index
    %40 = vector.load %arg2[%c640, %c0_29] : memref<1152x128xbf16, #tpu.memory_space<vmem>>, vector<128x128xbf16>
    %cst_30 = arith.constant dense<0.000000e+00> : vector<24x128xf32>
    %41 = tpu.matmul %39, %40, %cst_30 {dimension_numbers = #tpu.dot_dimension_numbers<[1], [0], [0], [1], [0, 0, 1, 1], [], []>} : vector<24x128xbf16>, vector<128x128xbf16>, vector<24x128xf32> -> vector<24x128xf32>
    %42 = arith.addf %35, %41 : vector<24x128xf32>
    %c0_31 = arith.constant 0 : index
    %c12 = arith.constant 12 : index
    %c0_32 = arith.constant 0 : index
    %43 = vector.load %arg1[%c0_31, %c12, %c0_32] : memref<1x38x128xbf16, #tpu.memory_space<vmem>>, vector<1x24x128xbf16>
    %44 = vector.shape_cast %43 : vector<1x24x128xbf16> to vector<24x128xbf16>
    %cst_33 = arith.constant 0.000000e+00 : bf16
    %45 = vector.broadcast %cst_33 : bf16 to vector<24x128xbf16>
    %46 = arith.maximumf %44, %45 : vector<24x128xbf16>
    %c768 = arith.constant 768 : index
    %c0_34 = arith.constant 0 : index
    %47 = vector.load %arg2[%c768, %c0_34] : memref<1152x128xbf16, #tpu.memory_space<vmem>>, vector<128x128xbf16>
    %cst_35 = arith.constant dense<0.000000e+00> : vector<24x128xf32>
    %48 = tpu.matmul %46, %47, %cst_35 {dimension_numbers = #tpu.dot_dimension_numbers<[1], [0], [0], [1], [0, 0, 1, 1], [], []>} : vector<24x128xbf16>, vector<128x128xbf16>, vector<24x128xf32> -> vector<24x128xf32>
    %49 = arith.addf %42, %48 : vector<24x128xf32>
    %c0_36 = arith.constant 0 : index
    %c13 = arith.constant 13 : index
    %c0_37 = arith.constant 0 : index
    %50 = vector.load %arg1[%c0_36, %c13, %c0_37] : memref<1x38x128xbf16, #tpu.memory_space<vmem>>, vector<1x24x128xbf16>
    %51 = vector.shape_cast %50 : vector<1x24x128xbf16> to vector<24x128xbf16>
    %cst_38 = arith.constant 0.000000e+00 : bf16
    %52 = vector.broadcast %cst_38 : bf16 to vector<24x128xbf16>
    %53 = arith.maximumf %51, %52 : vector<24x128xbf16>
    %c896 = arith.constant 896 : index
    %c0_39 = arith.constant 0 : index
    %54 = vector.load %arg2[%c896, %c0_39] : memref<1152x128xbf16, #tpu.memory_space<vmem>>, vector<128x128xbf16>
    %cst_40 = arith.constant dense<0.000000e+00> : vector<24x128xf32>
    %55 = tpu.matmul %53, %54, %cst_40 {dimension_numbers = #tpu.dot_dimension_numbers<[1], [0], [0], [1], [0, 0, 1, 1], [], []>} : vector<24x128xbf16>, vector<128x128xbf16>, vector<24x128xf32> -> vector<24x128xf32>
    %56 = arith.addf %49, %55 : vector<24x128xf32>
    %c0_41 = arith.constant 0 : index
    %c14 = arith.constant 14 : index
    %c0_42 = arith.constant 0 : index
    %57 = vector.load %arg1[%c0_41, %c14, %c0_42] : memref<1x38x128xbf16, #tpu.memory_space<vmem>>, vector<1x24x128xbf16>
    %58 = vector.shape_cast %57 : vector<1x24x128xbf16> to vector<24x128xbf16>
    %cst_43 = arith.constant 0.000000e+00 : bf16
    %59 = vector.broadcast %cst_43 : bf16 to vector<24x128xbf16>
    %60 = arith.maximumf %58, %59 : vector<24x128xbf16>
    %c1024 = arith.constant 1024 : index
    %c0_44 = arith.constant 0 : index
    %61 = vector.load %arg2[%c1024, %c0_44] : memref<1152x128xbf16, #tpu.memory_space<vmem>>, vector<128x128xbf16>
    %cst_45 = arith.constant dense<0.000000e+00> : vector<24x128xf32>
    %62 = tpu.matmul %60, %61, %cst_45 {dimension_numbers = #tpu.dot_dimension_numbers<[1], [0], [0], [1], [0, 0, 1, 1], [], []>} : vector<24x128xbf16>, vector<128x128xbf16>, vector<24x128xf32> -> vector<24x128xf32>
    %63 = arith.addf %56, %62 : vector<24x128xf32>
    %c0_46 = arith.constant 0 : index
    %c0_47 = arith.constant 0 : index
    %64 = vector.load %arg3[%c0_46, %c0_47] : memref<1x128xf32, #tpu.memory_space<vmem>>, vector<1x128xf32>
    %65 = vector.broadcast %64 : vector<1x128xf32> to vector<24x128xf32>
    %66 = arith.addf %63, %65 : vector<24x128xf32>
    %cst_48 = arith.constant 0.000000e+00 : f32
    %67 = vector.broadcast %cst_48 : f32 to vector<24x128xf32>
    %68 = arith.maximumf %66, %67 : vector<24x128xf32>
    %69 = arith.truncf %68 : vector<24x128xf32> to vector<24x128xbf16>
    %c0_49 = arith.constant 0 : index
    %c0_50 = arith.constant 0 : index
    %70 = vector.load %arg4[%c0_49, %c0_50] : memref<128x128xbf16, #tpu.memory_space<vmem>>, vector<128x128xbf16>
    %cst_51 = arith.constant dense<0.000000e+00> : vector<24x128xf32>
    %71 = tpu.matmul %69, %70, %cst_51 {dimension_numbers = #tpu.dot_dimension_numbers<[1], [0], [0], [1], [0, 0, 1, 1], [], []>} : vector<24x128xbf16>, vector<128x128xbf16>, vector<24x128xf32> -> vector<24x128xf32>
    %c0_52 = arith.constant 0 : index
    %c0_53 = arith.constant 0 : index
    %72 = vector.load %arg5[%c0_52, %c0_53] : memref<1x128xf32, #tpu.memory_space<vmem>>, vector<1x128xf32>
    %73 = vector.broadcast %72 : vector<1x128xf32> to vector<24x128xf32>
    %74 = arith.addf %71, %73 : vector<24x128xf32>
    %c0_54 = arith.constant 0 : index
    %c7_55 = arith.constant 7 : index
    %c0_56 = arith.constant 0 : index
    %75 = vector.load %arg1[%c0_54, %c7_55, %c0_56] : memref<1x38x128xbf16, #tpu.memory_space<vmem>>, vector<1x24x128xbf16>
    %76 = vector.shape_cast %75 : vector<1x24x128xbf16> to vector<24x128xbf16>
    %77 = arith.extf %76 : vector<24x128xbf16> to vector<24x128xf32>
    %78 = arith.addf %74, %77 : vector<24x128xf32>
    %cst_57 = arith.constant 0.000000e+00 : f32
    %79 = vector.broadcast %cst_57 : f32 to vector<24x128xf32>
    %80 = arith.maximumf %78, %79 : vector<24x128xf32>
    %c0_58 = arith.constant 0 : index
    %c0_59 = arith.constant 0 : index
    %81 = vector.load %arg6[%c0_58, %c0_59] : memref<24x1xf32, #tpu.memory_space<vmem>>, vector<24x1xf32>
    %82 = vector.broadcast %81 : vector<24x1xf32> to vector<24x128xf32>
    %83 = arith.mulf %80, %82 : vector<24x128xf32>
    %84 = arith.truncf %83 : vector<24x128xf32> to vector<24x128xbf16>
    %c0_60 = arith.constant 0 : index
    %c0_61 = arith.constant 0 : index
    %c0_62 = arith.constant 0 : index
    %85 = vector.load %arg7[%c0_60, %c0_61, %c0_62] : memref<1x24x128xbf16, #tpu.memory_space<vmem>>, vector<1x24x128xbf16>
    %86 = vector.shape_cast %85 : vector<1x24x128xbf16> to vector<24x128xbf16>
    %87 = vector.shape_cast %84 : vector<24x128xbf16> to vector<1x24x128xbf16>
    tpu.vector_store %arg7[%c0_60, %c0_61, %c0_62], %87 {strides = array<i32>} : memref<1x24x128xbf16, #tpu.memory_space<vmem>>, vector<1x24x128xbf16>,
    return
  }
  func.func @transform_0(%arg0: i32) -> (i32, i32, i32) {
    %c0_i32 = arith.constant 0 : i32
    %c0_i32_0 = arith.constant 0 : i32
    %c0_i32_1 = arith.constant 0 : i32
    return %arg0, %c0_i32, %c0_i32_0 : i32, i32, i32
  }
  func.func @transform_1(%arg0: i32) -> (i32, i32) {
    %c0_i32 = arith.constant 0 : i32
    %c0_i32_0 = arith.constant 0 : i32
    %c0_i32_1 = arith.constant 0 : i32
    return %c0_i32, %c0_i32_0 : i32, i32
  }
  func.func @transform_2(%arg0: i32) -> (i32, i32) {
    %c0_i32 = arith.constant 0 : i32
    %c0_i32_0 = arith.constant 0 : i32
    %c0_i32_1 = arith.constant 0 : i32
    return %c0_i32, %c0_i32_0 : i32, i32
  }
  func.func @transform_3(%arg0: i32) -> (i32, i32) {
    %c0_i32 = arith.constant 0 : i32
    %c0_i32_0 = arith.constant 0 : i32
    %c0_i32_1 = arith.constant 0 : i32
    return %c0_i32, %c0_i32_0 : i32, i32
  }
  func.func @transform_4(%arg0: i32) -> (i32, i32) {
    %c0_i32 = arith.constant 0 : i32
    %c0_i32_0 = arith.constant 0 : i32
    %c0_i32_1 = arith.constant 0 : i32
    return %c0_i32, %c0_i32_0 : i32, i32
  }
  func.func @transform_5(%arg0: i32) -> (i32, i32) {
    %c0_i32 = arith.constant 0 : i32
    %c0_i32_0 = arith.constant 0 : i32
    %c0_i32_1 = arith.constant 0 : i32
    return %c0_i32, %c0_i32_0 : i32, i32
  }
  func.func @transform_6(%arg0: i32) -> (i32, i32, i32) {
    %c0_i32 = arith.constant 0 : i32
    %c0_i32_0 = arith.constant 0 : i32
    %c0_i32_1 = arith.constant 0 : i32
    return %arg0, %c0_i32, %c0_i32_0 : i32, i32, i32
  }
}

module attributes {stable_mosaic.version = 11 : i64} {
  func.func @_resblock_kernel(%arg0: i32, %arg1: memref<1x38x128xbf16, #tpu.memory_space<vmem>>, %arg2: memref<1152x128xbf16, #tpu.memory_space<vmem>>, %arg3: memref<1x128xf32, #tpu.memory_space<vmem>>, %arg4: memref<128x128xbf16, #tpu.memory_space<vmem>>, %arg5: memref<1x128xf32, #tpu.memory_space<vmem>>, %arg6: memref<24x1xf32, #tpu.memory_space<vmem>>, %arg7: memref<1x24x128xbf16, #tpu.memory_space<vmem>>) attributes {dimension_semantics = [#tpu.dimension_semantics<parallel>], iteration_bounds = array<i64: 2>, scalar_prefetch = 0 : i64, scratch_operands = 0 : i64, tpu.core_type = #tpu.core_type<tc>, window_params = [{transform_indices = @transform_0, window_bounds = array<i64: 1, 38, 128>}, {pipeline_mode = #tpu.pipeline_mode<synchronous>, transform_indices = @transform_1, window_bounds = array<i64: 1152, 128>}, {pipeline_mode = #tpu.pipeline_mode<synchronous>, transform_indices = @transform_2, window_bounds = array<i64: 1, 128>}, {pipeline_mode = #tpu.pipeline_mode<synchronous>, transform_indices = @transform_3, window_bounds = array<i64: 128, 128>}, {pipeline_mode = #tpu.pipeline_mode<synchronous>, transform_indices = @transform_4, window_bounds = array<i64: 1, 128>}, {pipeline_mode = #tpu.pipeline_mode<synchronous>, transform_indices = @transform_5, window_bounds = array<i64: 24, 1>}, {transform_indices = @transform_6, window_bounds = array<i64: 1, 24, 128>}]} {
    %cst = arith.constant 0.000000e+00 : f32
    %0 = vector.broadcast %cst : f32 to vector<24x128xf32>
    %c0 = arith.constant 0 : index
    %c0_0 = arith.constant 0 : index
    %c0_1 = arith.constant 0 : index
    %1 = vector.load %arg1[%c0, %c0_0, %c0_1] : memref<1x38x128xbf16, #tpu.memory_space<vmem>>, vector<1x24x128xbf16>
    %2 = vector.shape_cast %1 : vector<1x24x128xbf16> to vector<24x128xbf16>
    %cst_2 = arith.constant 0.000000e+00 : bf16
    %3 = vector.broadcast %cst_2 : bf16 to vector<24x128xbf16>
    %4 = arith.maximumf %2, %3 : vector<24x128xbf16>
    %c0_3 = arith.constant 0 : index
    %c0_4 = arith.constant 0 : index
    %5 = vector.load %arg2[%c0_3, %c0_4] : memref<1152x128xbf16, #tpu.memory_space<vmem>>, vector<128x128xbf16>
    %cst_5 = arith.constant dense<0.000000e+00> : vector<24x128xf32>
    %6 = tpu.matmul %4, %5, %cst_5 {dimension_numbers = #tpu.dot_dimension_numbers<[1], [0], [0], [1], [0, 0, 1, 1], [], []>} : vector<24x128xbf16>, vector<128x128xbf16>, vector<24x128xf32> -> vector<24x128xf32>
    %7 = arith.addf %0, %6 : vector<24x128xf32>
    %c0_6 = arith.constant 0 : index
    %c1 = arith.constant 1 : index
    %c0_7 = arith.constant 0 : index
    %8 = vector.load %arg1[%c0_6, %c1, %c0_7] : memref<1x38x128xbf16, #tpu.memory_space<vmem>>, vector<1x24x128xbf16>
    %9 = vector.shape_cast %8 : vector<1x24x128xbf16> to vector<24x128xbf16>
    %cst_8 = arith.constant 0.000000e+00 : bf16
    %10 = vector.broadcast %cst_8 : bf16 to vector<24x128xbf16>
    %11 = arith.maximumf %9, %10 : vector<24x128xbf16>
    %c128 = arith.constant 128 : index
    %c0_9 = arith.constant 0 : index
    %12 = vector.load %arg2[%c128, %c0_9] : memref<1152x128xbf16, #tpu.memory_space<vmem>>, vector<128x128xbf16>
    %cst_10 = arith.constant dense<0.000000e+00> : vector<24x128xf32>
    %13 = tpu.matmul %11, %12, %cst_10 {dimension_numbers = #tpu.dot_dimension_numbers<[1], [0], [0], [1], [0, 0, 1, 1], [], []>} : vector<24x128xbf16>, vector<128x128xbf16>, vector<24x128xf32> -> vector<24x128xf32>
    %14 = arith.addf %7, %13 : vector<24x128xf32>
    %c0_11 = arith.constant 0 : index
    %c2 = arith.constant 2 : index
    %c0_12 = arith.constant 0 : index
    %15 = vector.load %arg1[%c0_11, %c2, %c0_12] : memref<1x38x128xbf16, #tpu.memory_space<vmem>>, vector<1x24x128xbf16>
    %16 = vector.shape_cast %15 : vector<1x24x128xbf16> to vector<24x128xbf16>
    %cst_13 = arith.constant 0.000000e+00 : bf16
    %17 = vector.broadcast %cst_13 : bf16 to vector<24x128xbf16>
    %18 = arith.maximumf %16, %17 : vector<24x128xbf16>
    %c256 = arith.constant 256 : index
    %c0_14 = arith.constant 0 : index
    %19 = vector.load %arg2[%c256, %c0_14] : memref<1152x128xbf16, #tpu.memory_space<vmem>>, vector<128x128xbf16>
    %cst_15 = arith.constant dense<0.000000e+00> : vector<24x128xf32>
    %20 = tpu.matmul %18, %19, %cst_15 {dimension_numbers = #tpu.dot_dimension_numbers<[1], [0], [0], [1], [0, 0, 1, 1], [], []>} : vector<24x128xbf16>, vector<128x128xbf16>, vector<24x128xf32> -> vector<24x128xf32>
    %21 = arith.addf %14, %20 : vector<24x128xf32>
    %c0_16 = arith.constant 0 : index
    %c6 = arith.constant 6 : index
    %c0_17 = arith.constant 0 : index
    %22 = vector.load %arg1[%c0_16, %c6, %c0_17] : memref<1x38x128xbf16, #tpu.memory_space<vmem>>, vector<1x24x128xbf16>
    %23 = vector.shape_cast %22 : vector<1x24x128xbf16> to vector<24x128xbf16>
    %cst_18 = arith.constant 0.000000e+00 : bf16
    %24 = vector.broadcast %cst_18 : bf16 to vector<24x128xbf16>
    %25 = arith.maximumf %23, %24 : vector<24x128xbf16>
    %c384 = arith.constant 384 : index
    %c0_19 = arith.constant 0 : index
    %26 = vector.load %arg2[%c384, %c0_19] : memref<1152x128xbf16, #tpu.memory_space<vmem>>, vector<128x128xbf16>
    %cst_20 = arith.constant dense<0.000000e+00> : vector<24x128xf32>
    %27 = tpu.matmul %25, %26, %cst_20 {dimension_numbers = #tpu.dot_dimension_numbers<[1], [0], [0], [1], [0, 0, 1, 1], [], []>} : vector<24x128xbf16>, vector<128x128xbf16>, vector<24x128xf32> -> vector<24x128xf32>
    %28 = arith.addf %21, %27 : vector<24x128xf32>
    %c0_21 = arith.constant 0 : index
    %c7 = arith.constant 7 : index
    %c0_22 = arith.constant 0 : index
    %29 = vector.load %arg1[%c0_21, %c7, %c0_22] : memref<1x38x128xbf16, #tpu.memory_space<vmem>>, vector<1x24x128xbf16>
    %30 = vector.shape_cast %29 : vector<1x24x128xbf16> to vector<24x128xbf16>
    %cst_23 = arith.constant 0.000000e+00 : bf16
    %31 = vector.broadcast %cst_23 : bf16 to vector<24x128xbf16>
    %32 = arith.maximumf %30, %31 : vector<24x128xbf16>
    %c512 = arith.constant 512 : index
    %c0_24 = arith.constant 0 : index
    %33 = vector.load %arg2[%c512, %c0_24] : memref<1152x128xbf16, #tpu.memory_space<vmem>>, vector<128x128xbf16>
    %cst_25 = arith.constant dense<0.000000e+00> : vector<24x128xf32>
    %34 = tpu.matmul %32, %33, %cst_25 {dimension_numbers = #tpu.dot_dimension_numbers<[1], [0], [0], [1], [0, 0, 1, 1], [], []>} : vector<24x128xbf16>, vector<128x128xbf16>, vector<24x128xf32> -> vector<24x128xf32>
    %35 = arith.addf %28, %34 : vector<24x128xf32>
    %c0_26 = arith.constant 0 : index
    %c8 = arith.constant 8 : index
    %c0_27 = arith.constant 0 : index
    %36 = vector.load %arg1[%c0_26, %c8, %c0_27] : memref<1x38x128xbf16, #tpu.memory_space<vmem>>, vector<1x24x128xbf16>
    %37 = vector.shape_cast %36 : vector<1x24x128xbf16> to vector<24x128xbf16>
    %cst_28 = arith.constant 0.000000e+00 : bf16
    %38 = vector.broadcast %cst_28 : bf16 to vector<24x128xbf16>
    %39 = arith.maximumf %37, %38 : vector<24x128xbf16>
    %c640 = arith.constant 640 : index
    %c0_29 = arith.constant 0 : index
    %40 = vector.load %arg2[%c640, %c0_29] : memref<1152x128xbf16, #tpu.memory_space<vmem>>, vector<128x128xbf16>
    %cst_30 = arith.constant dense<0.000000e+00> : vector<24x128xf32>
    %41 = tpu.matmul %39, %40, %cst_30 {dimension_numbers = #tpu.dot_dimension_numbers<[1], [0], [0], [1], [0, 0, 1, 1], [], []>} : vector<24x128xbf16>, vector<128x128xbf16>, vector<24x128xf32> -> vector<24x128xf32>
    %42 = arith.addf %35, %41 : vector<24x128xf32>
    %c0_31 = arith.constant 0 : index
    %c12 = arith.constant 12 : index
    %c0_32 = arith.constant 0 : index
    %43 = vector.load %arg1[%c0_31, %c12, %c0_32] : memref<1x38x128xbf16, #tpu.memory_space<vmem>>, vector<1x24x128xbf16>
    %44 = vector.shape_cast %43 : vector<1x24x128xbf16> to vector<24x128xbf16>
    %cst_33 = arith.constant 0.000000e+00 : bf16
    %45 = vector.broadcast %cst_33 : bf16 to vector<24x128xbf16>
    %46 = arith.maximumf %44, %45 : vector<24x128xbf16>
    %c768 = arith.constant 768 : index
    %c0_34 = arith.constant 0 : index
    %47 = vector.load %arg2[%c768, %c0_34] : memref<1152x128xbf16, #tpu.memory_space<vmem>>, vector<128x128xbf16>
    %cst_35 = arith.constant dense<0.000000e+00> : vector<24x128xf32>
    %48 = tpu.matmul %46, %47, %cst_35 {dimension_numbers = #tpu.dot_dimension_numbers<[1], [0], [0], [1], [0, 0, 1, 1], [], []>} : vector<24x128xbf16>, vector<128x128xbf16>, vector<24x128xf32> -> vector<24x128xf32>
    %49 = arith.addf %42, %48 : vector<24x128xf32>
    %c0_36 = arith.constant 0 : index
    %c13 = arith.constant 13 : index
    %c0_37 = arith.constant 0 : index
    %50 = vector.load %arg1[%c0_36, %c13, %c0_37] : memref<1x38x128xbf16, #tpu.memory_space<vmem>>, vector<1x24x128xbf16>
    %51 = vector.shape_cast %50 : vector<1x24x128xbf16> to vector<24x128xbf16>
    %cst_38 = arith.constant 0.000000e+00 : bf16
    %52 = vector.broadcast %cst_38 : bf16 to vector<24x128xbf16>
    %53 = arith.maximumf %51, %52 : vector<24x128xbf16>
    %c896 = arith.constant 896 : index
    %c0_39 = arith.constant 0 : index
    %54 = vector.load %arg2[%c896, %c0_39] : memref<1152x128xbf16, #tpu.memory_space<vmem>>, vector<128x128xbf16>
    %cst_40 = arith.constant dense<0.000000e+00> : vector<24x128xf32>
    %55 = tpu.matmul %53, %54, %cst_40 {dimension_numbers = #tpu.dot_dimension_numbers<[1], [0], [0], [1], [0, 0, 1, 1], [], []>} : vector<24x128xbf16>, vector<128x128xbf16>, vector<24x128xf32> -> vector<24x128xf32>
    %56 = arith.addf %49, %55 : vector<24x128xf32>
    %c0_41 = arith.constant 0 : index
    %c14 = arith.constant 14 : index
    %c0_42 = arith.constant 0 : index
    %57 = vector.load %arg1[%c0_41, %c14, %c0_42] : memref<1x38x128xbf16, #tpu.memory_space<vmem>>, vector<1x24x128xbf16>
    %58 = vector.shape_cast %57 : vector<1x24x128xbf16> to vector<24x128xbf16>
    %cst_43 = arith.constant 0.000000e+00 : bf16
    %59 = vector.broadcast %cst_43 : bf16 to vector<24x128xbf16>
    %60 = arith.maximumf %58, %59 : vector<24x128xbf16>
    %c1024 = arith.constant 1024 : index
    %c0_44 = arith.constant 0 : index
    %61 = vector.load %arg2[%c1024, %c0_44] : memref<1152x128xbf16, #tpu.memory_space<vmem>>, vector<128x128xbf16>
    %cst_45 = arith.constant dense<0.000000e+00> : vector<24x128xf32>
    %62 = tpu.matmul %60, %61, %cst_45 {dimension_numbers = #tpu.dot_dimension_numbers<[1], [0], [0], [1], [0, 0, 1, 1], [], []>} : vector<24x128xbf16>, vector<128x128xbf16>, vector<24x128xf32> -> vector<24x128xf32>
    %63 = arith.addf %56, %62 : vector<24x128xf32>
    %c0_46 = arith.constant 0 : index
    %c0_47 = arith.constant 0 : index
    %64 = vector.load %arg3[%c0_46, %c0_47] : memref<1x128xf32, #tpu.memory_space<vmem>>, vector<1x128xf32>
    %65 = vector.broadcast %64 : vector<1x128xf32> to vector<24x128xf32>
    %66 = arith.addf %63, %65 : vector<24x128xf32>
    %cst_48 = arith.constant 0.000000e+00 : f32
    %67 = vector.broadcast %cst_48 : f32 to vector<24x128xf32>
    %68 = arith.maximumf %66, %67 : vector<24x128xf32>
    %69 = arith.truncf %68 : vector<24x128xf32> to vector<24x128xbf16>
    %c0_49 = arith.constant 0 : index
    %c0_50 = arith.constant 0 : index
    %70 = vector.load %arg4[%c0_49, %c0_50] : memref<128x128xbf16, #tpu.memory_space<vmem>>, vector<128x128xbf16>
    %cst_51 = arith.constant dense<0.000000e+00> : vector<24x128xf32>
    %71 = tpu.matmul %69, %70, %cst_51 {dimension_numbers = #tpu.dot_dimension_numbers<[1], [0], [0], [1], [0, 0, 1, 1], [], []>} : vector<24x128xbf16>, vector<128x128xbf16>, vector<24x128xf32> -> vector<24x128xf32>
    %c0_52 = arith.constant 0 : index
    %c0_53 = arith.constant 0 : index
    %72 = vector.load %arg5[%c0_52, %c0_53] : memref<1x128xf32, #tpu.memory_space<vmem>>, vector<1x128xf32>
    %73 = vector.broadcast %72 : vector<1x128xf32> to vector<24x128xf32>
    %74 = arith.addf %71, %73 : vector<24x128xf32>
    %c0_54 = arith.constant 0 : index
    %c7_55 = arith.constant 7 : index
    %c0_56 = arith.constant 0 : index
    %75 = vector.load %arg1[%c0_54, %c7_55, %c0_56] : memref<1x38x128xbf16, #tpu.memory_space<vmem>>, vector<1x24x128xbf16>
    %76 = vector.shape_cast %75 : vector<1x24x128xbf16> to vector<24x128xbf16>
    %77 = arith.extf %76 : vector<24x128xbf16> to vector<24x128xf32>
    %78 = arith.addf %74, %77 : vector<24x128xf32>
    %c0_57 = arith.constant 0 : index
    %c0_58 = arith.constant 0 : index
    %79 = vector.load %arg6[%c0_57, %c0_58] : memref<24x1xf32, #tpu.memory_space<vmem>>, vector<24x1xf32>
    %80 = vector.broadcast %79 : vector<24x1xf32> to vector<24x128xf32>
    %81 = arith.mulf %78, %80 : vector<24x128xf32>
    %82 = arith.truncf %81 : vector<24x128xf32> to vector<24x128xbf16>
    %c0_59 = arith.constant 0 : index
    %c0_60 = arith.constant 0 : index
    %c0_61 = arith.constant 0 : index
    %83 = vector.load %arg7[%c0_59, %c0_60, %c0_61] : memref<1x24x128xbf16, #tpu.memory_space<vmem>>, vector<1x24x128xbf16>
    %84 = vector.shape_cast %83 : vector<1x24x128xbf16> to vector<24x128xbf16>
    %85 = vector.shape_cast %82 : vector<24x128xbf16> to vector<1x24x128xbf16>
    tpu.vector_store %arg7[%c0_59, %c0_60, %c0_61], %85 {strides = array<i32>} : memref<1x24x128xbf16, #tpu.memory_space<vmem>>, vector<1x24x128xbf16>,
    return
  }
  func.func @transform_0(%arg0: i32) -> (i32, i32, i32) {
    %c0_i32 = arith.constant 0 : i32
    %c0_i32_0 = arith.constant 0 : i32
    %c0_i32_1 = arith.constant 0 : i32
    return %arg0, %c0_i32, %c0_i32_0 : i32, i32, i32
  }
  func.func @transform_1(%arg0: i32) -> (i32, i32) {
    %c0_i32 = arith.constant 0 : i32
    %c0_i32_0 = arith.constant 0 : i32
    %c0_i32_1 = arith.constant 0 : i32
    return %c0_i32, %c0_i32_0 : i32, i32
  }
  func.func @transform_2(%arg0: i32) -> (i32, i32) {
    %c0_i32 = arith.constant 0 : i32
    %c0_i32_0 = arith.constant 0 : i32
    %c0_i32_1 = arith.constant 0 : i32
    return %c0_i32, %c0_i32_0 : i32, i32
  }
  func.func @transform_3(%arg0: i32) -> (i32, i32) {
    %c0_i32 = arith.constant 0 : i32
    %c0_i32_0 = arith.constant 0 : i32
    %c0_i32_1 = arith.constant 0 : i32
    return %c0_i32, %c0_i32_0 : i32, i32
  }
  func.func @transform_4(%arg0: i32) -> (i32, i32) {
    %c0_i32 = arith.constant 0 : i32
    %c0_i32_0 = arith.constant 0 : i32
    %c0_i32_1 = arith.constant 0 : i32
    return %c0_i32, %c0_i32_0 : i32, i32
  }
  func.func @transform_5(%arg0: i32) -> (i32, i32) {
    %c0_i32 = arith.constant 0 : i32
    %c0_i32_0 = arith.constant 0 : i32
    %c0_i32_1 = arith.constant 0 : i32
    return %c0_i32, %c0_i32_0 : i32, i32
  }
  func.func @transform_6(%arg0: i32) -> (i32, i32, i32) {
    %c0_i32 = arith.constant 0 : i32
    %c0_i32_0 = arith.constant 0 : i32
    %c0_i32_1 = arith.constant 0 : i32
    return %arg0, %c0_i32, %c0_i32_0 : i32, i32, i32
  }
}

module attributes {stable_mosaic.version = 11 : i64} {
  func.func @_conv_taps_kernel(%arg0: i32, %arg1: i32, %arg2: memref<1x38x128xbf16, #tpu.memory_space<vmem>>, %arg3: memref<1152x128xbf16, #tpu.memory_space<vmem>>, %arg4: memref<1x128xf32, #tpu.memory_space<vmem>>, %arg5: memref<24x1xf32, #tpu.memory_space<vmem>>, %arg6: memref<1x24x128xbf16, #tpu.memory_space<vmem>>) attributes {dimension_semantics = [#tpu.dimension_semantics<parallel>, #tpu.dimension_semantics<parallel>], iteration_bounds = array<i64: 1, 2>, scalar_prefetch = 0 : i64, scratch_operands = 0 : i64, tpu.core_type = #tpu.core_type<tc>, window_params = [{transform_indices = @transform_0, window_bounds = array<i64: 1, 38, 128>}, {transform_indices = @transform_1, window_bounds = array<i64: 1152, 128>}, {transform_indices = @transform_2, window_bounds = array<i64: 1, 128>}, {pipeline_mode = #tpu.pipeline_mode<synchronous>, transform_indices = @transform_3, window_bounds = array<i64: 24, 1>}, {transform_indices = @transform_4, window_bounds = array<i64: 1, 24, 128>}]} {
    %cst = arith.constant 0.000000e+00 : f32
    %0 = vector.broadcast %cst : f32 to vector<24x128xf32>
    %c0 = arith.constant 0 : index
    %c0_0 = arith.constant 0 : index
    %c0_1 = arith.constant 0 : index
    %1 = vector.load %arg2[%c0, %c0_0, %c0_1] : memref<1x38x128xbf16, #tpu.memory_space<vmem>>, vector<1x24x128xbf16>
    %2 = vector.shape_cast %1 : vector<1x24x128xbf16> to vector<24x128xbf16>
    %c0_2 = arith.constant 0 : index
    %c0_3 = arith.constant 0 : index
    %3 = vector.load %arg3[%c0_2, %c0_3] : memref<1152x128xbf16, #tpu.memory_space<vmem>>, vector<128x128xbf16>
    %cst_4 = arith.constant dense<0.000000e+00> : vector<24x128xf32>
    %4 = tpu.matmul %2, %3, %cst_4 {dimension_numbers = #tpu.dot_dimension_numbers<[1], [0], [0], [1], [0, 0, 1, 1], [], []>} : vector<24x128xbf16>, vector<128x128xbf16>, vector<24x128xf32> -> vector<24x128xf32>
    %5 = arith.addf %0, %4 : vector<24x128xf32>
    %c0_5 = arith.constant 0 : index
    %c1 = arith.constant 1 : index
    %c0_6 = arith.constant 0 : index
    %6 = vector.load %arg2[%c0_5, %c1, %c0_6] : memref<1x38x128xbf16, #tpu.memory_space<vmem>>, vector<1x24x128xbf16>
    %7 = vector.shape_cast %6 : vector<1x24x128xbf16> to vector<24x128xbf16>
    %c128 = arith.constant 128 : index
    %c0_7 = arith.constant 0 : index
    %8 = vector.load %arg3[%c128, %c0_7] : memref<1152x128xbf16, #tpu.memory_space<vmem>>, vector<128x128xbf16>
    %cst_8 = arith.constant dense<0.000000e+00> : vector<24x128xf32>
    %9 = tpu.matmul %7, %8, %cst_8 {dimension_numbers = #tpu.dot_dimension_numbers<[1], [0], [0], [1], [0, 0, 1, 1], [], []>} : vector<24x128xbf16>, vector<128x128xbf16>, vector<24x128xf32> -> vector<24x128xf32>
    %10 = arith.addf %5, %9 : vector<24x128xf32>
    %c0_9 = arith.constant 0 : index
    %c2 = arith.constant 2 : index
    %c0_10 = arith.constant 0 : index
    %11 = vector.load %arg2[%c0_9, %c2, %c0_10] : memref<1x38x128xbf16, #tpu.memory_space<vmem>>, vector<1x24x128xbf16>
    %12 = vector.shape_cast %11 : vector<1x24x128xbf16> to vector<24x128xbf16>
    %c256 = arith.constant 256 : index
    %c0_11 = arith.constant 0 : index
    %13 = vector.load %arg3[%c256, %c0_11] : memref<1152x128xbf16, #tpu.memory_space<vmem>>, vector<128x128xbf16>
    %cst_12 = arith.constant dense<0.000000e+00> : vector<24x128xf32>
    %14 = tpu.matmul %12, %13, %cst_12 {dimension_numbers = #tpu.dot_dimension_numbers<[1], [0], [0], [1], [0, 0, 1, 1], [], []>} : vector<24x128xbf16>, vector<128x128xbf16>, vector<24x128xf32> -> vector<24x128xf32>
    %15 = arith.addf %10, %14 : vector<24x128xf32>
    %c0_13 = arith.constant 0 : index
    %c6 = arith.constant 6 : index
    %c0_14 = arith.constant 0 : index
    %16 = vector.load %arg2[%c0_13, %c6, %c0_14] : memref<1x38x128xbf16, #tpu.memory_space<vmem>>, vector<1x24x128xbf16>
    %17 = vector.shape_cast %16 : vector<1x24x128xbf16> to vector<24x128xbf16>
    %c384 = arith.constant 384 : index
    %c0_15 = arith.constant 0 : index
    %18 = vector.load %arg3[%c384, %c0_15] : memref<1152x128xbf16, #tpu.memory_space<vmem>>, vector<128x128xbf16>
    %cst_16 = arith.constant dense<0.000000e+00> : vector<24x128xf32>
    %19 = tpu.matmul %17, %18, %cst_16 {dimension_numbers = #tpu.dot_dimension_numbers<[1], [0], [0], [1], [0, 0, 1, 1], [], []>} : vector<24x128xbf16>, vector<128x128xbf16>, vector<24x128xf32> -> vector<24x128xf32>
    %20 = arith.addf %15, %19 : vector<24x128xf32>
    %c0_17 = arith.constant 0 : index
    %c7 = arith.constant 7 : index
    %c0_18 = arith.constant 0 : index
    %21 = vector.load %arg2[%c0_17, %c7, %c0_18] : memref<1x38x128xbf16, #tpu.memory_space<vmem>>, vector<1x24x128xbf16>
    %22 = vector.shape_cast %21 : vector<1x24x128xbf16> to vector<24x128xbf16>
    %c512 = arith.constant 512 : index
    %c0_19 = arith.constant 0 : index
    %23 = vector.load %arg3[%c512, %c0_19] : memref<1152x128xbf16, #tpu.memory_space<vmem>>, vector<128x128xbf16>
    %cst_20 = arith.constant dense<0.000000e+00> : vector<24x128xf32>
    %24 = tpu.matmul %22, %23, %cst_20 {dimension_numbers = #tpu.dot_dimension_numbers<[1], [0], [0], [1], [0, 0, 1, 1], [], []>} : vector<24x128xbf16>, vector<128x128xbf16>, vector<24x128xf32> -> vector<24x128xf32>
    %25 = arith.addf %20, %24 : vector<24x128xf32>
    %c0_21 = arith.constant 0 : index
    %c8 = arith.constant 8 : index
    %c0_22 = arith.constant 0 : index
    %26 = vector.load %arg2[%c0_21, %c8, %c0_22] : memref<1x38x128xbf16, #tpu.memory_space<vmem>>, vector<1x24x128xbf16>
    %27 = vector.shape_cast %26 : vector<1x24x128xbf16> to vector<24x128xbf16>
    %c640 = arith.constant 640 : index
    %c0_23 = arith.constant 0 : index
    %28 = vector.load %arg3[%c640, %c0_23] : memref<1152x128xbf16, #tpu.memory_space<vmem>>, vector<128x128xbf16>
    %cst_24 = arith.constant dense<0.000000e+00> : vector<24x128xf32>
    %29 = tpu.matmul %27, %28, %cst_24 {dimension_numbers = #tpu.dot_dimension_numbers<[1], [0], [0], [1], [0, 0, 1, 1], [], []>} : vector<24x128xbf16>, vector<128x128xbf16>, vector<24x128xf32> -> vector<24x128xf32>
    %30 = arith.addf %25, %29 : vector<24x128xf32>
    %c0_25 = arith.constant 0 : index
    %c12 = arith.constant 12 : index
    %c0_26 = arith.constant 0 : index
    %31 = vector.load %arg2[%c0_25, %c12, %c0_26] : memref<1x38x128xbf16, #tpu.memory_space<vmem>>, vector<1x24x128xbf16>
    %32 = vector.shape_cast %31 : vector<1x24x128xbf16> to vector<24x128xbf16>
    %c768 = arith.constant 768 : index
    %c0_27 = arith.constant 0 : index
    %33 = vector.load %arg3[%c768, %c0_27] : memref<1152x128xbf16, #tpu.memory_space<vmem>>, vector<128x128xbf16>
    %cst_28 = arith.constant dense<0.000000e+00> : vector<24x128xf32>
    %34 = tpu.matmul %32, %33, %cst_28 {dimension_numbers = #tpu.dot_dimension_numbers<[1], [0], [0], [1], [0, 0, 1, 1], [], []>} : vector<24x128xbf16>, vector<128x128xbf16>, vector<24x128xf32> -> vector<24x128xf32>
    %35 = arith.addf %30, %34 : vector<24x128xf32>
    %c0_29 = arith.constant 0 : index
    %c13 = arith.constant 13 : index
    %c0_30 = arith.constant 0 : index
    %36 = vector.load %arg2[%c0_29, %c13, %c0_30] : memref<1x38x128xbf16, #tpu.memory_space<vmem>>, vector<1x24x128xbf16>
    %37 = vector.shape_cast %36 : vector<1x24x128xbf16> to vector<24x128xbf16>
    %c896 = arith.constant 896 : index
    %c0_31 = arith.constant 0 : index
    %38 = vector.load %arg3[%c896, %c0_31] : memref<1152x128xbf16, #tpu.memory_space<vmem>>, vector<128x128xbf16>
    %cst_32 = arith.constant dense<0.000000e+00> : vector<24x128xf32>
    %39 = tpu.matmul %37, %38, %cst_32 {dimension_numbers = #tpu.dot_dimension_numbers<[1], [0], [0], [1], [0, 0, 1, 1], [], []>} : vector<24x128xbf16>, vector<128x128xbf16>, vector<24x128xf32> -> vector<24x128xf32>
    %40 = arith.addf %35, %39 : vector<24x128xf32>
    %c0_33 = arith.constant 0 : index
    %c14 = arith.constant 14 : index
    %c0_34 = arith.constant 0 : index
    %41 = vector.load %arg2[%c0_33, %c14, %c0_34] : memref<1x38x128xbf16, #tpu.memory_space<vmem>>, vector<1x24x128xbf16>
    %42 = vector.shape_cast %41 : vector<1x24x128xbf16> to vector<24x128xbf16>
    %c1024 = arith.constant 1024 : index
    %c0_35 = arith.constant 0 : index
    %43 = vector.load %arg3[%c1024, %c0_35] : memref<1152x128xbf16, #tpu.memory_space<vmem>>, vector<128x128xbf16>
    %cst_36 = arith.constant dense<0.000000e+00> : vector<24x128xf32>
    %44 = tpu.matmul %42, %43, %cst_36 {dimension_numbers = #tpu.dot_dimension_numbers<[1], [0], [0], [1], [0, 0, 1, 1], [], []>} : vector<24x128xbf16>, vector<128x128xbf16>, vector<24x128xf32> -> vector<24x128xf32>
    %45 = arith.addf %40, %44 : vector<24x128xf32>
    %c0_37 = arith.constant 0 : index
    %c0_38 = arith.constant 0 : index
    %46 = vector.load %arg4[%c0_37, %c0_38] : memref<1x128xf32, #tpu.memory_space<vmem>>, vector<1x128xf32>
    %47 = vector.broadcast %46 : vector<1x128xf32> to vector<24x128xf32>
    %48 = arith.addf %45, %47 : vector<24x128xf32>
    %cst_39 = arith.constant 0.000000e+00 : f32
    %49 = vector.broadcast %cst_39 : f32 to vector<24x128xf32>
    %50 = arith.maximumf %48, %49 : vector<24x128xf32>
    %c0_40 = arith.constant 0 : index
    %c0_41 = arith.constant 0 : index
    %51 = vector.load %arg5[%c0_40, %c0_41] : memref<24x1xf32, #tpu.memory_space<vmem>>, vector<24x1xf32>
    %52 = vector.broadcast %51 : vector<24x1xf32> to vector<24x128xf32>
    %53 = arith.mulf %50, %52 : vector<24x128xf32>
    %54 = arith.truncf %53 : vector<24x128xf32> to vector<24x128xbf16>
    %c0_42 = arith.constant 0 : index
    %c0_43 = arith.constant 0 : index
    %c0_44 = arith.constant 0 : index
    %55 = vector.load %arg6[%c0_42, %c0_43, %c0_44] : memref<1x24x128xbf16, #tpu.memory_space<vmem>>, vector<1x24x128xbf16>
    %56 = vector.shape_cast %55 : vector<1x24x128xbf16> to vector<24x128xbf16>
    %57 = vector.shape_cast %54 : vector<24x128xbf16> to vector<1x24x128xbf16>
    tpu.vector_store %arg6[%c0_42, %c0_43, %c0_44], %57 {strides = array<i32>} : memref<1x24x128xbf16, #tpu.memory_space<vmem>>, vector<1x24x128xbf16>,
    return
  }
  func.func @transform_0(%arg0: i32, %arg1: i32) -> (i32, i32, i32) {
    %c0_i32 = arith.constant 0 : i32
    %c0_i32_0 = arith.constant 0 : i32
    %c0_i32_1 = arith.constant 0 : i32
    return %arg1, %c0_i32, %c0_i32_0 : i32, i32, i32
  }
  func.func @transform_1(%arg0: i32, %arg1: i32) -> (i32, i32) {
    %c0_i32 = arith.constant 0 : i32
    %c0_i32_0 = arith.constant 0 : i32
    return %c0_i32, %arg0 : i32, i32
  }
  func.func @transform_2(%arg0: i32, %arg1: i32) -> (i32, i32) {
    %c0_i32 = arith.constant 0 : i32
    %c0_i32_0 = arith.constant 0 : i32
    return %c0_i32, %arg0 : i32, i32
  }
  func.func @transform_3(%arg0: i32, %arg1: i32) -> (i32, i32) {
    %c0_i32 = arith.constant 0 : i32
    %c0_i32_0 = arith.constant 0 : i32
    %c0_i32_1 = arith.constant 0 : i32
    return %c0_i32, %c0_i32_0 : i32, i32
  }
  func.func @transform_4(%arg0: i32, %arg1: i32) -> (i32, i32, i32) {
    %c0_i32 = arith.constant 0 : i32
    %c0_i32_0 = arith.constant 0 : i32
    return %arg1, %c0_i32, %arg0 : i32, i32, i32
  }
}

module attributes {stable_mosaic.version = 11 : i64} {
  func.func @_conv_taps_kernel(%arg0: i32, %arg1: i32, %arg2: memref<1x110x128xbf16, #tpu.memory_space<vmem>>, %arg3: memref<1152x128xbf16, #tpu.memory_space<vmem>>, %arg4: memref<1x128xf32, #tpu.memory_space<vmem>>, %arg5: memref<80x1xf32, #tpu.memory_space<vmem>>, %arg6: memref<1x80x128xbf16, #tpu.memory_space<vmem>>) attributes {dimension_semantics = [#tpu.dimension_semantics<parallel>, #tpu.dimension_semantics<parallel>], iteration_bounds = array<i64: 1, 2>, scalar_prefetch = 0 : i64, scratch_operands = 0 : i64, tpu.core_type = #tpu.core_type<tc>, window_params = [{transform_indices = @transform_0, window_bounds = array<i64: 1, 110, 128>}, {transform_indices = @transform_1, window_bounds = array<i64: 1152, 128>}, {transform_indices = @transform_2, window_bounds = array<i64: 1, 128>}, {pipeline_mode = #tpu.pipeline_mode<synchronous>, transform_indices = @transform_3, window_bounds = array<i64: 80, 1>}, {transform_indices = @transform_4, window_bounds = array<i64: 1, 80, 128>}]} {
    %cst = arith.constant 0.000000e+00 : f32
    %0 = vector.broadcast %cst : f32 to vector<80x128xf32>
    %c0 = arith.constant 0 : index
    %c0_0 = arith.constant 0 : index
    %c0_1 = arith.constant 0 : index
    %1 = vector.load %arg2[%c0, %c0_0, %c0_1] : memref<1x110x128xbf16, #tpu.memory_space<vmem>>, vector<1x80x128xbf16>
    %2 = vector.shape_cast %1 : vector<1x80x128xbf16> to vector<80x128xbf16>
    %c0_2 = arith.constant 0 : index
    %c0_3 = arith.constant 0 : index
    %3 = vector.load %arg3[%c0_2, %c0_3] : memref<1152x128xbf16, #tpu.memory_space<vmem>>, vector<128x128xbf16>
    %cst_4 = arith.constant dense<0.000000e+00> : vector<80x128xf32>
    %4 = tpu.matmul %2, %3, %cst_4 {dimension_numbers = #tpu.dot_dimension_numbers<[1], [0], [0], [1], [0, 0, 1, 1], [], []>} : vector<80x128xbf16>, vector<128x128xbf16>, vector<80x128xf32> -> vector<80x128xf32>
    %5 = arith.addf %0, %4 : vector<80x128xf32>
    %c0_5 = arith.constant 0 : index
    %c1 = arith.constant 1 : index
    %c0_6 = arith.constant 0 : index
    %6 = vector.load %arg2[%c0_5, %c1, %c0_6] : memref<1x110x128xbf16, #tpu.memory_space<vmem>>, vector<1x80x128xbf16>
    %7 = vector.shape_cast %6 : vector<1x80x128xbf16> to vector<80x128xbf16>
    %c128 = arith.constant 128 : index
    %c0_7 = arith.constant 0 : index
    %8 = vector.load %arg3[%c128, %c0_7] : memref<1152x128xbf16, #tpu.memory_space<vmem>>, vector<128x128xbf16>
    %cst_8 = arith.constant dense<0.000000e+00> : vector<80x128xf32>
    %9 = tpu.matmul %7, %8, %cst_8 {dimension_numbers = #tpu.dot_dimension_numbers<[1], [0], [0], [1], [0, 0, 1, 1], [], []>} : vector<80x128xbf16>, vector<128x128xbf16>, vector<80x128xf32> -> vector<80x128xf32>
    %10 = arith.addf %5, %9 : vector<80x128xf32>
    %c0_9 = arith.constant 0 : index
    %c2 = arith.constant 2 : index
    %c0_10 = arith.constant 0 : index
    %11 = vector.load %arg2[%c0_9, %c2, %c0_10] : memref<1x110x128xbf16, #tpu.memory_space<vmem>>, vector<1x80x128xbf16>
    %12 = vector.shape_cast %11 : vector<1x80x128xbf16> to vector<80x128xbf16>
    %c256 = arith.constant 256 : index
    %c0_11 = arith.constant 0 : index
    %13 = vector.load %arg3[%c256, %c0_11] : memref<1152x128xbf16, #tpu.memory_space<vmem>>, vector<128x128xbf16>
    %cst_12 = arith.constant dense<0.000000e+00> : vector<80x128xf32>
    %14 = tpu.matmul %12, %13, %cst_12 {dimension_numbers = #tpu.dot_dimension_numbers<[1], [0], [0], [1], [0, 0, 1, 1], [], []>} : vector<80x128xbf16>, vector<128x128xbf16>, vector<80x128xf32> -> vector<80x128xf32>
    %15 = arith.addf %10, %14 : vector<80x128xf32>
    %c0_13 = arith.constant 0 : index
    %c10 = arith.constant 10 : index
    %c0_14 = arith.constant 0 : index
    %16 = vector.load %arg2[%c0_13, %c10, %c0_14] : memref<1x110x128xbf16, #tpu.memory_space<vmem>>, vector<1x80x128xbf16>
    %17 = vector.shape_cast %16 : vector<1x80x128xbf16> to vector<80x128xbf16>
    %c384 = arith.constant 384 : index
    %c0_15 = arith.constant 0 : index
    %18 = vector.load %arg3[%c384, %c0_15] : memref<1152x128xbf16, #tpu.memory_space<vmem>>, vector<128x128xbf16>
    %cst_16 = arith.constant dense<0.000000e+00> : vector<80x128xf32>
    %19 = tpu.matmul %17, %18, %cst_16 {dimension_numbers = #tpu.dot_dimension_numbers<[1], [0], [0], [1], [0, 0, 1, 1], [], []>} : vector<80x128xbf16>, vector<128x128xbf16>, vector<80x128xf32> -> vector<80x128xf32>
    %20 = arith.addf %15, %19 : vector<80x128xf32>
    %c0_17 = arith.constant 0 : index
    %c11 = arith.constant 11 : index
    %c0_18 = arith.constant 0 : index
    %21 = vector.load %arg2[%c0_17, %c11, %c0_18] : memref<1x110x128xbf16, #tpu.memory_space<vmem>>, vector<1x80x128xbf16>
    %22 = vector.shape_cast %21 : vector<1x80x128xbf16> to vector<80x128xbf16>
    %c512 = arith.constant 512 : index
    %c0_19 = arith.constant 0 : index
    %23 = vector.load %arg3[%c512, %c0_19] : memref<1152x128xbf16, #tpu.memory_space<vmem>>, vector<128x128xbf16>
    %cst_20 = arith.constant dense<0.000000e+00> : vector<80x128xf32>
    %24 = tpu.matmul %22, %23, %cst_20 {dimension_numbers = #tpu.dot_dimension_numbers<[1], [0], [0], [1], [0, 0, 1, 1], [], []>} : vector<80x128xbf16>, vector<128x128xbf16>, vector<80x128xf32> -> vector<80x128xf32>
    %25 = arith.addf %20, %24 : vector<80x128xf32>
    %c0_21 = arith.constant 0 : index
    %c12 = arith.constant 12 : index
    %c0_22 = arith.constant 0 : index
    %26 = vector.load %arg2[%c0_21, %c12, %c0_22] : memref<1x110x128xbf16, #tpu.memory_space<vmem>>, vector<1x80x128xbf16>
    %27 = vector.shape_cast %26 : vector<1x80x128xbf16> to vector<80x128xbf16>
    %c640 = arith.constant 640 : index
    %c0_23 = arith.constant 0 : index
    %28 = vector.load %arg3[%c640, %c0_23] : memref<1152x128xbf16, #tpu.memory_space<vmem>>, vector<128x128xbf16>
    %cst_24 = arith.constant dense<0.000000e+00> : vector<80x128xf32>
    %29 = tpu.matmul %27, %28, %cst_24 {dimension_numbers = #tpu.dot_dimension_numbers<[1], [0], [0], [1], [0, 0, 1, 1], [], []>} : vector<80x128xbf16>, vector<128x128xbf16>, vector<80x128xf32> -> vector<80x128xf32>
    %30 = arith.addf %25, %29 : vector<80x128xf32>
    %c0_25 = arith.constant 0 : index
    %c20 = arith.constant 20 : index
    %c0_26 = arith.constant 0 : index
    %31 = vector.load %arg2[%c0_25, %c20, %c0_26] : memref<1x110x128xbf16, #tpu.memory_space<vmem>>, vector<1x80x128xbf16>
    %32 = vector.shape_cast %31 : vector<1x80x128xbf16> to vector<80x128xbf16>
    %c768 = arith.constant 768 : index
    %c0_27 = arith.constant 0 : index
    %33 = vector.load %arg3[%c768, %c0_27] : memref<1152x128xbf16, #tpu.memory_space<vmem>>, vector<128x128xbf16>
    %cst_28 = arith.constant dense<0.000000e+00> : vector<80x128xf32>
    %34 = tpu.matmul %32, %33, %cst_28 {dimension_numbers = #tpu.dot_dimension_numbers<[1], [0], [0], [1], [0, 0, 1, 1], [], []>} : vector<80x128xbf16>, vector<128x128xbf16>, vector<80x128xf32> -> vector<80x128xf32>
    %35 = arith.addf %30, %34 : vector<80x128xf32>
    %c0_29 = arith.constant 0 : index
    %c21 = arith.constant 21 : index
    %c0_30 = arith.constant 0 : index
    %36 = vector.load %arg2[%c0_29, %c21, %c0_30] : memref<1x110x128xbf16, #tpu.memory_space<vmem>>, vector<1x80x128xbf16>
    %37 = vector.shape_cast %36 : vector<1x80x128xbf16> to vector<80x128xbf16>
    %c896 = arith.constant 896 : index
    %c0_31 = arith.constant 0 : index
    %38 = vector.load %arg3[%c896, %c0_31] : memref<1152x128xbf16, #tpu.memory_space<vmem>>, vector<128x128xbf16>
    %cst_32 = arith.constant dense<0.000000e+00> : vector<80x128xf32>
    %39 = tpu.matmul %37, %38, %cst_32 {dimension_numbers = #tpu.dot_dimension_numbers<[1], [0], [0], [1], [0, 0, 1, 1], [], []>} : vector<80x128xbf16>, vector<128x128xbf16>, vector<80x128xf32> -> vector<80x128xf32>
    %40 = arith.addf %35, %39 : vector<80x128xf32>
    %c0_33 = arith.constant 0 : index
    %c22 = arith.constant 22 : index
    %c0_34 = arith.constant 0 : index
    %41 = vector.load %arg2[%c0_33, %c22, %c0_34] : memref<1x110x128xbf16, #tpu.memory_space<vmem>>, vector<1x80x128xbf16>
    %42 = vector.shape_cast %41 : vector<1x80x128xbf16> to vector<80x128xbf16>
    %c1024 = arith.constant 1024 : index
    %c0_35 = arith.constant 0 : index
    %43 = vector.load %arg3[%c1024, %c0_35] : memref<1152x128xbf16, #tpu.memory_space<vmem>>, vector<128x128xbf16>
    %cst_36 = arith.constant dense<0.000000e+00> : vector<80x128xf32>
    %44 = tpu.matmul %42, %43, %cst_36 {dimension_numbers = #tpu.dot_dimension_numbers<[1], [0], [0], [1], [0, 0, 1, 1], [], []>} : vector<80x128xbf16>, vector<128x128xbf16>, vector<80x128xf32> -> vector<80x128xf32>
    %45 = arith.addf %40, %44 : vector<80x128xf32>
    %c0_37 = arith.constant 0 : index
    %c0_38 = arith.constant 0 : index
    %46 = vector.load %arg4[%c0_37, %c0_38] : memref<1x128xf32, #tpu.memory_space<vmem>>, vector<1x128xf32>
    %47 = vector.broadcast %46 : vector<1x128xf32> to vector<80x128xf32>
    %48 = arith.addf %45, %47 : vector<80x128xf32>
    %c0_39 = arith.constant 0 : index
    %c0_40 = arith.constant 0 : index
    %49 = vector.load %arg5[%c0_39, %c0_40] : memref<80x1xf32, #tpu.memory_space<vmem>>, vector<80x1xf32>
    %50 = vector.broadcast %49 : vector<80x1xf32> to vector<80x128xf32>
    %51 = arith.mulf %48, %50 : vector<80x128xf32>
    %52 = arith.truncf %51 : vector<80x128xf32> to vector<80x128xbf16>
    %c0_41 = arith.constant 0 : index
    %c0_42 = arith.constant 0 : index
    %c0_43 = arith.constant 0 : index
    %53 = vector.load %arg6[%c0_41, %c0_42, %c0_43] : memref<1x80x128xbf16, #tpu.memory_space<vmem>>, vector<1x80x128xbf16>
    %54 = vector.shape_cast %53 : vector<1x80x128xbf16> to vector<80x128xbf16>
    %55 = vector.shape_cast %52 : vector<80x128xbf16> to vector<1x80x128xbf16>
    tpu.vector_store %arg6[%c0_41, %c0_42, %c0_43], %55 {strides = array<i32>} : memref<1x80x128xbf16, #tpu.memory_space<vmem>>, vector<1x80x128xbf16>,
    return
  }
  func.func @transform_0(%arg0: i32, %arg1: i32) -> (i32, i32, i32) {
    %c0_i32 = arith.constant 0 : i32
    %c0_i32_0 = arith.constant 0 : i32
    %c0_i32_1 = arith.constant 0 : i32
    return %arg1, %c0_i32, %c0_i32_0 : i32, i32, i32
  }
  func.func @transform_1(%arg0: i32, %arg1: i32) -> (i32, i32) {
    %c0_i32 = arith.constant 0 : i32
    %c0_i32_0 = arith.constant 0 : i32
    return %c0_i32, %arg0 : i32, i32
  }
  func.func @transform_2(%arg0: i32, %arg1: i32) -> (i32, i32) {
    %c0_i32 = arith.constant 0 : i32
    %c0_i32_0 = arith.constant 0 : i32
    return %c0_i32, %arg0 : i32, i32
  }
  func.func @transform_3(%arg0: i32, %arg1: i32) -> (i32, i32) {
    %c0_i32 = arith.constant 0 : i32
    %c0_i32_0 = arith.constant 0 : i32
    %c0_i32_1 = arith.constant 0 : i32
    return %c0_i32, %c0_i32_0 : i32, i32
  }
  func.func @transform_4(%arg0: i32, %arg1: i32) -> (i32, i32, i32) {
    %c0_i32 = arith.constant 0 : i32
    %c0_i32_0 = arith.constant 0 : i32
    return %arg1, %c0_i32, %arg0 : i32, i32, i32
  }
}

</mosaic_0001>

<bundles_post_ra>
// kernel: tile.68
= control target key start
LH: loop header
LB: loop body
LE: loop exit
PB: predicated region body
PF: predicated region fallthrough
CT: control target
= control target key end

     0   :  { %s22_s0 = inlined_call_operand.vmem [shape: f32[6], index: 0, kind: input, shape index: {}]   ;;  %s23_s1 = inlined_call_operand.vmem [shape: f32[4,6], index: 1, kind: output, shape index: {}]  }
   0x1   :  { %v4_v0 = vld [vmem:[%s22_s0] ss:$0 sm:$0xff] }
   0x2   :  { %5 = vst [vmem:[%s23_s1] sm:$0xf] %v4_v0 }

// kernel: tile.63
= control target key start
LH: loop header
LB: loop body
LE: loop exit
PB: predicated region body
PF: predicated region fallthrough
CT: control target
= control target key end

     0   :  { %s22_s0 = inlined_call_operand.vmem [shape: f32[5], index: 0, kind: input, shape index: {}]   ;;  %s23_s1 = inlined_call_operand.vmem [shape: f32[4,5], index: 1, kind: output, shape index: {}]  }
   0x1   :  { %v4_v0 = vld [vmem:[%s22_s0] ss:$0 sm:$0xff] }
   0x2   :  { %5 = vst [vmem:[%s23_s1] sm:$0xf] %v4_v0 }

// kernel: tile.108
= control target key start
LH: loop header
LB: loop body
LE: loop exit
PB: predicated region body
PF: predicated region fallthrough
CT: control target
= control target key end

     0   :  { %s22_s0 = inlined_call_operand.vmem [shape: f32[10], index: 0, kind: input, shape index: {}]   ;;  %s23_s1 = inlined_call_operand.vmem [shape: f32[8,10], index: 1, kind: output, shape index: {}]  }
   0x1   :  { %v4_v0 = vld [vmem:[%s22_s0] ss:$0 sm:$0xff] }
   0x2   :  { %5 = vst [vmem:[%s23_s1] sm:$0xff] %v4_v0 }

// kernel: tile.58
= control target key start
LH: loop header
LB: loop body
LE: loop exit
PB: predicated region body
PF: predicated region fallthrough
CT: control target
= control target key end

     0   :  { %s22_s0 = inlined_call_operand.vmem [shape: f32[9], index: 0, kind: input, shape index: {}]   ;;  %s23_s1 = inlined_call_operand.vmem [shape: f32[8,9], index: 1, kind: output, shape index: {}]  }
   0x1   :  { %v4_v0 = vld [vmem:[%s22_s0] ss:$0 sm:$0xff] }
   0x2   :  { %5 = vst [vmem:[%s23_s1] sm:$0xff] %v4_v0 }

// kernel: tile.2
= control target key start
LH: loop header
LB: loop body
LE: loop exit
PB: predicated region body
PF: predicated region fallthrough
CT: control target
= control target key end

     0   :  { %s50_s8 = smov 127   ;;  %s51_s9 = smov 123   ;;  %vm7_vm0 = vcmask 7168   ;;  %s85_s0 = inlined_call_operand.vmem [shape: f32[4,6], index: 0, kind: input, shape index: {}]   ;;  %s86_s1 = inlined_call_operand.vmem [shape: f32[24,1], index: 1, kind: output, shape index: {}]  }
   0x1   :  { %v4_v0 = vld [vmem:[%s85_s0] sm:$0xf]  ;;  %s49_s0 = smov 125   ;;  %s52_s10 = smov 124  }
   0x2   :  { %5 = vst [vmem:[#allocation0] sm:$0xf] %v4_v0  ;;  %s53_s11 = smov 126  }
   0x9   :  { %v21_v1 = vld [vmem:[#allocation0] sm:$0xf]  }
   0xa   :  { %v9_v2 = vld [vmem:[#allocation0] sm:$0xf]   ;;  %22 = vrot.lane.b32.xlu1 %v21_v1, %s49_s0 }
   0xb   :  { %10 = vrot.lane.b32.xlu0 %v9_v2, %s50_s8  ;;  %v33_v3 = vld [vmem:[#allocation0] sm:$0xf]  }
   0xc   :  { %34 = vrot.lane.b32.xlu2 %v33_v3, %s51_s9  ;;  %v27_v4 = vld [vmem:[#allocation0] sm:$0xf]  }
   0xd   :  { %v15_v5 = vld [vmem:[#allocation0] sm:$0xf]  }
   0xe   :  { %v6_v6 = vld [vmem:[#allocation0] sm:$0xf]  }
   0xf   :  { %8 = vst.msk [vmem:[%s86_s1] ss:$6 sm:$0xf] %vm7_vm0, %v6_v6  }
  0x12   :  { %28 = vrot.lane.b32.xlu1 %v27_v4, %s52_s10 }
  0x13   :  { %16 = vrot.lane.b32.xlu0 %v15_v5, %s53_s11 }
  0x66   :  { %v35_v7 = vpop.permute.xlu2 %34  }
  0x67   :  { %43 = vst.msk [vmem:[%s86_s1 + $0x5] ss:$6 sm:$0xf] %vm7_vm0, %v35_v7  }
  0x7c   :  { %v23_v8 = vpop.permute.xlu1 %22  }
  0x7d   :  { %v11_v9 = vpop.permute.xlu0 %10   ;;  %41 = vst.msk [vmem:[%s86_s1 + $0x3] ss:$6 sm:$0xf] %vm7_vm0, %v23_v8  }
  0x7e   :  { %39 = vst.msk [vmem:[%s86_s1 + $0x1] ss:$6 sm:$0xf] %vm7_vm0, %v11_v9  }
  0x84   :  { %v29_v10 = vpop.permute.xlu1 %28  }
  0x85   :  { %v17_v11 = vpop.permute.xlu0 %16   ;;  %42 = vst.msk [vmem:[%s86_s1 + $0x4] ss:$6 sm:$0xf] %vm7_vm0, %v29_v10  }
  0x86   :  { %40 = vst.msk [vmem:[%s86_s1 + $0x2] ss:$6 sm:$0xf] %vm7_vm0, %v17_v11  }

// kernel: tile.1
= control target key start
LH: loop header
LB: loop body
LE: loop exit
PB: predicated region body
PF: predicated region fallthrough
CT: control target
= control target key end

     0   :  { %s42_s8 = smov 127   ;;  %s43_s9 = smov 124   ;;  %vm7_vm0 = vcmask 7168   ;;  %s73_s0 = inlined_call_operand.vmem [shape: f32[4,5], index: 0, kind: input, shape index: {}]   ;;  %s74_s1 = inlined_call_operand.vmem [shape: f32[20,1], index: 1, kind: output, shape index: {}]  }
   0x1   :  { %v4_v0 = vld [vmem:[%s73_s0] sm:$0xf]  ;;  %s41_s0 = smov 125   ;;  %s44_s10 = smov 126  }
   0x2   :  { %5 = vst [vmem:[#allocation0] sm:$0xf] %v4_v0 }
   0x9   :  { %v21_v1 = vld [vmem:[#allocation0] sm:$0xf]  }
   0xa   :  { %v9_v2 = vld [vmem:[#allocation0] sm:$0xf]   ;;  %22 = vrot.lane.b32.xlu1 %v21_v1, %s41_s0 }
   0xb   :  { %10 = vrot.lane.b32.xlu0 %v9_v2, %s42_s8  ;;  %v27_v3 = vld [vmem:[#allocation0] sm:$0xf]  }
   0xc   :  { %v15_v4 = vld [vmem:[#allocation0] sm:$0xf]  }
   0xd   :  { %v6_v5 = vld [vmem:[#allocation0] sm:$0xf]  }
   0xe   :  { %8 = vst.msk [vmem:[%s74_s1] ss:$5 sm:$0xf] %vm7_vm0, %v6_v5  }
  0x12   :  { %28 = vrot.lane.b32.xlu1 %v27_v3, %s43_s9 }
  0x13   :  { %16 = vrot.lane.b32.xlu0 %v15_v4, %s44_s10 }
  0x7c   :  { %v23_v6 = vpop.permute.xlu1 %22  }
  0x7d   :  { %v11_v7 = vpop.permute.xlu0 %10   ;;  %35 = vst.msk [vmem:[%s74_s1 + $0x3] ss:$5 sm:$0xf] %vm7_vm0, %v23_v6  }
  0x7e   :  { %33 = vst.msk [vmem:[%s74_s1 + $0x1] ss:$5 sm:$0xf] %vm7_vm0, %v11_v7  }
  0x84   :  { %v29_v8 = vpop.permute.xlu1 %28  }
  0x85   :  { %v17_v9 = vpop.permute.xlu0 %16   ;;  %36 = vst.msk [vmem:[%s74_s1 + $0x4] ss:$5 sm:$0xf] %vm7_vm0, %v29_v8  }
  0x86   :  { %34 = vst.msk [vmem:[%s74_s1 + $0x2] ss:$5 sm:$0xf] %vm7_vm0, %v17_v9  }

// kernel: tile.0
= control target key start
LH: loop header
LB: loop body
LE: loop exit
PB: predicated region body
PF: predicated region fallthrough
CT: control target
= control target key end

     0   :  { %vm3_vm0 = vcmask 7168   ;;  %s141_s10 = smov 125   ;;  %s142_s11 = smov 127   ;;  %s300_s0 = inlined_call_operand.vmem [shape: f32[8,9], index: 0, kind: input, shape index: {}]   ;;  %s301_s1 = inlined_call_operand.vmem [shape: f32[72,1], index: 1, kind: output, shape index: {}]  }
   0x1   :  { %v29_v0 = vld.sshfl [vmem:[%s300_s0] sm:$0xff pattern:$0x36251407]   ;;  %s144_s16 = smov 124   ;;  %s145_s17 = smov 126  }
   0x2   :  { %v2_v1 = vld [vmem:[%s300_s0] sm:$0xff]   ;;  %30 = vrot.lane.b32.xlu1 %v29_v0, %s141_s10  ;;  %6 = vrot.lane.b32.xlu0 %v29_v0, %s142_s11  ;;  %s146_s18 = smov 122   ;;  %s147_s19 = smov 120  }
   0x3   :  { %4 = vst.msk [vmem:[%s301_s1] ss:$9 sm:$0xff] %vm3_vm0, %v2_v1   ;;  %v89_v2 = vld.sshfl [vmem:[%s300_s0] sm:$0xff pattern:$0x62514073]   ;;  %s143_s0 = smov 123  }
   0x4   :  { %54 = vrot.lane.b32.xlu2 %v89_v2, %s143_s0  ;;  %s148_s20 = smov 121  }
   0xa   :  { %42 = vrot.lane.b32.xlu1 %v29_v0, %s144_s16  ;;  %18 = vrot.lane.b32.xlu0 %v29_v0, %s145_s17 }
   0xc   :  { %66 = vrot.lane.b32.xlu2 %v89_v2, %s146_s18 }
  0x12   :  { %90 = vrot.lane.b32.xlu1 %v89_v2, %s147_s19  ;;  %78 = vrot.lane.b32.xlu0 %v89_v2, %s148_s20 }
  0x5e   :  { %v55_v3 = vpop.permute.xlu2 %54  }
  0x5f   :  { %117 = vst.msk [vmem:[%s301_s1 + $0x20] ss:$36 sm:$0x3] %vm3_vm0, %v55_v3  }
  0x60   :  { %118 = vst.msk [vmem:[%s301_s1 - $0x43] ss:$36 sm:$0xc] %vm3_vm0, %v55_v3  }
  0x61   :  { %119 = vst.msk [vmem:[%s301_s1 - $0x82] ss:$36 sm:$0x30] %vm3_vm0, %v55_v3  }
  0x62   :  { %120 = vst.msk [vmem:[%s301_s1 - $0xc1] ss:$36 sm:$0xc0] %vm3_vm0, %v55_v3  }
  0x66   :  { %v67_v4 = vpop.permute.xlu2 %66  }
  0x67   :  { %121 = vst.msk [vmem:[%s301_s1 + $0x21] ss:$36 sm:$0x3] %vm3_vm0, %v67_v4  }
  0x68   :  { %122 = vst.msk [vmem:[%s301_s1 - $0x42] ss:$36 sm:$0xc] %vm3_vm0, %v67_v4  }
  0x69   :  { %123 = vst.msk [vmem:[%s301_s1 - $0x81] ss:$36 sm:$0x30] %vm3_vm0, %v67_v4  }
  0x6a   :  { %124 = vst.msk [vmem:[%s301_s1 - $0xc0] ss:$36 sm:$0xc0] %vm3_vm0, %v67_v4  }
  0x74   :  { %v31_v5 = vpop.permute.xlu1 %30   ;;  %v7_v6 = vpop.permute.xlu0 %6  }
  0x75   :  { %109 = vst.msk [vmem:[%s301_s1 + $0x42] ss:$-63 sm:$0x3] %vm3_vm0, %v31_v5  }
  0x76   :  { %110 = vst.msk [vmem:[%s301_s1 + $0x5d] ss:$-27 sm:$0xc] %vm3_vm0, %v31_v5  }
  0x77   :  { %111 = vst.msk [vmem:[%s301_s1 + $0x9c] ss:$-27 sm:$0x30] %vm3_vm0, %v31_v5  }
  0x78   :  { %112 = vst.msk [vmem:[%s301_s1 + $0xdb] ss:$-27 sm:$0xc0] %vm3_vm0, %v31_v5  }
  0x79   :  { %101 = vst.msk [vmem:[%s301_s1 + $0x40] ss:$-63 sm:$0x3] %vm3_vm0, %v7_v6  }
  0x7a   :  { %102 = vst.msk [vmem:[%s301_s1 + $0x5b] ss:$-27 sm:$0xc] %vm3_vm0, %v7_v6  }
  0x7b   :  { %103 = vst.msk [vmem:[%s301_s1 + $0x9a] ss:$-27 sm:$0x30] %vm3_vm0, %v7_v6  }
  0x7c   :  { %104 = vst.msk [vmem:[%s301_s1 + $0xd9] ss:$-27 sm:$0xc0] %vm3_vm0, %v7_v6   ;;  %v43_v7 = vpop.permute.xlu1 %42   ;;  %v19_v8 = vpop.permute.xlu0 %18  }
  0x7d   :  { %113 = vst.msk [vmem:[%s301_s1 + $0x43] ss:$-63 sm:$0x3] %vm3_vm0, %v43_v7  }
  0x7e   :  { %114 = vst.msk [vmem:[%s301_s1 + $0x5e] ss:$-27 sm:$0xc] %vm3_vm0, %v43_v7  }
  0x7f   :  { %115 = vst.msk [vmem:[%s301_s1 + $0x9d] ss:$-27 sm:$0x30] %vm3_vm0, %v43_v7  }
  0x80   :  { %116 = vst.msk [vmem:[%s301_s1 + $0xdc] ss:$-27 sm:$0xc0] %vm3_vm0, %v43_v7  }
  0x81   :  { %105 = vst.msk [vmem:[%s301_s1 + $0x41] ss:$-63 sm:$0x3] %vm3_vm0, %v19_v8  }
  0x82   :  { %106 = vst.msk [vmem:[%s301_s1 + $0x5c] ss:$-27 sm:$0xc] %vm3_vm0, %v19_v8  }
  0x83   :  { %107 = vst.msk [vmem:[%s301_s1 + $0x9b] ss:$-27 sm:$0x30] %vm3_vm0, %v19_v8  }
  0x84   :  { %108 = vst.msk [vmem:[%s301_s1 + $0xda] ss:$-27 sm:$0xc0] %vm3_vm0, %v19_v8   ;;  %v91_v9 = vpop.permute.xlu1 %90   ;;  %v79_v10 = vpop.permute.xlu0 %78  }
  0x85   :  { %129 = vst.msk [vmem:[%s301_s1 + $0x23] ss:$36 sm:$0x3] %vm3_vm0, %v91_v9  }
  0x86   :  { %130 = vst.msk [vmem:[%s301_s1 - $0x40] ss:$36 sm:$0xc] %vm3_vm0, %v91_v9  }
  0x87   :  { %131 = vst.msk [vmem:[%s301_s1 - $0x7f] ss:$36 sm:$0x30] %vm3_vm0, %v91_v9  }
  0x88   :  { %132 = vst.msk [vmem:[%s301_s1 - $0xbe] ss:$36 sm:$0xc0] %vm3_vm0, %v91_v9  }
  0x89   :  { %125 = vst.msk [vmem:[%s301_s1 + $0x22] ss:$36 sm:$0x3] %vm3_vm0, %v79_v10  }
  0x8a   :  { %126 = vst.msk [vmem:[%s301_s1 - $0x41] ss:$36 sm:$0xc] %vm3_vm0, %v79_v10  }
  0x8b   :  { %127 = vst.msk [vmem:[%s301_s1 - $0x80] ss:$36 sm:$0x30] %vm3_vm0, %v79_v10  }
  0x8c   :  { %128 = vst.msk [vmem:[%s301_s1 - $0xbf] ss:$36 sm:$0xc0] %vm3_vm0, %v79_v10  }

// kernel: tile.3
= control target key start
LH: loop header
LB: loop body
LE: loop exit
PB: predicated region body
PF: predicated region fallthrough
CT: control target
= control target key end

     0   :  { %s140_s10 = smov 125   ;;  %vm3_vm0 = vcmask 7168   ;;  %s141_s11 = smov 127   ;;  %s295_s0 = inlined_call_operand.vmem [shape: f32[8,10], index: 0, kind: input, shape index: {}]   ;;  %s296_s1 = inlined_call_operand.vmem [shape: f32[80,1], index: 1, kind: output, shape index: {}]  }
   0x1   :  { %v29_v0 = vld.sshfl [vmem:[%s295_s0] sm:$0xff pattern:$0x62514703]   ;;  %s143_s18 = smov 124   ;;  %s144_s19 = smov 126  }
   0x2   :  { %v5_v1 = vld.sshfl [vmem:[%s295_s0] sm:$0xff pattern:$0x36251470]   ;;  %30 = vrot.lane.b32.xlu1 %v29_v0, %s140_s10  ;;  %s145_s20 = smov 122   ;;  %s146_s21 = smov 120  }
   0x3   :  { %6 = vrot.lane.b32.xlu0 %v5_v1, %s141_s11  ;;  %v2_v2 = vld [vmem:[%s295_s0] sm:$0xff]   ;;  %s147_s22 = smov 121   ;;  %s148_s23 = smov 119  }
   0x4   :  { %4 = vst.msk [vmem:[%s296_s1] ss:$10 sm:$0xff] %vm3_vm0, %v2_v2   ;;  %v41_v3 = vld.sshfl [vmem:[%s295_s0] sm:$0xff pattern:$0x25147036]   ;;  %s142_s0 = smov 123  }
   0x5   :  { %52 = vrot.lane.b32.xlu2 %v41_v3, %s142_s0 }
   0xa   :  { %42 = vrot.lane.b32.xlu1 %v41_v3, %s143_s18 }
   0xb   :  { %18 = vrot.lane.b32.xlu0 %v29_v0, %s144_s19 }
   0xd   :  { %62 = vrot.lane.b32.xlu2 %v41_v3, %s145_s20 }
  0x12   :  { %82 = vrot.lane.b32.xlu1 %v41_v3, %s146_s21 }
  0x13   :  { %72 = vrot.lane.b32.xlu0 %v41_v3, %s147_s22 }
  0x15   :  { %92 = vrot.lane.b32.xlu2 %v41_v3, %s148_s23 }
  0x5f   :  { %v53_v4 = vpop.permute.xlu2 %52  }
  0x60   :  { %116 = vst.msk [vmem:[%s296_s1 + $0x41] ss:$-30 sm:$0x7] %vm3_vm0, %v53_v4  }
  0x61   :  { %117 = vst.msk [vmem:[%s296_s1 + $0xa5] ss:$-30 sm:$0x38] %vm3_vm0, %v53_v4  }
  0x62   :  { %118 = vst.msk [vmem:[%s296_s1 + $0xeb] ss:$-30 sm:$0xc0] %vm3_vm0, %v53_v4  }
  0x67   :  { %v63_v5 = vpop.permute.xlu2 %62  }
  0x68   :  { %119 = vst.msk [vmem:[%s296_s1 + $0x42] ss:$-30 sm:$0x7] %vm3_vm0, %v63_v5  }
  0x69   :  { %120 = vst.msk [vmem:[%s296_s1 + $0xa6] ss:$-30 sm:$0x38] %vm3_vm0, %v63_v5  }
  0x6a   :  { %121 = vst.msk [vmem:[%s296_s1 + $0xec] ss:$-30 sm:$0xc0] %vm3_vm0, %v63_v5  }
  0x6f   :  { %v93_v6 = vpop.permute.xlu2 %92  }
  0x70   :  { %128 = vst.msk [vmem:[%s296_s1 + $0x45] ss:$-30 sm:$0x7] %vm3_vm0, %v93_v6  }
  0x71   :  { %129 = vst.msk [vmem:[%s296_s1 + $0xa9] ss:$-30 sm:$0x38] %vm3_vm0, %v93_v6  }
  0x72   :  { %130 = vst.msk [vmem:[%s296_s1 + $0xef] ss:$-30 sm:$0xc0] %vm3_vm0, %v93_v6  }
  0x74   :  { %v31_v7 = vpop.permute.xlu1 %30  }
  0x75   :  { %v7_v8 = vpop.permute.xlu0 %6   ;;  %109 = vst.msk [vmem:[%s296_s1 + $0x21] ss:$-30 sm:$0x3] %vm3_vm0, %v31_v7  }
  0x76   :  { %110 = vst.msk [vmem:[%s296_s1 + $0x85] ss:$-30 sm:$0x1c] %vm3_vm0, %v31_v7  }
  0x77   :  { %111 = vst.msk [vmem:[%s296_s1 + $0xcb] ss:$-30 sm:$0x60] %vm3_vm0, %v31_v7  }
  0x78   :  { %112 = vst.msk [vmem:[%s296_s1 + $0x38] sm:$0x80] %vm3_vm0, %v31_v7  }
  0x79   :  { %101 = vst.msk [vmem:[%s296_s1 + $0x1] ss:$70 sm:$0x3] %vm3_vm0, %v7_v8  }
  0x7a   :  { %102 = vst.msk [vmem:[%s296_s1 + $0x65] ss:$-30 sm:$0xc] %vm3_vm0, %v7_v8  }
  0x7b   :  { %103 = vst.msk [vmem:[%s296_s1 + $0xab] ss:$-30 sm:$0x30] %vm3_vm0, %v7_v8  }
  0x7c   :  { %104 = vst.msk [vmem:[%s296_s1 + $0xf1] ss:$-30 sm:$0xc0] %vm3_vm0, %v7_v8   ;;  %v43_v9 = vpop.permute.xlu1 %42  }
  0x7d   :  { %v19_v10 = vpop.permute.xlu0 %18   ;;  %113 = vst.msk [vmem:[%s296_s1 + $0x40] ss:$-30 sm:$0x7] %vm3_vm0, %v43_v9  }
  0x7e   :  { %114 = vst.msk [vmem:[%s296_s1 + $0xa4] ss:$-30 sm:$0x38] %vm3_vm0, %v43_v9  }
  0x7f   :  { %115 = vst.msk [vmem:[%s296_s1 + $0xea] ss:$-30 sm:$0xc0] %vm3_vm0, %v43_v9  }
  0x80   :  { %105 = vst.msk [vmem:[%s296_s1 + $0x20] ss:$-30 sm:$0x3] %vm3_vm0, %v19_v10  }
  0x81   :  { %106 = vst.msk [vmem:[%s296_s1 + $0x84] ss:$-30 sm:$0x1c] %vm3_vm0, %v19_v10  }
  0x82   :  { %107 = vst.msk [vmem:[%s296_s1 + $0xca] ss:$-30 sm:$0x60] %vm3_vm0, %v19_v10  }
  0x83   :  { %108 = vst.msk [vmem:[%s296_s1 + $0x37] sm:$0x80] %vm3_vm0, %v19_v10  }
  0x84   :  { %v83_v11 = vpop.permute.xlu1 %82  }
  0x85   :  { %v73_v12 = vpop.permute.xlu0 %72   ;;  %125 = vst.msk [vmem:[%s296_s1 + $0x44] ss:$-30 sm:$0x7] %vm3_vm0, %v83_v11  }
  0x86   :  { %126 = vst.msk [vmem:[%s296_s1 + $0xa8] ss:$-30 sm:$0x38] %vm3_vm0, %v83_v11  }
  0x87   :  { %127 = vst.msk [vmem:[%s296_s1 + $0xee] ss:$-30 sm:$0xc0] %vm3_vm0, %v83_v11  }
  0x88   :  { %122 = vst.msk [vmem:[%s296_s1 + $0x43] ss:$-30 sm:$0x7] %vm3_vm0, %v73_v12  }
  0x89   :  { %123 = vst.msk [vmem:[%s296_s1 + $0xa7] ss:$-30 sm:$0x38] %vm3_vm0, %v73_v12  }
  0x8a   :  { %124 = vst.msk [vmem:[%s296_s1 + $0xed] ss:$-30 sm:$0xc0] %vm3_vm0, %v73_v12  }

// kernel: vqvae_forward.12
= control target key start
LH: loop header
LB: loop body
LE: loop exit
PB: predicated region body
PF: predicated region fallthrough
CT: control target
= control target key end

     0   :  { %s1070_s15 = smov 0   ;;  %s1072_s16 = smov 0   ;;  %s1231_s0 = inlined_call_operand.vmem [shape: bf16[2,90,12], index: 0, kind: input, shape index: {}]   ;;  %s1232_s1 = inlined_call_operand.vmem [shape: bf16[48,128], index: 1, kind: input, shape index: {}]   ;;  %s1233_s2 = inlined_call_operand.vmem [shape: f32[1,128], index: 2, kind: input, shape index: {}]   ;;  %s1234_s3 = inlined_call_operand.vmem [shape: f32[72,1], index: 3, kind: input, shape index: {}]   ;;  %s1235_s4 = inlined_call_operand.vmem [shape: bf16[2,72,128], index: 4, kind: output, shape index: {}]  }
   0x1   :  { %s1074_s17 = smov 0  }
   0x2 LB: > { %s23_s18 = sadd.s32 1, %s1038_s16  ;;  %p878_p0 = scmp.ge.s32.totalorder %s1042_s17, 1  ;;  %s1042_s17 = sphi %s1074_s17, %s14_s17   ;;  %s1038_s16 = sphi %s1072_s16, %s1237_s16   ;;  %s1034_s15 = sphi %s1070_s15, %s1236_s15  }
   0x3   : > { %p24_p1 = scmp.ge.s32.totalorder %s23_s18, 2  ;;  %p193_p2 = scmp.lt.s32.totalorder %s1042_s17, 3 }
   0x5   : > { %s1239_s18 = smov (%p24_p1, %s23_s18), 0  ;;  %p194_p3 = pnand %p878_p0, %p193_p2 }
   0x6   : > { %p229_p4 = scmp.lt.s32.totalorder (!%p194_p3), %s1034_s15, 1 }
   0x7   : > { %197 = sbr.rel (%p194_p3) target bundleno = 236 (0xec), region = 36 }
   0xc   : > { %v908_v0 = vld [vmem:[%s1232_s1] sm:$0xf]  ;;  %v955_v1 = vld [vmem:[%s1232_s1] sm:$0x30]  ;;  %vm351_vm0 = vcmask 1045504   ;;  %s1241_s15 = smov (!%p229_p4, %s1034_s15), 1 }
   0xd   : > { %v909_v2 = vor.u32 %v955_v1, %v908_v0  ;;  %v942_v3 = vld [vmem:[%s1232_s1 + $0x10] sm:$0xc]  ;;  %v962_v4 = vld [vmem:[%s1232_s1 + $0x10] sm:$0xf0]  ;;  %v899_v5 = vld [vmem:[%s1232_s1 + $0x4] sm:$0xc] }
   0xe   : > { %v943_v6 = vor.u32 %v962_v4, %v942_v3  ;;  %v956_v7 = vld [vmem:[%s1232_s1 + $0x4] sm:$0xf0]  ;;  %v933_v10 = vld [vmem:[%s1232_s1 + $0xc] sm:$0xf]  ;;  %v961_v11 = vld [vmem:[%s1232_s1 + $0xc] sm:$0x30] }
   0xf   : > { %v406_v8 = vsel %vm351_vm0, %v909_v2, 0  ;;  %v900_v9 = vor.u32 %v956_v7, %v899_v5  ;;  %s986_s9 = smul.u32 48, %s1241_s15  ;;  %v934_v13 = vor.u32 %v961_v11, %v933_v10  ;;  %v1044_v14 = vmov 0   ;;  %v686_v15 = vld [vmem:[%s1234_s3] sm:$0xff]  ;;  %v687_v45 = vld [vmem:[%s1234_s3 + $0x8] sm:$0xff]  ;;  %v688_v46 = vld [vmem:[%s1234_s3 + $0x10] sm:$0xff] }
  0x10   : > { %415 = vmatpush.bf16.msra.mxu1 %v406_v8  ;;  %v603_v12 = vrot.slane %v943_v6, 2  ;;  %1013 = vset.pattern.permute.xlu0 %v1044_v14  ;;  %vm335_vm1 = vcmask 97280   ;;  %vm588_vm2 = vcmask 1046528   ;;  %vm289_vm3 = vsmask.f32 7424  ;;  %v689_v61 = vld [vmem:[%s1234_s3 + $0x18] sm:$0xff] }
  0x11   : > { %v334_v16 = vrot.slane %v900_v9, 2  ;;  %697 = vperm.xlu0 %1013, %v686_v15   ;;  %1014 = vset.pattern.permute.xlu1 %v1044_v14  ;;  %s1123_s14 = scalar_lea.vmem %s1231_s0, %s986_s9  ;;  %v538_v18 = vsel %vm351_vm0, %v934_v13, 0  ;;  %s987_s11 = smul.u32 36, %s1241_s15 }
  0x12   : > { %v620_v17 = vsel %vm351_vm0, %v603_v12, 0  ;;  %1015 = vset.pattern.permute.xlu2 %v1044_v14  ;;  %v951_v20 = vld [vmem:[%s1123_s14] sm:$0xff]  ;;  %v1017_v22 = vld [vmem:[%s1123_s14 + $0x4] sm:$0xf0]  ;;  %v957_v23 = vld [vmem:[%s1123_s14 + $0xc] sm:$0xff]  ;;  %547 = vmatpush.bf16.msra.mxu2 %v538_v18 }
  0x13   : > { %629 = vmatpush.bf16.msra.mxu3 %v620_v17  ;;  %v353_v19 = vsel %vm351_vm0, %v334_v16, 0  ;;  %v442_v21 = vld [vmem:[%s1123_s14 + $0x4] sm:$0xff]   ;;  %v293_v26 = vshll.u32 %v951_v20, 16  ;;  %910 = vmatmul.msk.bf16.vlgmr.msra.gmra.mxu1 %vm335_vm1, %v951_v20  ;;  %v291_v27 = vshrl.u32 %v951_v20, 16  ;;  %v486_v29 = vshll.u32 %v957_v23, 16  ;;  %v953_v43 = vld [vmem:[%s1123_s14 + $0x10] sm:$0xff] }
  0x14   : > { %362 = vmatpush.bf16.msra.mxu0 %v353_v19  ;;  %v1018_v24 = vld [vmem:[%s1123_s14 + $0x4] sm:$0xe]  ;;  %v952_v25 = vld [vmem:[%s1123_s14 + $0x8] sm:$0xff]  ;;  %v590_v31 = vrot.slane %v957_v23, 1  ;;  %v479_v34 = vshrl.u32 %v442_v21, 16  ;;  %v481_v35 = vshll.u32 %v442_v21, 16  ;;  %707 = vperm.xlu1 %1014, %v688_v46  }
  0x15   : > { %v298_v28 = vshll.u32 %v952_v25, 16  ;;  %v1019_v30 = vor.u32 %v1018_v24, %v1017_v22  ;;  %v295_v32 = vrot.slane %v293_v26, 1  ;;  %v488_v39 = vrot.slane %v486_v29, 1  ;;  %v958_v47 = vld [vmem:[%s1123_s14 + $0x14] sm:$0xff]  ;;  %v959_v62 = vld [vmem:[%s1123_s14 + $0x1c] sm:$0xff]  ;;  %v691_v29 = vld [vmem:[%s1234_s3 + $0x28] sm:$0xff] }
  0x16   : > { %v483_v38 = vrot.slane %v481_v35, 1  ;;  %v302_v48 = vshrl.u32 %v952_v25, 16  ;;  %v306_v49 = vshll.u32 %v953_v43, 16  ;;  %v490_v50 = vshrl.u32 %v957_v23, 16  ;;  %v954_v60 = vld [vmem:[%s1123_s14 + $0x18] sm:$0xff]  ;;  %v692_v19 = vld [vmem:[%s1234_s3 + $0x30] sm:$0xff] }
  0x17   : > { %v300_v33 = vrot.slane %v298_v28, 1  ;;  %v589_v36 = vrot.slane %v1019_v30, 1  ;;  %v296_v37 = vor.u32 %v295_v32, %v291_v27  ;;  %v494_v51 = vshll.u32 %v958_v47, 16  ;;  %v258_v6 = vld [vmem:[%s1123_s14 + $0x20] sm:$0xf]  ;;  %v693_v18 = vld [vmem:[%s1234_s3 + $0x38] sm:$0xff] }
  0x18   : > { %v484_v42 = vor.u32 %v483_v38, %v479_v34  ;;  %v592_v52 = vrot.slane %v958_v47, 1  ;;  %v308_v54 = vrot.slane %v306_v49, 1  ;;  %v492_v55 = vor.u32 %v490_v50, %v488_v39  ;;  %v261_v7 = vld [vmem:[%s1123_s14 + $0x24] sm:$0x1]  ;;  %v960_v17 = vld [vmem:[%s1123_s14 + $0x24] sm:$0x10] }
  0x19   : > { %v591_v40 = vsel %vm588_vm2, %v589_v36, %v590_v31  ;;  %v301_v41 = vsel %vm289_vm3, %v296_v37, %v300_v33  ;;  %702 = vperm.xlu0 %1013, %v687_v45   ;;  %v304_v53 = vor.u32 %v302_v48, %v300_v33  ;;  %v496_v56 = vrot.slane %v494_v51, 1  ;;  %v929_v16 = vld [vmem:[%s1123_s14 + $0x24] sm:$0xf]  ;;  %s1208_s14 = scalar_lea.vmem %s1235_s4, %s987_s11 }
  0x1a   : > { %944 = vmatmul.msk.bf16.vlgmr.msra.gmra.mxu3 %vm335_vm1, %v591_v40  ;;  %901 = vmatmul.msk.bf16.vlgmr.msra.gmra.mxu0 %vm335_vm1, %v301_v41  ;;  %v489_v44 = vsel %vm289_vm3, %v484_v42, %v488_v39  ;;  %v593_v57 = vsel %vm588_vm2, %v590_v31, %v592_v52  ;;  %v310_v63 = vshrl.u32 %v953_v43, 16  ;;  %v314_v0 = vshll.u32 %v954_v60, 16  ;;  %v690_v20 = vld [vmem:[%s1234_s3 + $0x20] sm:$0xff] }
  0x1b   : > { %935 = vmatmul.msk.bf16.vlgmr.msra.gmra.mxu2 %vm335_vm1, %v489_v44  ;;  %v309_v58 = vsel %vm289_vm3, %v304_v53, %v308_v54  ;;  %v497_v59 = vsel %vm289_vm3, %v492_v55, %v496_v56  ;;  %v498_v1 = vshrl.u32 %v958_v47, 16  ;;  %v502_v2 = vshll.u32 %v959_v62, 16  ;;  %717 = vperm.xlu2 %1015, %v690_v20   ;;  %v694_v35 = vld [vmem:[%s1234_s3 + $0x40] sm:$0xff] }
  0x1c   : > { %712 = vperm.xlu1 %1014, %v689_v61   ;;  %v594_v3 = vrot.slane %v959_v62, 1  ;;  %v312_v4 = vor.u32 %v310_v63, %v308_v54  ;;  %v316_v5 = vrot.slane %v314_v0, 1  ;;  %v282_v12 = vunpack.c.l.b16 %v258_v6  ;;  %v1200_v53 = vld [vmem:[%s1233_s2] ss:$0 sm:$0xff] }
  0x1d   : > { %v500_v8 = vor.u32 %v498_v1, %v496_v56  ;;  %v504_v9 = vrot.slane %v502_v2, 1  ;;  %v283_v13 = vunpack.c.l.b16 %v261_v7  ;;  %v930_v21 = vor.u32 %v960_v17, %v929_v16 }
  0x1e   : > { %v595_v10 = vsel %vm588_vm2, %v592_v52, %v594_v3  ;;  %v317_v11 = vsel %vm289_vm3, %v312_v4, %v316_v5  ;;  %v318_v22 = vshrl.u32 %v954_v60, 16  ;;  %v506_v24 = vshrl.u32 %v959_v62, 16 }
  0x1f   : > { %v505_v14 = vsel %vm289_vm3, %v500_v8, %v504_v9  ;;  %v288_v15 = vpack.c.b16 %v283_v13, %v282_v12  ;;  %v596_v26 = vrot.slane %v930_v21, 1  ;;  %v388_v36 = vpack.c.b16 %v282_v12, %v282_v12 }
  0x20   : > { %v320_v27 = vor.u32 %v318_v22, %v316_v5  ;;  %v508_v30 = vor.u32 %v506_v24, %v504_v9  ;;  %v514_v38 = vshrl.u32 %v930_v21, 16 }
  0x21   : > { %727 = vperm.xlu0 %1013, %v692_v19   ;;  %v322_v23 = vshll.u32 %v288_v15, 16  ;;  %v597_v32 = vsel %vm588_vm2, %v594_v3, %v596_v26  ;;  %v326_v37 = vshrl.u32 %v288_v15, 16 }
  0x23   : > { %911 = vmatmul.msk.bf16.gmra.mxu1 %vm335_vm1, %v952_v25  ;;  %v510_v25 = vshll.u32 %v930_v21, 16  ;;  %v324_v28 = vrot.slane %v322_v23, 1  ;;  %722 = vperm.xlu2 %1015, %v691_v29  }
  0x24   : > { %732 = vperm.xlu1 %1014, %v693_v18  }
  0x25   : > { %v512_v31 = vrot.slane %v510_v25, 1  ;;  %v325_v33 = vsel %vm289_vm3, %v320_v27, %v324_v28  ;;  %v328_v39 = vor.u32 %v326_v37, %v324_v28 }
  0x27   : > { %v513_v34 = vsel %vm289_vm3, %v508_v30, %v512_v31  ;;  %v516_v40 = vor.u32 %v514_v38, %v512_v31 }
  0x2a   : > { %945 = vmatmul.msk.bf16.gmra.mxu3 %vm335_vm1, %v593_v57  ;;  %902 = vmatmul.msk.bf16.gmra.mxu0 %vm335_vm1, %v309_v58 }
  0x2b   : > { %936 = vmatmul.msk.bf16.gmra.mxu2 %vm335_vm1, %v497_v59  ;;  %737 = vperm.xlu2 %1015, %v694_v35  }
  0x33   : > { %912 = vmatmul.msk.bf16.gmra.mxu1 %vm335_vm1, %v953_v43 }
  0x3a   : > { %946 = vmatmul.msk.bf16.gmra.mxu3 %vm335_vm1, %v595_v10  ;;  %903 = vmatmul.msk.bf16.gmra.mxu0 %vm335_vm1, %v317_v11 }
  0x3b   : > { %937 = vmatmul.msk.bf16.gmra.mxu2 %vm335_vm1, %v505_v14 }
  0x43   : > { %913 = vmatmul.msk.bf16.gmra.mxu1 %vm335_vm1, %v954_v60 }
  0x4a   : > { %947 = vmatmul.msk.bf16.gmra.mxu3 %vm335_vm1, %v597_v32  ;;  %904 = vmatmul.msk.bf16.gmra.mxu0 %vm335_vm1, %v325_v33 }
  0x4b   : > { %938 = vmatmul.msk.bf16.gmra.mxu2 %vm335_vm1, %v513_v34 }
  0x53   : > { %914 = vmatmul.msk.bf16.gmra.mxu1 %vm335_vm1, %v388_v36 }
  0x5a   : > { %948 = vmatmul.msk.bf16.gmra.mxu3 %vm335_vm1, %v596_v26  ;;  %905 = vmatmul.msk.bf16.gmra.mxu0 %vm335_vm1, %v328_v39 }
  0x5b   : > { %939 = vmatmul.msk.bf16.gmra.mxu2 %vm335_vm1, %v516_v40 }
  0x75   : > { %v718_v33 = vpop.permute.xlu2 %717 }
  0x83   : > { %v698_v50 = vpop.permute.xlu0 %697 }
  0x86   : > { %v708_v10 = vpop.permute.xlu1 %707 }
  0x8b   : > { %v703_v1 = vpop.permute.xlu0 %702 }
  0x8e   : > { %v713_v24 = vpop.permute.xlu1 %712 }
  0x90   : > { %v417_v41 = vpop.f32.mrf.mxu1 }
  0x97   : > { %v364_v42 = vpop.f32.mrf.mxu0 }
  0x98   : > { %v419_v43 = vpop.f32.mrf.mxu1  ;;  %v418_v44 = vadd.f32 %v417_v41, %v364_v42 }
  0x9d   : > { %v631_v45 = vpop.f32.mrf.mxu3 }
  0x9e   : > { %v549_v47 = vpop.f32.mrf.mxu2 }
  0x9f   : > { %v366_v46 = vpop.f32.mrf.mxu0  ;;  %v573_v49 = vadd.f32 %v549_v47, %v418_v44  ;;  %v723_v47 = vpop.permute.xlu2 %722 }
  0xa0   : > { %v422_v48 = vpop.f32.mrf.mxu1  ;;  %v420_v54 = vadd.f32 %v419_v43, %v366_v46 }
  0xa1   : > { %v655_v51 = vadd.f32 %v631_v45, %v573_v49 }
  0xa3   : > { %v668_v58 = vadd.f32 %v1200_v53, %v655_v51 }
  0xa5   : > { %v633_v52 = vpop.f32.mrf.mxu3  ;;  %v677_v61 = vmax.f32 %v668_v58, 0.0 }
  0xa6   : > { %v551_v56 = vpop.f32.mrf.mxu2 }
  0xa7   : > { %v369_v55 = vpop.f32.mrf.mxu0  ;;  %v574_v59 = vadd.f32 %v551_v56, %v420_v54  ;;  %v740_v6 = vmul.f32 %v698_v50, %v677_v61 }
  0xa8   : > { %v424_v57 = vpop.f32.mrf.mxu1  ;;  %v423_v62 = vadd.f32 %v422_v48, %v369_v55 }
  0xa9   : > { %v656_v60 = vadd.f32 %v633_v52, %v574_v59 }
  0xab   : > { %v669_v0 = vadd.f32 %v1200_v53, %v656_v60 }
  0xad   : > { %v636_v63 = vpop.f32.mrf.mxu3  ;;  %v678_v2 = vmax.f32 %v669_v0, 0.0 }
  0xae   : > { %v554_v4 = vpop.f32.mrf.mxu2 }
  0xaf   : > { %v371_v3 = vpop.f32.mrf.mxu0  ;;  %v741_v7 = vmul.f32 %v703_v1, %v678_v2  ;;  %v575_v8 = vadd.f32 %v554_v4, %v423_v62 }
  0xb0   : > { %v427_v5 = vpop.f32.mrf.mxu1  ;;  %v425_v13 = vadd.f32 %v424_v57, %v371_v3 }
  0xb1   : > { %v966_v9 = vpack.c.bf16 %v741_v7, %v740_v6  ;;  %v657_v11 = vadd.f32 %v636_v63, %v575_v8  ;;  %v728_v6 = vpop.permute.xlu0 %727 }
  0xb3   : > { %967 = vst [vmem:[%s1208_s14] sm:$0xff] %v966_v9   ;;  %v670_v17 = vadd.f32 %v1200_v53, %v657_v11  ;;  %v733_v9 = vpop.permute.xlu1 %732 }
  0xb5   : > { %v638_v12 = vpop.f32.mrf.mxu3  ;;  %v679_v20 = vmax.f32 %v670_v17, 0.0 }
  0xb6   : > { %v556_v15 = vpop.f32.mrf.mxu2 }
  0xb7   : > { %v374_v14 = vpop.f32.mrf.mxu0  ;;  %v576_v18 = vadd.f32 %v556_v15, %v425_v13  ;;  %v742_v29 = vmul.f32 %v708_v10, %v679_v20 }
  0xb8   : > { %v429_v16 = vpop.f32.mrf.mxu1  ;;  %v428_v21 = vadd.f32 %v427_v5, %v374_v14 }
  0xb9   : > { %v658_v19 = vadd.f32 %v638_v12, %v576_v18 }
  0xbb   : > { %v671_v23 = vadd.f32 %v1200_v53, %v658_v19  ;;  %v738_v19 = vpop.permute.xlu2 %737 }
  0xbd   : > { %v641_v22 = vpop.f32.mrf.mxu3  ;;  %v680_v25 = vmax.f32 %v671_v23, 0.0 }
  0xbe   : > { %v559_v27 = vpop.f32.mrf.mxu2 }
  0xbf   : > { %v376_v26 = vpop.f32.mrf.mxu0  ;;  %v743_v30 = vmul.f32 %v713_v24, %v680_v25  ;;  %v577_v31 = vadd.f32 %v559_v27, %v428_v21 }
  0xc0   : > { %v432_v28 = vpop.f32.mrf.mxu1  ;;  %v430_v36 = vadd.f32 %v429_v16, %v376_v26 }
  0xc1   : > { %v971_v32 = vpack.c.bf16 %v743_v30, %v742_v29  ;;  %v659_v34 = vadd.f32 %v641_v22, %v577_v31 }
  0xc3   : > { %983 = vst [vmem:[%s1208_s14 + $0x8] sm:$0xff] %v971_v32   ;;  %v672_v40 = vadd.f32 %v1200_v53, %v659_v34 }
  0xc5   : > { %v643_v35 = vpop.f32.mrf.mxu3  ;;  %v681_v43 = vmax.f32 %v672_v40, 0.0 }
  0xc6   : > { %v561_v38 = vpop.f32.mrf.mxu2 }
  0xc7   : > { %v379_v37 = vpop.f32.mrf.mxu0  ;;  %v578_v41 = vadd.f32 %v561_v38, %v430_v36  ;;  %v744_v52 = vmul.f32 %v718_v33, %v681_v43 }
  0xc8   : > { %v434_v39 = vpop.f32.mrf.mxu1  ;;  %v433_v44 = vadd.f32 %v432_v28, %v379_v37 }
  0xc9   : > { %v660_v42 = vadd.f32 %v643_v35, %v578_v41 }
  0xcb   : > { %v673_v46 = vadd.f32 %v1200_v53, %v660_v42 }
  0xcd   : > { %v646_v45 = vpop.f32.mrf.mxu3  ;;  %v682_v48 = vmax.f32 %v673_v46, 0.0 }
  0xce   : > { %v564_v50 = vpop.f32.mrf.mxu2 }
  0xcf   : > { %v381_v49 = vpop.f32.mrf.mxu0  ;;  %v745_v54 = vmul.f32 %v723_v47, %v682_v48  ;;  %v579_v55 = vadd.f32 %v564_v50, %v433_v44 }
  0xd0   : > { %v437_v51 = vpop.f32.mrf.mxu1  ;;  %v435_v59 = vadd.f32 %v434_v39, %v381_v49 }
  0xd1   : > { %v976_v56 = vpack.c.bf16 %v745_v54, %v744_v52  ;;  %v661_v57 = vadd.f32 %v646_v45, %v579_v55 }
  0xd3   : > { %984 = vst [vmem:[%s1208_s14 + $0x10] sm:$0xff] %v976_v56   ;;  %v674_v63 = vadd.f32 %v1200_v53, %v661_v57 }
  0xd5   : > { %v648_v58 = vpop.f32.mrf.mxu3  ;;  %v683_v2 = vmax.f32 %v674_v63, 0.0 }
  0xd6   : > { %v566_v61 = vpop.f32.mrf.mxu2 }
  0xd7   : > { %v384_v60 = vpop.f32.mrf.mxu0  ;;  %v580_v0 = vadd.f32 %v566_v61, %v435_v59  ;;  %v746_v11 = vmul.f32 %v728_v6, %v683_v2 }
  0xd8   : > { %v439_v62 = vpop.f32.mrf.mxu1  ;;  %v438_v3 = vadd.f32 %v437_v51, %v384_v60 }
  0xd9   : > { %v662_v1 = vadd.f32 %v648_v58, %v580_v0 }
  0xdb   : > { %v675_v4 = vadd.f32 %v1200_v53, %v662_v1 }
  0xdd   : > { %v651_v5 = vpop.f32.mrf.mxu3  ;;  %v684_v7 = vmax.f32 %v675_v4, 0.0 }
  0xde   : > { %v569_v10 = vpop.f32.mrf.mxu2 }
  0xdf   : > { %v386_v8 = vpop.f32.mrf.mxu0  ;;  %v747_v12 = vmul.f32 %v733_v9, %v684_v7  ;;  %v581_v13 = vadd.f32 %v569_v10, %v438_v3 }
  0xe1   : > { %v981_v14 = vpack.c.bf16 %v747_v12, %v746_v11  ;;  %v663_v15 = vadd.f32 %v651_v5, %v581_v13 }
  0xe3   : > { %985 = vst [vmem:[%s1208_s14 + $0x18] sm:$0xff] %v981_v14   ;;  %v676_v16 = vadd.f32 %v1200_v53, %v663_v15 }
  0xe5   : > { %v653_v17 = vpop.f32.mrf.mxu3  ;;  %v685_v18 = vmax.f32 %v676_v16, 0.0 }
  0xe6   : > { %v571_v20 = vpop.f32.mrf.mxu2 }
  0xe7   : > { %v748_v21 = vmul.f32 %v738_v19, %v685_v18 }
  0xe9   : > { %v757_v22 = vpack.c.bf16 %v748_v21, %v748_v21 }
  0xeb   : > { %766 = vst [vmem:[%s1208_s14 + $0x20] sm:$0xf] %v757_v22 }
  0xec PF: > { %s14_s17 = sadd.s32 1, %s1042_s17   ;;  %s1236_s15 = smov %s1038_s16 }
  0xed   : > { %p11_p5 = scmp.ge.s32.totalorder %s14_s17, 4   ;;  %s1237_s16 = smov %s1239_s18 }
  0xef   :  { %13 = sbr.rel (!%p11_p5) target bundleno = 2 (0x2), region = 72 }

// kernel: vqvae_forward.13
= control target key start
LH: loop header
LB: loop body
LE: loop exit
PB: predicated region body
PF: predicated region fallthrough
CT: control target
= control target key end

     0   :  { %s2757_s15 = smov 0   ;;  %s2759_s16 = smov 0   ;;  %s3306_s0 = inlined_call_operand.vmem [shape: bf16[2,30,512], index: 0, kind: input, shape index: {}]   ;;  %s3307_s1 = inlined_call_operand.vmem [shape: bf16[2048,128], index: 1, kind: input, shape index: {}]   ;;  %s3308_s2 = inlined_call_operand.vmem [shape: f32[1,128], index: 2, kind: input, shape index: {}]   ;;  %s3309_s3 = inlined_call_operand.vmem [shape: f32[20,1], index: 3, kind: input, shape index: {}]   ;;  %s3310_s4 = inlined_call_operand.vmem [shape: bf16[2,20,128], index: 4, kind: output, shape index: {}]  }
   0x1   :  { %s2761_s17 = smov 0  }
   0x2 LB: > { %s23_s18 = sadd.s32 1, %s2725_s16  ;;  %p1986_p0 = scmp.ge.s32.totalorder %s2729_s17, 1  ;;  %s2729_s17 = sphi %s2761_s17, %s14_s17   ;;  %s2725_s16 = sphi %s2759_s16, %s3312_s16   ;;  %s2721_s15 = sphi %s2757_s15, %s3311_s15  }
   0x3   : > { %p24_p1 = scmp.ge.s32.totalorder %s23_s18, 2  ;;  %p193_p2 = scmp.lt.s32.totalorder %s2729_s17, 3 }
   0x5   : > { %s3314_s18 = smov (%p24_p1, %s23_s18), 0  ;;  %p194_p3 = pnand %p1986_p0, %p193_p2 }
   0x6   : > { %p229_p4 = scmp.lt.s32.totalorder (!%p194_p3), %s2721_s15, 1 }
   0x7   : > { %197 = sbr.rel (%p194_p3) target bundleno = 305 (0x131), region = 36 }
   0xc   : > { %v2580_v0 = vld [vmem:[%s3307_s1 + $0x138] sm:$0xff]  ;;  %v2579_v4 = vld [vmem:[%s3307_s1 + $0x130] sm:$0xff]  ;;  %s3316_s15 = smov (!%p229_p4, %s2721_s15), 1  ;;  %v2578_v8 = vld [vmem:[%s3307_s1 + $0x128] sm:$0xff]  ;;  %vm411_vm0 = vsmask.f32 7424 }
   0xd   : > { %v2588_v1 = vld [vmem:[%s3307_s1 + $0x178] sm:$0xff]  ;;  %672 = vmatpush.bf16.msra.mxu0 %v2580_v0  ;;  %v2587_v5 = vld [vmem:[%s3307_s1 + $0x170] sm:$0xff]  ;;  %s2536_s9 = sshll.u32 %s3316_s15, 6  ;;  %v2586_v9 = vld [vmem:[%s3307_s1 + $0x168] sm:$0xff]  ;;  %vm1130_vm1 = vsmask.f32 5376 }
   0xe   : > { %v2596_v2 = vld [vmem:[%s3307_s1 + $0x1b8] sm:$0xff]  ;;  %690 = vmatpush.bf16.msra.mxu1 %v2588_v1  ;;  %v2595_v6 = vld [vmem:[%s3307_s1 + $0x1b0] sm:$0xff]  ;;  %v2594_v10 = vld [vmem:[%s3307_s1 + $0x1a8] sm:$0xff]  ;;  %s2817_s24 = scalar_lea.vmem %s3306_s0, %s2536_s9  ;;  %vm1550_vm2 = vcmask 1044480   ;;  %s2678_s7 = smul.u32 12, %s3316_s15 }
   0xf   : > { %v2604_v3 = vld [vmem:[%s3307_s1 + $0x1f8] sm:$0xff]  ;;  %708 = vmatpush.bf16.msra.mxu2 %v2596_v2  ;;  %v2603_v7 = vld [vmem:[%s3307_s1 + $0x1f0] sm:$0xff]  ;;  %v2602_v11 = vld [vmem:[%s3307_s1 + $0x1e8] sm:$0xff] }
  0x10   : > { %726 = vmatpush.bf16.msra.mxu3 %v2604_v3  ;;  %v2577_v12 = vld [vmem:[%s3307_s1 + $0x120] sm:$0xff]  ;;  %v2539_v17 = vld [vmem:[%s2817_s24 + $0xc] sm:$0xf0]  ;;  %v1994_v20 = vld [vmem:[%s2817_s24 + $0x10] sm:$0xf0]  ;;  %s248_s10 = scalar_lea.vmem %s3310_s4, %s2678_s7 }
  0x11   : > { %673 = vmatpush.bf16.msra.mxu0 %v2579_v4  ;;  %v2585_v13 = vld [vmem:[%s3307_s1 + $0x160] sm:$0xff]  ;;  %v2000_v21 = vld [vmem:[%s2817_s24 + $0x8] sm:$0xf]  ;;  %v2540_v22 = vld [vmem:[%s2817_s24 + $0x14] sm:$0xf0] }
  0x12   : > { %691 = vmatpush.bf16.msra.mxu1 %v2587_v5  ;;  %v2593_v14 = vld [vmem:[%s3307_s1 + $0x1a0] sm:$0xff]  ;;  %v2576_v23 = vld [vmem:[%s3307_s1 + $0x118] sm:$0xff]  ;;  %v320_v25 = vld [vmem:[%s2817_s24 + $0x28] sm:$0x77]  ;;  %v2849_v30 = vor.u32 %v2540_v22, %v2000_v21 }
  0x13   : > { %709 = vmatpush.bf16.msra.mxu2 %v2595_v6  ;;  %v2601_v15 = vld [vmem:[%s3307_s1 + $0x1e0] sm:$0xff]  ;;  %v2584_v26 = vld [vmem:[%s3307_s1 + $0x158] sm:$0xff]  ;;  %v2538_v31 = vld [vmem:[%s2817_s24 + $0xc] sm:$0xf]  ;;  %v401_v35 = vunpack.c.l.b16 %v320_v25  ;;  %v402_v37 = vunpack.c.h.b16 %v320_v25 }
  0x14   : > { %727 = vmatpush.bf16.msra.mxu3 %v2603_v7  ;;  %v1992_v16 = vld [vmem:[%s2817_s24] sm:$0xf]  ;;  %v2537_v19 = vld [vmem:[%s2817_s24 + $0x4] sm:$0xf]  ;;  %v2002_v32 = vld [vmem:[%s2817_s24 + $0x18] sm:$0xf0] }
  0x15   : > { %674 = vmatpush.bf16.msra.mxu0 %v2578_v8  ;;  %v319_v18 = vld [vmem:[%s2817_s24 + $0x20] sm:$0x77]  ;;  %v2841_v24 = vor.u32 %v2539_v17, %v1992_v16  ;;  %v2847_v29 = vor.u32 %v2537_v19, %v1994_v20  ;;  %v2592_v33 = vld [vmem:[%s3307_s1 + $0x198] sm:$0xff]  ;;  %v2860_v38 = vor.u32 %v2538_v31, %v2002_v32  ;;  %v2575_v39 = vld [vmem:[%s3307_s1 + $0x110] sm:$0xff]  ;;  %v439_v44 = vshll.u32 %v2849_v30, 16 }
  0x16   : > { %692 = vmatpush.bf16.msra.mxu1 %v2586_v9  ;;  %v399_v27 = vunpack.c.l.b16 %v319_v18  ;;  %v400_v28 = vunpack.c.h.b16 %v319_v18  ;;  %v2600_v34 = vld [vmem:[%s3307_s1 + $0x1d8] sm:$0xff]  ;;  %v2583_v40 = vld [vmem:[%s3307_s1 + $0x150] sm:$0xff]  ;;  %v2880_v47 = vpack.c.b16 %v401_v35, %v401_v35  ;;  %v2882_v48 = vpack.c.b16 %v402_v37, %v402_v37  ;;  %v2574_v50 = vld [vmem:[%s3307_s1 + $0x108] sm:$0xff] }
  0x17   : > { %710 = vmatpush.bf16.msra.mxu2 %v2594_v10  ;;  %v415_v36 = vshll.u32 %v2841_v24, 16  ;;  %v427_v43 = vshll.u32 %v2847_v29, 16  ;;  %v2591_v45 = vld [vmem:[%s3307_s1 + $0x190] sm:$0xff]  ;;  %v451_v49 = vshll.u32 %v2860_v38, 16  ;;  %v2582_v51 = vld [vmem:[%s3307_s1 + $0x148] sm:$0xff]  ;;  %v413_v52 = vshrl.u32 %v2841_v24, 16 }
  0x18   : > { %728 = vmatpush.bf16.msra.mxu3 %v2602_v11  ;;  %v2868_v41 = vpack.c.b16 %v399_v27, %v399_v27  ;;  %v2870_v42 = vpack.c.b16 %v400_v28, %v400_v28  ;;  %v2599_v46 = vld [vmem:[%s3307_s1 + $0x1d0] sm:$0xff]  ;;  %v425_v54 = vshrl.u32 %v2847_v29, 16  ;;  %v437_v55 = vshrl.u32 %v2849_v30, 16  ;;  %v2590_v60 = vld [vmem:[%s3307_s1 + $0x188] sm:$0xff]  ;;  %v2573_v2 = vld [vmem:[%s3307_s1 + $0x100] sm:$0xff] }
  0x19   : > { %675 = vmatpush.bf16.msra.mxu0 %v2577_v12  ;;  %v417_v53 = vrot.slane %v415_v36, 1  ;;  %v429_v57 = vrot.slane %v427_v43, 1  ;;  %v441_v59 = vrot.slane %v439_v44, 1  ;;  %v2598_v61 = vld [vmem:[%s3307_s1 + $0x1c8] sm:$0xff]  ;;  %v444_v62 = vshll.u32 %v2880_v47, 16  ;;  %v2581_v3 = vld [vmem:[%s3307_s1 + $0x140] sm:$0xff] }
  0x1a   : > { %693 = vmatpush.bf16.msra.mxu1 %v2585_v13  ;;  %v420_v56 = vshll.u32 %v2868_v41, 16  ;;  %v432_v58 = vshll.u32 %v2870_v42, 16  ;;  %v449_v63 = vshrl.u32 %v2860_v38, 16  ;;  %v453_v0 = vrot.slane %v451_v49, 1  ;;  %v2589_v8 = vld [vmem:[%s3307_s1 + $0x180] sm:$0xff]  ;;  %v2556_v20 = vld [vmem:[%s3307_s1 + $0x78] sm:$0xff] }
  0x1b   : > { %711 = vmatpush.bf16.msra.mxu2 %v2593_v14  ;;  %v456_v1 = vshll.u32 %v2882_v48, 16  ;;  %v418_v4 = vor.u32 %v417_v53, %v413_v52  ;;  %v430_v6 = vor.u32 %v429_v57, %v425_v54  ;;  %v2597_v9 = vld [vmem:[%s3307_s1 + $0x1c0] sm:$0xff]  ;;  %v442_v10 = vor.u32 %v441_v59, %v437_v55  ;;  %v2564_v14 = vld [vmem:[%s3307_s1 + $0xb8] sm:$0xff]  ;;  %v2563_v22 = vld [vmem:[%s3307_s1 + $0xb0] sm:$0xff] }
  0x1c   : > { %729 = vmatpush.bf16.msra.mxu3 %v2601_v15  ;;  %v422_v5 = vrot.slane %v420_v56, 1  ;;  %v434_v7 = vrot.slane %v432_v58, 1  ;;  %v446_v11 = vrot.slane %v444_v62, 1  ;;  %v454_v12 = vor.u32 %v453_v0, %v449_v63  ;;  %v2548_v15 = vld [vmem:[%s3307_s1 + $0x38] sm:$0xff]  ;;  %v2555_v25 = vld [vmem:[%s3307_s1 + $0x70] sm:$0xff]  ;;  %v2562_v27 = vld [vmem:[%s3307_s1 + $0xa8] sm:$0xff] }
  0x1d   : > { %676 = vmatpush.bf16.msra.mxu0 %v2576_v23  ;;  %v458_v13 = vrot.slane %v456_v1, 1  ;;  %v2572_v21 = vld [vmem:[%s3307_s1 + $0xf8] sm:$0xff]  ;;  %v2547_v23 = vld [vmem:[%s3307_s1 + $0x30] sm:$0xff]  ;;  %v2546_v28 = vld [vmem:[%s3307_s1 + $0x28] sm:$0xff]  ;;  %v460_v35 = vshrl.u32 %v2868_v41, 16  ;;  %v463_v36 = vshrl.u32 %v2870_v42, 16 }
  0x1e   : > { %694 = vmatpush.bf16.msra.mxu1 %v2584_v26  ;;  %v423_v16 = vsel %vm411_vm0, %v418_v4, %v422_v5  ;;  %v435_v17 = vsel %vm411_vm0, %v430_v6, %v434_v7  ;;  %v447_v18 = vsel %vm411_vm0, %v442_v10, %v446_v11  ;;  %v2571_v26 = vld [vmem:[%s3307_s1 + $0xf0] sm:$0xff]  ;;  %v2554_v31 = vld [vmem:[%s3307_s1 + $0x68] sm:$0xff]  ;;  %v466_v37 = vshrl.u32 %v2880_v47, 16  ;;  %v2569_v43 = vld [vmem:[%s3307_s1 + $0xe0] sm:$0xff] }
  0x1f   : > { %712 = vmatpush.bf16.msra.mxu2 %v2592_v33  ;;  %v459_v19 = vsel %vm411_vm0, %v454_v12, %v458_v13  ;;  %v2570_v32 = vld [vmem:[%s3307_s1 + $0xe8] sm:$0xff]  ;;  %v2561_v33 = vld [vmem:[%s3307_s1 + $0xa0] sm:$0xff]  ;;  %v2560_v41 = vld [vmem:[%s3307_s1 + $0x98] sm:$0xff]  ;;  %v462_v44 = vor.u32 %v460_v35, %v422_v5 }
  0x20   : > { %730 = vmatpush.bf16.msra.mxu3 %v2600_v34  ;;  %v2545_v34 = vld [vmem:[%s3307_s1 + $0x20] sm:$0xff]  ;;  %v2544_v42 = vld [vmem:[%s3307_s1 + $0x18] sm:$0xff]  ;;  %v2551_v52 = vld [vmem:[%s3307_s1 + $0x50] sm:$0xff] }
  0x21   : > { %677 = vmatpush.bf16.msra.mxu0 %v2575_v39  ;;  %v469_v39 = vshrl.u32 %v2882_v48, 16  ;;  %v2552_v48 = vld [vmem:[%s3307_s1 + $0x58] sm:$0xff]  ;;  %v2567_v53 = vld [vmem:[%s3307_s1 + $0xd0] sm:$0xff]  ;;  %v2558_v54 = vld [vmem:[%s3307_s1 + $0x88] sm:$0xff] }
  0x22   : > { %695 = vmatpush.bf16.msra.mxu1 %v2583_v40  ;;  %v2553_v40 = vld [vmem:[%s3307_s1 + $0x60] sm:$0xff]  ;;  %v2568_v49 = vld [vmem:[%s3307_s1 + $0xd8] sm:$0xff]  ;;  %v2542_v55 = vld [vmem:[%s3307_s1 + $0x8] sm:$0xff] }
  0x23   : > { %713 = vmatpush.bf16.msra.mxu2 %v2591_v45  ;;  %v465_v45 = vor.u32 %v463_v36, %v434_v7  ;;  %v471_v47 = vor.u32 %v469_v39, %v458_v13  ;;  %v2550_v56 = vld [vmem:[%s3307_s1 + $0x48] sm:$0xff]  ;;  %v2557_v58 = vld [vmem:[%s3307_s1 + $0x80] sm:$0xff]  ;;  %v2624_v0 = vld [vmem:[%s3307_s1 + $0x278] sm:$0xff] }
  0x24   : > { %731 = vmatpush.bf16.msra.mxu3 %v2599_v46  ;;  %v468_v46 = vor.u32 %v466_v37, %v446_v11  ;;  %v2566_v57 = vld [vmem:[%s3307_s1 + $0xc8] sm:$0xff]  ;;  %v2541_v59 = vld [vmem:[%s3307_s1] sm:$0xff]  ;;  %v2640_v1 = vld [vmem:[%s3307_s1 + $0x2f8] sm:$0xff] }
  0x25   : > { %678 = vmatpush.bf16.msra.mxu0 %v2574_v50  ;;  %v2559_v50 = vld [vmem:[%s3307_s1 + $0x90] sm:$0xff]  ;;  %v2549_v62 = vld [vmem:[%s3307_s1 + $0x40] sm:$0xff]  ;;  %v2630_v6 = vld [vmem:[%s3307_s1 + $0x2a8] sm:$0xff] }
  0x26   : > { %696 = vmatpush.bf16.msra.mxu1 %v2582_v51  ;;  %v2543_v51 = vld [vmem:[%s3307_s1 + $0x10] sm:$0xff]  ;;  %v2565_v63 = vld [vmem:[%s3307_s1 + $0xc0] sm:$0xff]  ;;  %v2614_v7 = vld [vmem:[%s3307_s1 + $0x228] sm:$0xff] }
  0x27   : > { %714 = vmatpush.bf16.msra.mxu2 %v2590_v60  ;;  %v2632_v60 = vld [vmem:[%s3307_s1 + $0x2b8] sm:$0xff]  ;;  %v2623_v4 = vld [vmem:[%s3307_s1 + $0x270] sm:$0xff]  ;;  %v2613_v10 = vld [vmem:[%s3307_s1 + $0x220] sm:$0xff] }
  0x28   : > { %732 = vmatpush.bf16.msra.mxu3 %v2598_v61  ;;  %v2616_v61 = vld [vmem:[%s3307_s1 + $0x238] sm:$0xff]  ;;  %v2639_v5 = vld [vmem:[%s3307_s1 + $0x2f0] sm:$0xff]  ;;  %v2621_v11 = vld [vmem:[%s3307_s1 + $0x260] sm:$0xff] }
  0x29   : > { %679 = vmatpush.bf16.msra.mxu0 %v2573_v2  ;;  %v2631_v2 = vld [vmem:[%s3307_s1 + $0x2b0] sm:$0xff]  ;;  %v254_v12 = vld [vmem:[%s2817_s24 + $0x28] sm:$0x33]  ;;  %v2637_v13 = vld [vmem:[%s3307_s1 + $0x2e0] sm:$0xff] }
  0x2a   : > { %697 = vmatpush.bf16.msra.mxu1 %v2581_v3  ;;  %v2615_v3 = vld [vmem:[%s3307_s1 + $0x230] sm:$0xff]  ;;  %v2636_v36 = vld [vmem:[%s3307_s1 + $0x2d8] sm:$0xff]  ;;  %v2272_v37 = vld [vmem:[%s2817_s24 + $0x28] sm:$0xf] }
  0x2b   : > { %715 = vmatpush.bf16.msra.mxu2 %v2589_v8  ;;  %v1026_v8 = vld [vmem:[%s2817_s24] sm:$0xcc]  ;;  %v2608_v39 = vld [vmem:[%s2817_s24 + $0x34] sm:$0x10] }
  0x2c   : > { %733 = vmatpush.bf16.msra.mxu3 %v2597_v9  ;;  %680 = vmatmul.bf16.vlgmr.msra.gmra.mxu0 %v423_v16  ;;  %v3067_v9 = vld [vmem:[%s2817_s24 + $0x10] sm:$0xff] }
  0x2d   : > { %954 = vmatpush.bf16.msrb.mxu0 %v2548_v15  ;;  %698 = vmatmul.bf16.vlgmr.msra.gmra.mxu1 %v435_v17  ;;  %v3081_v15 = vld [vmem:[%s2817_s24 + $0x18] sm:$0xff] }
  0x2e   : > { %716 = vmatmul.bf16.vlgmr.msra.gmra.mxu2 %v447_v18  ;;  %972 = vmatpush.bf16.msrb.mxu1 %v2556_v20  ;;  %v2628_v17 = vld [vmem:[%s3307_s1 + $0x298] sm:$0xff]  ;;  %v1106_v18 = vunpack.c.l.b16 %v1026_v8  ;;  %v1112_v35 = vunpack.c.l.b16 %v3081_v15 }
  0x2f   : > { %990 = vmatpush.bf16.msrb.mxu2 %v2564_v14  ;;  %734 = vmatmul.bf16.vlgmr.msra.gmra.mxu3 %v459_v19  ;;  %v1027_v14 = vld [vmem:[%s2817_s24 + $0x8] sm:$0xcc]  ;;  %v1110_v19 = vunpack.c.l.b16 %v3067_v9 }
  0x30   : > { %1008 = vmatpush.bf16.msrb.mxu3 %v2572_v21  ;;  %v748_v21 = vunpack.c.l.b16 %v254_v12 }
  0x31   : > { %955 = vmatpush.bf16.msrb.mxu0 %v2547_v23  ;;  %v2264_v23 = vld [vmem:[%s2817_s24 + $0x20] sm:$0xf] }
  0x32   : > { %973 = vmatpush.bf16.msrb.mxu1 %v2555_v25  ;;  %v2607_v25 = vld [vmem:[%s2817_s24 + $0x2c] sm:$0x10] }
  0x33   : > { %991 = vmatpush.bf16.msrb.mxu2 %v2563_v22  ;;  %v2612_v22 = vld [vmem:[%s3307_s1 + $0x218] sm:$0xff] }
  0x34   : > { %1009 = vmatpush.bf16.msrb.mxu3 %v2571_v26  ;;  %v1107_v26 = vunpack.c.h.b16 %v1026_v8 }
  0x35   : > { %956 = vmatpush.bf16.msrb.mxu0 %v2546_v28  ;;  %v749_v28 = vunpack.c.h.b16 %v254_v12 }
  0x36   : > { %974 = vmatpush.bf16.msrb.mxu1 %v2554_v31  ;;  %v2620_v31 = vld [vmem:[%s3307_s1 + $0x258] sm:$0xff] }
  0x37   : > { %992 = vmatpush.bf16.msrb.mxu2 %v2562_v27  ;;  %v1111_v27 = vunpack.c.h.b16 %v3067_v9 }
  0x38   : > { %1010 = vmatpush.bf16.msrb.mxu3 %v2570_v32  ;;  %v2605_v32 = vld [vmem:[%s2817_s24 + $0x24] sm:$0xf] }
  0x39   : > { %957 = vmatpush.bf16.msrb.mxu0 %v2545_v34  ;;  %v1108_v34 = vunpack.c.l.b16 %v1027_v14 }
  0x3a   : > { %975 = vmatpush.bf16.msrb.mxu1 %v2553_v40  ;;  %v1109_v40 = vunpack.c.h.b16 %v1027_v14 }
  0x3b   : > { %993 = vmatpush.bf16.msrb.mxu2 %v2561_v33  ;;  %v2266_v33 = vld [vmem:[%s2817_s24 + $0x30] sm:$0x10] }
  0x3c   : > { %1011 = vmatpush.bf16.msrb.mxu3 %v2569_v43  ;;  %685 = vmatmul.bf16.gmra.mxu0 %v462_v44  ;;  %v1113_v43 = vunpack.c.h.b16 %v3081_v15  ;;  %v1122_v44 = vpack.c.b16 %v1110_v19, %v1106_v18 }
  0x3d   : > { %958 = vmatpush.bf16.msrb.mxu0 %v2544_v42  ;;  %703 = vmatmul.bf16.gmra.mxu1 %v465_v45  ;;  %v2627_v42 = vld [vmem:[%s3307_s1 + $0x290] sm:$0xff]  ;;  %v3110_v45 = vor.u32 %v2607_v25, %v2264_v23  ;;  %v2664_v25 = vld [vmem:[%s3307_s1 + $0x3b8] sm:$0xff] }
  0x3e   : > { %721 = vmatmul.bf16.gmra.mxu2 %v468_v46  ;;  %976 = vmatpush.bf16.msrb.mxu1 %v2552_v48  ;;  %v2606_v46 = vld [vmem:[%s2817_s24 + $0x2c] sm:$0xf] }
  0x3f   : > { %994 = vmatpush.bf16.msrb.mxu2 %v2560_v41  ;;  %739 = vmatmul.bf16.gmra.mxu3 %v471_v47  ;;  %v2274_v47 = vld [vmem:[%s2817_s24 + $0x38] sm:$0x10] }
  0x40   : > { %1012 = vmatpush.bf16.msrb.mxu3 %v2568_v49  ;;  %v752_v49 = vpack.c.b16 %v748_v21, %v748_v21 }
  0x41   : > { %959 = vmatpush.bf16.msrb.mxu0 %v2543_v51  ;;  %v3116_v51 = vor.u32 %v2605_v32, %v2266_v33 }
  0x42   : > { %977 = vmatpush.bf16.msrb.mxu1 %v2551_v52  ;;  %v753_v52 = vpack.c.b16 %v749_v28, %v749_v28 }
  0x43   : > { %995 = vmatpush.bf16.msrb.mxu2 %v2559_v50  ;;  %v1123_v50 = vpack.c.b16 %v1111_v27, %v1107_v26  ;;  %v2609_v26 = vld [vmem:[%s3307_s1 + $0x200] sm:$0xff] }
  0x44   : > { %1013 = vmatpush.bf16.msrb.mxu3 %v2567_v53  ;;  %v2611_v53 = vld [vmem:[%s3307_s1 + $0x210] sm:$0xff] }
  0x45   : > { %960 = vmatpush.bf16.msrb.mxu0 %v2542_v55  ;;  %v3123_v55 = vor.u32 %v2608_v39, %v2272_v37 }
  0x46   : > { %978 = vmatpush.bf16.msrb.mxu1 %v2550_v56  ;;  %v2619_v56 = vld [vmem:[%s3307_s1 + $0x250] sm:$0xff] }
  0x47   : > { %996 = vmatpush.bf16.msrb.mxu2 %v2558_v54  ;;  %v1124_v54 = vpack.c.b16 %v1112_v35, %v1108_v34  ;;  %v2617_v34 = vld [vmem:[%s3307_s1 + $0x240] sm:$0xff] }
  0x48   : > { %1014 = vmatpush.bf16.msrb.mxu3 %v2566_v57  ;;  %v2635_v57 = vld [vmem:[%s3307_s1 + $0x2d0] sm:$0xff] }
  0x49   : > { %961 = vmatpush.bf16.msrb.mxu0 %v2541_v59  ;;  %v3133_v59 = vor.u32 %v2606_v46, %v2274_v47 }
  0x4a   : > { %979 = vmatpush.bf16.msrb.mxu1 %v2549_v62  ;;  %v1135_v62 = vshll.u32 %v1122_v44, 16 }
  0x4b   : > { %997 = vmatpush.bf16.msrb.mxu2 %v2557_v58  ;;  %v1125_v58 = vpack.c.b16 %v1113_v43, %v1109_v40  ;;  %v1194_v12 = vshll.u32 %v3133_v59, 16 }
  0x4c   : > { %1015 = vmatpush.bf16.msrb.mxu3 %v2565_v63  ;;  %962 = vmatmul.bf16.vlgmr.msrb.gmra.mxu0 %v2841_v24  ;;  %v2622_v24 = vld [vmem:[%s3307_s1 + $0x268] sm:$0xff]  ;;  %v1140_v63 = vshrl.u32 %v3110_v45, 16 }
  0x4d   : > { %1399 = vmatpush.bf16.msra.mxu0 %v2616_v61  ;;  %980 = vmatmul.bf16.vlgmr.msrb.gmra.mxu1 %v2847_v29  ;;  %v2638_v29 = vld [vmem:[%s3307_s1 + $0x2e8] sm:$0xff]  ;;  %v1132_v61 = vshrl.u32 %v1122_v44, 16  ;;  %v1183_v8 = vshrl.u32 %v1125_v58, 16  ;;  %v2656_v44 = vld [vmem:[%s3307_s1 + $0x378] sm:$0xff] }
  0x4e   : > { %1417 = vmatpush.bf16.msra.mxu1 %v2624_v0  ;;  %998 = vmatmul.bf16.vlgmr.msrb.gmra.mxu2 %v2849_v30  ;;  %v2629_v30 = vld [vmem:[%s3307_s1 + $0x2a0] sm:$0xff]  ;;  %v1143_v0 = vshll.u32 %v3110_v45, 16 }
  0x4f   : > { %1435 = vmatpush.bf16.msra.mxu2 %v2632_v60  ;;  %1016 = vmatmul.bf16.vlgmr.msrb.gmra.mxu3 %v2860_v38  ;;  %v253_v38 = vld [vmem:[%s2817_s24 + $0x20] sm:$0x33]  ;;  %v2626_v60 = vld [vmem:[%s3307_s1 + $0x288] sm:$0xff]  ;;  %v1134_v14 = vrot.slane %v1132_v61, 2  ;;  %v1185_v37 = vrot.slane %v1183_v8, 2  ;;  %v2644_v8 = vld [vmem:[%s3307_s1 + $0x318] sm:$0xff] }
  0x50   : > { %1453 = vmatpush.bf16.msra.mxu3 %v2640_v1  ;;  %v746_v16 = vunpack.c.l.b16 %v253_v38  ;;  %v747_v20 = vunpack.c.h.b16 %v253_v38  ;;  %v1149_v1 = vshrl.u32 %v1123_v50, 16  ;;  %v2634_v38 = vld [vmem:[%s3307_s1 + $0x2c8] sm:$0xff]  ;;  %v1145_v18 = vrot.slane %v1143_v0, 3 }
  0x51   : > { %1400 = vmatpush.bf16.msra.mxu0 %v2615_v3  ;;  %v1157_v3 = vshrl.u32 %v3116_v51, 16 }
  0x52   : > { %1418 = vmatpush.bf16.msra.mxu1 %v2623_v4  ;;  %v750_v41 = vpack.c.b16 %v746_v16, %v746_v16  ;;  %v751_v48 = vpack.c.b16 %v747_v20, %v747_v20  ;;  %v1160_v4 = vshll.u32 %v3116_v51, 16  ;;  %v1137_v16 = vrot.slane %v1135_v62, 3 }
  0x53   : > { %1436 = vmatpush.bf16.msra.mxu2 %v2631_v2  ;;  %v1152_v2 = vshll.u32 %v1123_v50, 16  ;;  %v1151_v20 = vrot.slane %v1149_v1, 2  ;;  %v2671_v1 = vld [vmem:[%s3307_s1 + $0x3f0] sm:$0xff] }
  0x54   : > { %1454 = vmatpush.bf16.msra.mxu3 %v2639_v5  ;;  %v2610_v5 = vld [vmem:[%s3307_s1 + $0x208] sm:$0xff]  ;;  %v1162_v23 = vrot.slane %v1160_v4, 3  ;;  %v1138_v46 = vor.u32 %v1137_v16, %v1134_v14  ;;  %v1474_v14 = vld [vmem:[%s2817_s24] sm:$0x88]  ;;  %v2667_v16 = vld [vmem:[%s3307_s1 + $0x3d0] sm:$0xff] }
  0x55   : > { %1401 = vmatpush.bf16.msra.mxu0 %v2614_v7  ;;  %v1169_v7 = vshll.u32 %v1124_v54, 16  ;;  %v1154_v21 = vrot.slane %v1152_v2, 3  ;;  %v2662_v2 = vld [vmem:[%s3307_s1 + $0x3a8] sm:$0xff] }
  0x56   : > { %1419 = vmatpush.bf16.msra.mxu1 %v2622_v24  ;;  %v1174_v24 = vshrl.u32 %v3123_v55, 16  ;;  %v2646_v4 = vld [vmem:[%s3307_s1 + $0x328] sm:$0xff] }
  0x57   : > { %1437 = vmatpush.bf16.msra.mxu2 %v2630_v6  ;;  %v1166_v6 = vshrl.u32 %v1124_v54, 16  ;;  %v1155_v50 = vor.u32 %v1154_v21, %v1151_v20  ;;  %v2650_v20 = vld [vmem:[%s3307_s1 + $0x348] sm:$0xff]  ;;  %v1542_v21 = vunpack.c.l.b16 %v1474_v14 }
  0x58   : > { %1455 = vmatpush.bf16.msra.mxu3 %v2638_v29  ;;  %v1177_v29 = vshll.u32 %v3123_v55, 16  ;;  %v1176_v32 = vrot.slane %v1174_v24, 2  ;;  %v2645_v24 = vld [vmem:[%s3307_s1 + $0x320] sm:$0xff] }
  0x59   : > { %1402 = vmatpush.bf16.msra.mxu0 %v2613_v10  ;;  %v1186_v10 = vshll.u32 %v1125_v58, 16  ;;  %v1168_v28 = vrot.slane %v1166_v6, 2  ;;  %v2655_v58 = vld [vmem:[%s3307_s1 + $0x370] sm:$0xff]  ;;  %v2661_v6 = vld [vmem:[%s3307_s1 + $0x3a0] sm:$0xff] }
  0x5a   : > { %1420 = vmatpush.bf16.msra.mxu1 %v2621_v11  ;;  %v1191_v11 = vshrl.u32 %v3133_v59, 16  ;;  %v1179_v33 = vrot.slane %v1177_v29, 3  ;;  %v2669_v29 = vld [vmem:[%s3307_s1 + $0x3e0] sm:$0xff] }
  0x5b   : > { %1438 = vmatpush.bf16.msra.mxu2 %v2629_v30  ;;  %v2618_v30 = vld [vmem:[%s3307_s1 + $0x248] sm:$0xff]  ;;  %v1188_v39 = vrot.slane %v1186_v10, 3  ;;  %v2668_v10 = vld [vmem:[%s3307_s1 + $0x3d8] sm:$0xff] }
  0x5c   : > { %1456 = vmatpush.bf16.msra.mxu3 %v2637_v13  ;;  %967 = vmatmul.bf16.gmra.mxu0 %v750_v41  ;;  %v2625_v13 = vld [vmem:[%s3307_s1 + $0x280] sm:$0xff]  ;;  %v1193_v40 = vrot.slane %v1191_v11, 2  ;;  %v1196_v41 = vrot.slane %v1194_v12, 3  ;;  %v1180_v54 = vor.u32 %v1179_v33, %v1176_v32  ;;  %v2659_v11 = vld [vmem:[%s3307_s1 + $0x390] sm:$0xff] }
  0x5d   : > { %1403 = vmatpush.bf16.msra.mxu0 %v2612_v22  ;;  %985 = vmatmul.bf16.gmra.mxu1 %v751_v48  ;;  %v1159_v22 = vrot.slane %v1157_v3, 2  ;;  %v2672_v48 = vld [vmem:[%s3307_s1 + $0x3f8] sm:$0xff]  ;;  %v2654_v3 = vld [vmem:[%s3307_s1 + $0x368] sm:$0xff]  ;;  %v2651_v12 = vld [vmem:[%s3307_s1 + $0x350] sm:$0xff] }
  0x5e   : > { %1421 = vmatpush.bf16.msra.mxu1 %v2620_v31  ;;  %1003 = vmatmul.bf16.gmra.mxu2 %v752_v49  ;;  %v1171_v31 = vrot.slane %v1169_v7, 3  ;;  %v2663_v49 = vld [vmem:[%s3307_s1 + $0x3b0] sm:$0xff]  ;;  %v2653_v7 = vld [vmem:[%s3307_s1 + $0x360] sm:$0xff] }
  0x5f   : > { %1439 = vmatpush.bf16.msra.mxu2 %v2628_v17  ;;  %1021 = vmatmul.bf16.gmra.mxu3 %v753_v52  ;;  %v1142_v17 = vrot.slane %v1140_v63, 2  ;;  %v1163_v52 = vor.u32 %v1162_v23, %v1159_v22  ;;  %v2647_v63 = vld [vmem:[%s3307_s1 + $0x330] sm:$0xff]  ;;  %v2642_v22 = vld [vmem:[%s3307_s1 + $0x308] sm:$0xff]  ;;  %v1543_v23 = vunpack.c.h.b16 %v1474_v14  ;;  %v2649_v33 = vld [vmem:[%s3307_s1 + $0x340] sm:$0xff] }
  0x60   : > { %1457 = vmatpush.bf16.msra.mxu3 %v2636_v36  ;;  %v2633_v36 = vld [vmem:[%s3307_s1 + $0x2c0] sm:$0xff] }
  0x61   : > { %1404 = vmatpush.bf16.msra.mxu0 %v2611_v53  ;;  %v1146_v47 = vor.u32 %v1145_v18, %v1142_v17  ;;  %v1172_v53 = vor.u32 %v1171_v31, %v1168_v28  ;;  %v1164_v61 = vsel %vm1130_vm1, %v1155_v50, %v1163_v52  ;;  %v2658_v17 = vld [vmem:[%s3307_s1 + $0x388] sm:$0xff]  ;;  %v2657_v31 = vld [vmem:[%s3307_s1 + $0x380] sm:$0xff] }
  0x62   : > { %1422 = vmatpush.bf16.msra.mxu1 %v2619_v56  ;;  %v1189_v56 = vor.u32 %v1188_v39, %v1185_v37  ;;  %v1475_v18 = vld [vmem:[%s2817_s24 + $0x8] sm:$0x88]  ;;  %v2641_v37 = vld [vmem:[%s3307_s1 + $0x300] sm:$0xff]  ;;  %v1547_v39 = vpack.c.b16 %v1111_v27, %v1543_v23  ;;  %v1555_v27 = vrot.slane %v3116_v51, 3 }
  0x63   : > { %1440 = vmatpush.bf16.msra.mxu2 %v2627_v42  ;;  %v2648_v42 = vld [vmem:[%s3307_s1 + $0x338] sm:$0xff]  ;;  %v1181_v62 = vsel %vm1130_vm1, %v1172_v53, %v1180_v54  ;;  %v2666_v28 = vld [vmem:[%s3307_s1 + $0x3c8] sm:$0xff]  ;;  %v1545_v32 = vunpack.c.h.b16 %v1475_v18 }
  0x64   : > { %1458 = vmatpush.bf16.msra.mxu3 %v2635_v57  ;;  %v1197_v57 = vor.u32 %v1196_v41, %v1193_v40  ;;  %v2665_v41 = vld [vmem:[%s3307_s1 + $0x3c0] sm:$0xff]  ;;  %v1554_v9 = vrot.slane %v1547_v39, 3 }
  0x65   : > { %1405 = vmatpush.bf16.msra.mxu0 %v2610_v5  ;;  %v2670_v5 = vld [vmem:[%s3307_s1 + $0x3e8] sm:$0xff] }
  0x66   : > { %1423 = vmatpush.bf16.msra.mxu1 %v2618_v30  ;;  %v1198_v0 = vsel %vm1130_vm1, %v1189_v56, %v1197_v57  ;;  %v2660_v30 = vld [vmem:[%s3307_s1 + $0x398] sm:$0xff]  ;;  %v1556_v50 = vsel %vm1550_vm2, %v1554_v9, %v1555_v27 }
  0x67   : > { %1441 = vmatpush.bf16.msra.mxu2 %v2626_v60  ;;  %v1147_v60 = vsel %vm1130_vm1, %v1138_v46, %v1146_v47 }
  0x68   : > { %1459 = vmatpush.bf16.msra.mxu3 %v2634_v38  ;;  %v2652_v38 = vld [vmem:[%s3307_s1 + $0x358] sm:$0xff] }
  0x69   : > { %1406 = vmatpush.bf16.msra.mxu0 %v2609_v26  ;;  %v1848_v26 = vld [vmem:[%s3309_s3] sm:$0xff] }
  0x6a   : > { %1424 = vmatpush.bf16.msra.mxu1 %v2617_v34  ;;  %v2731_v34 = vmov 0  }
  0x6b   : > { %1442 = vmatpush.bf16.msra.mxu2 %v2625_v13  ;;  %v2643_v13 = vld [vmem:[%s3307_s1 + $0x310] sm:$0xff]  ;;  %2704 = vset.pattern.permute.xlu0 %v2731_v34 }
  0x6c   : > { %1460 = vmatpush.bf16.msra.mxu3 %v2633_v36  ;;  %1407 = vmatmul.bf16.vlgmr.msra.gmra.mxu0 %v1147_v60  ;;  %v1546_v36 = vpack.c.b16 %v1110_v19, %v1542_v21  ;;  %v1549_v19 = vpack.c.b16 %v1113_v43, %v1545_v32  ;;  %v1849_v43 = vld [vmem:[%s3309_s3 + $0x8] sm:$0xff] }
  0x6d   : > { %1763 = vmatpush.bf16.msrb.mxu0 %v2648_v42  ;;  %1425 = vmatmul.bf16.vlgmr.msra.gmra.mxu1 %v1164_v61 }
  0x6e   : > { %1781 = vmatpush.bf16.msrb.mxu1 %v2656_v44  ;;  %1443 = vmatmul.bf16.vlgmr.msra.gmra.mxu2 %v1181_v62  ;;  %v1551_v42 = vrot.slane %v1546_v36, 3  ;;  %v1552_v44 = vrot.slane %v3110_v45, 3  ;;  %v1850_v45 = vld [vmem:[%s3309_s3 + $0x10] sm:$0xf] }
  0x6f   : > { %1799 = vmatpush.bf16.msrb.mxu2 %v2664_v25  ;;  %1461 = vmatmul.bf16.vlgmr.msra.gmra.mxu3 %v1198_v0  ;;  %v1544_v25 = vunpack.c.l.b16 %v1475_v18 }
  0x70   : > { %1817 = vmatpush.bf16.msrb.mxu3 %v2672_v48  ;;  %1853 = vperm.xlu0 %2704, %v1848_v26   ;;  %v1561_v48 = vrot.slane %v3133_v59, 3 }
  0x71   : > { %1764 = vmatpush.bf16.msrb.mxu0 %v2647_v63  ;;  %2705 = vset.pattern.permute.xlu1 %v2731_v34  ;;  %v1548_v40 = vpack.c.b16 %v1112_v35, %v1544_v25  ;;  %v1558_v35 = vrot.slane %v3123_v55, 3 }
  0x72   : > { %1782 = vmatpush.bf16.msrb.mxu1 %v2655_v58  ;;  %1863 = vperm.xlu1 %2705, %v1850_v45  }
  0x73   : > { %1800 = vmatpush.bf16.msrb.mxu2 %v2663_v49  ;;  %v1557_v46 = vrot.slane %v1548_v40, 3  ;;  %v1553_v49 = vsel %vm1550_vm2, %v1551_v42, %v1552_v44 }
  0x74   : > { %1818 = vmatpush.bf16.msrb.mxu3 %v2671_v1 }
  0x75   : > { %1765 = vmatpush.bf16.msrb.mxu0 %v2646_v4  ;;  %v1559_v15 = vsel %vm1550_vm2, %v1557_v46, %v1558_v35 }
  0x76   : > { %1783 = vmatpush.bf16.msrb.mxu1 %v2654_v3 }
  0x77   : > { %1801 = vmatpush.bf16.msrb.mxu2 %v2662_v2 }
  0x78   : > { %1819 = vmatpush.bf16.msrb.mxu3 %v2670_v5  ;;  %1858 = vperm.xlu0 %2704, %v1849_v43  }
  0x79   : > { %1766 = vmatpush.bf16.msrb.mxu0 %v2645_v24 }
  0x7a   : > { %1784 = vmatpush.bf16.msrb.mxu1 %v2653_v7 }
  0x7b   : > { %1802 = vmatpush.bf16.msrb.mxu2 %v2661_v6 }
  0x7c   : > { %1820 = vmatpush.bf16.msrb.mxu3 %v2669_v29  ;;  %1412 = vmatmul.bf16.gmra.mxu0 %v1146_v47  ;;  %v1560_v47 = vrot.slane %v1549_v19, 3 }
  0x7d   : > { %1767 = vmatpush.bf16.msrb.mxu0 %v2644_v8  ;;  %1430 = vmatmul.bf16.gmra.mxu1 %v1163_v52 }
  0x7e   : > { %1785 = vmatpush.bf16.msrb.mxu1 %v2652_v38  ;;  %1448 = vmatmul.bf16.gmra.mxu2 %v1180_v54  ;;  %v1562_v52 = vsel %vm1550_vm2, %v1560_v47, %v1561_v48 }
  0x7f   : > { %1803 = vmatpush.bf16.msrb.mxu2 %v2660_v30  ;;  %1466 = vmatmul.bf16.gmra.mxu3 %v1197_v57 }
  0x80   : > { %1821 = vmatpush.bf16.msrb.mxu3 %v2668_v10 }
  0x81   : > { %1768 = vmatpush.bf16.msrb.mxu0 %v2643_v13 }
  0x82   : > { %1786 = vmatpush.bf16.msrb.mxu1 %v2651_v12 }
  0x83   : > { %1804 = vmatpush.bf16.msrb.mxu2 %v2659_v11 }
  0x84   : > { %1822 = vmatpush.bf16.msrb.mxu3 %v2667_v16 }
  0x85   : > { %1769 = vmatpush.bf16.msrb.mxu0 %v2642_v22 }
  0x86   : > { %1787 = vmatpush.bf16.msrb.mxu1 %v2650_v20 }
  0x87   : > { %1805 = vmatpush.bf16.msrb.mxu2 %v2658_v17 }
  0x88   : > { %1823 = vmatpush.bf16.msrb.mxu3 %v2666_v28 }
  0x89   : > { %1770 = vmatpush.bf16.msrb.mxu0 %v2641_v37 }
  0x8a   : > { %1788 = vmatpush.bf16.msrb.mxu1 %v2649_v33 }
  0x8b   : > { %1806 = vmatpush.bf16.msrb.mxu2 %v2657_v31 }
  0x8c   : > { %1824 = vmatpush.bf16.msrb.mxu3 %v2665_v41  ;;  %1771 = vmatmul.bf16.vlgmr.msrb.gmra.mxu0 %v1553_v49 }
  0x8d   : > { %1789 = vmatmul.bf16.vlgmr.msrb.gmra.mxu1 %v1556_v50 }
  0x8e   : > { %1807 = vmatmul.bf16.vlgmr.msrb.gmra.mxu2 %v1559_v15 }
  0x8f   : > { %1825 = vmatmul.bf16.vlgmr.msrb.gmra.mxu3 %v1562_v52 }
  0x9c   : > { %1776 = vmatmul.bf16.gmra.mxu0 %v1552_v44 }
  0x9d   : > { %1794 = vmatmul.bf16.gmra.mxu1 %v1555_v27 }
  0x9e   : > { %1812 = vmatmul.bf16.gmra.mxu2 %v1558_v35 }
  0x9f   : > { %1830 = vmatmul.bf16.gmra.mxu3 %v1561_v48 }
  0xa9   : > { %v681_v51 = vpop.f32.mrf.mxu0 }
  0xaa   : > { %v699_v55 = vpop.f32.mrf.mxu1 }
  0xab   : > { %v700_v59 = vadd.f32 %v699_v55, %v681_v51 }
  0xb1   : > { %v717_v53 = vpop.f32.mrf.mxu2  ;;  %v683_v57 = vpop.f32.mrf.mxu0 }
  0xb2   : > { %v735_v54 = vpop.f32.mrf.mxu3  ;;  %v718_v56 = vadd.f32 %v717_v53, %v700_v59  ;;  %v701_v58 = vpop.f32.mrf.mxu1 }
  0xb3   : > { %v702_v60 = vadd.f32 %v701_v58, %v683_v57 }
  0xb4   : > { %v736_v61 = vadd.f32 %v735_v54, %v718_v56 }
  0xb9   : > { %v719_v62 = vpop.f32.mrf.mxu2  ;;  %v686_v1 = vpop.f32.mrf.mxu0 }
  0xba   : > { %v737_v63 = vpop.f32.mrf.mxu3  ;;  %v720_v0 = vadd.f32 %v719_v62, %v702_v60  ;;  %v704_v2 = vpop.f32.mrf.mxu1 }
  0xbb   : > { %v705_v3 = vadd.f32 %v704_v2, %v686_v1 }
  0xbc   : > { %v738_v4 = vadd.f32 %v737_v63, %v720_v0 }
  0xc1   : > { %v722_v5 = vpop.f32.mrf.mxu2  ;;  %v688_v24 = vpop.f32.mrf.mxu0 }
  0xc2   : > { %v740_v6 = vpop.f32.mrf.mxu3  ;;  %v723_v7 = vadd.f32 %v722_v5, %v705_v3  ;;  %v706_v29 = vpop.f32.mrf.mxu1 }
  0xc4   : > { %v741_v30 = vadd.f32 %v740_v6, %v723_v7 }
  0xc9   : > { %v724_v38 = vpop.f32.mrf.mxu2  ;;  %v963_v10 = vpop.f32.mrf.mxu0 }
  0xca   : > { %v742_v8 = vpop.f32.mrf.mxu3  ;;  %v964_v11 = vadd.f32 %v963_v10, %v736_v61  ;;  %v981_v12 = vpop.f32.mrf.mxu1 }
  0xcc   : > { %v982_v13 = vadd.f32 %v981_v12, %v964_v11 }
  0xd1   : > { %v999_v14 = vpop.f32.mrf.mxu2  ;;  %v965_v18 = vpop.f32.mrf.mxu0 }
  0xd2   : > { %v1000_v16 = vadd.f32 %v999_v14, %v982_v13  ;;  %v1017_v17 = vpop.f32.mrf.mxu3  ;;  %v966_v20 = vadd.f32 %v965_v18, %v738_v4  ;;  %v983_v21 = vpop.f32.mrf.mxu1 }
  0xd4   : > { %v1018_v22 = vadd.f32 %v1017_v17, %v1000_v16  ;;  %v984_v23 = vadd.f32 %v983_v21, %v966_v20 }
  0xd9   : > { %v1001_v25 = vpop.f32.mrf.mxu2  ;;  %v968_v28 = vpop.f32.mrf.mxu0 }
  0xda   : > { %v1019_v26 = vpop.f32.mrf.mxu3  ;;  %v969_v31 = vadd.f32 %v968_v28, %v741_v30  ;;  %v986_v32 = vpop.f32.mrf.mxu1  ;;  %v1002_v3 = vadd.f32 %v1001_v25, %v984_v23  ;;  %v2706_v30 = vld [vmem:[%s3308_s2] ss:$0 sm:$0xff] }
  0xdc   : > { %v987_v33 = vadd.f32 %v986_v32, %v969_v31  ;;  %v1020_v8 = vadd.f32 %v1019_v26, %v1002_v3 }
  0xe1   : > { %v1004_v34 = vpop.f32.mrf.mxu2  ;;  %v970_v37 = vpop.f32.mrf.mxu0 }
  0xe2   : > { %v1022_v36 = vpop.f32.mrf.mxu3  ;;  %v988_v39 = vpop.f32.mrf.mxu1  ;;  %v1005_v20 = vadd.f32 %v1004_v34, %v987_v33 }
  0xe3   : > { %v1854_v5 = vpop.permute.xlu0 %1853 }
  0xe4   : > { %v1023_v37 = vadd.f32 %v1022_v36, %v1005_v20 }
  0xe9   : > { %v1006_v40 = vpop.f32.mrf.mxu2  ;;  %v1408_v19 = vpop.f32.mrf.mxu0 }
  0xea   : > { %v1024_v41 = vpop.f32.mrf.mxu3  ;;  %v1426_v42 = vpop.f32.mrf.mxu1 }
  0xeb   : > { %v1427_v51 = vadd.f32 %v1426_v42, %v1408_v19  ;;  %v1859_v32 = vpop.permute.xlu0 %1858 }
  0xf1   : > { %v1444_v44 = vpop.f32.mrf.mxu2  ;;  %v1410_v27 = vpop.f32.mrf.mxu0 }
  0xf2   : > { %v1462_v9 = vpop.f32.mrf.mxu3  ;;  %v1428_v46 = vpop.f32.mrf.mxu1  ;;  %v1445_v54 = vadd.f32 %v1444_v44, %v1427_v51 }
  0xf3   : > { %v1429_v60 = vadd.f32 %v1428_v46, %v1410_v27 }
  0xf4   : > { %v1463_v58 = vadd.f32 %v1462_v9, %v1445_v54 }
  0xf6   : > { %v1471_v4 = vadd.f32 %v1463_v58, %v1018_v22 }
  0xf9   : > { %v1446_v35 = vpop.f32.mrf.mxu2  ;;  %v1413_v48 = vpop.f32.mrf.mxu0 }
  0xfa   : > { %v1464_v47 = vpop.f32.mrf.mxu3  ;;  %v1431_v49 = vpop.f32.mrf.mxu1  ;;  %v1447_v1 = vadd.f32 %v1446_v35, %v1429_v60 }
  0xfb   : > { %v1432_v7 = vadd.f32 %v1431_v49, %v1413_v48 }
  0xfc   : > { %v1465_v6 = vadd.f32 %v1464_v47, %v1447_v1  ;;  %v1864_v47 = vpop.permute.xlu1 %1863 }
  0xfe   : > { %v1472_v14 = vadd.f32 %v1465_v6, %v1020_v8 }
 0x101   : > { %v1449_v50 = vpop.f32.mrf.mxu2  ;;  %v1415_v43 = vpop.f32.mrf.mxu0 }
 0x102   : > { %v1467_v15 = vpop.f32.mrf.mxu3  ;;  %v1433_v52 = vpop.f32.mrf.mxu1  ;;  %v1450_v16 = vadd.f32 %v1449_v50, %v1432_v7 }
 0x104   : > { %v1468_v23 = vadd.f32 %v1467_v15, %v1450_v16 }
 0x106   : > { %v1473_v42 = vadd.f32 %v1468_v23, %v1023_v37 }
 0x109   : > { %v1451_v45 = vpop.f32.mrf.mxu2  ;;  %v1772_v59 = vpop.f32.mrf.mxu0 }
 0x10a   : > { %v1469_v55 = vpop.f32.mrf.mxu3  ;;  %v1790_v53 = vpop.f32.mrf.mxu1 }
 0x10b   : > { %v1791_v56 = vadd.f32 %v1790_v53, %v1772_v59 }
 0x111   : > { %v1808_v57 = vpop.f32.mrf.mxu2  ;;  %v1774_v63 = vpop.f32.mrf.mxu0 }
 0x112   : > { %v1809_v61 = vadd.f32 %v1808_v57, %v1791_v56  ;;  %v1826_v62 = vpop.f32.mrf.mxu3  ;;  %v1792_v0 = vpop.f32.mrf.mxu1 }
 0x113   : > { %v1793_v29 = vadd.f32 %v1792_v0, %v1774_v63 }
 0x114   : > { %v1827_v2 = vadd.f32 %v1826_v62, %v1809_v61 }
 0x116   : > { %v1835_v24 = vadd.f32 %v1827_v2, %v1471_v4 }
 0x118   : > { %v1842_v18 = vadd.f32 %v2706_v30, %v1835_v24 }
 0x119   : > { %v1810_v38 = vpop.f32.mrf.mxu2  ;;  %v1777_v12 = vpop.f32.mrf.mxu0 }
 0x11a   : > { %v1811_v10 = vadd.f32 %v1810_v38, %v1793_v29  ;;  %v1828_v11 = vpop.f32.mrf.mxu3  ;;  %v1795_v13 = vpop.f32.mrf.mxu1  ;;  %v1845_v25 = vmax.f32 %v1842_v18, 0.0 }
 0x11b   : > { %v1796_v22 = vadd.f32 %v1795_v13, %v1777_v12 }
 0x11c   : > { %v1829_v17 = vadd.f32 %v1828_v11, %v1811_v10  ;;  %v1866_v44 = vmul.f32 %v1854_v5, %v1845_v25 }
 0x11e   : > { %v1836_v21 = vadd.f32 %v1829_v17, %v1472_v14 }
 0x120   : > { %v1843_v28 = vadd.f32 %v2706_v30, %v1836_v21 }
 0x121   : > { %v1813_v31 = vpop.f32.mrf.mxu2  ;;  %v1779_v41 = vpop.f32.mrf.mxu0 }
 0x122   : > { %v1814_v26 = vadd.f32 %v1813_v31, %v1796_v22  ;;  %v1831_v39 = vpop.f32.mrf.mxu3  ;;  %v1846_v40 = vmax.f32 %v1843_v28, 0.0  ;;  %v1797_v19 = vpop.f32.mrf.mxu1 }
 0x124   : > { %v1832_v9 = vadd.f32 %v1831_v39, %v1814_v26  ;;  %v1867_v27 = vmul.f32 %v1859_v32, %v1846_v40 }
 0x126   : > { %v1837_v33 = vadd.f32 %v1832_v9, %v1473_v42  ;;  %v2676_v34 = vpack.c.bf16 %v1867_v27, %v1866_v44 }
 0x128   : > { %v1844_v46 = vadd.f32 %v2706_v30, %v1837_v33  ;;  %2677 = vst [vmem:[%s248_s10] sm:$0xff] %v2676_v34  }
 0x129   : > { %v1815_v35 = vpop.f32.mrf.mxu2 }
 0x12a   : > { %v1833_v36 = vpop.f32.mrf.mxu3  ;;  %v1847_v48 = vmax.f32 %v1844_v46, 0.0 }
 0x12c   : > { %v1868_v49 = vmul.f32 %v1864_v47, %v1847_v48 }
 0x12e   : > { %v1871_v50 = vpack.c.bf16 %v1868_v49, %v1868_v49 }
 0x130   : > { %1874 = vst [vmem:[%s248_s10 + $0x8] sm:$0x3] %v1871_v50 }
 0x131 PF: > { %s14_s17 = sadd.s32 1, %s2729_s17   ;;  %s3311_s15 = smov %s2725_s16 }
 0x132   : > { %p11_p5 = scmp.ge.s32.totalorder %s14_s17, 4   ;;  %s3312_s16 = smov %s3314_s18 }
 0x134   :  { %13 = sbr.rel (!%p11_p5) target bundleno = 2 (0x2), region = 72 }

// kernel: vqvae_forward.14
= control target key start
LH: loop header
LB: loop body
LE: loop exit
PB: predicated region body
PF: predicated region fallthrough
CT: control target
= control target key end

     0   :  { %s1760_s15 = smov 0   ;;  %s1762_s16 = smov 0   ;;  %s2115_s0 = inlined_call_operand.vmem [shape: bf16[2,42,128], index: 0, kind: input, shape index: {}]   ;;  %s2116_s1 = inlined_call_operand.vmem [shape: bf16[1152,128], index: 1, kind: input, shape index: {}]   ;;  %s2117_s2 = inlined_call_operand.vmem [shape: f32[1,128], index: 2, kind: input, shape index: {}]   ;;  %s2118_s3 = inlined_call_operand.vmem [shape: f32[24,1], index: 3, kind: input, shape index: {}]   ;;  %s2119_s4 = inlined_call_operand.vmem [shape: bf16[2,24,128], index: 4, kind: output, shape index: {}]  }
   0x1   :  { %s1764_s17 = smov 0  }
   0x2 LB: > { %s23_s18 = sadd.s32 1, %s1728_s16  ;;  %p1293_p0 = scmp.ge.s32.totalorder %s1732_s17, 1  ;;  %s1732_s17 = sphi %s1764_s17, %s14_s17   ;;  %s1728_s16 = sphi %s1762_s16, %s2121_s16   ;;  %s1724_s15 = sphi %s1760_s15, %s2120_s15  }
   0x3   : > { %p24_p1 = scmp.ge.s32.totalorder %s23_s18, 2  ;;  %p193_p2 = scmp.lt.s32.totalorder %s1732_s17, 3 }
   0x5   : > { %s2123_s18 = smov (%p24_p1, %s23_s18), 0  ;;  %p194_p3 = pnand %p1293_p0, %p193_p2 }
   0x6   : > { %p229_p4 = scmp.lt.s32.totalorder (!%p194_p3), %s1724_s15, 1 }
   0x7   : > { %197 = sbr.rel (%p194_p3) target bundleno = 251 (0xfb), region = 36 }
   0xc   : > { %v1601_v0 = vld [vmem:[%s2116_s1 + $0x78] sm:$0xff]  ;;  %v1600_v4 = vld [vmem:[%s2116_s1 + $0x70] sm:$0xff]  ;;  %s2125_s15 = smov (!%p229_p4, %s1724_s15), 1  ;;  %v1599_v8 = vld [vmem:[%s2116_s1 + $0x68] sm:$0xff]  ;;  %vm295_vm0 = vsmask.f32 7424 }
   0xd   : > { %v1593_v1 = vld [vmem:[%s2116_s1 + $0x38] sm:$0xff]  ;;  %361 = vmatpush.bf16.msra.mxu0 %v1601_v0  ;;  %v1592_v5 = vld [vmem:[%s2116_s1 + $0x30] sm:$0xff]  ;;  %s1680_s9 = smul.u32 24, %s2125_s15  ;;  %v1591_v9 = vld [vmem:[%s2116_s1 + $0x28] sm:$0xff]  ;;  %vm468_vm1 = vcmask 1046528   ;;  %vm567_vm2 = vcmask 1044480  }
   0xe   : > { %v1609_v2 = vld [vmem:[%s2116_s1 + $0xb8] sm:$0xff]  ;;  %430 = vmatpush.bf16.msra.mxu1 %v1593_v1  ;;  %v1608_v6 = vld [vmem:[%s2116_s1 + $0xb0] sm:$0xff]  ;;  %v1607_v10 = vld [vmem:[%s2116_s1 + $0xa8] sm:$0xff]  ;;  %vm662_vm3 = vsmask.f32 4352  ;;  %vm870_vm4 = vcmask 1045504  }
   0xf   : > { %v1617_v3 = vld [vmem:[%s2116_s1 + $0xf8] sm:$0xff]  ;;  %522 = vmatpush.bf16.msra.mxu2 %v1609_v2  ;;  %v1616_v7 = vld [vmem:[%s2116_s1 + $0xf0] sm:$0xff]  ;;  %v1615_v11 = vld [vmem:[%s2116_s1 + $0xe8] sm:$0xff]  ;;  %s1820_s24 = scalar_lea.vmem %s2115_s0, %s1680_s9  ;;  %vm965_vm5 = vsmask.f32 5376  ;;  %s1681_s26 = smul.u32 12, %s2125_s15 }
  0x10   : > { %621 = vmatpush.bf16.msra.mxu3 %v1617_v3  ;;  %v1598_v12 = vld [vmem:[%s2116_s1 + $0x60] sm:$0xff]  ;;  %v1835_v16 = vld [vmem:[%s1820_s24 + $0x8] sm:$0xff]   ;;  %v1597_v18 = vld [vmem:[%s2116_s1 + $0x58] sm:$0xff] }
  0x11   : > { %362 = vmatpush.bf16.msra.mxu0 %v1600_v4  ;;  %v1590_v13 = vld [vmem:[%s2116_s1 + $0x20] sm:$0xff]  ;;  %v268_v17 = vld [vmem:[%s1820_s24 + $0xc] sm:$0x1]  ;;  %v1589_v19 = vld [vmem:[%s2116_s1 + $0x18] sm:$0xff]  ;;  %v1845_v20 = vunpack.c.l.b16 %v1835_v16  ;;  %s248_s29 = scalar_lea.vmem %s2119_s4, %s1681_s26 }
  0x12   : > { %431 = vmatpush.bf16.msra.mxu1 %v1592_v5  ;;  %v1606_v14 = vld [vmem:[%s2116_s1 + $0xa0] sm:$0xff]  ;;  %v292_v21 = vunpack.c.l.b16 %v268_v17  ;;  %v1605_v22 = vld [vmem:[%s2116_s1 + $0x98] sm:$0xff]  ;;  %v544_v27 = vld [vmem:[%s1820_s24 + $0xc] sm:$0x7] }
  0x13   : > { %523 = vmatpush.bf16.msra.mxu2 %v1608_v6  ;;  %v1614_v15 = vld [vmem:[%s2116_s1 + $0xe0] sm:$0xff]  ;;  %v1613_v23 = vld [vmem:[%s2116_s1 + $0xd8] sm:$0xff]  ;;  %v1596_v28 = vld [vmem:[%s2116_s1 + $0x50] sm:$0xff]  ;;  %v564_v37 = vunpack.c.l.b16 %v544_v27  ;;  %v379_v27 = vpack.c.b16 %v1845_v20, %v1845_v20 }
  0x14   : > { %622 = vmatpush.bf16.msra.mxu3 %v1616_v7  ;;  %v1854_v24 = vld [vmem:[%s1820_s24] sm:$0xff]   ;;  %v1588_v29 = vld [vmem:[%s2116_s1 + $0x10] sm:$0xff]  ;;  %v1866_v30 = vpack.c.b16 %v292_v21, %v1845_v20  ;;  %v1595_v38 = vld [vmem:[%s2116_s1 + $0x48] sm:$0xff] }
  0x15   : > { %363 = vmatpush.bf16.msra.mxu0 %v1599_v8  ;;  %v448_v25 = vld [vmem:[%s1820_s24] sm:$0xe]  ;;  %v299_v31 = vshll.u32 %v1854_v24, 16  ;;  %v1604_v32 = vld [vmem:[%s2116_s1 + $0x90] sm:$0xff]  ;;  %v1876_v34 = vunpack.c.h.b16 %v1854_v24  ;;  %v1587_v39 = vld [vmem:[%s2116_s1 + $0x8] sm:$0xff]  ;;  %v297_v40 = vshrl.u32 %v1854_v24, 16  ;;  %v1897_v47 = vpack.c.b16 %v564_v37, %v1845_v20 }
  0x16   : > { %432 = vmatpush.bf16.msra.mxu1 %v1591_v9  ;;  %v543_v26 = vld [vmem:[%s1820_s24] sm:$0x8]  ;;  %v1612_v33 = vld [vmem:[%s2116_s1 + $0xd0] sm:$0xff]  ;;  %v466_v35 = vunpack.c.l.b16 %v448_v25  ;;  %v304_v42 = vshll.u32 %v1866_v30, 16  ;;  %v1603_v43 = vld [vmem:[%s2116_s1 + $0x88] sm:$0xff]  ;;  %v470_v55 = vrot.slane %v1866_v30, 1 }
  0x17   : > { %524 = vmatpush.bf16.msra.mxu2 %v1607_v10  ;;  %v563_v36 = vunpack.c.l.b16 %v543_v26  ;;  %v301_v41 = vrot.slane %v299_v31, 1  ;;  %v1611_v44 = vld [vmem:[%s2116_s1 + $0xc8] sm:$0xff]  ;;  %v1594_v48 = vld [vmem:[%s2116_s1 + $0x40] sm:$0xff]  ;;  %v569_v57 = vrot.slane %v1897_v47, 3  ;;  %v1625_v58 = vld [vmem:[%s2116_s1 + $0x138] sm:$0xff] }
  0x18   : > { %623 = vmatpush.bf16.msra.mxu3 %v1615_v11  ;;  %v467_v45 = vpack.c.b16 %v1876_v34, %v466_v35  ;;  %v1586_v49 = vld [vmem:[%s2116_s1] sm:$0xff]  ;;  %v1905_v51 = vrot.slane %v304_v42, 1  ;;  %v1633_v59 = vld [vmem:[%s2116_s1 + $0x178] sm:$0xff]  ;;  %v1624_v1 = vld [vmem:[%s2116_s1 + $0x130] sm:$0xff] }
  0x19   : > { %364 = vmatpush.bf16.msra.mxu0 %v1598_v12  ;;  %v1894_v46 = vpack.c.b16 %v1876_v34, %v563_v36  ;;  %v302_v50 = vor.u32 %v301_v41, %v297_v40  ;;  %v1602_v52 = vld [vmem:[%s2116_s1 + $0x80] sm:$0xff]  ;;  %v1641_v62 = vld [vmem:[%s2116_s1 + $0x1b8] sm:$0xff]  ;;  %v1632_v2 = vld [vmem:[%s2116_s1 + $0x170] sm:$0xff]  ;;  %v675_v40 = vshll.u32 %v1835_v16, 16 }
  0x1a   : > { %433 = vmatpush.bf16.msra.mxu1 %v1590_v13  ;;  %v1610_v53 = vld [vmem:[%s2116_s1 + $0xc0] sm:$0xff]  ;;  %v469_v54 = vrot.slane %v467_v45, 1  ;;  %v1649_v0 = vld [vmem:[%s2116_s1 + $0x1f8] sm:$0xff]  ;;  %v1640_v3 = vld [vmem:[%s2116_s1 + $0x1b0] sm:$0xff] }
  0x1b   : > { %525 = vmatpush.bf16.msra.mxu2 %v1606_v14  ;;  %v568_v56 = vrot.slane %v1894_v46, 3  ;;  %v307_v60 = vsel %vm295_vm0, %v302_v50, %v1905_v51  ;;  %v1648_v4 = vld [vmem:[%s2116_s1 + $0x1f0] sm:$0xff]  ;;  %v1623_v5 = vld [vmem:[%s2116_s1 + $0x128] sm:$0xff]  ;;  %v1622_v9 = vld [vmem:[%s2116_s1 + $0x120] sm:$0xff]  ;;  %v308_v14 = vshrl.u32 %v1866_v30, 16  ;;  %v664_v37 = vshrl.u32 %v1894_v46, 16 }
  0x1c   : > { %624 = vmatpush.bf16.msra.mxu3 %v1614_v15  ;;  %v471_v61 = vsel %vm468_vm1, %v469_v54, %v470_v55  ;;  %v1631_v6 = vld [vmem:[%s2116_s1 + $0x168] sm:$0xff]  ;;  %v1630_v10 = vld [vmem:[%s2116_s1 + $0x160] sm:$0xff]  ;;  %v945_v13 = vld [vmem:[%s1820_s24 + $0x10] sm:$0x7]  ;;  %v660_v15 = vunpack.c.h.b16 %v1835_v16 }
  0x1d   : > { %365 = vmatpush.bf16.msra.mxu0 %v1597_v18  ;;  %v570_v63 = vsel %vm567_vm2, %v568_v56, %v569_v57  ;;  %v1639_v7 = vld [vmem:[%s2116_s1 + $0x1a8] sm:$0xff]  ;;  %v840_v11 = vld [vmem:[%s1820_s24 + $0x4] sm:$0xc]  ;;  %v1629_v25 = vld [vmem:[%s2116_s1 + $0x158] sm:$0xff]  ;;  %v310_v26 = vor.u32 %v308_v14, %v1905_v51  ;;  %v1734_v14 = vmov 0  }
  0x1e   : > { %434 = vmatpush.bf16.msra.mxu1 %v1589_v19  ;;  %v1647_v8 = vld [vmem:[%s2116_s1 + $0x1e8] sm:$0xff]  ;;  %v1638_v17 = vld [vmem:[%s2116_s1 + $0x1a0] sm:$0xff]  ;;  %v843_v31 = vld [vmem:[%s1820_s24 + $0x10] sm:$0x3]  ;;  %1707 = vset.pattern.permute.xlu0 %v1734_v14 }
  0x1f   : > { %526 = vmatpush.bf16.msra.mxu2 %v1605_v22  ;;  %v1968_v12 = vld [vmem:[%s1820_s24 + $0x8] sm:$0xff]   ;;  %v1646_v18 = vld [vmem:[%s2116_s1 + $0x1e0] sm:$0xff]  ;;  %v864_v22 = vunpack.c.l.b16 %v840_v11  ;;  %v1620_v35 = vld [vmem:[%s2116_s1 + $0x110] sm:$0xff]  ;;  %v867_v41 = vunpack.c.l.b16 %v843_v31  ;;  %1708 = vset.pattern.permute.xlu1 %v1734_v14 }
  0x20   : > { %625 = vmatpush.bf16.msra.mxu3 %v1613_v23  ;;  %v1664_v19 = vunpack.c.l.b16 %v1968_v12  ;;  %v1665_v21 = vunpack.c.h.b16 %v1968_v12  ;;  %v963_v23 = vunpack.c.l.b16 %v945_v13  ;;  %v1628_v36 = vld [vmem:[%s2116_s1 + $0x150] sm:$0xff]  ;;  %v1619_v47 = vld [vmem:[%s2116_s1 + $0x108] sm:$0xff] }
  0x21   : > { %366 = vmatpush.bf16.msra.mxu0 %v1596_v28  ;;  %v1637_v28 = vld [vmem:[%s2116_s1 + $0x198] sm:$0xff]  ;;  %v1636_v42 = vld [vmem:[%s2116_s1 + $0x190] sm:$0xff]  ;;  %v1635_v54 = vld [vmem:[%s2116_s1 + $0x188] sm:$0xff] }
  0x22   : > { %435 = vmatpush.bf16.msra.mxu1 %v1588_v29  ;;  %v1645_v29 = vld [vmem:[%s2116_s1 + $0x1d8] sm:$0xff]  ;;  %v1644_v30 = vld [vmem:[%s2116_s1 + $0x1d0] sm:$0xff]  ;;  %v1655_v13 = vld [vmem:[%s2116_s1 + $0x228] sm:$0xff] }
  0x23   : > { %527 = vmatpush.bf16.msra.mxu2 %v1604_v32  ;;  %v1999_v32 = vpack.c.b16 %v1664_v19, %v864_v22  ;;  %v1656_v11 = vld [vmem:[%s2116_s1 + $0x230] sm:$0xff]  ;;  %v768_v22 = vpack.c.b16 %v660_v15, %v660_v15 }
  0x24   : > { %626 = vmatpush.bf16.msra.mxu3 %v1612_v33  ;;  %v2001_v33 = vpack.c.b16 %v963_v23, %v1665_v21  ;;  %v1652_v23 = vld [vmem:[%s2116_s1 + $0x210] sm:$0xff] }
  0x25   : > { %367 = vmatpush.bf16.msra.mxu0 %v1595_v38  ;;  %v667_v38 = vshll.u32 %v1894_v46, 16 }
  0x26   : > { %436 = vmatpush.bf16.msra.mxu1 %v1587_v39  ;;  %v672_v39 = vshrl.u32 %v1835_v16, 16  ;;  %v975_v45 = vshrl.u32 %v2001_v33, 16  ;;  %v978_v46 = vshll.u32 %v2001_v33, 16  ;;  %v1651_v16 = vld [vmem:[%s2116_s1 + $0x208] sm:$0xff] }
  0x27   : > { %528 = vmatpush.bf16.msra.mxu2 %v1603_v43  ;;  %v967_v43 = vshrl.u32 %v1999_v32, 16  ;;  %v669_v50 = vrot.slane %v667_v38, 4 }
  0x28   : > { %627 = vmatpush.bf16.msra.mxu3 %v1611_v44  ;;  %v970_v44 = vshll.u32 %v1999_v32, 16  ;;  %v674_v51 = vrot.slane %v672_v39, 3 }
  0x29   : > { %368 = vmatpush.bf16.msra.mxu0 %v1594_v48  ;;  %v1627_v48 = vld [vmem:[%s2116_s1 + $0x148] sm:$0xff]  ;;  %v969_v56 = vrot.slane %v967_v43, 2 }
  0x2a   : > { %437 = vmatpush.bf16.msra.mxu1 %v1586_v49  ;;  %v666_v49 = vrot.slane %v664_v37, 3 }
  0x2b   : > { %529 = vmatpush.bf16.msra.mxu2 %v1602_v52  ;;  %v677_v52 = vrot.slane %v675_v40, 4 }
  0x2c   : > { %628 = vmatpush.bf16.msra.mxu3 %v1610_v53  ;;  %369 = vmatmul.bf16.vlgmr.msra.gmra.mxu0 %v307_v60  ;;  %v2033_v53 = vpack.c.b16 %v867_v41, %v1665_v21  ;;  %v1618_v60 = vld [vmem:[%s2116_s1 + $0x100] sm:$0xff]  ;;  %v1653_v21 = vld [vmem:[%s2116_s1 + $0x218] sm:$0xff] }
  0x2d   : > { %730 = vmatpush.bf16.msrb.mxu0 %v1625_v58  ;;  %438 = vmatmul.bf16.vlgmr.msra.gmra.mxu1 %v1854_v24  ;;  %v1621_v24 = vld [vmem:[%s2116_s1 + $0x118] sm:$0xff]  ;;  %v977_v58 = vrot.slane %v975_v45, 2 }
  0x2e   : > { %819 = vmatpush.bf16.msrb.mxu1 %v1633_v59  ;;  %530 = vmatmul.bf16.vlgmr.msra.gmra.mxu2 %v471_v61  ;;  %v980_v59 = vrot.slane %v978_v46, 3  ;;  %v1626_v61 = vld [vmem:[%s2116_s1 + $0x140] sm:$0xff] }
  0x2f   : > { %629 = vmatmul.bf16.vlgmr.msra.gmra.mxu3 %v570_v63  ;;  %924 = vmatpush.bf16.msrb.mxu2 %v1641_v62  ;;  %v1657_v62 = vld [vmem:[%s2116_s1 + $0x238] sm:$0xff]  ;;  %v670_v63 = vor.u32 %v669_v50, %v666_v49 }
  0x30   : > { %1033 = vmatpush.bf16.msrb.mxu3 %v1649_v0  ;;  %v678_v0 = vor.u32 %v677_v52, %v674_v51 }
  0x31   : > { %731 = vmatpush.bf16.msrb.mxu0 %v1624_v1  ;;  %v1634_v1 = vld [vmem:[%s2116_s1 + $0x180] sm:$0xff] }
  0x32   : > { %820 = vmatpush.bf16.msrb.mxu1 %v1632_v2  ;;  %v1642_v2 = vld [vmem:[%s2116_s1 + $0x1c0] sm:$0xff] }
  0x33   : > { %925 = vmatpush.bf16.msrb.mxu2 %v1640_v3  ;;  %v871_v3 = vrot.slane %v1999_v32, 2 }
  0x34   : > { %1034 = vmatpush.bf16.msrb.mxu3 %v1648_v4  ;;  %v872_v4 = vrot.slane %v2033_v53, 2 }
  0x35   : > { %732 = vmatpush.bf16.msrb.mxu0 %v1623_v5 }
  0x36   : > { %821 = vmatpush.bf16.msrb.mxu1 %v1631_v6  ;;  %v981_v6 = vor.u32 %v980_v59, %v977_v58 }
  0x37   : > { %926 = vmatpush.bf16.msrb.mxu2 %v1639_v7  ;;  %v767_v7 = vpack.c.b16 %v1845_v20, %v1876_v34  ;;  %v1155_v20 = vld [vmem:[%s2118_s3] sm:$0xff]  ;;  %v1157_v34 = vld [vmem:[%s2118_s3 + $0x10] sm:$0xff] }
  0x38   : > { %1035 = vmatpush.bf16.msrb.mxu3 %v1647_v8  ;;  %v679_v8 = vsel %vm662_vm3, %v670_v63, %v678_v0  ;;  %1160 = vperm.xlu0 %1707, %v1155_v20   ;;  %v1709_v20 = vld [vmem:[%s2117_s2] ss:$0 sm:$0xff] }
  0x39   : > { %733 = vmatpush.bf16.msrb.mxu0 %v1622_v9  ;;  %v873_v9 = vsel %vm870_vm4, %v871_v3, %v872_v4  ;;  %1170 = vperm.xlu1 %1708, %v1157_v34  }
  0x3a   : > { %822 = vmatpush.bf16.msrb.mxu1 %v1630_v10 }
  0x3b   : > { %927 = vmatpush.bf16.msrb.mxu2 %v1638_v17  ;;  %v1654_v17 = vld [vmem:[%s2116_s1 + $0x220] sm:$0xff] }
  0x3c   : > { %1036 = vmatpush.bf16.msrb.mxu3 %v1646_v18  ;;  %374 = vmatmul.bf16.gmra.mxu0 %v310_v26  ;;  %v1156_v18 = vld [vmem:[%s2118_s3 + $0x8] sm:$0xff]  ;;  %v1650_v26 = vld [vmem:[%s2116_s1 + $0x200] sm:$0xff] }
  0x3d   : > { %734 = vmatpush.bf16.msrb.mxu0 %v1621_v24  ;;  %443 = vmatmul.bf16.gmra.mxu1 %v379_v27  ;;  %v1054_v24 = vld [vmem:[%s1820_s24 + $0x4] sm:$0x8] }
  0x3e   : > { %823 = vmatpush.bf16.msrb.mxu1 %v1629_v25  ;;  %535 = vmatmul.bf16.gmra.mxu2 %v470_v55  ;;  %v1643_v55 = vld [vmem:[%s2116_s1 + $0x1c8] sm:$0xff]  ;;  %v1072_v25 = vunpack.c.l.b16 %v1054_v24 }
  0x3f   : > { %634 = vmatmul.bf16.gmra.mxu3 %v569_v57  ;;  %928 = vmatpush.bf16.msrb.mxu2 %v1637_v28  ;;  %v972_v57 = vrot.slane %v970_v44, 3  ;;  %v1075_v28 = vrot.slane %v2001_v33, 3 }
  0x40   : > { %1037 = vmatpush.bf16.msrb.mxu3 %v1645_v29  ;;  %1165 = vperm.xlu0 %1707, %v1156_v18   ;;  %v1073_v15 = vpack.c.b16 %v1664_v19, %v1072_v25 }
  0x41   : > { %735 = vmatpush.bf16.msrb.mxu0 %v1620_v35  ;;  %v973_v5 = vor.u32 %v972_v57, %v969_v56 }
  0x42   : > { %824 = vmatpush.bf16.msrb.mxu1 %v1628_v36  ;;  %v1074_v27 = vrot.slane %v1073_v15, 3 }
  0x43   : > { %929 = vmatpush.bf16.msrb.mxu2 %v1636_v42  ;;  %v982_v10 = vsel %vm965_vm5, %v973_v5, %v981_v6 }
  0x44   : > { %1038 = vmatpush.bf16.msrb.mxu3 %v1644_v30  ;;  %v1076_v29 = vsel %vm567_vm2, %v1074_v27, %v1075_v28 }
  0x45   : > { %736 = vmatpush.bf16.msrb.mxu0 %v1619_v47 }
  0x46   : > { %825 = vmatpush.bf16.msrb.mxu1 %v1627_v48 }
  0x47   : > { %930 = vmatpush.bf16.msrb.mxu2 %v1635_v54 }
  0x48   : > { %1039 = vmatpush.bf16.msrb.mxu3 %v1643_v55 }
  0x49   : > { %737 = vmatpush.bf16.msrb.mxu0 %v1618_v60 }
  0x4a   : > { %826 = vmatpush.bf16.msrb.mxu1 %v1626_v61 }
  0x4b   : > { %931 = vmatpush.bf16.msrb.mxu2 %v1634_v1 }
  0x4c   : > { %1040 = vmatpush.bf16.msrb.mxu3 %v1642_v2  ;;  %738 = vmatmul.bf16.vlgmr.msrb.gmra.mxu0 %v679_v8 }
  0x4d   : > { %1127 = vmatpush.bf16.msra.mxu0 %v1657_v62  ;;  %827 = vmatmul.bf16.vlgmr.msrb.gmra.mxu1 %v767_v7 }
  0x4e   : > { %1672 = vmatpush.bf16.msra.mxu1 %v1657_v62  ;;  %932 = vmatmul.bf16.vlgmr.msrb.gmra.mxu2 %v873_v9 }
  0x4f   : > { %1041 = vmatmul.bf16.vlgmr.msrb.gmra.mxu3 %v982_v10 }
  0x51   : > { %1128 = vmatpush.bf16.msra.mxu0 %v1656_v11 }
  0x52   : > { %1673 = vmatpush.bf16.msra.mxu1 %v1656_v11 }
  0x55   : > { %1129 = vmatpush.bf16.msra.mxu0 %v1655_v13 }
  0x56   : > { %1674 = vmatpush.bf16.msra.mxu1 %v1655_v13 }
  0x59   : > { %1130 = vmatpush.bf16.msra.mxu0 %v1654_v17 }
  0x5a   : > { %1675 = vmatpush.bf16.msra.mxu1 %v1654_v17 }
  0x5c   : > { %743 = vmatmul.bf16.gmra.mxu0 %v678_v0 }
  0x5d   : > { %1131 = vmatpush.bf16.msra.mxu0 %v1653_v21  ;;  %832 = vmatmul.bf16.gmra.mxu1 %v768_v22 }
  0x5e   : > { %1676 = vmatpush.bf16.msra.mxu1 %v1653_v21  ;;  %937 = vmatmul.bf16.gmra.mxu2 %v872_v4 }
  0x5f   : > { %1046 = vmatmul.bf16.gmra.mxu3 %v981_v6 }
  0x61   : > { %1132 = vmatpush.bf16.msra.mxu0 %v1652_v23 }
  0x62   : > { %1677 = vmatpush.bf16.msra.mxu1 %v1652_v23 }
  0x65   : > { %1133 = vmatpush.bf16.msra.mxu0 %v1651_v16 }
  0x66   : > { %1678 = vmatpush.bf16.msra.mxu1 %v1651_v16 }
  0x69   : > { %1134 = vmatpush.bf16.msra.mxu0 %v1650_v26 }
  0x6a   : > { %1679 = vmatpush.bf16.msra.mxu1 %v1650_v26 }
  0x6c   : > { %1135 = vmatmul.bf16.vlgmr.msra.gmra.mxu0 %v1076_v29 }
  0x6d   : > { %1140 = vmatmul.bf16.vlgmr.msra.gmra.mxu1 %v1075_v28 }
  0xa9   : > { %v370_v31 = vpop.f32.mrf.mxu0 }
  0xaa   : > { %v439_v32 = vpop.f32.mrf.mxu1  ;;  %v1161_v22 = vpop.permute.xlu0 %1160 }
  0xab   : > { %v440_v57 = vadd.f32 %v439_v32, %v370_v31  ;;  %v1171_v23 = vpop.permute.xlu1 %1170 }
  0xb1   : > { %v531_v35 = vpop.f32.mrf.mxu2  ;;  %v372_v19 = vpop.f32.mrf.mxu0 }
  0xb2   : > { %v630_v12 = vpop.f32.mrf.mxu3  ;;  %v441_v36 = vpop.f32.mrf.mxu1  ;;  %v540_v58 = vadd.f32 %v531_v35, %v440_v57 }
  0xb3   : > { %v442_v60 = vadd.f32 %v441_v36, %v372_v19  ;;  %v1166_v19 = vpop.permute.xlu0 %1165 }
  0xb4   : > { %v639_v62 = vadd.f32 %v630_v12, %v540_v58 }
  0xb9   : > { %v533_v37 = vpop.f32.mrf.mxu2  ;;  %v375_v39 = vpop.f32.mrf.mxu0 }
  0xba   : > { %v632_v38 = vpop.f32.mrf.mxu3  ;;  %v444_v40 = vpop.f32.mrf.mxu1  ;;  %v541_v63 = vadd.f32 %v533_v37, %v442_v60 }
  0xbb   : > { %v445_v51 = vadd.f32 %v444_v40, %v375_v39 }
  0xbc   : > { %v640_v6 = vadd.f32 %v632_v38, %v541_v63 }
  0xc1   : > { %v536_v41 = vpop.f32.mrf.mxu2  ;;  %v377_v30 = vpop.f32.mrf.mxu0 }
  0xc2   : > { %v635_v42 = vpop.f32.mrf.mxu3  ;;  %v446_v33 = vpop.f32.mrf.mxu1  ;;  %v542_v52 = vadd.f32 %v536_v41, %v445_v51 }
  0xc4   : > { %v641_v59 = vadd.f32 %v635_v42, %v542_v52 }
  0xc9   : > { %v538_v43 = vpop.f32.mrf.mxu2  ;;  %v739_v45 = vpop.f32.mrf.mxu0 }
  0xca   : > { %v637_v44 = vpop.f32.mrf.mxu3  ;;  %v828_v46 = vpop.f32.mrf.mxu1  ;;  %v748_v4 = vadd.f32 %v739_v45, %v639_v62 }
  0xcc   : > { %v837_v8 = vadd.f32 %v828_v46, %v748_v4 }
  0xd1   : > { %v933_v47 = vpop.f32.mrf.mxu2  ;;  %v741_v49 = vpop.f32.mrf.mxu0 }
  0xd2   : > { %v1042_v48 = vpop.f32.mrf.mxu3  ;;  %v830_v50 = vpop.f32.mrf.mxu1  ;;  %v749_v9 = vadd.f32 %v741_v49, %v640_v6  ;;  %v942_v10 = vadd.f32 %v933_v47, %v837_v8 }
  0xd4   : > { %v838_v18 = vadd.f32 %v830_v50, %v749_v9  ;;  %v1051_v24 = vadd.f32 %v1042_v48, %v942_v10 }
  0xd9   : > { %v935_v53 = vpop.f32.mrf.mxu2  ;;  %v744_v55 = vpop.f32.mrf.mxu0 }
  0xda   : > { %v1044_v54 = vpop.f32.mrf.mxu3  ;;  %v833_v56 = vpop.f32.mrf.mxu1  ;;  %v750_v61 = vadd.f32 %v744_v55, %v641_v59  ;;  %v943_v25 = vadd.f32 %v935_v53, %v838_v18 }
  0xdc   : > { %v839_v5 = vadd.f32 %v833_v56, %v750_v61  ;;  %v1052_v27 = vadd.f32 %v1044_v54, %v943_v25 }
  0xe1   : > { %v938_v0 = vpop.f32.mrf.mxu2  ;;  %v746_v2 = vpop.f32.mrf.mxu0 }
  0xe2   : > { %v1047_v1 = vpop.f32.mrf.mxu3  ;;  %v835_v3 = vpop.f32.mrf.mxu1  ;;  %v944_v7 = vadd.f32 %v938_v0, %v839_v5 }
  0xe4   : > { %v1053_v11 = vadd.f32 %v1047_v1, %v944_v7 }
  0xe9   : > { %v940_v34 = vpop.f32.mrf.mxu2  ;;  %v1136_v14 = vpop.f32.mrf.mxu0 }
  0xea   : > { %v1049_v13 = vpop.f32.mrf.mxu3  ;;  %v1141_v17 = vpop.f32.mrf.mxu1  ;;  %v1145_v15 = vadd.f32 %v1136_v14, %v1051_v24 }
  0xeb   : > { %v1147_v21 = vadd.f32 %v1141_v17, %v1053_v11 }
  0xec   : > { %v1152_v32 = vadd.f32 %v1709_v20, %v1145_v15 }
  0xed   : > { %v1154_v16 = vadd.f32 %v1709_v20, %v1147_v21 }
  0xee   : > { %v1173_v36 = vmul.f32 %v1161_v22, %v1152_v32 }
  0xef   : > { %v1175_v26 = vmul.f32 %v1171_v23, %v1154_v16 }
  0xf1   : > { %v1178_v28 = vpack.c.bf16 %v1175_v26, %v1175_v26  ;;  %v1138_v29 = vpop.f32.mrf.mxu0 }
  0xf2   : > { %v1143_v31 = vpop.f32.mrf.mxu1  ;;  %v1146_v35 = vadd.f32 %v1138_v29, %v1052_v27 }
  0xf3   : > { %1181 = vst [vmem:[%s248_s29 + $0x8] sm:$0xf] %v1178_v28 }
  0xf4   : > { %v1153_v12 = vadd.f32 %v1709_v20, %v1146_v35 }
  0xf6   : > { %v1174_v37 = vmul.f32 %v1166_v19, %v1153_v12 }
  0xf8   : > { %v1669_v38 = vpack.c.bf16 %v1174_v37, %v1173_v36 }
  0xfa   : > { %1670 = vst [vmem:[%s248_s29] sm:$0xff] %v1669_v38  }
  0xfb PF: > { %s14_s17 = sadd.s32 1, %s1732_s17   ;;  %s2120_s15 = smov %s1728_s16 }
  0xfc   : > { %p11_p5 = scmp.ge.s32.totalorder %s14_s17, 4   ;;  %s2121_s16 = smov %s2123_s18 }
  0xfe   :  { %13 = sbr.rel (!%p11_p5) target bundleno = 2 (0x2), region = 72 }

// kernel: vqvae_forward.15
= control target key start
LH: loop header
LB: loop body
LE: loop exit
PB: predicated region body
PF: predicated region fallthrough
CT: control target
= control target key end

     0   :  { %s1851_s21 = smov 0   ;;  %s2237_s0 = inlined_call_operand.vmem [shape: bf16[2,38,128], index: 0, kind: input, shape index: {}]   ;;  %s2238_s1 = inlined_call_operand.vmem [shape: bf16[1152,128], index: 1, kind: input, shape index: {}]   ;;  %s2239_s2 = inlined_call_operand.vmem [shape: f32[1,128], index: 2, kind: input, shape index: {}]   ;;  %s2240_s3 = inlined_call_operand.vmem [shape: bf16[128,128], index: 3, kind: input, shape index: {}]   ;;  %s2241_s4 = inlined_call_operand.vmem [shape: f32[1,128], index: 4, kind: input, shape index: {}]   ;;  %s2242_s5 = inlined_call_operand.vmem [shape: f32[24,1], index: 5, kind: input, shape index: {}]   ;;  %s2243_s6 = inlined_call_operand.vmem [shape: bf16[2,24,128], index: 6, kind: output, shape index: {}]  }
   0x1 LB: > { %s1353_s22 = sadd.s32 4294967295, %s1813_s21   ;;  %p1357_p0 = scmp.ge.s32.totalorder %s1813_s21, 1  ;;  %s1813_s21 = sphi %s1851_s21, %s16_s21  }
   0x2   : > { %p212_p1 = scmp.lt.s32.totalorder %s1813_s21, 3 }
   0x4   : > { %p213_p2 = pnand %p1357_p0, %p212_p1 }
   0x5   : > { %p242_p3 = scmp.lt.s32.totalorder (!%p213_p2), %s1353_s22, 1 }
   0x6   : > { %216 = sbr.rel (%p213_p2) target bundleno = 392 (0x188), region = 44 }
   0xb   : > { %v1697_v0 = vld [vmem:[%s2238_s1 + $0x78] sm:$0xff]  ;;  %v1696_v4 = vld [vmem:[%s2238_s1 + $0x70] sm:$0xff]  ;;  %s2245_s22 = smov (!%p242_p3, %s1353_s22), 1  ;;  %v1695_v8 = vld [vmem:[%s2238_s1 + $0x68] sm:$0xff]  ;;  %vm299_vm0 = vsmask.f32 7424 }
   0xc   : > { %v1689_v1 = vld [vmem:[%s2238_s1 + $0x38] sm:$0xff]  ;;  %365 = vmatpush.bf16.msra.mxu0 %v1697_v0  ;;  %v1688_v5 = vld [vmem:[%s2238_s1 + $0x30] sm:$0xff]  ;;  %s1792_s15 = smul.u32 20, %s2245_s22  ;;  %v1687_v9 = vld [vmem:[%s2238_s1 + $0x28] sm:$0xff]  ;;  %vm471_vm1 = vcmask 1046528   ;;  %vm572_vm2 = vcmask 1044480  }
   0xd   : > { %v1705_v2 = vld [vmem:[%s2238_s1 + $0xb8] sm:$0xff]  ;;  %431 = vmatpush.bf16.msra.mxu1 %v1689_v1  ;;  %v1704_v6 = vld [vmem:[%s2238_s1 + $0xb0] sm:$0xff]  ;;  %v1703_v10 = vld [vmem:[%s2238_s1 + $0xa8] sm:$0xff]  ;;  %vm667_vm3 = vsmask.f32 4352  ;;  %vm875_vm4 = vcmask 1045504  }
   0xe   : > { %v1713_v3 = vld [vmem:[%s2238_s1 + $0xf8] sm:$0xff]  ;;  %525 = vmatpush.bf16.msra.mxu2 %v1705_v2  ;;  %v1712_v7 = vld [vmem:[%s2238_s1 + $0xf0] sm:$0xff]  ;;  %v1711_v11 = vld [vmem:[%s2238_s1 + $0xe8] sm:$0xff]  ;;  %s1901_s28 = scalar_lea.vmem %s2237_s0, %s1792_s15  ;;  %vm970_vm5 = vsmask.f32 5376  ;;  %vm1257_vm6 = vcmask 1040384  }
   0xf   : > { %626 = vmatpush.bf16.msra.mxu3 %v1713_v3  ;;  %v1694_v12 = vld [vmem:[%s2238_s1 + $0x60] sm:$0xff]  ;;  %v1921_v19 = vld [vmem:[%s1901_s28 + $0x8] sm:$0xff]   ;;  %v1693_v28 = vld [vmem:[%s2238_s1 + $0x58] sm:$0xff]  ;;  %s1793_s25 = smul.u32 12, %s2245_s22 }
  0x10   : > { %366 = vmatpush.bf16.msra.mxu0 %v1696_v4  ;;  %v1686_v13 = vld [vmem:[%s2238_s1 + $0x20] sm:$0xff]  ;;  %v279_v20 = vld [vmem:[%s1901_s28 + $0xc] sm:$0x1]  ;;  %v257_v21 = vunpack.c.l.bf16 %v1921_v19  ;;  %v1685_v29 = vld [vmem:[%s2238_s1 + $0x18] sm:$0xff] }
  0x11   : > { %432 = vmatpush.bf16.msra.mxu1 %v1688_v5  ;;  %v1702_v14 = vld [vmem:[%s2238_s1 + $0xa0] sm:$0xff]  ;;  %v280_v22 = vunpack.c.l.bf16 %v279_v20  ;;  %v547_v27 = vld [vmem:[%s1901_s28 + $0xc] sm:$0x7]  ;;  %v1701_v32 = vld [vmem:[%s2238_s1 + $0x98] sm:$0xff]  ;;  %s251_s29 = scalar_lea.vmem %s2243_s6, %s1793_s25 }
  0x12   : > { %526 = vmatpush.bf16.msra.mxu2 %v1704_v6  ;;  %v1913_v15 = vld [vmem:[%s1901_s28] sm:$0xff]   ;;  %v1942_v30 = vmax.f32 %v257_v21, 0.0  ;;  %v1709_v33 = vld [vmem:[%s2238_s1 + $0xd8] sm:$0xff]  ;;  %v549_v37 = vunpack.c.l.bf16 %v547_v27  ;;  %v1692_v38 = vld [vmem:[%s2238_s1 + $0x50] sm:$0xff] }
  0x13   : > { %627 = vmatpush.bf16.msra.mxu3 %v1712_v7  ;;  %v1710_v16 = vld [vmem:[%s2238_s1 + $0xe0] sm:$0xff]  ;;  %v1764_v17 = vunpack.c.l.bf16 %v1913_v15  ;;  %v1765_v18 = vunpack.c.h.bf16 %v1913_v15  ;;  %v281_v31 = vmax.f32 %v280_v22, 0.0  ;;  %v1684_v39 = vld [vmem:[%s2238_s1 + $0x10] sm:$0xff]  ;;  %v1691_v47 = vld [vmem:[%s2238_s1 + $0x48] sm:$0xff] }
  0x14   : > { %367 = vmatpush.bf16.msra.mxu0 %v1695_v8  ;;  %v449_v23 = vld [vmem:[%s1901_s28] sm:$0xe]  ;;  %v1700_v42 = vld [vmem:[%s2238_s1 + $0x90] sm:$0xff]  ;;  %v551_v46 = vmax.f32 %v549_v37, 0.0  ;;  %v1683_v48 = vld [vmem:[%s2238_s1 + $0x8] sm:$0xff] }
  0x15   : > { %433 = vmatpush.bf16.msra.mxu1 %v1687_v9  ;;  %v1927_v24 = vld [vmem:[%s1901_s28] sm:$0x8]  ;;  %v258_v25 = vmax.f32 %v1764_v17, 0.0  ;;  %v1931_v26 = vmax.f32 %v1765_v18, 0.0  ;;  %v450_v35 = vunpack.c.l.bf16 %v449_v23  ;;  %v1961_v40 = vpack.c.bf16 %v281_v31, %v1942_v30  ;;  %v1708_v43 = vld [vmem:[%s2238_s1 + $0xd0] sm:$0xff]  ;;  %v1699_v52 = vld [vmem:[%s2238_s1 + $0x88] sm:$0xff] }
  0x16   : > { %527 = vmatpush.bf16.msra.mxu2 %v1703_v10  ;;  %v548_v36 = vunpack.c.l.bf16 %v1927_v24  ;;  %v1707_v53 = vld [vmem:[%s2238_s1 + $0xc8] sm:$0xff]  ;;  %v553_v56 = vpack.c.bf16 %v551_v46, %v1942_v30  ;;  %v1690_v57 = vld [vmem:[%s2238_s1 + $0x40] sm:$0xff]  ;;  %v1721_v3 = vld [vmem:[%s2238_s1 + $0x138] sm:$0xff]  ;;  %v648_v23 = vunpack.c.h.bf16 %v1921_v19 }
  0x17   : > { %628 = vmatpush.bf16.msra.mxu3 %v1711_v11  ;;  %v1951_v34 = vpack.c.bf16 %v1931_v26, %v258_v25  ;;  %v451_v44 = vmax.f32 %v450_v35, 0.0  ;;  %v308_v51 = vshll.u32 %v1961_v40, 16  ;;  %v1682_v58 = vld [vmem:[%s2238_s1] sm:$0xff]  ;;  %v473_v0 = vrot.slane %v1961_v40, 1  ;;  %v1737_v4 = vld [vmem:[%s2238_s1 + $0x1b8] sm:$0xff]  ;;  %v1720_v10 = vld [vmem:[%s2238_s1 + $0x130] sm:$0xff] }
  0x18   : > { %368 = vmatpush.bf16.msra.mxu0 %v1694_v12  ;;  %v550_v45 = vmax.f32 %v548_v36, 0.0  ;;  %v1698_v61 = vld [vmem:[%s2238_s1 + $0x80] sm:$0xff]  ;;  %v2007_v2 = vrot.slane %v553_v56, 3  ;;  %v1729_v8 = vld [vmem:[%s2238_s1 + $0x178] sm:$0xff]  ;;  %v1736_v11 = vld [vmem:[%s2238_s1 + $0x1b0] sm:$0xff]  ;;  %v312_v35 = vshrl.u32 %v1961_v40, 16 }
  0x19   : > { %434 = vmatpush.bf16.msra.mxu1 %v1686_v13  ;;  %v303_v41 = vshll.u32 %v1951_v34, 16  ;;  %v301_v49 = vshrl.u32 %v1951_v34, 16  ;;  %v452_v54 = vpack.c.bf16 %v1931_v26, %v451_v44  ;;  %v1997_v60 = vrot.slane %v308_v51, 1  ;;  %v1706_v62 = vld [vmem:[%s2238_s1 + $0xc0] sm:$0xff]  ;;  %v1745_v9 = vld [vmem:[%s2238_s1 + $0x1f8] sm:$0xff]  ;;  %v1728_v12 = vld [vmem:[%s2238_s1 + $0x170] sm:$0xff] }
  0x1a   : > { %528 = vmatpush.bf16.msra.mxu2 %v1702_v14  ;;  %v1988_v55 = vpack.c.bf16 %v1931_v26, %v550_v45  ;;  %v1744_v13 = vld [vmem:[%s2238_s1 + $0x1f0] sm:$0xff]  ;;  %v1719_v14 = vld [vmem:[%s2238_s1 + $0x128] sm:$0xff]  ;;  %v843_v17 = vld [vmem:[%s1901_s28 + $0x4] sm:$0xc] }
  0x1b   : > { %629 = vmatpush.bf16.msra.mxu3 %v1710_v16  ;;  %v305_v50 = vrot.slane %v303_v41, 1  ;;  %v472_v63 = vrot.slane %v452_v54, 1  ;;  %v1735_v16 = vld [vmem:[%s2238_s1 + $0x1a8] sm:$0xff]  ;;  %v950_v22 = vld [vmem:[%s1901_s28 + $0x10] sm:$0x7]  ;;  %v1726_v37 = vld [vmem:[%s2238_s1 + $0x160] sm:$0xff] }
  0x1c   : > { %369 = vmatpush.bf16.msra.mxu0 %v1693_v28  ;;  %v573_v1 = vrot.slane %v1988_v55, 3  ;;  %v1775_v20 = vld [vmem:[%s1901_s28 + $0x8] sm:$0xff]   ;;  %v1718_v28 = vld [vmem:[%s2238_s1 + $0x120] sm:$0xff]  ;;  %v1717_v41 = vld [vmem:[%s2238_s1 + $0x118] sm:$0xff] }
  0x1d   : > { %435 = vmatpush.bf16.msra.mxu1 %v1685_v29  ;;  %v306_v59 = vor.u32 %v305_v50, %v301_v49  ;;  %v474_v6 = vsel %vm471_vm1, %v472_v63, %v473_v0  ;;  %v1727_v25 = vld [vmem:[%s2238_s1 + $0x168] sm:$0xff]  ;;  %v1734_v29 = vld [vmem:[%s2238_s1 + $0x1a0] sm:$0xff]  ;;  %v1768_v31 = vunpack.c.l.bf16 %v1775_v20  ;;  %v262_v49 = vpack.c.bf16 %v1942_v30, %v1942_v30  ;;  %v1725_v51 = vld [vmem:[%s2238_s1 + $0x158] sm:$0xff] }
  0x1e   : > { %529 = vmatpush.bf16.msra.mxu2 %v1701_v32  ;;  %v575_v7 = vsel %vm572_vm2, %v573_v1, %v2007_v2  ;;  %v1743_v27 = vld [vmem:[%s2238_s1 + $0x1e8] sm:$0xff]  ;;  %v1769_v32 = vunpack.c.h.bf16 %v1775_v20  ;;  %v1716_v54 = vld [vmem:[%s2238_s1 + $0x110] sm:$0xff] }
  0x1f   : > { %630 = vmatpush.bf16.msra.mxu3 %v1709_v33  ;;  %v311_v5 = vsel %vm299_vm0, %v306_v59, %v1997_v60  ;;  %v847_v33 = vunpack.c.l.bf16 %v843_v17  ;;  %v2080_v45 = vmax.f32 %v1768_v31, 0.0  ;;  %v1732_v56 = vld [vmem:[%s2238_s1 + $0x190] sm:$0xff]  ;;  %v669_v59 = vshrl.u32 %v1988_v55, 16  ;;  %v1738_v31 = vld [vmem:[%s2238_s1 + $0x1c0] sm:$0xff] }
  0x20   : > { %370 = vmatpush.bf16.msra.mxu0 %v1692_v38  ;;  %v2068_v38 = vmax.f32 %v648_v23, 0.0  ;;  %v2082_v46 = vmax.f32 %v1769_v32, 0.0  ;;  %v1724_v63 = vld [vmem:[%s2238_s1 + $0x150] sm:$0xff] }
  0x21   : > { %436 = vmatpush.bf16.msra.mxu1 %v1684_v39  ;;  %v1742_v39 = vld [vmem:[%s2238_s1 + $0x1e0] sm:$0xff]  ;;  %v851_v44 = vmax.f32 %v847_v33, 0.0  ;;  %v1740_v1 = vld [vmem:[%s2238_s1 + $0x1d0] sm:$0xff] }
  0x22   : > { %530 = vmatpush.bf16.msra.mxu2 %v1700_v42  ;;  %v1733_v42 = vld [vmem:[%s2238_s1 + $0x198] sm:$0xff]  ;;  %v650_v50 = vpack.c.bf16 %v2068_v38, %v1942_v30 }
  0x23   : > { %631 = vmatpush.bf16.msra.mxu3 %v1708_v43  ;;  %v846_v43 = vld [vmem:[%s1901_s28 + $0x10] sm:$0x3] }
  0x24   : > { %371 = vmatpush.bf16.msra.mxu0 %v1691_v47 }
  0x25   : > { %437 = vmatpush.bf16.msra.mxu1 %v1683_v48  ;;  %v314_v48 = vor.u32 %v312_v35, %v1997_v60  ;;  %v672_v60 = vshll.u32 %v1988_v55, 16  ;;  %v1731_v55 = vld [vmem:[%s2238_s1 + $0x188] sm:$0xff] }
  0x26   : > { %531 = vmatpush.bf16.msra.mxu2 %v1699_v52  ;;  %v1741_v52 = vld [vmem:[%s2238_s1 + $0x1d8] sm:$0xff] }
  0x27   : > { %632 = vmatpush.bf16.msra.mxu3 %v1707_v53  ;;  %v850_v53 = vunpack.c.l.bf16 %v846_v43 }
  0x28   : > { %372 = vmatpush.bf16.msra.mxu0 %v1690_v57  ;;  %v2102_v57 = vpack.c.bf16 %v2080_v45, %v851_v44  ;;  %v1751_v44 = vld [vmem:[%s2238_s1 + $0x228] sm:$0xff] }
  0x29   : > { %438 = vmatpush.bf16.msra.mxu1 %v1682_v58  ;;  %v854_v40 = vmax.f32 %v850_v53, 0.0 }
  0x2a   : > { %532 = vmatpush.bf16.msra.mxu2 %v1698_v61  ;;  %v677_v61 = vshrl.u32 %v650_v50, 16  ;;  %v876_v32 = vrot.slane %v2102_v57, 2 }
  0x2b   : > { %633 = vmatpush.bf16.msra.mxu3 %v1706_v62  ;;  %373 = vmatmul.bf16.vlgmr.msra.gmra.mxu0 %v311_v5  ;;  %v680_v62 = vshll.u32 %v650_v50, 16  ;;  %v1747_v50 = vld [vmem:[%s2238_s1 + $0x208] sm:$0xff] }
  0x2c   : > { %735 = vmatpush.bf16.msrb.mxu0 %v1721_v3  ;;  %439 = vmatmul.bf16.vlgmr.msra.gmra.mxu1 %v1951_v34  ;;  %v951_v34 = vunpack.c.l.bf16 %v950_v22  ;;  %v975_v3 = vshll.u32 %v2102_v57, 16 }
  0x2d   : > { %533 = vmatmul.bf16.vlgmr.msra.gmra.mxu2 %v474_v6  ;;  %822 = vmatpush.bf16.msrb.mxu1 %v1729_v8  ;;  %v671_v6 = vrot.slane %v669_v59, 3  ;;  %v679_v8 = vrot.slane %v677_v61, 3 }
  0x2e   : > { %929 = vmatpush.bf16.msrb.mxu2 %v1737_v4  ;;  %634 = vmatmul.bf16.vlgmr.msra.gmra.mxu3 %v575_v7  ;;  %v952_v47 = vmax.f32 %v951_v34, 0.0  ;;  %v674_v7 = vrot.slane %v672_v60, 4  ;;  %v977_v17 = vrot.slane %v975_v3, 3 }
  0x2f   : > { %1038 = vmatpush.bf16.msrb.mxu3 %v1745_v9  ;;  %v682_v9 = vrot.slane %v680_v62, 4 }
  0x30   : > { %736 = vmatpush.bf16.msrb.mxu0 %v1720_v10  ;;  %v2105_v58 = vpack.c.bf16 %v952_v47, %v2082_v46  ;;  %v1723_v10 = vld [vmem:[%s2238_s1 + $0x148] sm:$0xff]  ;;  %v1748_v47 = vld [vmem:[%s2238_s1 + $0x210] sm:$0xff] }
  0x31   : > { %823 = vmatpush.bf16.msrb.mxu1 %v1728_v12  ;;  %v856_v12 = vpack.c.bf16 %v854_v40, %v2082_v46  ;;  %v1059_v46 = vld [vmem:[%s1901_s28 + $0x4] sm:$0x8] }
  0x32   : > { %930 = vmatpush.bf16.msrb.mxu2 %v1736_v11  ;;  %v980_v4 = vshrl.u32 %v2105_v58, 16  ;;  %v983_v5 = vshll.u32 %v2105_v58, 16  ;;  %v1739_v11 = vld [vmem:[%s2238_s1 + $0x1c8] sm:$0xff] }
  0x33   : > { %1039 = vmatpush.bf16.msrb.mxu3 %v1744_v13  ;;  %v1714_v13 = vld [vmem:[%s2238_s1 + $0x100] sm:$0xff]  ;;  %v877_v33 = vrot.slane %v856_v12, 2 }
  0x34   : > { %737 = vmatpush.bf16.msrb.mxu0 %v1719_v14  ;;  %v1730_v14 = vld [vmem:[%s2238_s1 + $0x180] sm:$0xff]  ;;  %v982_v20 = vrot.slane %v980_v4, 2  ;;  %v985_v22 = vrot.slane %v983_v5, 3  ;;  %v1759_v4 = vld [vmem:[%s2240_s3 + $0x28] sm:$0xff] }
  0x35   : > { %824 = vmatpush.bf16.msrb.mxu1 %v1727_v25  ;;  %v1753_v25 = vld [vmem:[%s2238_s1 + $0x238] sm:$0xff] }
  0x36   : > { %931 = vmatpush.bf16.msrb.mxu2 %v1735_v16  ;;  %v986_v35 = vor.u32 %v985_v22, %v982_v20 }
  0x37   : > { %1040 = vmatpush.bf16.msrb.mxu3 %v1743_v27  ;;  %v675_v27 = vor.u32 %v674_v7, %v671_v6  ;;  %v1758_v7 = vld [vmem:[%s2240_s3 + $0x20] sm:$0xff] }
  0x38   : > { %738 = vmatpush.bf16.msrb.mxu0 %v1718_v28  ;;  %v683_v28 = vor.u32 %v682_v9, %v679_v8 }
  0x39   : > { %825 = vmatpush.bf16.msrb.mxu1 %v1726_v37  ;;  %v1752_v37 = vld [vmem:[%s2238_s1 + $0x230] sm:$0xff] }
  0x3a   : > { %932 = vmatpush.bf16.msrb.mxu2 %v1734_v29  ;;  %v1722_v29 = vld [vmem:[%s2238_s1 + $0x140] sm:$0xff] }
  0x3b   : > { %1041 = vmatpush.bf16.msrb.mxu3 %v1742_v39  ;;  %378 = vmatmul.bf16.gmra.mxu0 %v314_v48  ;;  %v684_v39 = vsel %vm667_vm3, %v675_v27, %v683_v28  ;;  %v757_v48 = vpack.c.bf16 %v2068_v38, %v2068_v38 }
  0x3c   : > { %739 = vmatpush.bf16.msrb.mxu0 %v1717_v41  ;;  %444 = vmatmul.bf16.gmra.mxu1 %v262_v49  ;;  %v756_v41 = vpack.c.bf16 %v1942_v30, %v1931_v26  ;;  %v1750_v26 = vld [vmem:[%s2238_s1 + $0x220] sm:$0xff]  ;;  %v1749_v30 = vld [vmem:[%s2238_s1 + $0x218] sm:$0xff]  ;;  %v1060_v49 = vunpack.c.l.bf16 %v1059_v46 }
  0x3d   : > { %538 = vmatmul.bf16.gmra.mxu2 %v473_v0  ;;  %826 = vmatpush.bf16.msrb.mxu1 %v1725_v51  ;;  %v1715_v0 = vld [vmem:[%s2238_s1 + $0x108] sm:$0xff] }
  0x3e   : > { %933 = vmatpush.bf16.msrb.mxu2 %v1733_v42  ;;  %639 = vmatmul.bf16.gmra.mxu3 %v2007_v2  ;;  %v972_v2 = vshrl.u32 %v2102_v57, 16  ;;  %v878_v42 = vsel %vm875_vm4, %v876_v32, %v877_v33  ;;  %v1061_v51 = vmax.f32 %v1060_v49, 0.0 }
  0x3f   : > { %1042 = vmatpush.bf16.msrb.mxu3 %v1741_v52  ;;  %v1746_v52 = vld [vmem:[%s2238_s1 + $0x200] sm:$0xff] }
  0x40   : > { %740 = vmatpush.bf16.msrb.mxu0 %v1716_v54  ;;  %v974_v16 = vrot.slane %v972_v2, 2  ;;  %v1062_v38 = vpack.c.bf16 %v2080_v45, %v1061_v51  ;;  %v1082_v54 = vrot.slane %v2105_v58, 3  ;;  %v1761_v45 = vld [vmem:[%s2240_s3 + $0x38] sm:$0xff] }
  0x41   : > { %827 = vmatpush.bf16.msrb.mxu1 %v1724_v63 }
  0x42   : > { %934 = vmatpush.bf16.msrb.mxu2 %v1732_v56  ;;  %v978_v34 = vor.u32 %v977_v17, %v974_v16  ;;  %v1081_v53 = vrot.slane %v1062_v38, 3  ;;  %v1755_v16 = vld [vmem:[%s2240_s3 + $0x8] sm:$0xff] }
  0x43   : > { %1043 = vmatpush.bf16.msrb.mxu3 %v1740_v1 }
  0x44   : > { %741 = vmatpush.bf16.msrb.mxu0 %v1715_v0  ;;  %v987_v43 = vsel %vm970_vm5, %v978_v34, %v986_v35  ;;  %v1083_v56 = vsel %vm572_vm2, %v1081_v53, %v1082_v54  ;;  %v1273_v34 = vld [vmem:[%s2242_s5 + $0x10] sm:$0xff] }
  0x45   : > { %828 = vmatpush.bf16.msrb.mxu1 %v1723_v10  ;;  %v1757_v10 = vld [vmem:[%s2240_s3 + $0x18] sm:$0xff] }
  0x46   : > { %935 = vmatpush.bf16.msrb.mxu2 %v1731_v55  ;;  %v1760_v55 = vld [vmem:[%s2240_s3 + $0x30] sm:$0xff] }
  0x47   : > { %1044 = vmatpush.bf16.msrb.mxu3 %v1739_v11 }
  0x48   : > { %742 = vmatpush.bf16.msrb.mxu0 %v1714_v13  ;;  %v1756_v13 = vld [vmem:[%s2240_s3 + $0x10] sm:$0xff] }
  0x49   : > { %829 = vmatpush.bf16.msrb.mxu1 %v1722_v29 }
  0x4a   : > { %936 = vmatpush.bf16.msrb.mxu2 %v1730_v14 }
  0x4b   : > { %1045 = vmatpush.bf16.msrb.mxu3 %v1738_v31  ;;  %743 = vmatmul.bf16.vlgmr.msrb.gmra.mxu0 %v684_v39 }
  0x4c   : > { %1134 = vmatpush.bf16.msra.mxu0 %v1753_v25  ;;  %830 = vmatmul.bf16.vlgmr.msrb.gmra.mxu1 %v756_v41 }
  0x4d   : > { %937 = vmatmul.bf16.vlgmr.msrb.gmra.mxu2 %v878_v42  ;;  %1235 = vmatpush.bf16.msra.mxu1 %v1761_v45 }
  0x4e   : > { %1776 = vmatpush.bf16.msra.mxu2 %v1753_v25  ;;  %1046 = vmatmul.bf16.vlgmr.msrb.gmra.mxu3 %v987_v43  ;;  %v1754_v25 = vld [vmem:[%s2240_s3] sm:$0xff] }
  0x4f   : > { %1784 = vmatpush.bf16.msra.mxu3 %v1761_v45 }
  0x50   : > { %1135 = vmatpush.bf16.msra.mxu0 %v1752_v37 }
  0x51   : > { %1236 = vmatpush.bf16.msra.mxu1 %v1760_v55 }
  0x52   : > { %1777 = vmatpush.bf16.msra.mxu2 %v1752_v37 }
  0x53   : > { %1785 = vmatpush.bf16.msra.mxu3 %v1760_v55 }
  0x54   : > { %1136 = vmatpush.bf16.msra.mxu0 %v1751_v44 }
  0x55   : > { %1237 = vmatpush.bf16.msra.mxu1 %v1759_v4 }
  0x56   : > { %1778 = vmatpush.bf16.msra.mxu2 %v1751_v44 }
  0x57   : > { %1786 = vmatpush.bf16.msra.mxu3 %v1759_v4 }
  0x58   : > { %1137 = vmatpush.bf16.msra.mxu0 %v1750_v26 }
  0x59   : > { %1238 = vmatpush.bf16.msra.mxu1 %v1758_v7 }
  0x5a   : > { %1779 = vmatpush.bf16.msra.mxu2 %v1750_v26 }
  0x5b   : > { %748 = vmatmul.bf16.gmra.mxu0 %v683_v28  ;;  %1787 = vmatpush.bf16.msra.mxu3 %v1758_v7 }
  0x5c   : > { %1138 = vmatpush.bf16.msra.mxu0 %v1749_v30  ;;  %835 = vmatmul.bf16.gmra.mxu1 %v757_v48 }
  0x5d   : > { %942 = vmatmul.bf16.gmra.mxu2 %v877_v33  ;;  %1239 = vmatpush.bf16.msra.mxu1 %v1757_v10  ;;  %v1271_v33 = vld [vmem:[%s2242_s5] sm:$0xff] }
  0x5e   : > { %1780 = vmatpush.bf16.msra.mxu2 %v1749_v30  ;;  %1051 = vmatmul.bf16.gmra.mxu3 %v986_v35  ;;  %v1815_v35 = vmov 0  }
  0x5f   : > { %1788 = vmatpush.bf16.msra.mxu3 %v1757_v10  ;;  %1803 = vset.pattern.permute.xlu0 %v1815_v35 }
  0x60   : > { %1139 = vmatpush.bf16.msra.mxu0 %v1748_v47  ;;  %1804 = vset.pattern.permute.xlu1 %v1815_v35 }
  0x61   : > { %1240 = vmatpush.bf16.msra.mxu1 %v1756_v13  ;;  %1276 = vperm.xlu0 %1803, %v1271_v33  }
  0x62   : > { %1781 = vmatpush.bf16.msra.mxu2 %v1748_v47  ;;  %1286 = vperm.xlu1 %1804, %v1273_v34   ;;  %v1272_v47 = vld [vmem:[%s2242_s5 + $0x8] sm:$0xff] }
  0x63   : > { %1789 = vmatpush.bf16.msra.mxu3 %v1756_v13 }
  0x64   : > { %1140 = vmatpush.bf16.msra.mxu0 %v1747_v50 }
  0x65   : > { %1241 = vmatpush.bf16.msra.mxu1 %v1755_v16 }
  0x66   : > { %1782 = vmatpush.bf16.msra.mxu2 %v1747_v50 }
  0x67   : > { %1790 = vmatpush.bf16.msra.mxu3 %v1755_v16  ;;  %v1806_v16 = vld [vmem:[%s2241_s4] ss:$0 sm:$0xff] }
  0x68   : > { %1141 = vmatpush.bf16.msra.mxu0 %v1746_v52 }
  0x69   : > { %1242 = vmatpush.bf16.msra.mxu1 %v1754_v25  ;;  %1281 = vperm.xlu0 %1803, %v1272_v47  }
  0x6a   : > { %1783 = vmatpush.bf16.msra.mxu2 %v1746_v52 }
  0x6b   : > { %1142 = vmatmul.bf16.vlgmr.msra.gmra.mxu0 %v1083_v56  ;;  %1791 = vmatpush.bf16.msra.mxu3 %v1754_v25  ;;  %v1258_v25 = vrot.slane %v548_v36, 7 }
  0x6d   : > { %1147 = vmatmul.bf16.vlgmr.msra.gmra.mxu2 %v1082_v54 }
  0xa8   : > { %v374_v57 = vpop.f32.mrf.mxu0 }
  0xa9   : > { %v440_v59 = vpop.f32.mrf.mxu1 }
  0xaa   : > { %v441_v31 = vadd.f32 %v440_v59, %v374_v57 }
  0xb0   : > { %v534_v60 = vpop.f32.mrf.mxu2  ;;  %v376_v62 = vpop.f32.mrf.mxu0 }
  0xb1   : > { %v635_v61 = vpop.f32.mrf.mxu3  ;;  %v442_v63 = vpop.f32.mrf.mxu1  ;;  %v543_v37 = vadd.f32 %v534_v60, %v441_v31 }
  0xb2   : > { %v443_v41 = vadd.f32 %v442_v63, %v376_v62 }
  0xb3   : > { %v644_v43 = vadd.f32 %v635_v61, %v543_v37 }
  0xb8   : > { %v536_v1 = vpop.f32.mrf.mxu2  ;;  %v379_v0 = vpop.f32.mrf.mxu0 }
  0xb9   : > { %v2180_v40 = vpop.f32.mrf.mxu3  ;;  %v445_v58 = vpop.f32.mrf.mxu1  ;;  %v544_v44 = vadd.f32 %v536_v1, %v443_v41 }
  0xba   : > { %v446_v39 = vadd.f32 %v445_v58, %v379_v0  ;;  %v1805_v0 = vld [vmem:[%s2239_s2] ss:$0 sm:$0xff] }
  0xbb   : > { %v645_v51 = vadd.f32 %v2180_v40, %v544_v44 }
  0xc0   : > { %v539_v2 = vpop.f32.mrf.mxu2  ;;  %v381_v5 = vpop.f32.mrf.mxu0 }
  0xc1   : > { %v640_v3 = vpop.f32.mrf.mxu3  ;;  %v447_v6 = vpop.f32.mrf.mxu1  ;;  %v545_v42 = vadd.f32 %v539_v2, %v446_v39 }
  0xc3   : > { %v646_v50 = vadd.f32 %v640_v3, %v545_v42 }
  0xc8   : > { %v541_v8 = vpop.f32.mrf.mxu2  ;;  %v744_v11 = vpop.f32.mrf.mxu0 }
  0xc9   : > { %v642_v9 = vpop.f32.mrf.mxu3  ;;  %v831_v12 = vpop.f32.mrf.mxu1  ;;  %v753_v48 = vadd.f32 %v744_v11, %v644_v43 }
  0xcb   : > { %v840_v38 = vadd.f32 %v831_v12, %v753_v48 }
  0xd0   : > { %v938_v14 = vpop.f32.mrf.mxu2  ;;  %v746_v17 = vpop.f32.mrf.mxu0 }
  0xd1   : > { %v1047_v20 = vpop.f32.mrf.mxu3  ;;  %v833_v22 = vpop.f32.mrf.mxu1  ;;  %v754_v53 = vadd.f32 %v746_v17, %v645_v51  ;;  %v947_v54 = vadd.f32 %v938_v14, %v840_v38  ;;  %v1261_v17 = vrot.slane %v257_v21, 7 }
  0xd3   : > { %v841_v61 = vadd.f32 %v833_v22, %v754_v53  ;;  %v1056_v63 = vadd.f32 %v1047_v20, %v947_v54  ;;  %v1263_v20 = vrot.slane %v648_v23, 7  ;;  %v1277_v22 = vpop.permute.xlu0 %1276 }
  0xd4   : > { %v1287_v34 = vpop.permute.xlu1 %1286 }
  0xd5   : > { %v1264_v31 = vsel %vm1257_vm6, %v1261_v17, %v1263_v20 }
  0xd8   : > { %v940_v27 = vpop.f32.mrf.mxu2  ;;  %v749_v28 = vpop.f32.mrf.mxu0 }
  0xd9   : > { %v1049_v29 = vpop.f32.mrf.mxu3  ;;  %v836_v32 = vpop.f32.mrf.mxu1  ;;  %v755_v52 = vadd.f32 %v749_v28, %v646_v50  ;;  %v948_v1 = vadd.f32 %v940_v27, %v841_v61  ;;  %v1259_v27 = vrot.slane %v1765_v18, 7 }
  0xdb   : > { %v842_v57 = vadd.f32 %v836_v32, %v755_v52  ;;  %v1057_v40 = vadd.f32 %v1049_v29, %v948_v1  ;;  %v1260_v32 = vsel %vm1257_vm6, %v1258_v25, %v1259_v27  ;;  %v1262_v37 = vsel %vm1257_vm6, %v1259_v27, %v1261_v17  ;;  %v1282_v18 = vpop.permute.xlu0 %1281 }
  0xe0   : > { %v943_v26 = vpop.f32.mrf.mxu2  ;;  %v751_v30 = vpop.f32.mrf.mxu0 }
  0xe1   : > { %v1052_v46 = vpop.f32.mrf.mxu3  ;;  %v838_v49 = vpop.f32.mrf.mxu1  ;;  %v949_v62 = vadd.f32 %v943_v26, %v842_v57 }
  0xe3   : > { %v1058_v58 = vadd.f32 %v1052_v46, %v949_v62 }
  0xe8   : > { %v945_v56 = vpop.f32.mrf.mxu2  ;;  %v1143_v59 = vpop.f32.mrf.mxu0 }
  0xe9   : > { %v1054_v60 = vpop.f32.mrf.mxu3  ;;  %v1152_v45 = vadd.f32 %v1143_v59, %v1056_v63 }
  0xeb   : > { %v1159_v4 = vadd.f32 %v1805_v0, %v1152_v45 }
  0xed   : > { %v1162_v9 = vmax.f32 %v1159_v4, 0.0 }
  0xf0   : > { %v1148_v55 = vpop.f32.mrf.mxu2  ;;  %v1145_v3 = vpop.f32.mrf.mxu0 }
  0xf1   : > { %v1154_v2 = vadd.f32 %v1148_v55, %v1058_v58  ;;  %v1153_v5 = vadd.f32 %v1145_v3, %v1057_v40 }
  0xf3   : > { %v1161_v6 = vadd.f32 %v1805_v0, %v1154_v2  ;;  %v1160_v7 = vadd.f32 %v1805_v0, %v1153_v5 }
  0xf5   : > { %v1164_v8 = vmax.f32 %v1161_v6, 0.0  ;;  %v1163_v10 = vmax.f32 %v1160_v7, 0.0 }
  0xf7   : > { %v1166_v11 = vpack.c.bf16 %v1164_v8, %v1164_v8  ;;  %v1165_v12 = vpack.c.bf16 %v1163_v10, %v1162_v9 }
  0xf8   : > { %v1150_v13 = vpop.f32.mrf.mxu2 }
  0xf9   : > { %1248 = vmatmul.bf16.vlgmr.msra.gmra.mxu3 %v1166_v11  ;;  %1243 = vmatmul.bf16.vlgmr.msra.gmra.mxu1 %v1165_v12 }
 0x176   : > { %v1244_v14 = vpop.f32.mrf.mxu1 }
 0x177   : > { %v1245_v28 = vadd.f32 %v1806_v16, %v1244_v14 }
 0x179   : > { %v1268_v19 = vadd.f32 %v1260_v32, %v1245_v28 }
 0x17b   : > { %v1289_v36 = vmul.f32 %v1277_v22, %v1268_v19 }
 0x17c   : > { %v1249_v29 = vpop.f32.mrf.mxu3 }
 0x17d   : > { %v1250_v33 = vadd.f32 %v1806_v16, %v1249_v29 }
 0x17e   : > { %v1246_v21 = vpop.f32.mrf.mxu1 }
 0x17f   : > { %v1270_v35 = vadd.f32 %v1264_v31, %v1250_v33  ;;  %v1247_v23 = vadd.f32 %v1806_v16, %v1246_v21 }
 0x181   : > { %v1291_v39 = vmul.f32 %v1287_v34, %v1270_v35  ;;  %v1269_v15 = vadd.f32 %v1262_v37, %v1247_v23 }
 0x183   : > { %v1294_v24 = vpack.c.bf16 %v1291_v39, %v1291_v39  ;;  %v1290_v41 = vmul.f32 %v1282_v18, %v1269_v15 }
 0x184   : > { %v1251_v42 = vpop.f32.mrf.mxu3 }
 0x185   : > { %1297 = vst [vmem:[%s251_s29 + $0x8] sm:$0xf] %v1294_v24  ;;  %v1773_v43 = vpack.c.bf16 %v1290_v41, %v1289_v36 }
 0x187   : > { %1774 = vst [vmem:[%s251_s29] sm:$0xff] %v1773_v43  }
 0x188 PF: > { %s16_s21 = sadd.s32 1, %s1813_s21  }
 0x189   : > { %p13_p4 = scmp.ge.s32.totalorder %s16_s21, 4  }
 0x18b   :  { %15 = sbr.rel (!%p13_p4) target bundleno = 1 (0x1), region = 74 }

// kernel: vqvae_forward.16
= control target key start
LH: loop header
LB: loop body
LE: loop exit
PB: predicated region body
PF: predicated region fallthrough
CT: control target
= control target key end

     0   :  { %11 = vsyncpa [#allocation3], 0  ;;  %s1929_s21 = smov 0   ;;  %s2315_s0 = inlined_call_operand.vmem [shape: bf16[2,38,128], index: 0, kind: input, shape index: {}]   ;;  %s2316_s1 = inlined_call_operand.vmem [shape: bf16[1152,128], index: 1, kind: input, shape index: {}]   ;;  %s2317_s2 = inlined_call_operand.vmem [shape: f32[1,128], index: 2, kind: input, shape index: {}]   ;;  %s2318_s3 = inlined_call_operand.vmem [shape: bf16[128,128], index: 3, kind: input, shape index: {}]   ;;  %s2319_s4 = inlined_call_operand.hbm [shape: f32[1,128], index: 4, kind: input, shape index: {}]   ;;  %s2320_s5 = inlined_call_operand.vmem [shape: f32[24,1], index: 5, kind: input, shape index: {}]   ;;  %s2321_s6 = inlined_call_operand.vmem [shape: bf16[2,24,128], index: 6, kind: output, shape index: {}]  }
   0x1 LB: > { %s1383_s22 = sadd.s32 4294967295, %s1890_s21   ;;  %p1385_p0 = scmp.ge.s32.totalorder %s1890_s21, 1  ;;  %s1890_s21 = sphi %s1929_s21, %s17_s21  }
   0x2   : > { %p179_p1 = scmp.lt.s32.totalorder %s1890_s21, 3  ;;  %s200_s25 = sshll.u32 %s2319_s4, 4  ;;  %s201_s25 = int_to_ptr.hbm [resolvable:$true] %s200_s25 }
   0x3   : > { %p1834_p3 = scmp.eq.s32.totalorder %s1383_s22, 0  ;;  %s1892_s26 = smov [#allocation2]  }
   0x4   : > { %p180_p2 = pnand %p1385_p0, %p179_p1  ;;  %s202_s27 = sshll.u32 %s1892_s26, 4  ;;  %s203_s27 = int_to_ptr.vmem [resolvable:$true] %s202_s27 }
   0x6   : > { %p1830_p4 = pneg %p180_p2  ;;  %226 = sbr.rel (%p180_p2) target bundleno = 395 (0x18b), region = 44 }
   0x8   : > { %p1831_p5 = pnand %p1834_p3, %p1830_p4 }
   0xa   : > { %1833 = dma.hbm_to_vmem [thread:$0]  (!%p1831_p5), %s201_s25, 16, %s203_s27, [#allocation3]  }
   0xb   : > { %1885 = dma.done.wait (%p1834_p3), [#allocation3], 16  }
   0xc   : > { %1887 = vsyncadd (%p1834_p3), [#allocation3], 4294967280  ;;  %p257_p6 = scmp.lt.s32.totalorder %s1383_s22, 1  ;;  %v1729_v0 = vld [vmem:[%s2316_s1 + $0x78] sm:$0xff]  ;;  %v1728_v4 = vld [vmem:[%s2316_s1 + $0x70] sm:$0xff]  ;;  %vm486_vm1 = vcmask 1046528  }
   0xd   : > { %v1721_v1 = vld [vmem:[%s2316_s1 + $0x38] sm:$0xff]  ;;  %380 = vmatpush.bf16.msra.mxu0 %v1729_v0  ;;  %v1720_v5 = vld [vmem:[%s2316_s1 + $0x30] sm:$0xff]  ;;  %v1727_v8 = vld [vmem:[%s2316_s1 + $0x68] sm:$0xff]  ;;  %vm314_vm0 = vsmask.f32 7424  ;;  %vm587_vm2 = vcmask 1044480  }
   0xe   : > { %s2323_s22 = smov (!%p257_p6, %s1383_s22), 1  ;;  %v1737_v2 = vld [vmem:[%s2316_s1 + $0xb8] sm:$0xff]  ;;  %446 = vmatpush.bf16.msra.mxu1 %v1721_v1  ;;  %v1736_v6 = vld [vmem:[%s2316_s1 + $0xb0] sm:$0xff]  ;;  %v1719_v9 = vld [vmem:[%s2316_s1 + $0x28] sm:$0xff]  ;;  %vm682_vm3 = vsmask.f32 4352 }
   0xf   : > { %v1745_v3 = vld [vmem:[%s2316_s1 + $0xf8] sm:$0xff]  ;;  %540 = vmatpush.bf16.msra.mxu2 %v1737_v2  ;;  %v1744_v7 = vld [vmem:[%s2316_s1 + $0xf0] sm:$0xff]  ;;  %s1824_s20 = smul.u32 20, %s2323_s22  ;;  %v1735_v10 = vld [vmem:[%s2316_s1 + $0xa8] sm:$0xff]  ;;  %vm890_vm4 = vcmask 1045504   ;;  %vm1272_vm6 = vcmask 1040384  }
  0x10   : > { %641 = vmatpush.bf16.msra.mxu3 %v1745_v3  ;;  %v1743_v11 = vld [vmem:[%s2316_s1 + $0xe8] sm:$0xff]  ;;  %v1726_v12 = vld [vmem:[%s2316_s1 + $0x60] sm:$0xff]  ;;  %v1725_v28 = vld [vmem:[%s2316_s1 + $0x58] sm:$0xff]  ;;  %vm985_vm5 = vsmask.f32 5376  ;;  %s1825_s28 = smul.u32 12, %s2323_s22 }
  0x11   : > { %381 = vmatpush.bf16.msra.mxu0 %v1728_v4  ;;  %s1982_s9 = scalar_lea.vmem %s2315_s0, %s1824_s20  ;;  %v1718_v13 = vld [vmem:[%s2316_s1 + $0x20] sm:$0xff]  ;;  %v1717_v29 = vld [vmem:[%s2316_s1 + $0x18] sm:$0xff]  ;;  %v1724_v38 = vld [vmem:[%s2316_s1 + $0x50] sm:$0xff] }
  0x12   : > { %447 = vmatpush.bf16.msra.mxu1 %v1720_v5  ;;  %v1734_v14 = vld [vmem:[%s2316_s1 + $0xa0] sm:$0xff]  ;;  %v2002_v19 = vld [vmem:[%s1982_s9 + $0x8] sm:$0xff]   ;;  %v1733_v32 = vld [vmem:[%s2316_s1 + $0x98] sm:$0xff]  ;;  %s266_s7 = scalar_lea.vmem %s2321_s6, %s1825_s28 }
  0x13   : > { %541 = vmatpush.bf16.msra.mxu2 %v1736_v6  ;;  %v1994_v15 = vld [vmem:[%s1982_s9] sm:$0xff]   ;;  %v294_v20 = vld [vmem:[%s1982_s9 + $0xc] sm:$0x1]  ;;  %v272_v21 = vunpack.c.l.bf16 %v2002_v19  ;;  %v1741_v33 = vld [vmem:[%s2316_s1 + $0xd8] sm:$0xff] }
  0x14   : > { %642 = vmatpush.bf16.msra.mxu3 %v1744_v7  ;;  %v1742_v16 = vld [vmem:[%s2316_s1 + $0xe0] sm:$0xff]  ;;  %v1796_v17 = vunpack.c.l.bf16 %v1994_v15  ;;  %v1797_v18 = vunpack.c.h.bf16 %v1994_v15  ;;  %v295_v22 = vunpack.c.l.bf16 %v294_v20  ;;  %v562_v27 = vld [vmem:[%s1982_s9 + $0xc] sm:$0x7]  ;;  %v1716_v39 = vld [vmem:[%s2316_s1 + $0x10] sm:$0xff] }
  0x15   : > { %382 = vmatpush.bf16.msra.mxu0 %v1727_v8  ;;  %v464_v23 = vld [vmem:[%s1982_s9] sm:$0xe]  ;;  %v2023_v30 = vmax.f32 %v272_v21, 0.0  ;;  %v564_v37 = vunpack.c.l.bf16 %v562_v27  ;;  %v1732_v42 = vld [vmem:[%s2316_s1 + $0x90] sm:$0xff]  ;;  %v1723_v47 = vld [vmem:[%s2316_s1 + $0x48] sm:$0xff] }
  0x16   : > { %448 = vmatpush.bf16.msra.mxu1 %v1719_v9  ;;  %v2008_v24 = vld [vmem:[%s1982_s9] sm:$0x8]  ;;  %v273_v25 = vmax.f32 %v1796_v17, 0.0  ;;  %v2012_v26 = vmax.f32 %v1797_v18, 0.0  ;;  %v296_v31 = vmax.f32 %v295_v22, 0.0  ;;  %v465_v35 = vunpack.c.l.bf16 %v464_v23  ;;  %v1740_v43 = vld [vmem:[%s2316_s1 + $0xd0] sm:$0xff] }
  0x17   : > { %542 = vmatpush.bf16.msra.mxu2 %v1735_v10  ;;  %v563_v36 = vunpack.c.l.bf16 %v2008_v24  ;;  %v566_v46 = vmax.f32 %v564_v37, 0.0  ;;  %v1715_v48 = vld [vmem:[%s2316_s1 + $0x8] sm:$0xff]  ;;  %v1722_v57 = vld [vmem:[%s2316_s1 + $0x40] sm:$0xff]  ;;  %v1753_v3 = vld [vmem:[%s2316_s1 + $0x138] sm:$0xff]  ;;  %v663_v23 = vunpack.c.h.bf16 %v2002_v19 }
  0x18   : > { %643 = vmatpush.bf16.msra.mxu3 %v1743_v11  ;;  %v2032_v34 = vpack.c.bf16 %v2012_v26, %v273_v25  ;;  %v2042_v40 = vpack.c.bf16 %v296_v31, %v2023_v30  ;;  %v466_v44 = vmax.f32 %v465_v35, 0.0  ;;  %v1731_v52 = vld [vmem:[%s2316_s1 + $0x88] sm:$0xff]  ;;  %v1714_v58 = vld [vmem:[%s2316_s1] sm:$0xff]  ;;  %v1769_v4 = vld [vmem:[%s2316_s1 + $0x1b8] sm:$0xff] }
  0x19   : > { %383 = vmatpush.bf16.msra.mxu0 %v1726_v12  ;;  %v565_v45 = vmax.f32 %v563_v36, 0.0  ;;  %v1739_v53 = vld [vmem:[%s2316_s1 + $0xc8] sm:$0xff]  ;;  %v568_v56 = vpack.c.bf16 %v566_v46, %v2023_v30  ;;  %v1730_v61 = vld [vmem:[%s2316_s1 + $0x80] sm:$0xff]  ;;  %v1761_v8 = vld [vmem:[%s2316_s1 + $0x178] sm:$0xff] }
  0x1a   : > { %449 = vmatpush.bf16.msra.mxu1 %v1718_v13  ;;  %v318_v41 = vshll.u32 %v2032_v34, 16  ;;  %v316_v49 = vshrl.u32 %v2032_v34, 16  ;;  %v323_v51 = vshll.u32 %v2042_v40, 16  ;;  %v467_v54 = vpack.c.bf16 %v2012_v26, %v466_v44  ;;  %v1738_v62 = vld [vmem:[%s2316_s1 + $0xc0] sm:$0xff]  ;;  %v1777_v9 = vld [vmem:[%s2316_s1 + $0x1f8] sm:$0xff]  ;;  %v1752_v10 = vld [vmem:[%s2316_s1 + $0x130] sm:$0xff] }
  0x1b   : > { %543 = vmatpush.bf16.msra.mxu2 %v1734_v14  ;;  %v2069_v55 = vpack.c.bf16 %v2012_v26, %v565_v45  ;;  %v488_v0 = vrot.slane %v2042_v40, 1  ;;  %v2088_v2 = vrot.slane %v568_v56, 3  ;;  %v1768_v11 = vld [vmem:[%s2316_s1 + $0x1b0] sm:$0xff]  ;;  %v1751_v14 = vld [vmem:[%s2316_s1 + $0x128] sm:$0xff]  ;;  %v858_v17 = vld [vmem:[%s1982_s9 + $0x4] sm:$0xc] }
  0x1c   : > { %644 = vmatpush.bf16.msra.mxu3 %v1742_v16  ;;  %v320_v50 = vrot.slane %v318_v41, 1  ;;  %v2078_v60 = vrot.slane %v323_v51, 1  ;;  %v487_v63 = vrot.slane %v467_v54, 1  ;;  %v1760_v12 = vld [vmem:[%s2316_s1 + $0x170] sm:$0xff]  ;;  %v1767_v16 = vld [vmem:[%s2316_s1 + $0x1a8] sm:$0xff]  ;;  %v327_v35 = vshrl.u32 %v2042_v40, 16 }
  0x1d   : > { %384 = vmatpush.bf16.msra.mxu0 %v1725_v28  ;;  %v588_v1 = vrot.slane %v2069_v55, 3  ;;  %v1776_v13 = vld [vmem:[%s2316_s1 + $0x1f0] sm:$0xff]  ;;  %v1807_v20 = vld [vmem:[%s1982_s9 + $0x8] sm:$0xff]   ;;  %v1750_v28 = vld [vmem:[%s2316_s1 + $0x120] sm:$0xff] }
  0x1e   : > { %450 = vmatpush.bf16.msra.mxu1 %v1717_v29  ;;  %v321_v59 = vor.u32 %v320_v50, %v316_v49  ;;  %v489_v6 = vsel %vm486_vm1, %v487_v63, %v488_v0  ;;  %v965_v22 = vld [vmem:[%s1982_s9 + $0x10] sm:$0x7]  ;;  %v1759_v25 = vld [vmem:[%s2316_s1 + $0x168] sm:$0xff]  ;;  %v1766_v29 = vld [vmem:[%s2316_s1 + $0x1a0] sm:$0xff]  ;;  %v1800_v31 = vunpack.c.l.bf16 %v1807_v20  ;;  %v277_v49 = vpack.c.bf16 %v2023_v30, %v2023_v30 }
  0x1f   : > { %544 = vmatpush.bf16.msra.mxu2 %v1733_v32  ;;  %v590_v7 = vsel %vm587_vm2, %v588_v1, %v2088_v2  ;;  %v1775_v27 = vld [vmem:[%s2316_s1 + $0x1e8] sm:$0xff]  ;;  %v1801_v32 = vunpack.c.h.bf16 %v1807_v20  ;;  %v1758_v37 = vld [vmem:[%s2316_s1 + $0x160] sm:$0xff]  ;;  %v1749_v41 = vld [vmem:[%s2316_s1 + $0x118] sm:$0xff] }
  0x20   : > { %645 = vmatpush.bf16.msra.mxu3 %v1741_v33  ;;  %v326_v5 = vsel %vm314_vm0, %v321_v59, %v2078_v60  ;;  %v862_v33 = vunpack.c.l.bf16 %v858_v17  ;;  %v2161_v45 = vmax.f32 %v1800_v31, 0.0  ;;  %v1757_v51 = vld [vmem:[%s2316_s1 + $0x158] sm:$0xff]  ;;  %v1748_v54 = vld [vmem:[%s2316_s1 + $0x110] sm:$0xff]  ;;  %v684_v59 = vshrl.u32 %v2069_v55, 16  ;;  %v1770_v31 = vld [vmem:[%s2316_s1 + $0x1c0] sm:$0xff] }
  0x21   : > { %385 = vmatpush.bf16.msra.mxu0 %v1724_v38  ;;  %v2149_v38 = vmax.f32 %v663_v23, 0.0  ;;  %v2163_v46 = vmax.f32 %v1801_v32, 0.0  ;;  %v1764_v56 = vld [vmem:[%s2316_s1 + $0x190] sm:$0xff] }
  0x22   : > { %451 = vmatpush.bf16.msra.mxu1 %v1716_v39  ;;  %v1774_v39 = vld [vmem:[%s2316_s1 + $0x1e0] sm:$0xff]  ;;  %v866_v44 = vmax.f32 %v862_v33, 0.0  ;;  %v1756_v63 = vld [vmem:[%s2316_s1 + $0x150] sm:$0xff] }
  0x23   : > { %545 = vmatpush.bf16.msra.mxu2 %v1732_v42  ;;  %v1765_v42 = vld [vmem:[%s2316_s1 + $0x198] sm:$0xff]  ;;  %v665_v50 = vpack.c.bf16 %v2149_v38, %v2023_v30  ;;  %v1772_v1 = vld [vmem:[%s2316_s1 + $0x1d0] sm:$0xff] }
  0x24   : > { %646 = vmatpush.bf16.msra.mxu3 %v1740_v43  ;;  %v861_v43 = vld [vmem:[%s1982_s9 + $0x10] sm:$0x3] }
  0x25   : > { %386 = vmatpush.bf16.msra.mxu0 %v1723_v47 }
  0x26   : > { %452 = vmatpush.bf16.msra.mxu1 %v1715_v48  ;;  %v329_v48 = vor.u32 %v327_v35, %v2078_v60  ;;  %v687_v60 = vshll.u32 %v2069_v55, 16  ;;  %v1763_v55 = vld [vmem:[%s2316_s1 + $0x188] sm:$0xff] }
  0x27   : > { %546 = vmatpush.bf16.msra.mxu2 %v1731_v52  ;;  %v1773_v52 = vld [vmem:[%s2316_s1 + $0x1d8] sm:$0xff] }
  0x28   : > { %647 = vmatpush.bf16.msra.mxu3 %v1739_v53  ;;  %v865_v53 = vunpack.c.l.bf16 %v861_v43 }
  0x29   : > { %387 = vmatpush.bf16.msra.mxu0 %v1722_v57  ;;  %v2183_v57 = vpack.c.bf16 %v2161_v45, %v866_v44  ;;  %v1783_v44 = vld [vmem:[%s2316_s1 + $0x228] sm:$0xff] }
  0x2a   : > { %453 = vmatpush.bf16.msra.mxu1 %v1714_v58  ;;  %v869_v40 = vmax.f32 %v865_v53, 0.0 }
  0x2b   : > { %547 = vmatpush.bf16.msra.mxu2 %v1730_v61  ;;  %v692_v61 = vshrl.u32 %v665_v50, 16  ;;  %v891_v32 = vrot.slane %v2183_v57, 2 }
  0x2c   : > { %648 = vmatpush.bf16.msra.mxu3 %v1738_v62  ;;  %388 = vmatmul.bf16.vlgmr.msra.gmra.mxu0 %v326_v5  ;;  %v695_v62 = vshll.u32 %v665_v50, 16  ;;  %v1779_v50 = vld [vmem:[%s2316_s1 + $0x208] sm:$0xff] }
  0x2d   : > { %750 = vmatpush.bf16.msrb.mxu0 %v1753_v3  ;;  %454 = vmatmul.bf16.vlgmr.msra.gmra.mxu1 %v2032_v34  ;;  %v966_v34 = vunpack.c.l.bf16 %v965_v22  ;;  %v990_v3 = vshll.u32 %v2183_v57, 16 }
  0x2e   : > { %548 = vmatmul.bf16.vlgmr.msra.gmra.mxu2 %v489_v6  ;;  %837 = vmatpush.bf16.msrb.mxu1 %v1761_v8  ;;  %v686_v6 = vrot.slane %v684_v59, 3  ;;  %v694_v8 = vrot.slane %v692_v61, 3 }
  0x2f   : > { %944 = vmatpush.bf16.msrb.mxu2 %v1769_v4  ;;  %649 = vmatmul.bf16.vlgmr.msra.gmra.mxu3 %v590_v7  ;;  %v967_v47 = vmax.f32 %v966_v34, 0.0  ;;  %v689_v7 = vrot.slane %v687_v60, 4  ;;  %v992_v17 = vrot.slane %v990_v3, 3 }
  0x30   : > { %1053 = vmatpush.bf16.msrb.mxu3 %v1777_v9  ;;  %v697_v9 = vrot.slane %v695_v62, 4 }
  0x31   : > { %751 = vmatpush.bf16.msrb.mxu0 %v1752_v10  ;;  %v2186_v58 = vpack.c.bf16 %v967_v47, %v2163_v46  ;;  %v1755_v10 = vld [vmem:[%s2316_s1 + $0x148] sm:$0xff]  ;;  %v1780_v47 = vld [vmem:[%s2316_s1 + $0x210] sm:$0xff] }
  0x32   : > { %838 = vmatpush.bf16.msrb.mxu1 %v1760_v12  ;;  %v871_v12 = vpack.c.bf16 %v869_v40, %v2163_v46  ;;  %v1074_v46 = vld [vmem:[%s1982_s9 + $0x4] sm:$0x8] }
  0x33   : > { %945 = vmatpush.bf16.msrb.mxu2 %v1768_v11  ;;  %v995_v4 = vshrl.u32 %v2186_v58, 16  ;;  %v998_v5 = vshll.u32 %v2186_v58, 16  ;;  %v1771_v11 = vld [vmem:[%s2316_s1 + $0x1c8] sm:$0xff] }
  0x34   : > { %1054 = vmatpush.bf16.msrb.mxu3 %v1776_v13  ;;  %v1746_v13 = vld [vmem:[%s2316_s1 + $0x100] sm:$0xff]  ;;  %v892_v33 = vrot.slane %v871_v12, 2 }
  0x35   : > { %752 = vmatpush.bf16.msrb.mxu0 %v1751_v14  ;;  %v1762_v14 = vld [vmem:[%s2316_s1 + $0x180] sm:$0xff]  ;;  %v997_v20 = vrot.slane %v995_v4, 2  ;;  %v1000_v22 = vrot.slane %v998_v5, 3  ;;  %v1791_v4 = vld [vmem:[%s2318_s3 + $0x28] sm:$0xff] }
  0x36   : > { %839 = vmatpush.bf16.msrb.mxu1 %v1759_v25  ;;  %v1785_v25 = vld [vmem:[%s2316_s1 + $0x238] sm:$0xff] }
  0x37   : > { %946 = vmatpush.bf16.msrb.mxu2 %v1767_v16  ;;  %v1001_v35 = vor.u32 %v1000_v22, %v997_v20 }
  0x38   : > { %1055 = vmatpush.bf16.msrb.mxu3 %v1775_v27  ;;  %v690_v27 = vor.u32 %v689_v7, %v686_v6  ;;  %v1790_v7 = vld [vmem:[%s2318_s3 + $0x20] sm:$0xff] }
  0x39   : > { %753 = vmatpush.bf16.msrb.mxu0 %v1750_v28  ;;  %v698_v28 = vor.u32 %v697_v9, %v694_v8 }
  0x3a   : > { %840 = vmatpush.bf16.msrb.mxu1 %v1758_v37  ;;  %v1784_v37 = vld [vmem:[%s2316_s1 + $0x230] sm:$0xff] }
  0x3b   : > { %947 = vmatpush.bf16.msrb.mxu2 %v1766_v29  ;;  %v1754_v29 = vld [vmem:[%s2316_s1 + $0x140] sm:$0xff] }
  0x3c   : > { %1056 = vmatpush.bf16.msrb.mxu3 %v1774_v39  ;;  %393 = vmatmul.bf16.gmra.mxu0 %v329_v48  ;;  %v699_v39 = vsel %vm682_vm3, %v690_v27, %v698_v28  ;;  %v772_v48 = vpack.c.bf16 %v2149_v38, %v2149_v38 }
  0x3d   : > { %754 = vmatpush.bf16.msrb.mxu0 %v1749_v41  ;;  %459 = vmatmul.bf16.gmra.mxu1 %v277_v49  ;;  %v771_v41 = vpack.c.bf16 %v2023_v30, %v2012_v26  ;;  %v1782_v26 = vld [vmem:[%s2316_s1 + $0x220] sm:$0xff]  ;;  %v1781_v30 = vld [vmem:[%s2316_s1 + $0x218] sm:$0xff]  ;;  %v1075_v49 = vunpack.c.l.bf16 %v1074_v46 }
  0x3e   : > { %553 = vmatmul.bf16.gmra.mxu2 %v488_v0  ;;  %841 = vmatpush.bf16.msrb.mxu1 %v1757_v51  ;;  %v1747_v0 = vld [vmem:[%s2316_s1 + $0x108] sm:$0xff] }
  0x3f   : > { %948 = vmatpush.bf16.msrb.mxu2 %v1765_v42  ;;  %654 = vmatmul.bf16.gmra.mxu3 %v2088_v2  ;;  %v987_v2 = vshrl.u32 %v2183_v57, 16  ;;  %v893_v42 = vsel %vm890_vm4, %v891_v32, %v892_v33  ;;  %v1076_v51 = vmax.f32 %v1075_v49, 0.0 }
  0x40   : > { %1057 = vmatpush.bf16.msrb.mxu3 %v1773_v52  ;;  %v1778_v52 = vld [vmem:[%s2316_s1 + $0x200] sm:$0xff] }
  0x41   : > { %755 = vmatpush.bf16.msrb.mxu0 %v1748_v54  ;;  %v989_v16 = vrot.slane %v987_v2, 2  ;;  %v1077_v38 = vpack.c.bf16 %v2161_v45, %v1076_v51  ;;  %v1097_v54 = vrot.slane %v2186_v58, 3  ;;  %v1793_v45 = vld [vmem:[%s2318_s3 + $0x38] sm:$0xff] }
  0x42   : > { %842 = vmatpush.bf16.msrb.mxu1 %v1756_v63 }
  0x43   : > { %949 = vmatpush.bf16.msrb.mxu2 %v1764_v56  ;;  %v993_v34 = vor.u32 %v992_v17, %v989_v16  ;;  %v1096_v53 = vrot.slane %v1077_v38, 3  ;;  %v1787_v16 = vld [vmem:[%s2318_s3 + $0x8] sm:$0xff] }
  0x44   : > { %1058 = vmatpush.bf16.msrb.mxu3 %v1772_v1 }
  0x45   : > { %756 = vmatpush.bf16.msrb.mxu0 %v1747_v0  ;;  %v1002_v43 = vsel %vm985_vm5, %v993_v34, %v1001_v35  ;;  %v1098_v56 = vsel %vm587_vm2, %v1096_v53, %v1097_v54  ;;  %v1291_v34 = vld [vmem:[%s2320_s5 + $0x10] sm:$0xff] }
  0x46   : > { %843 = vmatpush.bf16.msrb.mxu1 %v1755_v10  ;;  %v1789_v10 = vld [vmem:[%s2318_s3 + $0x18] sm:$0xff] }
  0x47   : > { %950 = vmatpush.bf16.msrb.mxu2 %v1763_v55  ;;  %v1792_v55 = vld [vmem:[%s2318_s3 + $0x30] sm:$0xff] }
  0x48   : > { %1059 = vmatpush.bf16.msrb.mxu3 %v1771_v11 }
  0x49   : > { %757 = vmatpush.bf16.msrb.mxu0 %v1746_v13  ;;  %v1788_v13 = vld [vmem:[%s2318_s3 + $0x10] sm:$0xff] }
  0x4a   : > { %844 = vmatpush.bf16.msrb.mxu1 %v1754_v29 }
  0x4b   : > { %951 = vmatpush.bf16.msrb.mxu2 %v1762_v14 }
  0x4c   : > { %1060 = vmatpush.bf16.msrb.mxu3 %v1770_v31  ;;  %758 = vmatmul.bf16.vlgmr.msrb.gmra.mxu0 %v699_v39 }
  0x4d   : > { %1149 = vmatpush.bf16.msra.mxu0 %v1785_v25  ;;  %845 = vmatmul.bf16.vlgmr.msrb.gmra.mxu1 %v771_v41 }
  0x4e   : > { %952 = vmatmul.bf16.vlgmr.msrb.gmra.mxu2 %v893_v42  ;;  %1250 = vmatpush.bf16.msra.mxu1 %v1793_v45 }
  0x4f   : > { %1808 = vmatpush.bf16.msra.mxu2 %v1785_v25  ;;  %1061 = vmatmul.bf16.vlgmr.msrb.gmra.mxu3 %v1002_v43  ;;  %v1786_v25 = vld [vmem:[%s2318_s3] sm:$0xff] }
  0x50   : > { %1816 = vmatpush.bf16.msra.mxu3 %v1793_v45 }
  0x51   : > { %1150 = vmatpush.bf16.msra.mxu0 %v1784_v37 }
  0x52   : > { %1251 = vmatpush.bf16.msra.mxu1 %v1792_v55 }
  0x53   : > { %1809 = vmatpush.bf16.msra.mxu2 %v1784_v37 }
  0x54   : > { %1817 = vmatpush.bf16.msra.mxu3 %v1792_v55 }
  0x55   : > { %1151 = vmatpush.bf16.msra.mxu0 %v1783_v44 }
  0x56   : > { %1252 = vmatpush.bf16.msra.mxu1 %v1791_v4 }
  0x57   : > { %1810 = vmatpush.bf16.msra.mxu2 %v1783_v44 }
  0x58   : > { %1818 = vmatpush.bf16.msra.mxu3 %v1791_v4 }
  0x59   : > { %1152 = vmatpush.bf16.msra.mxu0 %v1782_v26 }
  0x5a   : > { %1253 = vmatpush.bf16.msra.mxu1 %v1790_v7 }
  0x5b   : > { %1811 = vmatpush.bf16.msra.mxu2 %v1782_v26 }
  0x5c   : > { %763 = vmatmul.bf16.gmra.mxu0 %v698_v28  ;;  %1819 = vmatpush.bf16.msra.mxu3 %v1790_v7 }
  0x5d   : > { %1153 = vmatpush.bf16.msra.mxu0 %v1781_v30  ;;  %850 = vmatmul.bf16.gmra.mxu1 %v772_v48 }
  0x5e   : > { %957 = vmatmul.bf16.gmra.mxu2 %v892_v33  ;;  %1254 = vmatpush.bf16.msra.mxu1 %v1789_v10  ;;  %v1289_v33 = vld [vmem:[%s2320_s5] sm:$0xff] }
  0x5f   : > { %1812 = vmatpush.bf16.msra.mxu2 %v1781_v30  ;;  %1066 = vmatmul.bf16.gmra.mxu3 %v1001_v35  ;;  %v1893_v35 = vmov 0  }
  0x60   : > { %1820 = vmatpush.bf16.msra.mxu3 %v1789_v10  ;;  %1846 = vset.pattern.permute.xlu0 %v1893_v35 }
  0x61   : > { %1154 = vmatpush.bf16.msra.mxu0 %v1780_v47  ;;  %1847 = vset.pattern.permute.xlu1 %v1893_v35 }
  0x62   : > { %1255 = vmatpush.bf16.msra.mxu1 %v1788_v13  ;;  %1294 = vperm.xlu0 %1846, %v1289_v33  }
  0x63   : > { %1813 = vmatpush.bf16.msra.mxu2 %v1780_v47  ;;  %1304 = vperm.xlu1 %1847, %v1291_v34   ;;  %v1290_v47 = vld [vmem:[%s2320_s5 + $0x8] sm:$0xff] }
  0x64   : > { %1821 = vmatpush.bf16.msra.mxu3 %v1788_v13 }
  0x65   : > { %1155 = vmatpush.bf16.msra.mxu0 %v1779_v50 }
  0x66   : > { %1256 = vmatpush.bf16.msra.mxu1 %v1787_v16 }
  0x67   : > { %1814 = vmatpush.bf16.msra.mxu2 %v1779_v50 }
  0x68   : > { %1822 = vmatpush.bf16.msra.mxu3 %v1787_v16 }
  0x69   : > { %1156 = vmatpush.bf16.msra.mxu0 %v1778_v52 }
  0x6a   : > { %1257 = vmatpush.bf16.msra.mxu1 %v1786_v25  ;;  %1299 = vperm.xlu0 %1846, %v1290_v47  }
  0x6b   : > { %1815 = vmatpush.bf16.msra.mxu2 %v1778_v52 }
  0x6c   : > { %1157 = vmatmul.bf16.vlgmr.msra.gmra.mxu0 %v1098_v56  ;;  %1823 = vmatpush.bf16.msra.mxu3 %v1786_v25  ;;  %v1278_v25 = vrot.slane %v663_v23, 7 }
  0x6e   : > { %1162 = vmatmul.bf16.vlgmr.msra.gmra.mxu2 %v1097_v54 }
  0xa9   : > { %v389_v57 = vpop.f32.mrf.mxu0 }
  0xaa   : > { %v455_v59 = vpop.f32.mrf.mxu1 }
  0xab   : > { %v456_v31 = vadd.f32 %v455_v59, %v389_v57 }
  0xb1   : > { %v549_v60 = vpop.f32.mrf.mxu2  ;;  %v391_v62 = vpop.f32.mrf.mxu0 }
  0xb2   : > { %v650_v61 = vpop.f32.mrf.mxu3  ;;  %v457_v63 = vpop.f32.mrf.mxu1  ;;  %v558_v37 = vadd.f32 %v549_v60, %v456_v31 }
  0xb3   : > { %v458_v41 = vadd.f32 %v457_v63, %v391_v62 }
  0xb4   : > { %v659_v43 = vadd.f32 %v650_v61, %v558_v37 }
  0xb9   : > { %v551_v1 = vpop.f32.mrf.mxu2  ;;  %v394_v0 = vpop.f32.mrf.mxu0 }
  0xba   : > { %v2261_v40 = vpop.f32.mrf.mxu3  ;;  %v460_v58 = vpop.f32.mrf.mxu1  ;;  %v559_v44 = vadd.f32 %v551_v1, %v458_v41 }
  0xbb   : > { %v461_v39 = vadd.f32 %v460_v58, %v394_v0  ;;  %v1848_v0 = vld [vmem:[%s2317_s2] ss:$0 sm:$0xff] }
  0xbc   : > { %v660_v51 = vadd.f32 %v2261_v40, %v559_v44 }
  0xc1   : > { %v554_v2 = vpop.f32.mrf.mxu2  ;;  %v396_v5 = vpop.f32.mrf.mxu0 }
  0xc2   : > { %v655_v3 = vpop.f32.mrf.mxu3  ;;  %v462_v6 = vpop.f32.mrf.mxu1  ;;  %v560_v42 = vadd.f32 %v554_v2, %v461_v39 }
  0xc4   : > { %v661_v50 = vadd.f32 %v655_v3, %v560_v42 }
  0xc9   : > { %v556_v8 = vpop.f32.mrf.mxu2  ;;  %v759_v11 = vpop.f32.mrf.mxu0 }
  0xca   : > { %v657_v9 = vpop.f32.mrf.mxu3  ;;  %v846_v12 = vpop.f32.mrf.mxu1  ;;  %v768_v48 = vadd.f32 %v759_v11, %v659_v43 }
  0xcc   : > { %v855_v38 = vadd.f32 %v846_v12, %v768_v48 }
  0xd1   : > { %v953_v14 = vpop.f32.mrf.mxu2  ;;  %v761_v17 = vpop.f32.mrf.mxu0 }
  0xd2   : > { %v1062_v20 = vpop.f32.mrf.mxu3  ;;  %v848_v22 = vpop.f32.mrf.mxu1  ;;  %v769_v53 = vadd.f32 %v761_v17, %v660_v51  ;;  %v962_v54 = vadd.f32 %v953_v14, %v855_v38  ;;  %v1849_v14 = vld [vmem:[#allocation2] ss:$0 sm:$0xff]  ;;  %v1273_v17 = vrot.slane %v563_v36, 7 }
  0xd4   : > { %v856_v61 = vadd.f32 %v848_v22, %v769_v53  ;;  %v1071_v63 = vadd.f32 %v1062_v20, %v962_v54  ;;  %v1274_v20 = vrot.slane %v1797_v18, 7  ;;  %v1276_v22 = vrot.slane %v272_v21, 7 }
  0xd5   : > { %v1305_v18 = vpop.permute.xlu1 %1304 }
  0xd6   : > { %v1277_v35 = vsel %vm1272_vm6, %v1274_v20, %v1276_v22 }
  0xd9   : > { %v955_v27 = vpop.f32.mrf.mxu2  ;;  %v764_v28 = vpop.f32.mrf.mxu0 }
  0xda   : > { %v1064_v29 = vpop.f32.mrf.mxu3  ;;  %v851_v32 = vpop.f32.mrf.mxu1  ;;  %v770_v52 = vadd.f32 %v764_v28, %v661_v50  ;;  %v963_v1 = vadd.f32 %v955_v27, %v856_v61 }
  0xdb   : > { %v1295_v28 = vpop.permute.xlu0 %1294 }
  0xdc   : > { %v857_v57 = vadd.f32 %v851_v32, %v770_v52  ;;  %v1072_v40 = vadd.f32 %v1064_v29, %v963_v1  ;;  %v1275_v29 = vsel %vm1272_vm6, %v1273_v17, %v1274_v20  ;;  %v1279_v32 = vsel %vm1272_vm6, %v1276_v22, %v1278_v25 }
  0xe1   : > { %v958_v26 = vpop.f32.mrf.mxu2  ;;  %v766_v30 = vpop.f32.mrf.mxu0 }
  0xe2   : > { %v1067_v46 = vpop.f32.mrf.mxu3  ;;  %v853_v49 = vpop.f32.mrf.mxu1  ;;  %v964_v62 = vadd.f32 %v958_v26, %v857_v57 }
  0xe3   : > { %v1300_v23 = vpop.permute.xlu0 %1299 }
  0xe4   : > { %v1073_v58 = vadd.f32 %v1067_v46, %v964_v62 }
  0xe9   : > { %v960_v56 = vpop.f32.mrf.mxu2  ;;  %v1158_v59 = vpop.f32.mrf.mxu0 }
  0xea   : > { %v1069_v60 = vpop.f32.mrf.mxu3  ;;  %v1167_v45 = vadd.f32 %v1158_v59, %v1071_v63 }
  0xec   : > { %v1174_v4 = vadd.f32 %v1848_v0, %v1167_v45 }
  0xee   : > { %v1177_v9 = vmax.f32 %v1174_v4, 0.0 }
  0xf1   : > { %v1163_v55 = vpop.f32.mrf.mxu2  ;;  %v1160_v3 = vpop.f32.mrf.mxu0 }
  0xf2   : > { %v1169_v2 = vadd.f32 %v1163_v55, %v1073_v58  ;;  %v1168_v5 = vadd.f32 %v1160_v3, %v1072_v40 }
  0xf4   : > { %v1176_v6 = vadd.f32 %v1848_v0, %v1169_v2  ;;  %v1175_v7 = vadd.f32 %v1848_v0, %v1168_v5 }
  0xf6   : > { %v1179_v8 = vmax.f32 %v1176_v6, 0.0  ;;  %v1178_v10 = vmax.f32 %v1175_v7, 0.0 }
  0xf8   : > { %v1181_v11 = vpack.c.bf16 %v1179_v8, %v1179_v8  ;;  %v1180_v12 = vpack.c.bf16 %v1178_v10, %v1177_v9 }
  0xf9   : > { %v1165_v13 = vpop.f32.mrf.mxu2 }
  0xfa   : > { %1263 = vmatmul.bf16.vlgmr.msra.gmra.mxu3 %v1181_v11  ;;  %1258 = vmatmul.bf16.vlgmr.msra.gmra.mxu1 %v1180_v12 }
 0x177   : > { %v1259_v16 = vpop.f32.mrf.mxu1 }
 0x178   : > { %v1260_v27 = vadd.f32 %v1849_v14, %v1259_v16 }
 0x17a   : > { %v1283_v34 = vadd.f32 %v1275_v29, %v1260_v27 }
 0x17c   : > { %v1286_v39 = vmax.f32 %v1283_v34, 0.0 }
 0x17d   : > { %v1264_v31 = vpop.f32.mrf.mxu3 }
 0x17e   : > { %v1265_v33 = vadd.f32 %v1849_v14, %v1264_v31  ;;  %v1307_v44 = vmul.f32 %v1295_v28, %v1286_v39 }
 0x17f   : > { %v1261_v36 = vpop.f32.mrf.mxu1 }
 0x180   : > { %v1285_v24 = vadd.f32 %v1279_v32, %v1265_v33  ;;  %v1262_v15 = vadd.f32 %v1849_v14, %v1261_v36 }
 0x182   : > { %v1288_v37 = vmax.f32 %v1285_v24, 0.0  ;;  %v1284_v41 = vadd.f32 %v1277_v35, %v1262_v15 }
 0x184   : > { %v1309_v21 = vmul.f32 %v1305_v18, %v1288_v37  ;;  %v1287_v42 = vmax.f32 %v1284_v41, 0.0 }
 0x185   : > { %v1266_v19 = vpop.f32.mrf.mxu3 }
 0x186   : > { %v1312_v43 = vpack.c.bf16 %v1309_v21, %v1309_v21  ;;  %v1308_v26 = vmul.f32 %v1300_v23, %v1287_v42 }
 0x188   : > { %1315 = vst [vmem:[%s266_s7 + $0x8] sm:$0xf] %v1312_v43  ;;  %v1805_v30 = vpack.c.bf16 %v1308_v26, %v1307_v44 }
 0x18a   : > { %1806 = vst [vmem:[%s266_s7] sm:$0xff] %v1805_v30  }
 0x18b PF: > { %s17_s21 = sadd.s32 1, %s1890_s21  }
 0x18c   : > { %p14_p7 = scmp.ge.s32.totalorder %s17_s21, 4  }
 0x18e   :  { %16 = sbr.rel (!%p14_p7) target bundleno = 1 (0x1), region = 79 }
 0x193   :  { %1337 = vsyncpa [#allocation3], 1 }
 0x194   :  { %1339 = vsyncpa [#allocation3 + $0x1], 1 }

// kernel: vqvae_forward.17
= control target key start
LH: loop header
LB: loop body
LE: loop exit
PB: predicated region body
PF: predicated region fallthrough
CT: control target
= control target key end

     0   :  { %9 = vsyncpa [#allocation3], 0  ;;  %s683_s15 = smov 0   ;;  %s685_s16 = smov 0   ;;  %s760_s0 = inlined_call_operand.vmem [shape: bf16[2,24,128], index: 0, kind: input, shape index: {}]   ;;  %s761_s1 = inlined_call_operand.vmem [shape: bf16[128,128], index: 1, kind: input, shape index: {}]   ;;  %s762_s2 = inlined_call_operand.hbm [shape: f32[1,128], index: 2, kind: input, shape index: {}]   ;;  %s763_s3 = inlined_call_operand.vmem [shape: f32[24,1], index: 3, kind: input, shape index: {}]   ;;  %s764_s4 = inlined_call_operand.vmem [shape: bf16[2,24,128], index: 4, kind: output, shape index: {}]  }
   0x1   :  { %s687_s17 = smov 0  }
   0x2 LB: > { %s488_s18 = sadd.s32 4294967295, %s654_s17   ;;  %s24_s19 = sadd.s32 1, %s650_s16  ;;  %s654_s17 = sphi %s687_s17, %s15_s17   ;;  %s650_s16 = sphi %s685_s16, %s766_s16   ;;  %s646_s15 = sphi %s683_s15, %s765_s15  }
   0x3   : > { %p25_p0 = scmp.ge.s32.totalorder %s24_s19, 2  ;;  %p490_p1 = scmp.ge.s32.totalorder %s654_s17, 1 }
   0x4   : > { %p159_p2 = scmp.lt.s32.totalorder %s654_s17, 3  ;;  %p567_p4 = scmp.eq.s32.totalorder %s488_s18, 0 }
   0x5   : > { %s768_s19 = smov (%p25_p0, %s24_s19), 0  ;;  %s179_s22 = sshll.u32 %s762_s2, 4  ;;  %s180_s22 = int_to_ptr.hbm [resolvable:$true] %s179_s22 }
   0x6   : > { %p160_p3 = pnand %p490_p1, %p159_p2  ;;  %s656_s23 = smov [#allocation2]  }
   0x7   : > { %s181_s24 = sshll.u32 %s656_s23, 4  ;;  %s182_s24 = int_to_ptr.vmem [resolvable:$true] %s181_s24 }
   0x8   : > { %p563_p5 = pneg %p160_p3  ;;  %205 = sbr.rel (%p160_p3) target bundleno = 187 (0xbb), region = 36 }
   0xa   : > { %p564_p6 = pnand %p567_p4, %p563_p5 }
   0xc   : > { %566 = dma.hbm_to_vmem [thread:$0]  (!%p564_p6), %s180_s22, 16, %s182_s24, [#allocation3]  }
   0xd   : > { %641 = dma.done.wait (%p567_p4), [#allocation3], 16  }
   0xe   : > { %643 = vsyncadd (%p567_p4), [#allocation3], 4294967280  ;;  %v544_v0 = vld [vmem:[%s761_s1 + $0x38] sm:$0xff]  ;;  %v543_v1 = vld [vmem:[%s761_s1 + $0x30] sm:$0xff]  ;;  %v657_v2 = vmov 0   ;;  %p239_p7 = scmp.lt.s32.totalorder %s646_s15, 1 }
   0xf   : > { %337 = vmatpush.bf16.msra.mxu0 %v544_v0  ;;  %550 = vmatpush.bf16.msra.mxu1 %v544_v0  ;;  %v355_v3 = vld [vmem:[%s763_s3] sm:$0xff]  ;;  %v357_v4 = vld [vmem:[%s763_s3 + $0x10] sm:$0xff]  ;;  %v542_v5 = vld [vmem:[%s761_s1 + $0x28] sm:$0xff] }
  0x10   : > { %595 = vset.pattern.permute.xlu0 %v657_v2  ;;  %596 = vset.pattern.permute.xlu1 %v657_v2  ;;  %v356_v6 = vld [vmem:[%s763_s3 + $0x8] sm:$0xff]  ;;  %v541_v7 = vld [vmem:[%s761_s1 + $0x20] sm:$0xff]  ;;  %s770_s15 = smov (!%p239_p7, %s646_s15), 1  ;;  %v540_v8 = vld [vmem:[%s761_s1 + $0x18] sm:$0xff] }
  0x11   : > { %360 = vperm.xlu0 %595, %v355_v3   ;;  %370 = vperm.xlu1 %596, %v357_v4   ;;  %s558_s18 = smul.u32 12, %s770_s15  ;;  %v539_v9 = vld [vmem:[%s761_s1 + $0x10] sm:$0xff]  ;;  %v538_v10 = vld [vmem:[%s761_s1 + $0x8] sm:$0xff]  ;;  %v537_v13 = vld [vmem:[%s761_s1] sm:$0xff] }
  0x12   : > { %v597_v17 = vld [vmem:[#allocation2] ss:$0 sm:$0xff] }
  0x13   : > { %338 = vmatpush.bf16.msra.mxu0 %v543_v1  ;;  %551 = vmatpush.bf16.msra.mxu1 %v543_v1  ;;  %s243_s24 = scalar_lea.vmem %s760_s0, %s558_s18  ;;  %s255_s30 = scalar_lea.vmem %s764_s4, %s558_s18 }
  0x14   : > { %v258_v11 = vld [vmem:[%s243_s24 + $0x8] sm:$0xf]  ;;  %v536_v14 = vld [vmem:[%s243_s24] sm:$0xff] }
  0x15   : > { %v284_v12 = vunpack.c.l.b16 %v258_v11 }
  0x17   : > { %339 = vmatpush.bf16.msra.mxu0 %v542_v5  ;;  %552 = vmatpush.bf16.msra.mxu1 %v542_v5  ;;  %v286_v15 = vpack.c.b16 %v284_v12, %v284_v12 }
  0x19   : > { %365 = vperm.xlu0 %595, %v356_v6  }
  0x1b   : > { %340 = vmatpush.bf16.msra.mxu0 %v541_v7  ;;  %553 = vmatpush.bf16.msra.mxu1 %v541_v7 }
  0x1f   : > { %341 = vmatpush.bf16.msra.mxu0 %v540_v8  ;;  %554 = vmatpush.bf16.msra.mxu1 %v540_v8 }
  0x23   : > { %342 = vmatpush.bf16.msra.mxu0 %v539_v9  ;;  %555 = vmatpush.bf16.msra.mxu1 %v539_v9 }
  0x27   : > { %343 = vmatpush.bf16.msra.mxu0 %v538_v10  ;;  %556 = vmatpush.bf16.msra.mxu1 %v538_v10 }
  0x2b   : > { %344 = vmatpush.bf16.msra.mxu0 %v537_v13  ;;  %557 = vmatpush.bf16.msra.mxu1 %v537_v13 }
  0x2e   : > { %345 = vmatmul.bf16.vlgmr.msra.gmra.mxu0 %v536_v14  ;;  %350 = vmatmul.bf16.vlgmr.msra.gmra.mxu1 %v286_v15 }
  0x83   : > { %v361_v16 = vpop.permute.xlu0 %360  ;;  %v371_v18 = vpop.permute.xlu1 %370 }
  0x8b   : > { %v366_v28 = vpop.permute.xlu0 %365 }
  0xab   : > { %v346_v19 = vpop.f32.mrf.mxu0  ;;  %v351_v20 = vpop.f32.mrf.mxu1 }
  0xac   : > { %v352_v21 = vadd.f32 %v597_v17, %v351_v20  ;;  %v347_v24 = vadd.f32 %v597_v17, %v346_v19 }
  0xae   : > { %v375_v22 = vmul.f32 %v371_v18, %v352_v21  ;;  %v373_v29 = vmul.f32 %v361_v16, %v347_v24 }
  0xb0   : > { %v378_v23 = vpack.c.bf16 %v375_v22, %v375_v22 }
  0xb2   : > { %381 = vst [vmem:[%s255_s30 + $0x8] sm:$0xf] %v378_v23 }
  0xb3   : > { %v348_v25 = vpop.f32.mrf.mxu0  ;;  %v353_v26 = vpop.f32.mrf.mxu1 }
  0xb4   : > { %v349_v27 = vadd.f32 %v597_v17, %v348_v25 }
  0xb6   : > { %v374_v30 = vmul.f32 %v366_v28, %v349_v27 }
  0xb8   : > { %v548_v31 = vpack.c.bf16 %v374_v30, %v373_v29 }
  0xba   : > { %549 = vst [vmem:[%s255_s30] sm:$0xff] %v548_v31  }
  0xbb PF: > { %s15_s17 = sadd.s32 1, %s654_s17   ;;  %s765_s15 = smov %s650_s16 }
  0xbc   : > { %p12_p8 = scmp.ge.s32.totalorder %s15_s17, 4   ;;  %s766_s16 = smov %s768_s19 }
  0xbe   :  { %14 = sbr.rel (!%p12_p8) target bundleno = 2 (0x2), region = 75 }
  0xc3   :  { %409 = vsyncpa [#allocation3], 1 }
  0xc4   :  { %411 = vsyncpa [#allocation3 + $0x1], 1 }

// kernel: vqvae_forward.18
= control target key start
LH: loop header
LB: loop body
LE: loop exit
PB: predicated region body
PF: predicated region fallthrough
CT: control target
= control target key end

     0   :  { %13 = vsyncpa [#allocation3], 0  ;;  %s920_s24 = smov 0   ;;  %s1031_s0 = inlined_call_operand.vmem [shape: bf16[2,24,128], index: 0, kind: input, shape index: {}]   ;;  %s1032_s1 = inlined_call_operand.vmem [shape: bf16[128,128], index: 1, kind: input, shape index: {}]   ;;  %s1033_s2 = inlined_call_operand.hbm [shape: f32[1,128], index: 2, kind: input, shape index: {}]   ;;  %s1034_s3 = inlined_call_operand.vmem [shape: f32[24,1], index: 3, kind: input, shape index: {}]   ;;  %s1035_s4 = inlined_call_operand.vmem [shape: bf16[2,24,128], index: 4, kind: output, shape index: {0}]   ;;  %s1036_s5 = inlined_call_operand.vmem [shape: bf16[2,24,128], index: 5, kind: output, shape index: {1}]   ;;  %s1037_s6 = inlined_call_operand.vmem [shape: f32[2,1,128], index: 6, kind: output, shape index: {2}]   ;;  %s1038_s7 = inlined_call_operand.vmem [shape: f32[2,1,128], index: 7, kind: output, shape index: {3}]  }
   0x1 LB: > { %s926_s25 = sadd.s32 4294967295, %s874_s24   ;;  %p727_p0 = scmp.ge.s32.totalorder %s874_s24, 1  ;;  %s874_s24 = sphi %s920_s24, %s19_s24  }
   0x2   : > { %p217_p1 = scmp.lt.s32.totalorder %s874_s24, 3  ;;  %s232_s28 = sshll.u32 %s1033_s2, 4  ;;  %s233_s28 = int_to_ptr.hbm [resolvable:$true] %s232_s28 }
   0x3   : > { %p816_p3 = scmp.eq.s32.totalorder %s926_s25, 0  ;;  %s876_s29 = smov [#allocation2]  }
   0x4   : > { %p218_p2 = pnand %p727_p0, %p217_p1  ;;  %s234_s30 = sshll.u32 %s876_s29, 4  ;;  %s235_s30 = int_to_ptr.vmem [resolvable:$true] %s234_s30 }
   0x6   : > { %p812_p4 = pneg %p218_p2  ;;  %258 = sbr.rel (%p218_p2) target bundleno = 824 (0x338), region = 36 }
   0x8   : > { %p813_p5 = pnand %p816_p3, %p812_p4 }
   0xa   : > { %815 = dma.hbm_to_vmem [thread:$0]  (!%p813_p5), %s233_s28, 16, %s235_s30, [#allocation3]  }
   0xb   : > { %869 = dma.done.wait (%p816_p3), [#allocation3], 16  }
   0xc   : > { %871 = vsyncadd (%p816_p3), [#allocation3], 4294967280  ;;  %v788_v0 = vld [vmem:[%s1032_s1 + $0x38] sm:$0xff]  ;;  %v787_v1 = vld [vmem:[%s1032_s1 + $0x30] sm:$0xff]  ;;  %p302_p6 = scmp.lt.s32.totalorder %s926_s25, 1  ;;  %v443_v20 = vlaneseq  ;;  %v877_v41 = vmov 0  }
   0xd   : > { %412 = vmatpush.bf16.xpose.msra.mxu0 %v788_v0  ;;  %799 = vmatpush.bf16.xpose.msra.mxu2 %v788_v0  ;;  %v786_v2 = vld [vmem:[%s1032_s1 + $0x28] sm:$0xff]  ;;  %v785_v3 = vld [vmem:[%s1032_s1 + $0x20] sm:$0xff]  ;;  %v784_v4 = vld [vmem:[%s1032_s1 + $0x18] sm:$0xff]  ;;  %v878_v54 = vmov 1.0|1.0   ;;  %v879_v56 = vmov 0.0  }
   0xe   : > { %479 = vmatpush.bf16.msra.mxu1 %v788_v0  ;;  %v783_v5 = vld [vmem:[%s1032_s1 + $0x10] sm:$0xff]  ;;  %s1040_s25 = smov (!%p302_p6, %s926_s25), 1  ;;  %v782_v6 = vld [vmem:[%s1032_s1 + $0x8] sm:$0xff]  ;;  %v781_v7 = vld [vmem:[%s1032_s1] sm:$0xff]  ;;  %v444_v22 = vand.u32 127, %v443_v20  ;;  %830 = vset.pattern.permute.xlu0 %v877_v41  ;;  %vm536_vm9 = vcmask 7168  }
   0xf   : > { %s960_s22 = smul.u32 12, %s1040_s25  ;;  %v833_v21 = vld [vmem:[#allocation2] ss:$0 sm:$0xff]  ;;  %831 = vset.pattern.permute.xlu1 %v877_v41  ;;  %832 = vset.pattern.permute.xlu2 %v877_v41  ;;  %v993_v50 = vld [vmem:[%s1034_s3 + $0x8] sm:$0xff]  ;;  %v999_v51 = vld [vmem:[%s1034_s3 + $0x10] sm:$0xff]  ;;  %s322_s18 = scalar_lea.vmem %s1038_s7, %s1040_s25 }
  0x10   : > { %vm445_vm0 = vcmp.lt.s32.totalorder %v444_v22, 16  ;;  %v449_v42 = vcvt.s32.f32 %v444_v22  ;;  %v987_v49 = vld [vmem:[%s1034_s3] sm:$0xff]  ;;  %s319_s26 = scalar_lea.vmem %s1037_s6, %s1040_s25 }
  0x11   : > { %s306_s29 = scalar_lea.vmem %s1031_s0, %s960_s22  ;;  %s316_s15 = scalar_lea.vmem %s1036_s5, %s960_s22 }
  0x12   : > { %480 = vmatpush.bf16.msra.mxu1 %v787_v1  ;;  %v325_v8 = vld [vmem:[%s306_s29 + $0x8] sm:$0xf]  ;;  %v323_v9 = vld [vmem:[%s306_s29] sm:$0xff]   ;;  %s311_s21 = scalar_lea.vmem %s1035_s4, %s960_s22 }
  0x13   : > { %v969_v10 = vunpack.c.l.bf16 %v323_v9  ;;  %v971_v11 = vunpack.c.l.bf16 %v325_v8  ;;  %v977_v14 = vunpack.c.h.bf16 %v323_v9  ;;  %v359_v16 = vunpack.c.l.b16 %v325_v8  ;;  %v780_v17 = vld [vmem:[%s306_s29] sm:$0xff] }
  0x15   : > { %413 = vmatpush.bf16.xpose.msra.mxu0 %v787_v1  ;;  %800 = vmatpush.bf16.xpose.msra.mxu2 %v787_v1  ;;  %v329_v12 = vmul.f32 %v969_v10, %v969_v10  ;;  %v331_v13 = vmul.f32 %v971_v11, %v971_v11  ;;  %v330_v15 = vmul.f32 %v977_v14, %v977_v14 }
  0x16   : > { %481 = vmatpush.bf16.msra.mxu1 %v786_v2  ;;  %v361_v18 = vpack.c.b16 %v359_v16, %v359_v16 }
  0x17   : > { %332 = vadd.xlane.f32.xlu0 %v329_v12  ;;  %336 = vadd.xlane.f32.xlu1 %v331_v13 }
  0x1a   : > { %482 = vmatpush.bf16.msra.mxu1 %v785_v3 }
  0x1d   : > { %414 = vmatpush.bf16.xpose.msra.mxu0 %v786_v2  ;;  %801 = vmatpush.bf16.xpose.msra.mxu2 %v786_v2 }
  0x1e   : > { %483 = vmatpush.bf16.msra.mxu1 %v784_v4 }
  0x1f   : > { %334 = vadd.xlane.f32.xlu0 %v330_v15 }
  0x22   : > { %484 = vmatpush.bf16.msra.mxu1 %v783_v5 }
  0x25   : > { %415 = vmatpush.bf16.xpose.msra.mxu0 %v785_v3  ;;  %802 = vmatpush.bf16.xpose.msra.mxu2 %v785_v3 }
  0x26   : > { %485 = vmatpush.bf16.msra.mxu1 %v782_v6 }
  0x2a   : > { %486 = vmatpush.bf16.msra.mxu1 %v781_v7 }
  0x2d   : > { %416 = vmatpush.bf16.xpose.msra.mxu0 %v784_v4  ;;  %803 = vmatpush.bf16.xpose.msra.mxu2 %v784_v4 }
  0x35   : > { %417 = vmatpush.bf16.xpose.msra.mxu0 %v783_v5  ;;  %804 = vmatpush.bf16.xpose.msra.mxu2 %v783_v5 }
  0x3d   : > { %418 = vmatpush.bf16.xpose.msra.mxu0 %v782_v6  ;;  %805 = vmatpush.bf16.xpose.msra.mxu2 %v782_v6 }
  0x45   : > { %419 = vmatpush.bf16.xpose.msra.mxu0 %v781_v7  ;;  %806 = vmatpush.bf16.xpose.msra.mxu2 %v781_v7 }
  0x4c   : > { %420 = vmatmul.bf16.vlgmr.msra.gmra.mxu0 %v780_v17  ;;  %425 = vmatmul.bf16.vlgmr.msra.gmra.mxu2 %v361_v18 }
  0x8a   : > { %v333_v19 = vpop.xlane.xlu0 %332  ;;  %v337_v32 = vpop.xlane.xlu1 %336 }
  0x8b   : > { %v434_v23 = vadd.f32 %v833_v21, %v333_v19  ;;  %v436_v36 = vadd.f32 %v833_v21, %v337_v32 }
  0x92   : > { %v335_v27 = vpop.xlane.xlu0 %334 }
  0x93   : > { %v435_v30 = vadd.f32 %v833_v21, %v335_v27 }
  0xc9   : > { %v421_v24 = vpop.f32.mrf.mxu0 }
  0xca   : > { %v437_v25 = vmul.f32 2.0, %v421_v24 }
  0xcc   : > { %v440_v26 = vsub.f32 %v434_v23, %v437_v25 }
  0xce   : > { %v446_v28 = vsel %vm445_vm0, %v440_v26, 1e+30 }
  0xcf   : > { %450 = vmin.xlane.f32.xlu1 %v446_v28  ;;  %v426_v29 = vpop.f32.mrf.mxu2 }
  0xd0   : > { %v439_v35 = vmul.f32 2.0, %v426_v29 }
  0xd1   : > { %v423_v31 = vpop.f32.mrf.mxu0 }
  0xd2   : > { %v438_v33 = vmul.f32 2.0, %v423_v31  ;;  %v442_v39 = vsub.f32 %v436_v36, %v439_v35 }
  0xd4   : > { %v441_v34 = vsub.f32 %v435_v30, %v438_v33  ;;  %v448_v40 = vsel %vm445_vm0, %v442_v39, 1e+30 }
  0xd6   : > { %v447_v37 = vsel %vm445_vm0, %v441_v34, 1e+30 }
  0xd7   : > { %452 = vmin.xlane.f32.xlu2 %v447_v37  ;;  %v428_v38 = vpop.f32.mrf.mxu2 }
  0xdf   : > { %454 = vmin.xlane.f32.xlu2 %v448_v40 }
 0x142   : > { %v451_v43 = vpop.xlane.xlu1 %450 }
 0x143   : > { %vm456_vm1 = vcmp.le.f32.partialorder %v446_v28, %v451_v43 }
 0x144   : > { %v459_v44 = vsel %vm456_vm1, %v449_v42, 128.0 }
 0x145   : > { %462 = vmin.xlane.f32.xlu0 %v459_v44 }
 0x14a   : > { %v453_v45 = vpop.xlane.xlu2 %452 }
 0x14b   : > { %vm457_vm2 = vcmp.le.f32.partialorder %v447_v37, %v453_v45 }
 0x14c   : > { %v460_v46 = vsel %vm457_vm2, %v449_v42, 128.0 }
 0x14d   : > { %464 = vmin.xlane.f32.xlu1 %v460_v46 }
 0x152   : > { %v455_v47 = vpop.xlane.xlu2 %454 }
 0x153   : > { %vm458_vm3 = vcmp.le.f32.partialorder %v448_v40, %v455_v47 }
 0x154   : > { %v461_v48 = vsel %vm458_vm3, %v449_v42, 128.0 }
 0x155   : > { %466 = vmin.xlane.f32.xlu2 %v461_v48 }
 0x159   : > { %502 = vperm.xlu0 %830, %v987_v49  }
 0x166   : > { %507 = vperm.xlu1 %831, %v993_v50  }
 0x16d   : > { %512 = vperm.xlu2 %832, %v999_v51  }
 0x1b8   : > { %v463_v52 = vpop.xlane.xlu0 %462 }
 0x1b9   : > { %vm468_vm4 = vcmp.eq.f32.partialorder %v449_v42, %v463_v52 }
 0x1ba   : > { %v771_v62 = vsel %vm468_vm4, 1.0, %v879_v56 }
 0x1c0   : > { %v465_v53 = vpop.xlane.xlu1 %464 }
 0x1c1   : > { %vm469_vm5 = vcmp.eq.f32.partialorder %v449_v42, %v465_v53 }
 0x1c2   : > { %vm774_vm6 = vmpackc.low %vm469_vm5, %vm468_vm4  ;;  %v772_v63 = vsel %vm469_vm5, 1.0, %v879_v56 }
 0x1c3   : > { %775 = vmatmul.msk.bf16.vlgmr.msra.gmra.mxu1 %vm774_vm6, %v878_v54 }
 0x1c8   : > { %v467_v55 = vpop.xlane.xlu2 %466 }
 0x1c9   : > { %vm470_vm7 = vcmp.eq.f32.partialorder %v449_v42, %v467_v55 }
 0x1ca   : > { %v773_v57 = vsel %vm470_vm7, 1.0, %v879_v56  ;;  %vm776_vm8 = vmpackc.low %vm470_vm7, %vm470_vm7 }
 0x1cb   : > { %v503_v61 = vpop.permute.xlu0 %502 }
 0x1cc   : > { %v518_v1 = vmul.f32 %v771_v62, %v503_v61 }
 0x1d0   : > { %v513_v58 = vpop.permute.xlu2 %512 }
 0x1d1   : > { %v520_v59 = vmul.f32 %v773_v57, %v513_v58 }
 0x1d3   : > { %v571_v60 = vpack.c.bf16 %v520_v59, %v520_v59  ;;  %777 = vmatmul.msk.bf16.gmra.mxu1 %vm776_vm8, %v878_v54 }
 0x1d5   : > { %574 = vst [vmem:[%s316_s15 + $0x8] sm:$0xf] %v571_v60 }
 0x1d8   : > { %v508_v0 = vpop.permute.xlu1 %507 }
 0x1d9   : > { %v519_v2 = vmul.f32 %v772_v63, %v508_v0 }
 0x1db   : > { %v554_v3 = vadd.f32 %v519_v2, %v518_v1  ;;  %v797_v4 = vpack.c.bf16 %v519_v2, %v518_v1 }
 0x1dd   : > { %v555_v5 = vadd.f32 %v554_v3, %v520_v59  ;;  %798 = vst [vmem:[%s316_s15] sm:$0xff] %v797_v4  }
 0x1df   : > { %v556_v6 = vrot.slane %v555_v5, 4 }
 0x1e1   : > { %v557_v7 = vadd.f32 %v556_v6, %v555_v5 }
 0x1e3   : > { %v558_v8 = vrot.slane %v557_v7, 2 }
 0x1e5   : > { %v559_v9 = vadd.f32 %v558_v8, %v557_v7 }
 0x1e7   : > { %v560_v12 = vrot.slane %v559_v9, 1 }
 0x1e9   : > { %v561_v13 = vadd.f32 %v560_v12, %v559_v9 }
 0x1eb   : > { %562 = vst [vmem:[%s322_s18] sm:$0x1] %v561_v13 }
 0x240   : > { %v488_v15 = vpop.f32.mrf.mxu1 }
 0x241   : > { %v515_v16 = vmul.f32 %v503_v61, %v488_v15 }
 0x243   : > { %v521_v17 = vsub.f32 %v515_v16, %v969_v10 }
 0x245   : > { %v524_v18 = vmul.f32 %v521_v17, %v521_v17 }
 0x247   : > { %527 = vadd.xlane.f32.xlu2 %v524_v18 }
 0x248   : > { %v490_v19 = vpop.f32.mrf.mxu1 }
 0x249   : > { %v516_v20 = vmul.f32 %v508_v0, %v490_v19 }
 0x24b   : > { %v792_v21 = vpack.c.bf16 %v516_v20, %v515_v16  ;;  %v522_v22 = vsub.f32 %v516_v20, %v977_v14 }
 0x24d   : > { %793 = vst [vmem:[%s311_s21] sm:$0xff] %v792_v21   ;;  %v525_v23 = vmul.f32 %v522_v22, %v522_v22 }
 0x24f   : > { %529 = vadd.xlane.f32.xlu1 %v525_v23 }
 0x250   : > { %v493_v24 = vpop.f32.mrf.mxu1 }
 0x251   : > { %v517_v25 = vmul.f32 %v513_v58, %v493_v24 }
 0x253   : > { %v565_v26 = vpack.c.bf16 %v517_v25, %v517_v25  ;;  %v523_v27 = vsub.f32 %v517_v25, %v971_v11 }
 0x255   : > { %568 = vst [vmem:[%s311_s21 + $0x8] sm:$0xf] %v565_v26  ;;  %v526_v10 = vmul.f32 %v523_v27, %v523_v27 }
 0x257   : > { %531 = vadd.xlane.f32.xlu0 %v526_v10 }
 0x258   : > { %v495_v28 = vpop.f32.mrf.mxu1 }
 0x2ba   : > { %v528_v30 = vpop.xlane.xlu2 %527 }
 0x2bb   : > { %v533_v32 = vmul.f32 %v528_v30, %v987_v49 }
 0x2bd   : > { %v537_v34 = vsel %vm536_vm9, %v533_v32, 0.0 }
 0x2c2   : > { %v530_v29 = vpop.xlane.xlu1 %529 }
 0x2c3   : > { %v534_v31 = vmul.f32 %v530_v29, %v993_v50 }
 0x2c5   : > { %v538_v14 = vsel %vm536_vm9, %v534_v31, 0.0 }
 0x2c6   : > { %v539_v36 = vadd.f32 %v538_v14, %v537_v34 }
 0x2ca   : > { %v532_v33 = vpop.xlane.xlu0 %531 }
 0x2cb   : > { %v535_v35 = vmul.f32 %v532_v33, %v999_v51 }
 0x2cd   : > { %v540_v37 = vsel %vm536_vm9, %v535_v35, 0.0 }
 0x2ce   : > { %v541_v11 = vadd.f32 %v540_v37, %v539_v36 }
 0x2d0   : > { %v542_v38 = vrot.slane %v541_v11, 4 }
 0x2d2   : > { %v543_v39 = vadd.f32 %v542_v38, %v541_v11 }
 0x2d4   : > { %v544_v40 = vrot.slane %v543_v39, 2 }
 0x2d6   : > { %v545_v41 = vadd.f32 %v544_v40, %v543_v39 }
 0x2d8   : > { %v546_v42 = vrot.slane %v545_v41, 1 }
 0x2da   : > { %v547_v43 = vadd.f32 %v546_v42, %v545_v41 }
 0x2dc   : > { %550 = vperm.xlu2 %832, %v547_v43  }
 0x336   : > { %v551_v44 = vpop.permute.xlu2 %550 }
 0x337   : > { %553 = vst [vmem:[%s319_s26] sm:$0x1] %v551_v44 }
 0x338 PF: > { %s19_s24 = sadd.s32 1, %s874_s24  }
 0x339   : > { %p16_p7 = scmp.ge.s32.totalorder %s19_s24, 4  }
 0x33b   :  { %18 = sbr.rel (!%p16_p7) target bundleno = 1 (0x1), region = 107 }
 0x340   :  { %636 = vsyncpa [#allocation3], 1 }
 0x341   :  { %638 = vsyncpa [#allocation3 + $0x1], 1 }

// kernel: vqvae_forward.19
= control target key start
LH: loop header
LB: loop body
LE: loop exit
PB: predicated region body
PF: predicated region fallthrough
CT: control target
= control target key end

     0   :  { %9 = vsyncpa [#allocation3], 0  ;;  %s2038_s0 = inlined_call_operand.vmem [shape: bf16[2,38,128], index: 0, kind: input, shape index: {}]   ;;  %s2039_s1 = inlined_call_operand.hbm [shape: bf16[1152,128], index: 1, kind: input, shape index: {}]   ;;  %s2040_s2 = inlined_call_operand.hbm [shape: f32[1,128], index: 2, kind: input, shape index: {}]   ;;  %s2041_s3 = inlined_call_operand.vmem [shape: f32[24,1], index: 3, kind: input, shape index: {}]   ;;  %s2042_s4 = inlined_call_operand.vmem [shape: bf16[2,24,128], index: 4, kind: output, shape index: {}]  }
   0x1   :  { %10 = vsyncpa [#allocation5], 0  ;;  %s1869_s15 = smov 0   ;;  %s1871_s16 = smov 0  }
   0x2   :  { %s1873_s17 = smov 0  }
   0x3 LB: > { %s1299_s18 = sadd.s32 4294967295, %s1837_s17   ;;  %s25_s19 = sadd.s32 1, %s1833_s16  ;;  %s1837_s17 = sphi %s1873_s17, %s16_s17   ;;  %s1833_s16 = sphi %s1871_s16, %s2046_s16   ;;  %s1829_s15 = sphi %s1869_s15, %s2045_s15  }
   0x4   : > { %p26_p0 = scmp.ge.s32.totalorder %s25_s19, 2  ;;  %p1301_p1 = scmp.ge.s32.totalorder %s1837_s17, 1 }
   0x5   : > { %p160_p2 = scmp.lt.s32.totalorder %s1837_s17, 3  ;;  %p1894_p4 = scmp.eq.s32.totalorder %s1299_s18, 0 }
   0x6   : > { %s2048_s19 = smov (%p26_p0, %s25_s19), 0  ;;  %s173_s24 = sshll.u32 %s2039_s1, 4  ;;  %s174_s24 = int_to_ptr.hbm [resolvable:$true] %s173_s24 }
   0x7   : > { %p1890_p3 = pnand %p1301_p1, %p160_p2  ;;  %s1839_s25 = smov [#allocation2]  }
   0x8   : > { %s175_s26 = sshll.u32 %s1839_s25, 4  ;;  %s189_s29 = sshll.u32 %s2040_s2, 4  ;;  %s176_s26 = int_to_ptr.vmem [resolvable:$true] %s175_s26  ;;  %s190_s29 = int_to_ptr.hbm [resolvable:$true] %s189_s29 }
   0x9   : > { %p1704_p5 = pneg %p1890_p3  ;;  %s1840_s30 = smov 64  }
   0xa   : > { %s1841_s5 = smov 4   ;;  %s1842_s6 = smov [#allocation4]  }
   0xb   : > { %p1705_p6 = pnand %p1894_p4, %p1704_p5  ;;  %s191_s7 = sshll.u32 %s1842_s6, 4  ;;  %s192_s7 = int_to_ptr.vmem [resolvable:$true] %s191_s7 }
   0xc   : > { %215 = sbr.rel (%p1890_p3) target bundleno = 259 (0x103), region = 36 }
   0xd   : > { %1707 = dma.hbm_to_vmem [thread:$0]  (!%p1705_p6), %s174_s24, 9216, %s176_s26, [#allocation3], %s1840_s30, %s1840_s30, %s1841_s5  }
   0xe   : > { %1710 = dma.hbm_to_vmem [thread:$0]  (!%p1705_p6), %s190_s29, 16, %s192_s7, [#allocation5]  }
  0x11   : > { %1820 = dma.done.wait (%p1894_p4), [#allocation3], 9216  }
  0x12   : > { %1822 = vsyncadd (%p1894_p4), [#allocation3], 4294958080 }
  0x13   : > { %1824 = dma.done.wait (%p1894_p4), [#allocation5], 16  }
  0x14   : > { %1826 = vsyncadd (%p1894_p4), [#allocation5], 4294967280  ;;  %p250_p7 = scmp.lt.s32.totalorder %s1829_s15, 1  ;;  %v1615_v0 = vld [vmem:[#allocation2 + $0x78] sm:$0xff]  ;;  %v1614_v4 = vld [vmem:[#allocation2 + $0x70] sm:$0xff]  ;;  %vm482_vm1 = vcmask 1046528  }
  0x15   : > { %v1607_v1 = vld [vmem:[#allocation2 + $0x38] sm:$0xff]  ;;  %375 = vmatpush.bf16.msra.mxu0 %v1615_v0  ;;  %v1606_v5 = vld [vmem:[#allocation2 + $0x30] sm:$0xff]  ;;  %v1613_v8 = vld [vmem:[#allocation2 + $0x68] sm:$0xff]  ;;  %vm309_vm0 = vsmask.f32 7424  ;;  %vm581_vm2 = vcmask 1044480  }
  0x16   : > { %v1623_v2 = vld [vmem:[#allocation2 + $0xb8] sm:$0xff]  ;;  %s2050_s15 = smov (!%p250_p7, %s1829_s15), 1  ;;  %444 = vmatpush.bf16.msra.mxu1 %v1607_v1  ;;  %v1622_v6 = vld [vmem:[#allocation2 + $0xb0] sm:$0xff]  ;;  %v1605_v9 = vld [vmem:[#allocation2 + $0x28] sm:$0xff]  ;;  %vm676_vm3 = vsmask.f32 4352 }
  0x17   : > { %v1631_v3 = vld [vmem:[#allocation2 + $0xf8] sm:$0xff]  ;;  %536 = vmatpush.bf16.msra.mxu2 %v1623_v2  ;;  %v1630_v7 = vld [vmem:[#allocation2 + $0xf0] sm:$0xff]  ;;  %s1694_s8 = smul.u32 20, %s2050_s15  ;;  %v1621_v10 = vld [vmem:[#allocation2 + $0xa8] sm:$0xff]  ;;  %vm884_vm4 = vcmask 1045504  }
  0x18   : > { %635 = vmatpush.bf16.msra.mxu3 %v1631_v3  ;;  %v1629_v11 = vld [vmem:[#allocation2 + $0xe8] sm:$0xff]  ;;  %v1612_v12 = vld [vmem:[#allocation2 + $0x60] sm:$0xff]  ;;  %v1611_v18 = vld [vmem:[#allocation2 + $0x58] sm:$0xff]  ;;  %vm979_vm5 = vsmask.f32 5376  ;;  %s1695_s22 = smul.u32 12, %s2050_s15 }
  0x19   : > { %376 = vmatpush.bf16.msra.mxu0 %v1614_v4  ;;  %s1926_s11 = scalar_lea.vmem %s2038_s0, %s1694_s8  ;;  %v1604_v13 = vld [vmem:[#allocation2 + $0x20] sm:$0xff]  ;;  %v1603_v19 = vld [vmem:[#allocation2 + $0x18] sm:$0xff]  ;;  %v1610_v28 = vld [vmem:[#allocation2 + $0x50] sm:$0xff] }
  0x1a   : > { %445 = vmatpush.bf16.msra.mxu1 %v1606_v5  ;;  %v1620_v14 = vld [vmem:[#allocation2 + $0xa0] sm:$0xff]  ;;  %v1929_v16 = vld [vmem:[%s1926_s11 + $0x8] sm:$0xff]   ;;  %v1619_v22 = vld [vmem:[#allocation2 + $0x98] sm:$0xff]  ;;  %s262_s25 = scalar_lea.vmem %s2042_s4, %s1695_s22 }
  0x1b   : > { %537 = vmatpush.bf16.msra.mxu2 %v1622_v6  ;;  %v1628_v15 = vld [vmem:[#allocation2 + $0xe0] sm:$0xff]  ;;  %v282_v17 = vld [vmem:[%s1926_s11 + $0xc] sm:$0x1]  ;;  %v1933_v20 = vunpack.c.l.b16 %v1929_v16  ;;  %v1627_v23 = vld [vmem:[#allocation2 + $0xd8] sm:$0xff] }
  0x1c   : > { %636 = vmatpush.bf16.msra.mxu3 %v1630_v7  ;;  %v306_v21 = vunpack.c.l.b16 %v282_v17  ;;  %v1936_v24 = vld [vmem:[%s1926_s11] sm:$0xff]   ;;  %v558_v27 = vld [vmem:[%s1926_s11 + $0xc] sm:$0x7]  ;;  %v1602_v29 = vld [vmem:[#allocation2 + $0x10] sm:$0xff] }
  0x1d   : > { %377 = vmatpush.bf16.msra.mxu0 %v1613_v8  ;;  %v462_v25 = vld [vmem:[%s1926_s11] sm:$0xe]  ;;  %v313_v31 = vshll.u32 %v1936_v24, 16  ;;  %v1618_v32 = vld [vmem:[#allocation2 + $0x90] sm:$0xff]  ;;  %v1946_v34 = vunpack.c.h.b16 %v1936_v24  ;;  %v578_v37 = vunpack.c.l.b16 %v558_v27  ;;  %v1609_v38 = vld [vmem:[#allocation2 + $0x48] sm:$0xff]  ;;  %v311_v40 = vshrl.u32 %v1936_v24, 16 }
  0x1e   : > { %446 = vmatpush.bf16.msra.mxu1 %v1605_v9  ;;  %v557_v26 = vld [vmem:[%s1926_s11] sm:$0x8]  ;;  %v1942_v30 = vpack.c.b16 %v306_v21, %v1933_v20  ;;  %v1626_v33 = vld [vmem:[#allocation2 + $0xd0] sm:$0xff]  ;;  %v480_v35 = vunpack.c.l.b16 %v462_v25  ;;  %v1601_v39 = vld [vmem:[#allocation2 + $0x8] sm:$0xff]  ;;  %v393_v27 = vpack.c.b16 %v1933_v20, %v1933_v20 }
  0x1f   : > { %538 = vmatpush.bf16.msra.mxu2 %v1621_v10  ;;  %v577_v36 = vunpack.c.l.b16 %v557_v26  ;;  %v315_v41 = vrot.slane %v313_v31, 1  ;;  %v1617_v43 = vld [vmem:[#allocation2 + $0x88] sm:$0xff]  ;;  %v1955_v47 = vpack.c.b16 %v578_v37, %v1933_v20  ;;  %v1608_v48 = vld [vmem:[#allocation2 + $0x40] sm:$0xff]  ;;  %v1639_v58 = vld [vmem:[#allocation2 + $0x138] sm:$0xff] }
  0x20   : > { %637 = vmatpush.bf16.msra.mxu3 %v1629_v11  ;;  %v318_v42 = vshll.u32 %v1942_v30, 16  ;;  %v1625_v44 = vld [vmem:[#allocation2 + $0xc8] sm:$0xff]  ;;  %v481_v45 = vpack.c.b16 %v1946_v34, %v480_v35  ;;  %v1600_v49 = vld [vmem:[#allocation2] sm:$0xff]  ;;  %v484_v55 = vrot.slane %v1942_v30, 1  ;;  %v1647_v59 = vld [vmem:[#allocation2 + $0x178] sm:$0xff] }
  0x21   : > { %378 = vmatpush.bf16.msra.mxu0 %v1612_v12  ;;  %v1952_v46 = vpack.c.b16 %v1946_v34, %v577_v36  ;;  %v316_v50 = vor.u32 %v315_v41, %v311_v40  ;;  %v1616_v52 = vld [vmem:[#allocation2 + $0x80] sm:$0xff]  ;;  %v583_v57 = vrot.slane %v1955_v47, 3  ;;  %v1655_v62 = vld [vmem:[#allocation2 + $0x1b8] sm:$0xff]  ;;  %v1638_v1 = vld [vmem:[#allocation2 + $0x130] sm:$0xff]  ;;  %v689_v40 = vshll.u32 %v1929_v16, 16 }
  0x22   : > { %447 = vmatpush.bf16.msra.mxu1 %v1604_v13  ;;  %v1957_v51 = vrot.slane %v318_v42, 1  ;;  %v1624_v53 = vld [vmem:[#allocation2 + $0xc0] sm:$0xff]  ;;  %v483_v54 = vrot.slane %v481_v45, 1  ;;  %v1663_v0 = vld [vmem:[#allocation2 + $0x1f8] sm:$0xff]  ;;  %v1646_v2 = vld [vmem:[#allocation2 + $0x170] sm:$0xff] }
  0x23   : > { %539 = vmatpush.bf16.msra.mxu2 %v1620_v14  ;;  %v582_v56 = vrot.slane %v1952_v46, 3  ;;  %v1654_v3 = vld [vmem:[#allocation2 + $0x1b0] sm:$0xff]  ;;  %v1637_v5 = vld [vmem:[#allocation2 + $0x128] sm:$0xff]  ;;  %v1636_v9 = vld [vmem:[#allocation2 + $0x120] sm:$0xff]  ;;  %v322_v14 = vshrl.u32 %v1942_v30, 16  ;;  %v678_v37 = vshrl.u32 %v1952_v46, 16 }
  0x24   : > { %638 = vmatpush.bf16.msra.mxu3 %v1628_v15  ;;  %v321_v60 = vsel %vm309_vm0, %v316_v50, %v1957_v51  ;;  %v485_v61 = vsel %vm482_vm1, %v483_v54, %v484_v55  ;;  %v1662_v4 = vld [vmem:[#allocation2 + $0x1f0] sm:$0xff]  ;;  %v1645_v6 = vld [vmem:[#allocation2 + $0x168] sm:$0xff]  ;;  %v1644_v10 = vld [vmem:[#allocation2 + $0x160] sm:$0xff]  ;;  %v674_v15 = vunpack.c.h.b16 %v1929_v16 }
  0x25   : > { %379 = vmatpush.bf16.msra.mxu0 %v1611_v18  ;;  %v584_v63 = vsel %vm581_vm2, %v582_v56, %v583_v57  ;;  %v1653_v7 = vld [vmem:[#allocation2 + $0x1a8] sm:$0xff]  ;;  %v854_v11 = vld [vmem:[%s1926_s11 + $0x4] sm:$0xc]  ;;  %v959_v13 = vld [vmem:[%s1926_s11 + $0x10] sm:$0x7]  ;;  %v324_v26 = vor.u32 %v322_v14, %v1957_v51  ;;  %v1843_v14 = vmov 0  }
  0x26   : > { %448 = vmatpush.bf16.msra.mxu1 %v1603_v19  ;;  %v1661_v8 = vld [vmem:[#allocation2 + $0x1e8] sm:$0xff]  ;;  %v1652_v17 = vld [vmem:[#allocation2 + $0x1a0] sm:$0xff]  ;;  %v1643_v25 = vld [vmem:[#allocation2 + $0x158] sm:$0xff]  ;;  %1744 = vset.pattern.permute.xlu0 %v1843_v14 }
  0x27   : > { %540 = vmatpush.bf16.msra.mxu2 %v1619_v22  ;;  %v1972_v12 = vld [vmem:[%s1926_s11 + $0x8] sm:$0xff]   ;;  %v1660_v18 = vld [vmem:[#allocation2 + $0x1e0] sm:$0xff]  ;;  %v878_v22 = vunpack.c.l.b16 %v854_v11  ;;  %v857_v31 = vld [vmem:[%s1926_s11 + $0x10] sm:$0x3]  ;;  %1745 = vset.pattern.permute.xlu1 %v1843_v14 }
  0x28   : > { %639 = vmatpush.bf16.msra.mxu3 %v1627_v23  ;;  %v1678_v19 = vunpack.c.l.b16 %v1972_v12  ;;  %v1679_v21 = vunpack.c.h.b16 %v1972_v12  ;;  %v977_v23 = vunpack.c.l.b16 %v959_v13  ;;  %v1634_v35 = vld [vmem:[#allocation2 + $0x110] sm:$0xff]  ;;  %v881_v41 = vunpack.c.l.b16 %v857_v31  ;;  %v1649_v54 = vld [vmem:[#allocation2 + $0x188] sm:$0xff]  ;;  %v1169_v13 = vld [vmem:[%s2041_s3] sm:$0xff] }
  0x29   : > { %380 = vmatpush.bf16.msra.mxu0 %v1610_v28  ;;  %v1651_v28 = vld [vmem:[#allocation2 + $0x198] sm:$0xff]  ;;  %v1642_v36 = vld [vmem:[#allocation2 + $0x150] sm:$0xff]  ;;  %1174 = vperm.xlu0 %1744, %v1169_v13   ;;  %v1746_v13 = vld [vmem:[#allocation4] ss:$0 sm:$0xff] }
  0x2a   : > { %449 = vmatpush.bf16.msra.mxu1 %v1602_v29  ;;  %v1659_v29 = vld [vmem:[#allocation2 + $0x1d8] sm:$0xff]  ;;  %v1650_v42 = vld [vmem:[#allocation2 + $0x190] sm:$0xff] }
  0x2b   : > { %541 = vmatpush.bf16.msra.mxu2 %v1618_v32  ;;  %v1985_v32 = vpack.c.b16 %v1678_v19, %v878_v22  ;;  %v1670_v11 = vld [vmem:[#allocation2 + $0x230] sm:$0xff]  ;;  %v782_v22 = vpack.c.b16 %v674_v15, %v674_v15 }
  0x2c   : > { %640 = vmatpush.bf16.msra.mxu3 %v1626_v33  ;;  %v1987_v33 = vpack.c.b16 %v977_v23, %v1679_v21  ;;  %v1666_v23 = vld [vmem:[#allocation2 + $0x210] sm:$0xff] }
  0x2d   : > { %381 = vmatpush.bf16.msra.mxu0 %v1609_v38  ;;  %v681_v38 = vshll.u32 %v1952_v46, 16  ;;  %v984_v45 = vshll.u32 %v1985_v32, 16  ;;  %v1633_v46 = vld [vmem:[#allocation2 + $0x108] sm:$0xff] }
  0x2e   : > { %450 = vmatpush.bf16.msra.mxu1 %v1601_v39  ;;  %v686_v39 = vshrl.u32 %v1929_v16, 16  ;;  %v989_v30 = vshrl.u32 %v1987_v33, 16  ;;  %v992_v47 = vshll.u32 %v1987_v33, 16  ;;  %v1664_v16 = vld [vmem:[#allocation2 + $0x200] sm:$0xff] }
  0x2f   : > { %542 = vmatpush.bf16.msra.mxu2 %v1617_v43  ;;  %v1658_v43 = vld [vmem:[#allocation2 + $0x1d0] sm:$0xff]  ;;  %v683_v50 = vrot.slane %v681_v38, 4 }
  0x30   : > { %641 = vmatpush.bf16.msra.mxu3 %v1625_v44  ;;  %v981_v44 = vshrl.u32 %v1985_v32, 16  ;;  %v688_v51 = vrot.slane %v686_v39, 3 }
  0x31   : > { %382 = vmatpush.bf16.msra.mxu0 %v1608_v48  ;;  %v1641_v48 = vld [vmem:[#allocation2 + $0x148] sm:$0xff] }
  0x32   : > { %451 = vmatpush.bf16.msra.mxu1 %v1600_v49  ;;  %v680_v49 = vrot.slane %v678_v37, 3  ;;  %v983_v56 = vrot.slane %v981_v44, 2 }
  0x33   : > { %543 = vmatpush.bf16.msra.mxu2 %v1616_v52  ;;  %v691_v52 = vrot.slane %v689_v40, 4 }
  0x34   : > { %642 = vmatpush.bf16.msra.mxu3 %v1624_v53  ;;  %383 = vmatmul.bf16.vlgmr.msra.gmra.mxu0 %v321_v60  ;;  %v2001_v53 = vpack.c.b16 %v881_v41, %v1679_v21  ;;  %v1632_v60 = vld [vmem:[#allocation2 + $0x100] sm:$0xff]  ;;  %v1667_v21 = vld [vmem:[#allocation2 + $0x218] sm:$0xff] }
  0x35   : > { %744 = vmatpush.bf16.msrb.mxu0 %v1639_v58  ;;  %452 = vmatmul.bf16.vlgmr.msra.gmra.mxu1 %v1936_v24  ;;  %v1635_v24 = vld [vmem:[#allocation2 + $0x118] sm:$0xff]  ;;  %v991_v58 = vrot.slane %v989_v30, 2 }
  0x36   : > { %833 = vmatpush.bf16.msrb.mxu1 %v1647_v59  ;;  %544 = vmatmul.bf16.vlgmr.msra.gmra.mxu2 %v485_v61  ;;  %v994_v59 = vrot.slane %v992_v47, 3  ;;  %v1640_v61 = vld [vmem:[#allocation2 + $0x140] sm:$0xff] }
  0x37   : > { %643 = vmatmul.bf16.vlgmr.msra.gmra.mxu3 %v584_v63  ;;  %938 = vmatpush.bf16.msrb.mxu2 %v1655_v62  ;;  %v1671_v62 = vld [vmem:[#allocation2 + $0x238] sm:$0xff]  ;;  %v684_v63 = vor.u32 %v683_v50, %v680_v49 }
  0x38   : > { %1047 = vmatpush.bf16.msrb.mxu3 %v1663_v0  ;;  %v692_v0 = vor.u32 %v691_v52, %v688_v51 }
  0x39   : > { %745 = vmatpush.bf16.msrb.mxu0 %v1638_v1  ;;  %v1648_v1 = vld [vmem:[#allocation2 + $0x180] sm:$0xff] }
  0x3a   : > { %834 = vmatpush.bf16.msrb.mxu1 %v1646_v2  ;;  %v1656_v2 = vld [vmem:[#allocation2 + $0x1c0] sm:$0xff] }
  0x3b   : > { %939 = vmatpush.bf16.msrb.mxu2 %v1654_v3  ;;  %v885_v3 = vrot.slane %v1985_v32, 2 }
  0x3c   : > { %1048 = vmatpush.bf16.msrb.mxu3 %v1662_v4  ;;  %v886_v4 = vrot.slane %v2001_v53, 2 }
  0x3d   : > { %746 = vmatpush.bf16.msrb.mxu0 %v1637_v5 }
  0x3e   : > { %835 = vmatpush.bf16.msrb.mxu1 %v1645_v6  ;;  %v995_v6 = vor.u32 %v994_v59, %v991_v58 }
  0x3f   : > { %940 = vmatpush.bf16.msrb.mxu2 %v1653_v7  ;;  %v781_v7 = vpack.c.b16 %v1933_v20, %v1946_v34  ;;  %v1171_v20 = vld [vmem:[%s2041_s3 + $0x10] sm:$0xff]  ;;  %v1669_v34 = vld [vmem:[#allocation2 + $0x228] sm:$0xff] }
  0x40   : > { %1049 = vmatpush.bf16.msrb.mxu3 %v1661_v8  ;;  %v693_v8 = vsel %vm676_vm3, %v684_v63, %v692_v0  ;;  %1184 = vperm.xlu1 %1745, %v1171_v20  }
  0x41   : > { %747 = vmatpush.bf16.msrb.mxu0 %v1636_v9  ;;  %v887_v9 = vsel %vm884_vm4, %v885_v3, %v886_v4 }
  0x42   : > { %836 = vmatpush.bf16.msrb.mxu1 %v1644_v10 }
  0x43   : > { %941 = vmatpush.bf16.msrb.mxu2 %v1652_v17  ;;  %v1668_v17 = vld [vmem:[#allocation2 + $0x220] sm:$0xff] }
  0x44   : > { %1050 = vmatpush.bf16.msrb.mxu3 %v1660_v18  ;;  %388 = vmatmul.bf16.gmra.mxu0 %v324_v26  ;;  %v1170_v18 = vld [vmem:[%s2041_s3 + $0x8] sm:$0xff] }
  0x45   : > { %748 = vmatpush.bf16.msrb.mxu0 %v1635_v24  ;;  %457 = vmatmul.bf16.gmra.mxu1 %v393_v27  ;;  %v1068_v24 = vld [vmem:[%s1926_s11 + $0x4] sm:$0x8]  ;;  %v1665_v26 = vld [vmem:[#allocation2 + $0x208] sm:$0xff] }
  0x46   : > { %837 = vmatpush.bf16.msrb.mxu1 %v1643_v25  ;;  %549 = vmatmul.bf16.gmra.mxu2 %v484_v55  ;;  %v1657_v55 = vld [vmem:[#allocation2 + $0x1c8] sm:$0xff]  ;;  %v1086_v25 = vunpack.c.l.b16 %v1068_v24 }
  0x47   : > { %648 = vmatmul.bf16.gmra.mxu3 %v583_v57  ;;  %942 = vmatpush.bf16.msrb.mxu2 %v1651_v28  ;;  %v986_v57 = vrot.slane %v984_v45, 3  ;;  %v1089_v28 = vrot.slane %v1987_v33, 3 }
  0x48   : > { %1051 = vmatpush.bf16.msrb.mxu3 %v1659_v29  ;;  %1179 = vperm.xlu0 %1744, %v1170_v18   ;;  %v1087_v27 = vpack.c.b16 %v1678_v19, %v1086_v25 }
  0x49   : > { %749 = vmatpush.bf16.msrb.mxu0 %v1634_v35  ;;  %v987_v5 = vor.u32 %v986_v57, %v983_v56 }
  0x4a   : > { %838 = vmatpush.bf16.msrb.mxu1 %v1642_v36  ;;  %v1088_v15 = vrot.slane %v1087_v27, 3 }
  0x4b   : > { %943 = vmatpush.bf16.msrb.mxu2 %v1650_v42  ;;  %v996_v10 = vsel %vm979_vm5, %v987_v5, %v995_v6 }
  0x4c   : > { %1052 = vmatpush.bf16.msrb.mxu3 %v1658_v43  ;;  %v1090_v29 = vsel %vm581_vm2, %v1088_v15, %v1089_v28 }
  0x4d   : > { %750 = vmatpush.bf16.msrb.mxu0 %v1633_v46 }
  0x4e   : > { %839 = vmatpush.bf16.msrb.mxu1 %v1641_v48 }
  0x4f   : > { %944 = vmatpush.bf16.msrb.mxu2 %v1649_v54 }
  0x50   : > { %1053 = vmatpush.bf16.msrb.mxu3 %v1657_v55 }
  0x51   : > { %751 = vmatpush.bf16.msrb.mxu0 %v1632_v60 }
  0x52   : > { %840 = vmatpush.bf16.msrb.mxu1 %v1640_v61 }
  0x53   : > { %945 = vmatpush.bf16.msrb.mxu2 %v1648_v1 }
  0x54   : > { %1054 = vmatpush.bf16.msrb.mxu3 %v1656_v2  ;;  %752 = vmatmul.bf16.vlgmr.msrb.gmra.mxu0 %v693_v8 }
  0x55   : > { %1141 = vmatpush.bf16.msra.mxu0 %v1671_v62  ;;  %841 = vmatmul.bf16.vlgmr.msrb.gmra.mxu1 %v781_v7 }
  0x56   : > { %1686 = vmatpush.bf16.msra.mxu1 %v1671_v62  ;;  %946 = vmatmul.bf16.vlgmr.msrb.gmra.mxu2 %v887_v9 }
  0x57   : > { %1055 = vmatmul.bf16.vlgmr.msrb.gmra.mxu3 %v996_v10 }
  0x59   : > { %1142 = vmatpush.bf16.msra.mxu0 %v1670_v11 }
  0x5a   : > { %1687 = vmatpush.bf16.msra.mxu1 %v1670_v11 }
  0x5d   : > { %1143 = vmatpush.bf16.msra.mxu0 %v1669_v34 }
  0x5e   : > { %1688 = vmatpush.bf16.msra.mxu1 %v1669_v34 }
  0x61   : > { %1144 = vmatpush.bf16.msra.mxu0 %v1668_v17 }
  0x62   : > { %1689 = vmatpush.bf16.msra.mxu1 %v1668_v17 }
  0x64   : > { %757 = vmatmul.bf16.gmra.mxu0 %v692_v0 }
  0x65   : > { %1145 = vmatpush.bf16.msra.mxu0 %v1667_v21  ;;  %846 = vmatmul.bf16.gmra.mxu1 %v782_v22 }
  0x66   : > { %1690 = vmatpush.bf16.msra.mxu1 %v1667_v21  ;;  %951 = vmatmul.bf16.gmra.mxu2 %v886_v4 }
  0x67   : > { %1060 = vmatmul.bf16.gmra.mxu3 %v995_v6 }
  0x69   : > { %1146 = vmatpush.bf16.msra.mxu0 %v1666_v23 }
  0x6a   : > { %1691 = vmatpush.bf16.msra.mxu1 %v1666_v23 }
  0x6d   : > { %1147 = vmatpush.bf16.msra.mxu0 %v1665_v26 }
  0x6e   : > { %1692 = vmatpush.bf16.msra.mxu1 %v1665_v26 }
  0x71   : > { %1148 = vmatpush.bf16.msra.mxu0 %v1664_v16 }
  0x72   : > { %1693 = vmatpush.bf16.msra.mxu1 %v1664_v16 }
  0x74   : > { %1149 = vmatmul.bf16.vlgmr.msra.gmra.mxu0 %v1090_v29 }
  0x75   : > { %1154 = vmatmul.bf16.vlgmr.msra.gmra.mxu1 %v1089_v28 }
  0x9b   : > { %v1175_v22 = vpop.permute.xlu0 %1174 }
  0xb1   : > { %v384_v31 = vpop.f32.mrf.mxu0 }
  0xb2   : > { %v453_v32 = vpop.f32.mrf.mxu1  ;;  %v1185_v23 = vpop.permute.xlu1 %1184 }
  0xb3   : > { %v454_v57 = vadd.f32 %v453_v32, %v384_v31 }
  0xb9   : > { %v545_v35 = vpop.f32.mrf.mxu2  ;;  %v386_v37 = vpop.f32.mrf.mxu0 }
  0xba   : > { %v644_v36 = vpop.f32.mrf.mxu3  ;;  %v455_v38 = vpop.f32.mrf.mxu1  ;;  %v554_v58 = vadd.f32 %v545_v35, %v454_v57 }
  0xbb   : > { %v456_v60 = vadd.f32 %v455_v38, %v386_v37  ;;  %v1180_v37 = vpop.permute.xlu0 %1179 }
  0xbc   : > { %v653_v62 = vadd.f32 %v644_v36, %v554_v58 }
  0xc1   : > { %v547_v12 = vpop.f32.mrf.mxu2  ;;  %v389_v39 = vpop.f32.mrf.mxu0 }
  0xc2   : > { %v646_v19 = vpop.f32.mrf.mxu3  ;;  %v458_v40 = vpop.f32.mrf.mxu1  ;;  %v555_v63 = vadd.f32 %v547_v12, %v456_v60 }
  0xc3   : > { %v459_v51 = vadd.f32 %v458_v40, %v389_v39 }
  0xc4   : > { %v654_v6 = vadd.f32 %v646_v19, %v555_v63 }
  0xc9   : > { %v550_v41 = vpop.f32.mrf.mxu2  ;;  %v391_v43 = vpop.f32.mrf.mxu0 }
  0xca   : > { %v649_v42 = vpop.f32.mrf.mxu3  ;;  %v460_v33 = vpop.f32.mrf.mxu1  ;;  %v556_v52 = vadd.f32 %v550_v41, %v459_v51 }
  0xcc   : > { %v655_v59 = vadd.f32 %v649_v42, %v556_v52 }
  0xd1   : > { %v552_v44 = vpop.f32.mrf.mxu2  ;;  %v753_v30 = vpop.f32.mrf.mxu0 }
  0xd2   : > { %v651_v45 = vpop.f32.mrf.mxu3  ;;  %v842_v47 = vpop.f32.mrf.mxu1  ;;  %v762_v4 = vadd.f32 %v753_v30, %v653_v62 }
  0xd4   : > { %v851_v8 = vadd.f32 %v842_v47, %v762_v4 }
  0xd9   : > { %v947_v46 = vpop.f32.mrf.mxu2  ;;  %v755_v49 = vpop.f32.mrf.mxu0 }
  0xda   : > { %v1056_v48 = vpop.f32.mrf.mxu3  ;;  %v844_v50 = vpop.f32.mrf.mxu1  ;;  %v763_v9 = vadd.f32 %v755_v49, %v654_v6  ;;  %v956_v10 = vadd.f32 %v947_v46, %v851_v8 }
  0xdc   : > { %v852_v18 = vadd.f32 %v844_v50, %v763_v9  ;;  %v1065_v24 = vadd.f32 %v1056_v48, %v956_v10 }
  0xe1   : > { %v949_v53 = vpop.f32.mrf.mxu2  ;;  %v758_v55 = vpop.f32.mrf.mxu0 }
  0xe2   : > { %v1058_v54 = vpop.f32.mrf.mxu3  ;;  %v847_v56 = vpop.f32.mrf.mxu1  ;;  %v764_v61 = vadd.f32 %v758_v55, %v655_v59  ;;  %v957_v25 = vadd.f32 %v949_v53, %v852_v18 }
  0xe4   : > { %v853_v5 = vadd.f32 %v847_v56, %v764_v61  ;;  %v1066_v15 = vadd.f32 %v1058_v54, %v957_v25 }
  0xe9   : > { %v952_v0 = vpop.f32.mrf.mxu2  ;;  %v760_v2 = vpop.f32.mrf.mxu0 }
  0xea   : > { %v1061_v1 = vpop.f32.mrf.mxu3  ;;  %v849_v3 = vpop.f32.mrf.mxu1  ;;  %v958_v7 = vadd.f32 %v952_v0, %v853_v5 }
  0xec   : > { %v1067_v11 = vadd.f32 %v1061_v1, %v958_v7 }
  0xf1   : > { %v954_v20 = vpop.f32.mrf.mxu2  ;;  %v1150_v14 = vpop.f32.mrf.mxu0 }
  0xf2   : > { %v1063_v34 = vpop.f32.mrf.mxu3  ;;  %v1155_v17 = vpop.f32.mrf.mxu1  ;;  %v1159_v27 = vadd.f32 %v1150_v14, %v1065_v24 }
  0xf3   : > { %v1161_v21 = vadd.f32 %v1155_v17, %v1067_v11 }
  0xf4   : > { %v1166_v32 = vadd.f32 %v1746_v13, %v1159_v27 }
  0xf5   : > { %v1168_v26 = vadd.f32 %v1746_v13, %v1161_v21 }
  0xf6   : > { %v1187_v38 = vmul.f32 %v1175_v22, %v1166_v32 }
  0xf7   : > { %v1189_v16 = vmul.f32 %v1185_v23, %v1168_v26 }
  0xf9   : > { %v1192_v28 = vpack.c.bf16 %v1189_v16, %v1189_v16  ;;  %v1152_v29 = vpop.f32.mrf.mxu0 }
  0xfa   : > { %v1157_v31 = vpop.f32.mrf.mxu1  ;;  %v1160_v35 = vadd.f32 %v1152_v29, %v1066_v15 }
  0xfb   : > { %1195 = vst [vmem:[%s262_s25 + $0x8] sm:$0xf] %v1192_v28 }
  0xfc   : > { %v1167_v36 = vadd.f32 %v1746_v13, %v1160_v35 }
  0xfe   : > { %v1188_v12 = vmul.f32 %v1180_v37, %v1167_v36 }
 0x100   : > { %v1683_v19 = vpack.c.bf16 %v1188_v12, %v1187_v38 }
 0x102   : > { %1684 = vst [vmem:[%s262_s25] sm:$0xff] %v1683_v19  }
 0x103 PF: > { %s16_s17 = sadd.s32 1, %s1837_s17   ;;  %s2045_s15 = smov %s1833_s16 }
 0x104   : > { %p13_p8 = scmp.ge.s32.totalorder %s16_s17, 4   ;;  %s2046_s16 = smov %s2048_s19 }
 0x106   :  { %15 = sbr.rel (!%p13_p8) target bundleno = 3 (0x3), region = 77 }
 0x10b   :  { %1223 = vsyncpa [#allocation3], 1 }
 0x10c   :  { %1225 = vsyncpa [#allocation3 + $0x1], 1 }
 0x10d   :  { %1226 = vsyncpa [#allocation5], 1 }

// kernel: vqvae_forward.21
= control target key start
LH: loop header
LB: loop body
LE: loop exit
PB: predicated region body
PF: predicated region fallthrough
CT: control target
= control target key end

     0   :  { %11 = vsyncpa [#allocation3], 0  ;;  %s2269_s0 = inlined_call_operand.vmem [shape: bf16[2,38,128], index: 0, kind: input, shape index: {}]   ;;  %s2270_s1 = inlined_call_operand.hbm [shape: bf16[1152,128], index: 1, kind: input, shape index: {}]   ;;  %s2271_s2 = inlined_call_operand.hbm [shape: f32[1,128], index: 2, kind: input, shape index: {}]   ;;  %s2272_s3 = inlined_call_operand.vmem [shape: bf16[128,128], index: 3, kind: input, shape index: {}]   ;;  %s2273_s4 = inlined_call_operand.hbm [shape: f32[1,128], index: 4, kind: input, shape index: {}]   ;;  %s2274_s5 = inlined_call_operand.vmem [shape: f32[24,1], index: 5, kind: input, shape index: {}]   ;;  %s2275_s6 = inlined_call_operand.vmem [shape: bf16[2,24,128], index: 6, kind: output, shape index: {}]  }
   0x1   :  { %12 = vsyncpa [#allocation5], 0  ;;  %s2073_s21 = smov 0  }
   0x2 LB: > { %s206_s24 = sshll.u32 %s2271_s2, 4  ;;  %s2082_s25 = sadd.s32 4294967295, %s2030_s21   ;;  %s2030_s21 = sphi %s2073_s21, %s18_s21   ;;  %s207_s24 = int_to_ptr.hbm [resolvable:$true] %s206_s24 }
   0x3   : > { %p1435_p0 = scmp.ge.s32.totalorder %s2030_s21, 1  ;;  %p180_p1 = scmp.lt.s32.totalorder %s2030_s21, 3 }
   0x4   : > { %p1902_p2 = scmp.eq.s32.totalorder %s2082_s25, 0  ;;  %s2032_s27 = smov [#allocation4]  }
   0x5   : > { %p2087_p3 = pnand %p1435_p0, %p180_p1  ;;  %s208_s28 = sshll.u32 %s2032_s27, 4  ;;  %s209_s28 = int_to_ptr.vmem [resolvable:$true] %s208_s28 }
   0x6   : > { %s191_s7 = sshll.u32 %s2270_s1, 4  ;;  %s2033_s8 = smov [#allocation2]   ;;  %s192_s7 = int_to_ptr.hbm [resolvable:$true] %s191_s7 }
   0x7   : > { %p1892_p4 = pneg %p2087_p3  ;;  %s193_s9 = sshll.u32 %s2033_s8, 4  ;;  %s194_s9 = int_to_ptr.vmem [resolvable:$true] %s193_s9 }
   0x8   : > { %s221_s12 = sshll.u32 %s2273_s4, 4  ;;  %s2034_s13 = smov 64   ;;  %s222_s12 = int_to_ptr.hbm [resolvable:$true] %s221_s12 }
   0x9   : > { %p1893_p5 = pnand %p1902_p2, %p1892_p4  ;;  %s2035_s14 = smov 4  }
   0xa   : > { %s2036_s15 = smov [#allocation6]   ;;  %247 = sbr.rel (%p2087_p3) target bundleno = 401 (0x191), region = 44 }
   0xb   : > { %1898 = dma.hbm_to_vmem [thread:$0]  (!%p1893_p5), %s207_s24, 16, %s209_s28, [#allocation5]  }
   0xc   : > { %1895 = dma.hbm_to_vmem [thread:$0]  (!%p1893_p5), %s192_s7, 9216, %s194_s9, [#allocation3], %s2034_s13, %s2034_s13, %s2035_s14  }
   0xd   : > { %s223_s16 = sshll.u32 %s2036_s15, 4  ;;  %s224_s16 = int_to_ptr.vmem [resolvable:$true] %s223_s16 }
   0xe   : > { %1901 = dma.hbm_to_vmem [thread:$0]  (!%p1893_p5), %s222_s12, 16, %s224_s16, [#allocation5]  }
   0xf   : > { %2021 = dma.done.wait (%p1902_p2), [#allocation3], 9216  }
  0x10   : > { %2023 = vsyncadd (%p1902_p2), [#allocation3], 4294958080 }
  0x11   : > { %2025 = dma.done.wait (%p1902_p2), [#allocation5], 32  }
  0x12   : > { %2027 = vsyncadd (%p1902_p2), [#allocation5], 4294967264  ;;  %p288_p6 = scmp.lt.s32.totalorder %s2082_s25, 1  ;;  %v1783_v0 = vld [vmem:[#allocation2 + $0x78] sm:$0xff]  ;;  %v1782_v4 = vld [vmem:[#allocation2 + $0x70] sm:$0xff]  ;;  %vm517_vm1 = vcmask 1046528  }
  0x13   : > { %v1775_v1 = vld [vmem:[#allocation2 + $0x38] sm:$0xff]  ;;  %411 = vmatpush.bf16.msra.mxu0 %v1783_v0  ;;  %v1774_v5 = vld [vmem:[#allocation2 + $0x30] sm:$0xff]  ;;  %v1781_v8 = vld [vmem:[#allocation2 + $0x68] sm:$0xff]  ;;  %vm345_vm0 = vsmask.f32 7424  ;;  %vm618_vm2 = vcmask 1044480  }
  0x14   : > { %s2278_s25 = smov (!%p288_p6, %s2082_s25), 1  ;;  %v1791_v2 = vld [vmem:[#allocation2 + $0xb8] sm:$0xff]  ;;  %477 = vmatpush.bf16.msra.mxu1 %v1775_v1  ;;  %v1790_v6 = vld [vmem:[#allocation2 + $0xb0] sm:$0xff]  ;;  %v1773_v9 = vld [vmem:[#allocation2 + $0x28] sm:$0xff]  ;;  %vm713_vm3 = vsmask.f32 4352 }
  0x15   : > { %v1799_v3 = vld [vmem:[#allocation2 + $0xf8] sm:$0xff]  ;;  %571 = vmatpush.bf16.msra.mxu2 %v1791_v2  ;;  %v1798_v7 = vld [vmem:[#allocation2 + $0xf0] sm:$0xff]  ;;  %s1878_s17 = smul.u32 20, %s2278_s25  ;;  %v1789_v10 = vld [vmem:[#allocation2 + $0xa8] sm:$0xff]  ;;  %vm921_vm4 = vcmask 1045504   ;;  %vm1303_vm6 = vcmask 1040384  }
  0x16   : > { %672 = vmatpush.bf16.msra.mxu3 %v1799_v3  ;;  %v1797_v11 = vld [vmem:[#allocation2 + $0xe8] sm:$0xff]  ;;  %v1780_v12 = vld [vmem:[#allocation2 + $0x60] sm:$0xff]  ;;  %v1779_v28 = vld [vmem:[#allocation2 + $0x58] sm:$0xff]  ;;  %vm1016_vm5 = vsmask.f32 5376  ;;  %s1879_s22 = smul.u32 12, %s2278_s25 }
  0x17   : > { %412 = vmatpush.bf16.msra.mxu0 %v1782_v4  ;;  %s2119_s20 = scalar_lea.vmem %s2269_s0, %s1878_s17  ;;  %v1772_v13 = vld [vmem:[#allocation2 + $0x20] sm:$0xff]  ;;  %v1771_v29 = vld [vmem:[#allocation2 + $0x18] sm:$0xff]  ;;  %v1778_v38 = vld [vmem:[#allocation2 + $0x50] sm:$0xff] }
  0x18   : > { %478 = vmatpush.bf16.msra.mxu1 %v1774_v5  ;;  %v1788_v14 = vld [vmem:[#allocation2 + $0xa0] sm:$0xff]  ;;  %v2127_v19 = vld [vmem:[%s2119_s20 + $0x8] sm:$0xff]   ;;  %v1787_v32 = vld [vmem:[#allocation2 + $0x98] sm:$0xff]  ;;  %s297_s26 = scalar_lea.vmem %s2275_s6, %s1879_s22 }
  0x19   : > { %572 = vmatpush.bf16.msra.mxu2 %v1790_v6  ;;  %v2122_v15 = vld [vmem:[%s2119_s20] sm:$0xff]   ;;  %v325_v20 = vld [vmem:[%s2119_s20 + $0xc] sm:$0x1]  ;;  %v303_v21 = vunpack.c.l.bf16 %v2127_v19  ;;  %v1795_v33 = vld [vmem:[#allocation2 + $0xd8] sm:$0xff] }
  0x1a   : > { %673 = vmatpush.bf16.msra.mxu3 %v1798_v7  ;;  %v1796_v16 = vld [vmem:[#allocation2 + $0xe0] sm:$0xff]  ;;  %v1850_v17 = vunpack.c.l.bf16 %v2122_v15  ;;  %v1851_v18 = vunpack.c.h.bf16 %v2122_v15  ;;  %v326_v22 = vunpack.c.l.bf16 %v325_v20  ;;  %v593_v27 = vld [vmem:[%s2119_s20 + $0xc] sm:$0x7]  ;;  %v1770_v39 = vld [vmem:[#allocation2 + $0x10] sm:$0xff] }
  0x1b   : > { %413 = vmatpush.bf16.msra.mxu0 %v1781_v8  ;;  %v495_v23 = vld [vmem:[%s2119_s20] sm:$0xe]  ;;  %v2142_v30 = vmax.f32 %v303_v21, 0.0  ;;  %v595_v37 = vunpack.c.l.bf16 %v593_v27  ;;  %v1786_v42 = vld [vmem:[#allocation2 + $0x90] sm:$0xff]  ;;  %v1777_v47 = vld [vmem:[#allocation2 + $0x48] sm:$0xff] }
  0x1c   : > { %479 = vmatpush.bf16.msra.mxu1 %v1773_v9  ;;  %v2133_v24 = vld [vmem:[%s2119_s20] sm:$0x8]  ;;  %v304_v25 = vmax.f32 %v1850_v17, 0.0  ;;  %v2137_v26 = vmax.f32 %v1851_v18, 0.0  ;;  %v327_v31 = vmax.f32 %v326_v22, 0.0  ;;  %v496_v35 = vunpack.c.l.bf16 %v495_v23  ;;  %v1794_v43 = vld [vmem:[#allocation2 + $0xd0] sm:$0xff] }
  0x1d   : > { %573 = vmatpush.bf16.msra.mxu2 %v1789_v10  ;;  %v594_v36 = vunpack.c.l.bf16 %v2133_v24  ;;  %v597_v46 = vmax.f32 %v595_v37, 0.0  ;;  %v1769_v48 = vld [vmem:[#allocation2 + $0x8] sm:$0xff]  ;;  %v1776_v57 = vld [vmem:[#allocation2 + $0x40] sm:$0xff]  ;;  %v1807_v3 = vld [vmem:[#allocation2 + $0x138] sm:$0xff]  ;;  %v694_v23 = vunpack.c.h.bf16 %v2127_v19 }
  0x1e   : > { %674 = vmatpush.bf16.msra.mxu3 %v1797_v11  ;;  %v2145_v34 = vpack.c.bf16 %v2137_v26, %v304_v25  ;;  %v2149_v40 = vpack.c.bf16 %v327_v31, %v2142_v30  ;;  %v497_v44 = vmax.f32 %v496_v35, 0.0  ;;  %v1785_v52 = vld [vmem:[#allocation2 + $0x88] sm:$0xff]  ;;  %v1768_v58 = vld [vmem:[#allocation2] sm:$0xff]  ;;  %v1823_v4 = vld [vmem:[#allocation2 + $0x1b8] sm:$0xff] }
  0x1f   : > { %414 = vmatpush.bf16.msra.mxu0 %v1780_v12  ;;  %v596_v45 = vmax.f32 %v594_v36, 0.0  ;;  %v1793_v53 = vld [vmem:[#allocation2 + $0xc8] sm:$0xff]  ;;  %v599_v56 = vpack.c.bf16 %v597_v46, %v2142_v30  ;;  %v1784_v61 = vld [vmem:[#allocation2 + $0x80] sm:$0xff]  ;;  %v1815_v8 = vld [vmem:[#allocation2 + $0x178] sm:$0xff] }
  0x20   : > { %480 = vmatpush.bf16.msra.mxu1 %v1772_v13  ;;  %v349_v41 = vshll.u32 %v2145_v34, 16  ;;  %v347_v49 = vshrl.u32 %v2145_v34, 16  ;;  %v354_v51 = vshll.u32 %v2149_v40, 16  ;;  %v498_v54 = vpack.c.bf16 %v2137_v26, %v497_v44  ;;  %v1792_v62 = vld [vmem:[#allocation2 + $0xc0] sm:$0xff]  ;;  %v1831_v9 = vld [vmem:[#allocation2 + $0x1f8] sm:$0xff]  ;;  %v1806_v10 = vld [vmem:[#allocation2 + $0x130] sm:$0xff] }
  0x21   : > { %574 = vmatpush.bf16.msra.mxu2 %v1788_v14  ;;  %v2158_v55 = vpack.c.bf16 %v2137_v26, %v596_v45  ;;  %v519_v0 = vrot.slane %v2149_v40, 1  ;;  %v2165_v2 = vrot.slane %v599_v56, 3  ;;  %v1822_v11 = vld [vmem:[#allocation2 + $0x1b0] sm:$0xff]  ;;  %v1805_v14 = vld [vmem:[#allocation2 + $0x128] sm:$0xff]  ;;  %v889_v17 = vld [vmem:[%s2119_s20 + $0x4] sm:$0xc] }
  0x22   : > { %675 = vmatpush.bf16.msra.mxu3 %v1796_v16  ;;  %v351_v50 = vrot.slane %v349_v41, 1  ;;  %v2161_v60 = vrot.slane %v354_v51, 1  ;;  %v518_v63 = vrot.slane %v498_v54, 1  ;;  %v1814_v12 = vld [vmem:[#allocation2 + $0x170] sm:$0xff]  ;;  %v1821_v16 = vld [vmem:[#allocation2 + $0x1a8] sm:$0xff]  ;;  %v358_v35 = vshrl.u32 %v2149_v40, 16 }
  0x23   : > { %415 = vmatpush.bf16.msra.mxu0 %v1779_v28  ;;  %v619_v1 = vrot.slane %v2158_v55, 3  ;;  %v1830_v13 = vld [vmem:[#allocation2 + $0x1f0] sm:$0xff]  ;;  %v1861_v20 = vld [vmem:[%s2119_s20 + $0x8] sm:$0xff]   ;;  %v1804_v28 = vld [vmem:[#allocation2 + $0x120] sm:$0xff] }
  0x24   : > { %481 = vmatpush.bf16.msra.mxu1 %v1771_v29  ;;  %v352_v59 = vor.u32 %v351_v50, %v347_v49  ;;  %v520_v6 = vsel %vm517_vm1, %v518_v63, %v519_v0  ;;  %v996_v22 = vld [vmem:[%s2119_s20 + $0x10] sm:$0x7]  ;;  %v1813_v25 = vld [vmem:[#allocation2 + $0x168] sm:$0xff]  ;;  %v1820_v29 = vld [vmem:[#allocation2 + $0x1a0] sm:$0xff]  ;;  %v1854_v31 = vunpack.c.l.bf16 %v1861_v20  ;;  %v308_v49 = vpack.c.bf16 %v2142_v30, %v2142_v30 }
  0x25   : > { %575 = vmatpush.bf16.msra.mxu2 %v1787_v32  ;;  %v621_v7 = vsel %vm618_vm2, %v619_v1, %v2165_v2  ;;  %v1829_v27 = vld [vmem:[#allocation2 + $0x1e8] sm:$0xff]  ;;  %v1855_v32 = vunpack.c.h.bf16 %v1861_v20  ;;  %v1812_v37 = vld [vmem:[#allocation2 + $0x160] sm:$0xff]  ;;  %v1803_v41 = vld [vmem:[#allocation2 + $0x118] sm:$0xff] }
  0x26   : > { %676 = vmatpush.bf16.msra.mxu3 %v1795_v33  ;;  %v357_v5 = vsel %vm345_vm0, %v352_v59, %v2161_v60  ;;  %v893_v33 = vunpack.c.l.bf16 %v889_v17  ;;  %v2184_v45 = vmax.f32 %v1854_v31, 0.0  ;;  %v1811_v51 = vld [vmem:[#allocation2 + $0x158] sm:$0xff]  ;;  %v1802_v54 = vld [vmem:[#allocation2 + $0x110] sm:$0xff]  ;;  %v715_v59 = vshrl.u32 %v2158_v55, 16  ;;  %v1824_v31 = vld [vmem:[#allocation2 + $0x1c0] sm:$0xff] }
  0x27   : > { %416 = vmatpush.bf16.msra.mxu0 %v1778_v38  ;;  %v2181_v38 = vmax.f32 %v694_v23, 0.0  ;;  %v2186_v46 = vmax.f32 %v1855_v32, 0.0  ;;  %v1818_v56 = vld [vmem:[#allocation2 + $0x190] sm:$0xff] }
  0x28   : > { %482 = vmatpush.bf16.msra.mxu1 %v1770_v39  ;;  %v1828_v39 = vld [vmem:[#allocation2 + $0x1e0] sm:$0xff]  ;;  %v897_v44 = vmax.f32 %v893_v33, 0.0  ;;  %v1810_v63 = vld [vmem:[#allocation2 + $0x150] sm:$0xff] }
  0x29   : > { %576 = vmatpush.bf16.msra.mxu2 %v1786_v42  ;;  %v1819_v42 = vld [vmem:[#allocation2 + $0x198] sm:$0xff]  ;;  %v696_v50 = vpack.c.bf16 %v2181_v38, %v2142_v30  ;;  %v1826_v1 = vld [vmem:[#allocation2 + $0x1d0] sm:$0xff] }
  0x2a   : > { %677 = vmatpush.bf16.msra.mxu3 %v1794_v43  ;;  %v892_v43 = vld [vmem:[%s2119_s20 + $0x10] sm:$0x3] }
  0x2b   : > { %417 = vmatpush.bf16.msra.mxu0 %v1777_v47 }
  0x2c   : > { %483 = vmatpush.bf16.msra.mxu1 %v1769_v48  ;;  %v360_v48 = vor.u32 %v358_v35, %v2161_v60  ;;  %v718_v60 = vshll.u32 %v2158_v55, 16  ;;  %v717_v55 = vrot.slane %v715_v59, 3 }
  0x2d   : > { %577 = vmatpush.bf16.msra.mxu2 %v1785_v52  ;;  %v1827_v52 = vld [vmem:[#allocation2 + $0x1d8] sm:$0xff] }
  0x2e   : > { %678 = vmatpush.bf16.msra.mxu3 %v1793_v53  ;;  %v896_v53 = vunpack.c.l.bf16 %v892_v43 }
  0x2f   : > { %418 = vmatpush.bf16.msra.mxu0 %v1776_v57  ;;  %v2194_v57 = vpack.c.bf16 %v2184_v45, %v897_v44  ;;  %v1837_v44 = vld [vmem:[#allocation2 + $0x228] sm:$0xff] }
  0x30   : > { %484 = vmatpush.bf16.msra.mxu1 %v1768_v58 }
  0x31   : > { %578 = vmatpush.bf16.msra.mxu2 %v1784_v61  ;;  %v723_v61 = vshrl.u32 %v696_v50, 16  ;;  %v1018_v40 = vshrl.u32 %v2194_v57, 16  ;;  %v922_v32 = vrot.slane %v2194_v57, 2 }
  0x32   : > { %679 = vmatpush.bf16.msra.mxu3 %v1792_v62  ;;  %419 = vmatmul.bf16.vlgmr.msra.gmra.mxu0 %v357_v5  ;;  %v726_v62 = vshll.u32 %v696_v50, 16  ;;  %v1817_v5 = vld [vmem:[#allocation2 + $0x188] sm:$0xff] }
  0x33   : > { %781 = vmatpush.bf16.msrb.mxu0 %v1807_v3  ;;  %485 = vmatmul.bf16.vlgmr.msra.gmra.mxu1 %v2145_v34  ;;  %v997_v34 = vunpack.c.l.bf16 %v996_v22  ;;  %v900_v3 = vmax.f32 %v896_v53, 0.0  ;;  %v1833_v50 = vld [vmem:[#allocation2 + $0x208] sm:$0xff] }
  0x34   : > { %579 = vmatmul.bf16.vlgmr.msra.gmra.mxu2 %v520_v6  ;;  %868 = vmatpush.bf16.msrb.mxu1 %v1815_v8  ;;  %v725_v8 = vrot.slane %v723_v61, 3 }
  0x35   : > { %975 = vmatpush.bf16.msrb.mxu2 %v1823_v4  ;;  %680 = vmatmul.bf16.vlgmr.msra.gmra.mxu3 %v621_v7  ;;  %v998_v47 = vmax.f32 %v997_v34, 0.0  ;;  %v1801_v4 = vld [vmem:[#allocation2 + $0x108] sm:$0xff]  ;;  %v720_v7 = vrot.slane %v718_v60, 4 }
  0x36   : > { %1084 = vmatpush.bf16.msrb.mxu3 %v1831_v9  ;;  %v728_v9 = vrot.slane %v726_v62, 4 }
  0x37   : > { %782 = vmatpush.bf16.msrb.mxu0 %v1806_v10  ;;  %v2197_v58 = vpack.c.bf16 %v998_v47, %v2186_v46  ;;  %v1809_v10 = vld [vmem:[#allocation2 + $0x148] sm:$0xff]  ;;  %v1835_v47 = vld [vmem:[#allocation2 + $0x218] sm:$0xff] }
  0x38   : > { %869 = vmatpush.bf16.msrb.mxu1 %v1814_v12  ;;  %v902_v12 = vpack.c.bf16 %v900_v3, %v2186_v46  ;;  %v1836_v46 = vld [vmem:[#allocation2 + $0x220] sm:$0xff] }
  0x39   : > { %976 = vmatpush.bf16.msrb.mxu2 %v1822_v11  ;;  %v1029_v6 = vshll.u32 %v2197_v58, 16  ;;  %v1825_v11 = vld [vmem:[#allocation2 + $0x1c8] sm:$0xff] }
  0x3a   : > { %1085 = vmatpush.bf16.msrb.mxu3 %v1830_v13  ;;  %v1800_v13 = vld [vmem:[#allocation2 + $0x100] sm:$0xff]  ;;  %v923_v33 = vrot.slane %v902_v12, 2 }
  0x3b   : > { %783 = vmatpush.bf16.msrb.mxu0 %v1805_v14  ;;  %v1816_v14 = vld [vmem:[#allocation2 + $0x180] sm:$0xff]  ;;  %v1031_v22 = vrot.slane %v1029_v6, 3 }
  0x3c   : > { %870 = vmatpush.bf16.msrb.mxu1 %v1813_v25  ;;  %v1839_v25 = vld [vmem:[#allocation2 + $0x238] sm:$0xff] }
  0x3d   : > { %977 = vmatpush.bf16.msrb.mxu2 %v1821_v16  ;;  %v1020_v16 = vrot.slane %v1018_v40, 2 }
  0x3e   : > { %1086 = vmatpush.bf16.msrb.mxu3 %v1829_v27  ;;  %v721_v27 = vor.u32 %v720_v7, %v717_v55  ;;  %v1844_v7 = vld [vmem:[%s2272_s3 + $0x20] sm:$0xff] }
  0x3f   : > { %784 = vmatpush.bf16.msrb.mxu0 %v1804_v28  ;;  %v729_v28 = vor.u32 %v728_v9, %v725_v8 }
  0x40   : > { %871 = vmatpush.bf16.msrb.mxu1 %v1812_v37  ;;  %v1838_v37 = vld [vmem:[#allocation2 + $0x230] sm:$0xff] }
  0x41   : > { %978 = vmatpush.bf16.msrb.mxu2 %v1820_v29  ;;  %v1808_v29 = vld [vmem:[#allocation2 + $0x140] sm:$0xff] }
  0x42   : > { %1087 = vmatpush.bf16.msrb.mxu3 %v1828_v39  ;;  %424 = vmatmul.bf16.gmra.mxu0 %v360_v48  ;;  %v730_v39 = vsel %vm713_vm3, %v721_v27, %v729_v28  ;;  %v1105_v48 = vld [vmem:[%s2119_s20 + $0x4] sm:$0x8] }
  0x43   : > { %785 = vmatpush.bf16.msrb.mxu0 %v1803_v41  ;;  %490 = vmatmul.bf16.gmra.mxu1 %v308_v49  ;;  %v802_v41 = vpack.c.bf16 %v2142_v30, %v2137_v26  ;;  %v1834_v26 = vld [vmem:[#allocation2 + $0x210] sm:$0xff]  ;;  %v803_v30 = vpack.c.bf16 %v2181_v38, %v2181_v38  ;;  %v1106_v49 = vunpack.c.l.bf16 %v1105_v48 }
  0x44   : > { %584 = vmatmul.bf16.gmra.mxu2 %v519_v0  ;;  %872 = vmatpush.bf16.msrb.mxu1 %v1811_v51  ;;  %v1021_v0 = vshll.u32 %v2194_v57, 16 }
  0x45   : > { %979 = vmatpush.bf16.msrb.mxu2 %v1819_v42  ;;  %685 = vmatmul.bf16.gmra.mxu3 %v2165_v2  ;;  %v1026_v2 = vshrl.u32 %v2197_v58, 16  ;;  %v924_v42 = vsel %vm921_vm4, %v922_v32, %v923_v33  ;;  %v1107_v51 = vmax.f32 %v1106_v49, 0.0 }
  0x46   : > { %1088 = vmatpush.bf16.msrb.mxu3 %v1827_v52  ;;  %v1023_v17 = vrot.slane %v1021_v0, 3  ;;  %v1832_v52 = vld [vmem:[#allocation2 + $0x200] sm:$0xff] }
  0x47   : > { %786 = vmatpush.bf16.msrb.mxu0 %v1802_v54  ;;  %v1028_v20 = vrot.slane %v1026_v2, 2  ;;  %v1108_v53 = vpack.c.bf16 %v2184_v45, %v1107_v51  ;;  %v1847_v45 = vld [vmem:[%s2272_s3 + $0x38] sm:$0xff]  ;;  %v1845_v2 = vld [vmem:[%s2272_s3 + $0x28] sm:$0xff] }
  0x48   : > { %873 = vmatpush.bf16.msrb.mxu1 %v1810_v63  ;;  %v1024_v34 = vor.u32 %v1023_v17, %v1020_v16  ;;  %v1841_v16 = vld [vmem:[%s2272_s3 + $0x8] sm:$0xff] }
  0x49   : > { %980 = vmatpush.bf16.msrb.mxu2 %v1818_v56  ;;  %v1032_v35 = vor.u32 %v1031_v22, %v1028_v20  ;;  %v1127_v54 = vrot.slane %v1108_v53, 3  ;;  %v1128_v56 = vrot.slane %v2197_v58, 3 }
  0x4a   : > { %1089 = vmatpush.bf16.msrb.mxu3 %v1826_v1 }
  0x4b   : > { %787 = vmatpush.bf16.msrb.mxu0 %v1801_v4  ;;  %v1033_v43 = vsel %vm1016_vm5, %v1024_v34, %v1032_v35  ;;  %v1129_v38 = vsel %vm618_vm2, %v1127_v54, %v1128_v56  ;;  %v1322_v34 = vld [vmem:[%s2274_s5 + $0x10] sm:$0xff] }
  0x4c   : > { %874 = vmatpush.bf16.msrb.mxu1 %v1809_v10  ;;  %v1843_v10 = vld [vmem:[%s2272_s3 + $0x18] sm:$0xff] }
  0x4d   : > { %981 = vmatpush.bf16.msrb.mxu2 %v1817_v5  ;;  %v1846_v5 = vld [vmem:[%s2272_s3 + $0x30] sm:$0xff] }
  0x4e   : > { %1090 = vmatpush.bf16.msrb.mxu3 %v1825_v11 }
  0x4f   : > { %788 = vmatpush.bf16.msrb.mxu0 %v1800_v13  ;;  %v1842_v13 = vld [vmem:[%s2272_s3 + $0x10] sm:$0xff] }
  0x50   : > { %875 = vmatpush.bf16.msrb.mxu1 %v1808_v29 }
  0x51   : > { %982 = vmatpush.bf16.msrb.mxu2 %v1816_v14 }
  0x52   : > { %1091 = vmatpush.bf16.msrb.mxu3 %v1824_v31  ;;  %789 = vmatmul.bf16.vlgmr.msrb.gmra.mxu0 %v730_v39 }
  0x53   : > { %1180 = vmatpush.bf16.msra.mxu0 %v1839_v25  ;;  %876 = vmatmul.bf16.vlgmr.msrb.gmra.mxu1 %v802_v41 }
  0x54   : > { %983 = vmatmul.bf16.vlgmr.msrb.gmra.mxu2 %v924_v42  ;;  %1281 = vmatpush.bf16.msra.mxu1 %v1847_v45 }
  0x55   : > { %1862 = vmatpush.bf16.msra.mxu2 %v1839_v25  ;;  %1092 = vmatmul.bf16.vlgmr.msrb.gmra.mxu3 %v1033_v43  ;;  %v1840_v25 = vld [vmem:[%s2272_s3] sm:$0xff] }
  0x56   : > { %1870 = vmatpush.bf16.msra.mxu3 %v1847_v45 }
  0x57   : > { %1181 = vmatpush.bf16.msra.mxu0 %v1838_v37 }
  0x58   : > { %1282 = vmatpush.bf16.msra.mxu1 %v1846_v5 }
  0x59   : > { %1863 = vmatpush.bf16.msra.mxu2 %v1838_v37 }
  0x5a   : > { %1871 = vmatpush.bf16.msra.mxu3 %v1846_v5 }
  0x5b   : > { %1182 = vmatpush.bf16.msra.mxu0 %v1837_v44 }
  0x5c   : > { %1283 = vmatpush.bf16.msra.mxu1 %v1845_v2 }
  0x5d   : > { %1864 = vmatpush.bf16.msra.mxu2 %v1837_v44 }
  0x5e   : > { %1872 = vmatpush.bf16.msra.mxu3 %v1845_v2 }
  0x5f   : > { %1183 = vmatpush.bf16.msra.mxu0 %v1836_v46 }
  0x60   : > { %1284 = vmatpush.bf16.msra.mxu1 %v1844_v7 }
  0x61   : > { %1865 = vmatpush.bf16.msra.mxu2 %v1836_v46 }
  0x62   : > { %794 = vmatmul.bf16.gmra.mxu0 %v729_v28  ;;  %1873 = vmatpush.bf16.msra.mxu3 %v1844_v7 }
  0x63   : > { %1184 = vmatpush.bf16.msra.mxu0 %v1835_v47  ;;  %881 = vmatmul.bf16.gmra.mxu1 %v803_v30 }
  0x64   : > { %988 = vmatmul.bf16.gmra.mxu2 %v923_v33  ;;  %1285 = vmatpush.bf16.msra.mxu1 %v1843_v10  ;;  %v1320_v33 = vld [vmem:[%s2274_s5] sm:$0xff] }
  0x65   : > { %1866 = vmatpush.bf16.msra.mxu2 %v1835_v47  ;;  %1097 = vmatmul.bf16.gmra.mxu3 %v1032_v35  ;;  %v2037_v35 = vmov 0  }
  0x66   : > { %1874 = vmatpush.bf16.msra.mxu3 %v1843_v10  ;;  %1922 = vset.pattern.permute.xlu0 %v2037_v35 }
  0x67   : > { %1185 = vmatpush.bf16.msra.mxu0 %v1834_v26  ;;  %1923 = vset.pattern.permute.xlu1 %v2037_v35 }
  0x68   : > { %1286 = vmatpush.bf16.msra.mxu1 %v1842_v13  ;;  %1325 = vperm.xlu0 %1922, %v1320_v33  }
  0x69   : > { %1867 = vmatpush.bf16.msra.mxu2 %v1834_v26  ;;  %1335 = vperm.xlu1 %1923, %v1322_v34   ;;  %v1321_v26 = vld [vmem:[%s2274_s5 + $0x8] sm:$0xff] }
  0x6a   : > { %1875 = vmatpush.bf16.msra.mxu3 %v1842_v13 }
  0x6b   : > { %1186 = vmatpush.bf16.msra.mxu0 %v1833_v50 }
  0x6c   : > { %1287 = vmatpush.bf16.msra.mxu1 %v1841_v16 }
  0x6d   : > { %1868 = vmatpush.bf16.msra.mxu2 %v1833_v50 }
  0x6e   : > { %1876 = vmatpush.bf16.msra.mxu3 %v1841_v16 }
  0x6f   : > { %1187 = vmatpush.bf16.msra.mxu0 %v1832_v52 }
  0x70   : > { %1288 = vmatpush.bf16.msra.mxu1 %v1840_v25  ;;  %1330 = vperm.xlu0 %1922, %v1321_v26  }
  0x71   : > { %1869 = vmatpush.bf16.msra.mxu2 %v1832_v52 }
  0x72   : > { %1188 = vmatmul.bf16.vlgmr.msra.gmra.mxu0 %v1129_v38  ;;  %1877 = vmatpush.bf16.msra.mxu3 %v1840_v25  ;;  %v1309_v25 = vrot.slane %v694_v23, 7 }
  0x74   : > { %1193 = vmatmul.bf16.vlgmr.msra.gmra.mxu2 %v1128_v56 }
  0xaf   : > { %v420_v57 = vpop.f32.mrf.mxu0 }
  0xb0   : > { %v486_v59 = vpop.f32.mrf.mxu1 }
  0xb1   : > { %v487_v31 = vadd.f32 %v486_v59, %v420_v57 }
  0xb7   : > { %v580_v60 = vpop.f32.mrf.mxu2  ;;  %v422_v62 = vpop.f32.mrf.mxu0 }
  0xb8   : > { %v681_v61 = vpop.f32.mrf.mxu3  ;;  %v488_v63 = vpop.f32.mrf.mxu1  ;;  %v589_v37 = vadd.f32 %v580_v60, %v487_v31 }
  0xb9   : > { %v489_v41 = vadd.f32 %v488_v63, %v422_v62 }
  0xba   : > { %v690_v43 = vadd.f32 %v681_v61, %v589_v37 }
  0xbf   : > { %v582_v1 = vpop.f32.mrf.mxu2  ;;  %v425_v4 = vpop.f32.mrf.mxu0 }
  0xc0   : > { %v2218_v3 = vpop.f32.mrf.mxu3  ;;  %v491_v58 = vpop.f32.mrf.mxu1  ;;  %v590_v44 = vadd.f32 %v582_v1, %v489_v41 }
  0xc1   : > { %v492_v39 = vadd.f32 %v491_v58, %v425_v4  ;;  %v1924_v4 = vld [vmem:[#allocation4] ss:$0 sm:$0xff] }
  0xc2   : > { %v691_v51 = vadd.f32 %v2218_v3, %v590_v44 }
  0xc7   : > { %v585_v40 = vpop.f32.mrf.mxu2  ;;  %v427_v6 = vpop.f32.mrf.mxu0 }
  0xc8   : > { %v686_v0 = vpop.f32.mrf.mxu3  ;;  %v493_v55 = vpop.f32.mrf.mxu1  ;;  %v591_v42 = vadd.f32 %v585_v40, %v492_v39 }
  0xca   : > { %v692_v50 = vadd.f32 %v686_v0, %v591_v42 }
  0xcf   : > { %v587_v8 = vpop.f32.mrf.mxu2  ;;  %v790_v11 = vpop.f32.mrf.mxu0 }
  0xd0   : > { %v688_v9 = vpop.f32.mrf.mxu3  ;;  %v877_v12 = vpop.f32.mrf.mxu1  ;;  %v799_v30 = vadd.f32 %v790_v11, %v690_v43 }
  0xd2   : > { %v886_v53 = vadd.f32 %v877_v12, %v799_v30 }
  0xd7   : > { %v984_v14 = vpop.f32.mrf.mxu2  ;;  %v792_v17 = vpop.f32.mrf.mxu0 }
  0xd8   : > { %v1093_v20 = vpop.f32.mrf.mxu3  ;;  %v879_v22 = vpop.f32.mrf.mxu1  ;;  %v800_v54 = vadd.f32 %v792_v17, %v691_v51  ;;  %v993_v56 = vadd.f32 %v984_v14, %v886_v53  ;;  %v1925_v14 = vld [vmem:[#allocation6] ss:$0 sm:$0xff]  ;;  %v1304_v17 = vrot.slane %v594_v36, 7 }
  0xda   : > { %v887_v61 = vadd.f32 %v879_v22, %v800_v54  ;;  %v1102_v63 = vadd.f32 %v1093_v20, %v993_v56  ;;  %v1305_v20 = vrot.slane %v1851_v18, 7  ;;  %v1307_v22 = vrot.slane %v303_v21, 7 }
  0xdb   : > { %v1336_v18 = vpop.permute.xlu1 %1335 }
  0xdc   : > { %v1308_v35 = vsel %vm1303_vm6, %v1305_v20, %v1307_v22 }
  0xdf   : > { %v986_v27 = vpop.f32.mrf.mxu2  ;;  %v795_v28 = vpop.f32.mrf.mxu0 }
  0xe0   : > { %v1095_v29 = vpop.f32.mrf.mxu3  ;;  %v882_v32 = vpop.f32.mrf.mxu1  ;;  %v801_v52 = vadd.f32 %v795_v28, %v692_v50  ;;  %v994_v1 = vadd.f32 %v986_v27, %v887_v61 }
  0xe1   : > { %v1326_v28 = vpop.permute.xlu0 %1325 }
  0xe2   : > { %v888_v57 = vadd.f32 %v882_v32, %v801_v52  ;;  %v1103_v5 = vadd.f32 %v1095_v29, %v994_v1  ;;  %v1306_v29 = vsel %vm1303_vm6, %v1304_v17, %v1305_v20  ;;  %v1310_v32 = vsel %vm1303_vm6, %v1307_v22, %v1309_v25 }
  0xe7   : > { %v989_v46 = vpop.f32.mrf.mxu2  ;;  %v797_v47 = vpop.f32.mrf.mxu0 }
  0xe8   : > { %v1098_v48 = vpop.f32.mrf.mxu3  ;;  %v884_v49 = vpop.f32.mrf.mxu1  ;;  %v995_v62 = vadd.f32 %v989_v46, %v888_v57 }
  0xe9   : > { %v1331_v23 = vpop.permute.xlu0 %1330 }
  0xea   : > { %v1104_v58 = vadd.f32 %v1098_v48, %v995_v62 }
  0xef   : > { %v991_v38 = vpop.f32.mrf.mxu2  ;;  %v1189_v59 = vpop.f32.mrf.mxu0 }
  0xf0   : > { %v1100_v60 = vpop.f32.mrf.mxu3  ;;  %v1198_v45 = vadd.f32 %v1189_v59, %v1102_v63 }
  0xf2   : > { %v1205_v2 = vadd.f32 %v1924_v4, %v1198_v45 }
  0xf4   : > { %v1208_v9 = vmax.f32 %v1205_v2, 0.0 }
  0xf7   : > { %v1194_v40 = vpop.f32.mrf.mxu2  ;;  %v1191_v3 = vpop.f32.mrf.mxu0 }
  0xf8   : > { %v1200_v0 = vadd.f32 %v1194_v40, %v1104_v58  ;;  %v1199_v6 = vadd.f32 %v1191_v3, %v1103_v5 }
  0xfa   : > { %v1207_v55 = vadd.f32 %v1924_v4, %v1200_v0  ;;  %v1206_v7 = vadd.f32 %v1924_v4, %v1199_v6 }
  0xfc   : > { %v1210_v8 = vmax.f32 %v1207_v55, 0.0  ;;  %v1209_v10 = vmax.f32 %v1206_v7, 0.0 }
  0xfe   : > { %v1212_v11 = vpack.c.bf16 %v1210_v8, %v1210_v8  ;;  %v1211_v12 = vpack.c.bf16 %v1209_v10, %v1208_v9 }
  0xff   : > { %v1196_v13 = vpop.f32.mrf.mxu2 }
 0x100   : > { %1294 = vmatmul.bf16.vlgmr.msra.gmra.mxu3 %v1212_v11  ;;  %1289 = vmatmul.bf16.vlgmr.msra.gmra.mxu1 %v1211_v12 }
 0x17d   : > { %v1290_v16 = vpop.f32.mrf.mxu1 }
 0x17e   : > { %v1291_v27 = vadd.f32 %v1925_v14, %v1290_v16 }
 0x180   : > { %v1314_v34 = vadd.f32 %v1306_v29, %v1291_v27 }
 0x182   : > { %v1317_v39 = vmax.f32 %v1314_v34, 0.0 }
 0x183   : > { %v1295_v31 = vpop.f32.mrf.mxu3 }
 0x184   : > { %v1296_v33 = vadd.f32 %v1925_v14, %v1295_v31  ;;  %v1338_v44 = vmul.f32 %v1326_v28, %v1317_v39 }
 0x185   : > { %v1292_v36 = vpop.f32.mrf.mxu1 }
 0x186   : > { %v1316_v24 = vadd.f32 %v1310_v32, %v1296_v33  ;;  %v1293_v15 = vadd.f32 %v1925_v14, %v1292_v36 }
 0x188   : > { %v1319_v37 = vmax.f32 %v1316_v24, 0.0  ;;  %v1315_v41 = vadd.f32 %v1308_v35, %v1293_v15 }
 0x18a   : > { %v1340_v21 = vmul.f32 %v1336_v18, %v1319_v37  ;;  %v1318_v42 = vmax.f32 %v1315_v41, 0.0 }
 0x18b   : > { %v1297_v19 = vpop.f32.mrf.mxu3 }
 0x18c   : > { %v1343_v43 = vpack.c.bf16 %v1340_v21, %v1340_v21  ;;  %v1339_v46 = vmul.f32 %v1331_v23, %v1318_v42 }
 0x18e   : > { %1346 = vst [vmem:[%s297_s26 + $0x8] sm:$0xf] %v1343_v43  ;;  %v1859_v47 = vpack.c.bf16 %v1339_v46, %v1338_v44 }
 0x190   : > { %1860 = vst [vmem:[%s297_s26] sm:$0xff] %v1859_v47  }
 0x191 PF: > { %s18_s21 = sadd.s32 1, %s2030_s21  }
 0x192   : > { %p15_p7 = scmp.ge.s32.totalorder %s18_s21, 4  }
 0x194   :  { %17 = sbr.rel (!%p15_p7) target bundleno = 2 (0x2), region = 87 }
 0x199   :  { %1368 = vsyncpa [#allocation3], 1 }
 0x19a   :  { %1370 = vsyncpa [#allocation3 + $0x1], 1 }
 0x19b   :  { %1371 = vsyncpa [#allocation5], 1 }

// kernel: vqvae_forward.22
= control target key start
LH: loop header
LB: loop body
LE: loop exit
PB: predicated region body
PF: predicated region fallthrough
CT: control target
= control target key end

     0   :  { %9 = vsyncpa [#allocation3], 0  ;;  %s1818_s15 = smov 0   ;;  %s1820_s16 = smov 0   ;;  %s2174_s0 = inlined_call_operand.vmem [shape: bf16[2,38,128], index: 0, kind: input, shape index: {}]   ;;  %s2175_s1 = inlined_call_operand.vmem [shape: bf16[1152,128], index: 1, kind: input, shape index: {}]   ;;  %s2176_s2 = inlined_call_operand.hbm [shape: f32[1,128], index: 2, kind: input, shape index: {}]   ;;  %s2177_s3 = inlined_call_operand.vmem [shape: f32[24,1], index: 3, kind: input, shape index: {}]   ;;  %s2178_s4 = inlined_call_operand.vmem [shape: bf16[2,24,128], index: 4, kind: output, shape index: {}]  }
   0x1   :  { %s1822_s17 = smov 0  }
   0x2 LB: > { %s1298_s18 = sadd.s32 4294967295, %s1789_s17   ;;  %s24_s19 = sadd.s32 1, %s1785_s16  ;;  %s1789_s17 = sphi %s1822_s17, %s15_s17   ;;  %s1785_s16 = sphi %s1820_s16, %s2180_s16   ;;  %s1781_s15 = sphi %s1818_s15, %s2179_s15  }
   0x3   : > { %p25_p0 = scmp.ge.s32.totalorder %s24_s19, 2  ;;  %p1300_p1 = scmp.ge.s32.totalorder %s1789_s17, 1 }
   0x4   : > { %p159_p2 = scmp.lt.s32.totalorder %s1789_s17, 3  ;;  %p1702_p4 = scmp.eq.s32.totalorder %s1298_s18, 0 }
   0x5   : > { %s2182_s19 = smov (%p25_p0, %s24_s19), 0  ;;  %s179_s22 = sshll.u32 %s2176_s2, 4  ;;  %s180_s22 = int_to_ptr.hbm [resolvable:$true] %s179_s22 }
   0x6   : > { %p160_p3 = pnand %p1300_p1, %p159_p2  ;;  %s1791_s23 = smov [#allocation2]  }
   0x7   : > { %s181_s24 = sshll.u32 %s1791_s23, 4  ;;  %s182_s24 = int_to_ptr.vmem [resolvable:$true] %s181_s24 }
   0x8   : > { %p1698_p5 = pneg %p160_p3  ;;  %205 = sbr.rel (%p160_p3) target bundleno = 255 (0xff), region = 36 }
   0xa   : > { %p1699_p6 = pnand %p1702_p4, %p1698_p5 }
   0xc   : > { %1701 = dma.hbm_to_vmem [thread:$0]  (!%p1699_p6), %s180_s22, 16, %s182_s24, [#allocation3]  }
   0xd   : > { %1776 = dma.done.wait (%p1702_p4), [#allocation3], 16  }
   0xe   : > { %1778 = vsyncadd (%p1702_p4), [#allocation3], 4294967280  ;;  %p239_p7 = scmp.lt.s32.totalorder %s1781_s15, 1  ;;  %v1613_v0 = vld [vmem:[%s2175_s1 + $0x78] sm:$0xff]  ;;  %v1612_v4 = vld [vmem:[%s2175_s1 + $0x70] sm:$0xff]  ;;  %vm475_vm1 = vcmask 1046528  }
   0xf   : > { %v1605_v1 = vld [vmem:[%s2175_s1 + $0x38] sm:$0xff]  ;;  %368 = vmatpush.bf16.msra.mxu0 %v1613_v0  ;;  %v1604_v5 = vld [vmem:[%s2175_s1 + $0x30] sm:$0xff]  ;;  %v1611_v8 = vld [vmem:[%s2175_s1 + $0x68] sm:$0xff]  ;;  %vm302_vm0 = vsmask.f32 7424  ;;  %vm574_vm2 = vcmask 1044480  }
  0x10   : > { %v1621_v2 = vld [vmem:[%s2175_s1 + $0xb8] sm:$0xff]  ;;  %s2184_s15 = smov (!%p239_p7, %s1781_s15), 1  ;;  %437 = vmatpush.bf16.msra.mxu1 %v1605_v1  ;;  %v1620_v6 = vld [vmem:[%s2175_s1 + $0xb0] sm:$0xff]  ;;  %v1603_v9 = vld [vmem:[%s2175_s1 + $0x28] sm:$0xff]  ;;  %vm669_vm3 = vsmask.f32 4352 }
  0x11   : > { %v1629_v3 = vld [vmem:[%s2175_s1 + $0xf8] sm:$0xff]  ;;  %529 = vmatpush.bf16.msra.mxu2 %v1621_v2  ;;  %v1628_v7 = vld [vmem:[%s2175_s1 + $0xf0] sm:$0xff]  ;;  %s1692_s18 = smul.u32 20, %s2184_s15  ;;  %v1619_v10 = vld [vmem:[%s2175_s1 + $0xa8] sm:$0xff]  ;;  %vm877_vm4 = vcmask 1045504  }
  0x12   : > { %628 = vmatpush.bf16.msra.mxu3 %v1629_v3  ;;  %v1627_v11 = vld [vmem:[%s2175_s1 + $0xe8] sm:$0xff]  ;;  %v1610_v12 = vld [vmem:[%s2175_s1 + $0x60] sm:$0xff]  ;;  %v1609_v18 = vld [vmem:[%s2175_s1 + $0x58] sm:$0xff]  ;;  %vm972_vm5 = vsmask.f32 5376 }
  0x13   : > { %369 = vmatpush.bf16.msra.mxu0 %v1612_v4  ;;  %s1882_s30 = scalar_lea.vmem %s2174_s0, %s1692_s18  ;;  %v1602_v13 = vld [vmem:[%s2175_s1 + $0x20] sm:$0xff]  ;;  %v1601_v19 = vld [vmem:[%s2175_s1 + $0x18] sm:$0xff]  ;;  %v1608_v28 = vld [vmem:[%s2175_s1 + $0x50] sm:$0xff] }
  0x14   : > { %438 = vmatpush.bf16.msra.mxu1 %v1604_v5  ;;  %v1618_v14 = vld [vmem:[%s2175_s1 + $0xa0] sm:$0xff]  ;;  %v1897_v16 = vld [vmem:[%s1882_s30 + $0x8] sm:$0xff]   ;;  %v1617_v22 = vld [vmem:[%s2175_s1 + $0x98] sm:$0xff] }
  0x15   : > { %530 = vmatpush.bf16.msra.mxu2 %v1620_v6  ;;  %v1626_v15 = vld [vmem:[%s2175_s1 + $0xe0] sm:$0xff]  ;;  %v275_v17 = vld [vmem:[%s1882_s30 + $0xc] sm:$0x1]  ;;  %v1907_v20 = vunpack.c.l.b16 %v1897_v16  ;;  %v1625_v23 = vld [vmem:[%s2175_s1 + $0xd8] sm:$0xff] }
  0x16   : > { %629 = vmatpush.bf16.msra.mxu3 %v1628_v7  ;;  %v299_v21 = vunpack.c.l.b16 %v275_v17  ;;  %v1916_v24 = vld [vmem:[%s1882_s30] sm:$0xff]   ;;  %v551_v27 = vld [vmem:[%s1882_s30 + $0xc] sm:$0x7]  ;;  %v1600_v29 = vld [vmem:[%s2175_s1 + $0x10] sm:$0xff] }
  0x17   : > { %370 = vmatpush.bf16.msra.mxu0 %v1611_v8  ;;  %v455_v25 = vld [vmem:[%s1882_s30] sm:$0xe]  ;;  %v306_v31 = vshll.u32 %v1916_v24, 16  ;;  %v1616_v32 = vld [vmem:[%s2175_s1 + $0x90] sm:$0xff]  ;;  %v1938_v34 = vunpack.c.h.b16 %v1916_v24  ;;  %v571_v37 = vunpack.c.l.b16 %v551_v27  ;;  %v1607_v38 = vld [vmem:[%s2175_s1 + $0x48] sm:$0xff]  ;;  %v304_v40 = vshrl.u32 %v1916_v24, 16 }
  0x18   : > { %439 = vmatpush.bf16.msra.mxu1 %v1603_v9  ;;  %v550_v26 = vld [vmem:[%s1882_s30] sm:$0x8]  ;;  %v1928_v30 = vpack.c.b16 %v299_v21, %v1907_v20  ;;  %v1624_v33 = vld [vmem:[%s2175_s1 + $0xd0] sm:$0xff]  ;;  %v473_v35 = vunpack.c.l.b16 %v455_v25  ;;  %v1599_v39 = vld [vmem:[%s2175_s1 + $0x8] sm:$0xff]  ;;  %v386_v27 = vpack.c.b16 %v1907_v20, %v1907_v20 }
  0x19   : > { %531 = vmatpush.bf16.msra.mxu2 %v1619_v10  ;;  %v570_v36 = vunpack.c.l.b16 %v550_v26  ;;  %v308_v41 = vrot.slane %v306_v31, 1  ;;  %v1615_v43 = vld [vmem:[%s2175_s1 + $0x88] sm:$0xff]  ;;  %v1959_v47 = vpack.c.b16 %v571_v37, %v1907_v20  ;;  %v1606_v48 = vld [vmem:[%s2175_s1 + $0x40] sm:$0xff]  ;;  %v1637_v58 = vld [vmem:[%s2175_s1 + $0x138] sm:$0xff] }
  0x1a   : > { %630 = vmatpush.bf16.msra.mxu3 %v1627_v11  ;;  %v311_v42 = vshll.u32 %v1928_v30, 16  ;;  %v1623_v44 = vld [vmem:[%s2175_s1 + $0xc8] sm:$0xff]  ;;  %v474_v45 = vpack.c.b16 %v1938_v34, %v473_v35  ;;  %v1598_v49 = vld [vmem:[%s2175_s1] sm:$0xff]  ;;  %v477_v55 = vrot.slane %v1928_v30, 1  ;;  %v1645_v59 = vld [vmem:[%s2175_s1 + $0x178] sm:$0xff] }
  0x1b   : > { %371 = vmatpush.bf16.msra.mxu0 %v1610_v12  ;;  %v1956_v46 = vpack.c.b16 %v1938_v34, %v570_v36  ;;  %v309_v50 = vor.u32 %v308_v41, %v304_v40  ;;  %v1614_v52 = vld [vmem:[%s2175_s1 + $0x80] sm:$0xff]  ;;  %v576_v57 = vrot.slane %v1959_v47, 3  ;;  %v1653_v62 = vld [vmem:[%s2175_s1 + $0x1b8] sm:$0xff]  ;;  %v1636_v1 = vld [vmem:[%s2175_s1 + $0x130] sm:$0xff]  ;;  %v682_v40 = vshll.u32 %v1897_v16, 16 }
  0x1c   : > { %440 = vmatpush.bf16.msra.mxu1 %v1602_v13  ;;  %v1967_v51 = vrot.slane %v311_v42, 1  ;;  %v1622_v53 = vld [vmem:[%s2175_s1 + $0xc0] sm:$0xff]  ;;  %v476_v54 = vrot.slane %v474_v45, 1  ;;  %v1661_v0 = vld [vmem:[%s2175_s1 + $0x1f8] sm:$0xff]  ;;  %v1644_v2 = vld [vmem:[%s2175_s1 + $0x170] sm:$0xff] }
  0x1d   : > { %532 = vmatpush.bf16.msra.mxu2 %v1618_v14  ;;  %v575_v56 = vrot.slane %v1956_v46, 3  ;;  %v1652_v3 = vld [vmem:[%s2175_s1 + $0x1b0] sm:$0xff]  ;;  %v1635_v5 = vld [vmem:[%s2175_s1 + $0x128] sm:$0xff]  ;;  %v1634_v9 = vld [vmem:[%s2175_s1 + $0x120] sm:$0xff]  ;;  %v315_v14 = vshrl.u32 %v1928_v30, 16  ;;  %v671_v37 = vshrl.u32 %v1956_v46, 16 }
  0x1e   : > { %631 = vmatpush.bf16.msra.mxu3 %v1626_v15  ;;  %v314_v60 = vsel %vm302_vm0, %v309_v50, %v1967_v51  ;;  %v478_v61 = vsel %vm475_vm1, %v476_v54, %v477_v55  ;;  %v1660_v4 = vld [vmem:[%s2175_s1 + $0x1f0] sm:$0xff]  ;;  %v1643_v6 = vld [vmem:[%s2175_s1 + $0x168] sm:$0xff]  ;;  %v1642_v10 = vld [vmem:[%s2175_s1 + $0x160] sm:$0xff]  ;;  %v667_v15 = vunpack.c.h.b16 %v1897_v16 }
  0x1f   : > { %372 = vmatpush.bf16.msra.mxu0 %v1609_v18  ;;  %v577_v63 = vsel %vm574_vm2, %v575_v56, %v576_v57  ;;  %v1651_v7 = vld [vmem:[%s2175_s1 + $0x1a8] sm:$0xff]  ;;  %v847_v11 = vld [vmem:[%s1882_s30 + $0x4] sm:$0xc]  ;;  %v952_v13 = vld [vmem:[%s1882_s30 + $0x10] sm:$0x7]  ;;  %v317_v26 = vor.u32 %v315_v14, %v1967_v51  ;;  %v1792_v14 = vmov 0  }
  0x20   : > { %441 = vmatpush.bf16.msra.mxu1 %v1601_v19  ;;  %v1659_v8 = vld [vmem:[%s2175_s1 + $0x1e8] sm:$0xff]  ;;  %v1650_v17 = vld [vmem:[%s2175_s1 + $0x1a0] sm:$0xff]  ;;  %v1641_v25 = vld [vmem:[%s2175_s1 + $0x158] sm:$0xff]  ;;  %1730 = vset.pattern.permute.xlu0 %v1792_v14 }
  0x21   : > { %533 = vmatpush.bf16.msra.mxu2 %v1617_v22  ;;  %v2030_v12 = vld [vmem:[%s1882_s30 + $0x8] sm:$0xff]   ;;  %v1658_v18 = vld [vmem:[%s2175_s1 + $0x1e0] sm:$0xff]  ;;  %v871_v22 = vunpack.c.l.b16 %v847_v11  ;;  %v850_v31 = vld [vmem:[%s1882_s30 + $0x10] sm:$0x3]  ;;  %1731 = vset.pattern.permute.xlu1 %v1792_v14 }
  0x22   : > { %632 = vmatpush.bf16.msra.mxu3 %v1625_v23  ;;  %v1676_v19 = vunpack.c.l.b16 %v2030_v12  ;;  %v1677_v21 = vunpack.c.h.b16 %v2030_v12  ;;  %v970_v23 = vunpack.c.l.b16 %v952_v13  ;;  %v1632_v35 = vld [vmem:[%s2175_s1 + $0x110] sm:$0xff]  ;;  %v874_v41 = vunpack.c.l.b16 %v850_v31  ;;  %v1631_v47 = vld [vmem:[%s2175_s1 + $0x108] sm:$0xff] }
  0x23   : > { %373 = vmatpush.bf16.msra.mxu0 %v1608_v28  ;;  %v1649_v28 = vld [vmem:[%s2175_s1 + $0x198] sm:$0xff]  ;;  %v1640_v36 = vld [vmem:[%s2175_s1 + $0x150] sm:$0xff]  ;;  %v1647_v54 = vld [vmem:[%s2175_s1 + $0x188] sm:$0xff] }
  0x24   : > { %442 = vmatpush.bf16.msra.mxu1 %v1600_v29  ;;  %v1657_v29 = vld [vmem:[%s2175_s1 + $0x1d8] sm:$0xff]  ;;  %v1648_v42 = vld [vmem:[%s2175_s1 + $0x190] sm:$0xff]  ;;  %v1667_v13 = vld [vmem:[%s2175_s1 + $0x228] sm:$0xff] }
  0x25   : > { %534 = vmatpush.bf16.msra.mxu2 %v1616_v32  ;;  %v2061_v32 = vpack.c.b16 %v1676_v19, %v871_v22  ;;  %v1656_v30 = vld [vmem:[%s2175_s1 + $0x1d0] sm:$0xff]  ;;  %v775_v22 = vpack.c.b16 %v667_v15, %v667_v15 }
  0x26   : > { %633 = vmatpush.bf16.msra.mxu3 %v1624_v33  ;;  %v2063_v33 = vpack.c.b16 %v970_v23, %v1677_v21  ;;  %v1668_v11 = vld [vmem:[%s2175_s1 + $0x230] sm:$0xff] }
  0x27   : > { %374 = vmatpush.bf16.msra.mxu0 %v1607_v38  ;;  %v674_v38 = vshll.u32 %v1956_v46, 16  ;;  %v1664_v23 = vld [vmem:[%s2175_s1 + $0x210] sm:$0xff] }
  0x28   : > { %443 = vmatpush.bf16.msra.mxu1 %v1599_v39  ;;  %v679_v39 = vshrl.u32 %v1897_v16, 16  ;;  %v982_v45 = vshrl.u32 %v2063_v33, 16  ;;  %v985_v46 = vshll.u32 %v2063_v33, 16  ;;  %v1663_v16 = vld [vmem:[%s2175_s1 + $0x208] sm:$0xff] }
  0x29   : > { %535 = vmatpush.bf16.msra.mxu2 %v1615_v43  ;;  %v974_v43 = vshrl.u32 %v2061_v32, 16  ;;  %v676_v50 = vrot.slane %v674_v38, 4 }
  0x2a   : > { %634 = vmatpush.bf16.msra.mxu3 %v1623_v44  ;;  %v977_v44 = vshll.u32 %v2061_v32, 16  ;;  %v681_v51 = vrot.slane %v679_v39, 3 }
  0x2b   : > { %375 = vmatpush.bf16.msra.mxu0 %v1606_v48  ;;  %v1639_v48 = vld [vmem:[%s2175_s1 + $0x148] sm:$0xff]  ;;  %v976_v56 = vrot.slane %v974_v43, 2 }
  0x2c   : > { %444 = vmatpush.bf16.msra.mxu1 %v1598_v49  ;;  %v673_v49 = vrot.slane %v671_v37, 3 }
  0x2d   : > { %536 = vmatpush.bf16.msra.mxu2 %v1614_v52  ;;  %v684_v52 = vrot.slane %v682_v40, 4 }
  0x2e   : > { %635 = vmatpush.bf16.msra.mxu3 %v1622_v53  ;;  %376 = vmatmul.bf16.vlgmr.msra.gmra.mxu0 %v314_v60  ;;  %v2095_v53 = vpack.c.b16 %v874_v41, %v1677_v21  ;;  %v1630_v60 = vld [vmem:[%s2175_s1 + $0x100] sm:$0xff]  ;;  %v1665_v21 = vld [vmem:[%s2175_s1 + $0x218] sm:$0xff] }
  0x2f   : > { %737 = vmatpush.bf16.msrb.mxu0 %v1637_v58  ;;  %445 = vmatmul.bf16.vlgmr.msra.gmra.mxu1 %v1916_v24  ;;  %v1633_v24 = vld [vmem:[%s2175_s1 + $0x118] sm:$0xff]  ;;  %v984_v58 = vrot.slane %v982_v45, 2 }
  0x30   : > { %826 = vmatpush.bf16.msrb.mxu1 %v1645_v59  ;;  %537 = vmatmul.bf16.vlgmr.msra.gmra.mxu2 %v478_v61  ;;  %v987_v59 = vrot.slane %v985_v46, 3  ;;  %v1638_v61 = vld [vmem:[%s2175_s1 + $0x140] sm:$0xff] }
  0x31   : > { %636 = vmatmul.bf16.vlgmr.msra.gmra.mxu3 %v577_v63  ;;  %931 = vmatpush.bf16.msrb.mxu2 %v1653_v62  ;;  %v1669_v62 = vld [vmem:[%s2175_s1 + $0x238] sm:$0xff]  ;;  %v677_v63 = vor.u32 %v676_v50, %v673_v49 }
  0x32   : > { %1040 = vmatpush.bf16.msrb.mxu3 %v1661_v0  ;;  %v685_v0 = vor.u32 %v684_v52, %v681_v51 }
  0x33   : > { %738 = vmatpush.bf16.msrb.mxu0 %v1636_v1  ;;  %v1646_v1 = vld [vmem:[%s2175_s1 + $0x180] sm:$0xff] }
  0x34   : > { %827 = vmatpush.bf16.msrb.mxu1 %v1644_v2  ;;  %v1654_v2 = vld [vmem:[%s2175_s1 + $0x1c0] sm:$0xff] }
  0x35   : > { %932 = vmatpush.bf16.msrb.mxu2 %v1652_v3  ;;  %v878_v3 = vrot.slane %v2061_v32, 2 }
  0x36   : > { %1041 = vmatpush.bf16.msrb.mxu3 %v1660_v4  ;;  %v879_v4 = vrot.slane %v2095_v53, 2 }
  0x37   : > { %739 = vmatpush.bf16.msrb.mxu0 %v1635_v5 }
  0x38   : > { %828 = vmatpush.bf16.msrb.mxu1 %v1643_v6  ;;  %v988_v6 = vor.u32 %v987_v59, %v984_v58 }
  0x39   : > { %933 = vmatpush.bf16.msrb.mxu2 %v1651_v7  ;;  %v774_v7 = vpack.c.b16 %v1907_v20, %v1938_v34  ;;  %v1165_v20 = vld [vmem:[%s2177_s3] sm:$0xff]  ;;  %v1167_v34 = vld [vmem:[%s2177_s3 + $0x10] sm:$0xff] }
  0x3a   : > { %1042 = vmatpush.bf16.msrb.mxu3 %v1659_v8  ;;  %v686_v8 = vsel %vm669_vm3, %v677_v63, %v685_v0  ;;  %1170 = vperm.xlu0 %1730, %v1165_v20   ;;  %v1732_v20 = vld [vmem:[#allocation2] ss:$0 sm:$0xff] }
  0x3b   : > { %740 = vmatpush.bf16.msrb.mxu0 %v1634_v9  ;;  %v880_v9 = vsel %vm877_vm4, %v878_v3, %v879_v4  ;;  %1180 = vperm.xlu1 %1731, %v1167_v34  }
  0x3c   : > { %829 = vmatpush.bf16.msrb.mxu1 %v1642_v10 }
  0x3d   : > { %934 = vmatpush.bf16.msrb.mxu2 %v1650_v17  ;;  %v1666_v17 = vld [vmem:[%s2175_s1 + $0x220] sm:$0xff] }
  0x3e   : > { %1043 = vmatpush.bf16.msrb.mxu3 %v1658_v18  ;;  %381 = vmatmul.bf16.gmra.mxu0 %v317_v26  ;;  %v1166_v18 = vld [vmem:[%s2177_s3 + $0x8] sm:$0xff]  ;;  %v1662_v26 = vld [vmem:[%s2175_s1 + $0x200] sm:$0xff] }
  0x3f   : > { %741 = vmatpush.bf16.msrb.mxu0 %v1633_v24  ;;  %450 = vmatmul.bf16.gmra.mxu1 %v386_v27  ;;  %v1061_v24 = vld [vmem:[%s1882_s30 + $0x4] sm:$0x8]  ;;  %s1693_s30 = smul.u32 12, %s2184_s15 }
  0x40   : > { %830 = vmatpush.bf16.msrb.mxu1 %v1641_v25  ;;  %542 = vmatmul.bf16.gmra.mxu2 %v477_v55  ;;  %v1655_v55 = vld [vmem:[%s2175_s1 + $0x1c8] sm:$0xff]  ;;  %v1079_v25 = vunpack.c.l.b16 %v1061_v24 }
  0x41   : > { %641 = vmatmul.bf16.gmra.mxu3 %v576_v57  ;;  %935 = vmatpush.bf16.msrb.mxu2 %v1649_v28  ;;  %v979_v57 = vrot.slane %v977_v44, 3  ;;  %v1082_v28 = vrot.slane %v2063_v33, 3  ;;  %s255_s7 = scalar_lea.vmem %s2178_s4, %s1693_s30 }
  0x42   : > { %1044 = vmatpush.bf16.msrb.mxu3 %v1657_v29  ;;  %1175 = vperm.xlu0 %1730, %v1166_v18   ;;  %v1080_v15 = vpack.c.b16 %v1676_v19, %v1079_v25 }
  0x43   : > { %742 = vmatpush.bf16.msrb.mxu0 %v1632_v35  ;;  %v980_v5 = vor.u32 %v979_v57, %v976_v56 }
  0x44   : > { %831 = vmatpush.bf16.msrb.mxu1 %v1640_v36  ;;  %v1081_v27 = vrot.slane %v1080_v15, 3 }
  0x45   : > { %936 = vmatpush.bf16.msrb.mxu2 %v1648_v42  ;;  %v989_v10 = vsel %vm972_vm5, %v980_v5, %v988_v6 }
  0x46   : > { %1045 = vmatpush.bf16.msrb.mxu3 %v1656_v30  ;;  %v1083_v29 = vsel %vm574_vm2, %v1081_v27, %v1082_v28 }
  0x47   : > { %743 = vmatpush.bf16.msrb.mxu0 %v1631_v47 }
  0x48   : > { %832 = vmatpush.bf16.msrb.mxu1 %v1639_v48 }
  0x49   : > { %937 = vmatpush.bf16.msrb.mxu2 %v1647_v54 }
  0x4a   : > { %1046 = vmatpush.bf16.msrb.mxu3 %v1655_v55 }
  0x4b   : > { %744 = vmatpush.bf16.msrb.mxu0 %v1630_v60 }
  0x4c   : > { %833 = vmatpush.bf16.msrb.mxu1 %v1638_v61 }
  0x4d   : > { %938 = vmatpush.bf16.msrb.mxu2 %v1646_v1 }
  0x4e   : > { %1047 = vmatpush.bf16.msrb.mxu3 %v1654_v2  ;;  %745 = vmatmul.bf16.vlgmr.msrb.gmra.mxu0 %v686_v8 }
  0x4f   : > { %1134 = vmatpush.bf16.msra.mxu0 %v1669_v62  ;;  %834 = vmatmul.bf16.vlgmr.msrb.gmra.mxu1 %v774_v7 }
  0x50   : > { %1684 = vmatpush.bf16.msra.mxu1 %v1669_v62  ;;  %939 = vmatmul.bf16.vlgmr.msrb.gmra.mxu2 %v880_v9 }
  0x51   : > { %1048 = vmatmul.bf16.vlgmr.msrb.gmra.mxu3 %v989_v10 }
  0x53   : > { %1135 = vmatpush.bf16.msra.mxu0 %v1668_v11 }
  0x54   : > { %1685 = vmatpush.bf16.msra.mxu1 %v1668_v11 }
  0x57   : > { %1136 = vmatpush.bf16.msra.mxu0 %v1667_v13 }
  0x58   : > { %1686 = vmatpush.bf16.msra.mxu1 %v1667_v13 }
  0x5b   : > { %1137 = vmatpush.bf16.msra.mxu0 %v1666_v17 }
  0x5c   : > { %1687 = vmatpush.bf16.msra.mxu1 %v1666_v17 }
  0x5e   : > { %750 = vmatmul.bf16.gmra.mxu0 %v685_v0 }
  0x5f   : > { %1138 = vmatpush.bf16.msra.mxu0 %v1665_v21  ;;  %839 = vmatmul.bf16.gmra.mxu1 %v775_v22 }
  0x60   : > { %1688 = vmatpush.bf16.msra.mxu1 %v1665_v21  ;;  %944 = vmatmul.bf16.gmra.mxu2 %v879_v4 }
  0x61   : > { %1053 = vmatmul.bf16.gmra.mxu3 %v988_v6 }
  0x63   : > { %1139 = vmatpush.bf16.msra.mxu0 %v1664_v23 }
  0x64   : > { %1689 = vmatpush.bf16.msra.mxu1 %v1664_v23 }
  0x67   : > { %1140 = vmatpush.bf16.msra.mxu0 %v1663_v16 }
  0x68   : > { %1690 = vmatpush.bf16.msra.mxu1 %v1663_v16 }
  0x6b   : > { %1141 = vmatpush.bf16.msra.mxu0 %v1662_v26 }
  0x6c   : > { %1691 = vmatpush.bf16.msra.mxu1 %v1662_v26 }
  0x6e   : > { %1142 = vmatmul.bf16.vlgmr.msra.gmra.mxu0 %v1083_v29 }
  0x6f   : > { %1147 = vmatmul.bf16.vlgmr.msra.gmra.mxu1 %v1082_v28 }
  0xab   : > { %v377_v31 = vpop.f32.mrf.mxu0 }
  0xac   : > { %v446_v32 = vpop.f32.mrf.mxu1  ;;  %v1171_v16 = vpop.permute.xlu0 %1170 }
  0xad   : > { %v447_v52 = vadd.f32 %v446_v32, %v377_v31  ;;  %v1181_v15 = vpop.permute.xlu1 %1180 }
  0xb3   : > { %v538_v35 = vpop.f32.mrf.mxu2  ;;  %v379_v19 = vpop.f32.mrf.mxu0 }
  0xb4   : > { %v637_v12 = vpop.f32.mrf.mxu3  ;;  %v448_v36 = vpop.f32.mrf.mxu1  ;;  %v547_v58 = vadd.f32 %v538_v35, %v447_v52 }
  0xb5   : > { %v449_v60 = vadd.f32 %v448_v36, %v379_v19 }
  0xb6   : > { %v646_v61 = vadd.f32 %v637_v12, %v547_v58 }
  0xbb   : > { %v540_v37 = vpop.f32.mrf.mxu2  ;;  %v382_v39 = vpop.f32.mrf.mxu0 }
  0xbc   : > { %v639_v38 = vpop.f32.mrf.mxu3  ;;  %v451_v40 = vpop.f32.mrf.mxu1  ;;  %v548_v63 = vadd.f32 %v540_v37, %v449_v60 }
  0xbd   : > { %v452_v51 = vadd.f32 %v451_v40, %v382_v39 }
  0xbe   : > { %v647_v6 = vadd.f32 %v639_v38, %v548_v63  ;;  %v1176_v38 = vpop.permute.xlu0 %1175 }
  0xc3   : > { %v543_v41 = vpop.f32.mrf.mxu2  ;;  %v384_v30 = vpop.f32.mrf.mxu0 }
  0xc4   : > { %v642_v42 = vpop.f32.mrf.mxu3  ;;  %v453_v33 = vpop.f32.mrf.mxu1  ;;  %v549_v53 = vadd.f32 %v543_v41, %v452_v51 }
  0xc6   : > { %v648_v59 = vadd.f32 %v642_v42, %v549_v53 }
  0xcb   : > { %v545_v43 = vpop.f32.mrf.mxu2  ;;  %v746_v45 = vpop.f32.mrf.mxu0 }
  0xcc   : > { %v644_v44 = vpop.f32.mrf.mxu3  ;;  %v835_v46 = vpop.f32.mrf.mxu1  ;;  %v755_v0 = vadd.f32 %v746_v45, %v646_v61 }
  0xce   : > { %v844_v7 = vadd.f32 %v835_v46, %v755_v0 }
  0xd3   : > { %v940_v47 = vpop.f32.mrf.mxu2  ;;  %v748_v49 = vpop.f32.mrf.mxu0 }
  0xd4   : > { %v1049_v48 = vpop.f32.mrf.mxu3  ;;  %v837_v50 = vpop.f32.mrf.mxu1  ;;  %v949_v9 = vadd.f32 %v940_v47, %v844_v7  ;;  %v756_v10 = vadd.f32 %v748_v49, %v647_v6 }
  0xd6   : > { %v845_v18 = vadd.f32 %v837_v50, %v756_v10  ;;  %v1058_v21 = vadd.f32 %v1049_v48, %v949_v9 }
  0xdb   : > { %v942_v54 = vpop.f32.mrf.mxu2  ;;  %v751_v56 = vpop.f32.mrf.mxu0 }
  0xdc   : > { %v1051_v55 = vpop.f32.mrf.mxu3  ;;  %v840_v57 = vpop.f32.mrf.mxu1  ;;  %v757_v62 = vadd.f32 %v751_v56, %v648_v59  ;;  %v950_v23 = vadd.f32 %v942_v54, %v845_v18 }
  0xde   : > { %v846_v5 = vadd.f32 %v840_v57, %v757_v62  ;;  %v1059_v27 = vadd.f32 %v1051_v55, %v950_v23 }
  0xe3   : > { %v945_v1 = vpop.f32.mrf.mxu2  ;;  %v753_v3 = vpop.f32.mrf.mxu0 }
  0xe4   : > { %v1054_v2 = vpop.f32.mrf.mxu3  ;;  %v842_v4 = vpop.f32.mrf.mxu1  ;;  %v951_v8 = vadd.f32 %v945_v1, %v846_v5 }
  0xe6   : > { %v1060_v11 = vadd.f32 %v1054_v2, %v951_v8 }
  0xeb   : > { %v947_v34 = vpop.f32.mrf.mxu2  ;;  %v1143_v14 = vpop.f32.mrf.mxu0 }
  0xec   : > { %v1056_v13 = vpop.f32.mrf.mxu3  ;;  %v1148_v17 = vpop.f32.mrf.mxu1  ;;  %v1152_v24 = vadd.f32 %v1143_v14, %v1058_v21 }
  0xed   : > { %v1154_v22 = vadd.f32 %v1148_v17, %v1060_v11 }
  0xee   : > { %v1159_v28 = vadd.f32 %v1732_v20, %v1152_v24 }
  0xef   : > { %v1161_v25 = vadd.f32 %v1732_v20, %v1154_v22 }
  0xf0   : > { %v1162_v19 = vmax.f32 %v1159_v28, 0.0 }
  0xf1   : > { %v1164_v26 = vmax.f32 %v1161_v25, 0.0 }
  0xf2   : > { %v1183_v39 = vmul.f32 %v1171_v16, %v1162_v19 }
  0xf3   : > { %v1185_v29 = vmul.f32 %v1181_v15, %v1164_v26  ;;  %v1145_v31 = vpop.f32.mrf.mxu0 }
  0xf4   : > { %v1150_v32 = vpop.f32.mrf.mxu1  ;;  %v1153_v12 = vadd.f32 %v1145_v31, %v1059_v27 }
  0xf5   : > { %v1188_v35 = vpack.c.bf16 %v1185_v29, %v1185_v29 }
  0xf6   : > { %v1160_v36 = vadd.f32 %v1732_v20, %v1153_v12 }
  0xf7   : > { %1191 = vst [vmem:[%s255_s7 + $0x8] sm:$0xf] %v1188_v35 }
  0xf8   : > { %v1163_v37 = vmax.f32 %v1160_v36, 0.0 }
  0xfa   : > { %v1184_v40 = vmul.f32 %v1176_v38, %v1163_v37 }
  0xfc   : > { %v1681_v41 = vpack.c.bf16 %v1184_v40, %v1183_v39 }
  0xfe   : > { %1682 = vst [vmem:[%s255_s7] sm:$0xff] %v1681_v41  }
  0xff PF: > { %s15_s17 = sadd.s32 1, %s1789_s17   ;;  %s2179_s15 = smov %s1785_s16 }
 0x100   : > { %p12_p8 = scmp.ge.s32.totalorder %s15_s17, 4   ;;  %s2180_s16 = smov %s2182_s19 }
 0x102   :  { %14 = sbr.rel (!%p12_p8) target bundleno = 2 (0x2), region = 75 }
 0x107   :  { %1219 = vsyncpa [#allocation3], 1 }
 0x108   :  { %1221 = vsyncpa [#allocation3 + $0x1], 1 }

// kernel: vqvae_forward.20
= control target key start
LH: loop header
LB: loop body
LE: loop exit
PB: predicated region body
PF: predicated region fallthrough
CT: control target
= control target key end

     0   :  { %11 = vsyncpa [#allocation3], 0  ;;  %s2266_s0 = inlined_call_operand.vmem [shape: bf16[2,38,128], index: 0, kind: input, shape index: {}]   ;;  %s2267_s1 = inlined_call_operand.hbm [shape: bf16[1152,128], index: 1, kind: input, shape index: {}]   ;;  %s2268_s2 = inlined_call_operand.hbm [shape: f32[1,128], index: 2, kind: input, shape index: {}]   ;;  %s2269_s3 = inlined_call_operand.vmem [shape: bf16[128,128], index: 3, kind: input, shape index: {}]   ;;  %s2270_s4 = inlined_call_operand.hbm [shape: f32[1,128], index: 4, kind: input, shape index: {}]   ;;  %s2271_s5 = inlined_call_operand.vmem [shape: f32[24,1], index: 5, kind: input, shape index: {}]   ;;  %s2272_s6 = inlined_call_operand.vmem [shape: bf16[2,24,128], index: 6, kind: output, shape index: {}]  }
   0x1   :  { %12 = vsyncpa [#allocation5], 0  ;;  %s2070_s21 = smov 0  }
   0x2 LB: > { %s206_s24 = sshll.u32 %s2268_s2, 4  ;;  %s2079_s25 = sadd.s32 4294967295, %s2027_s21   ;;  %s2027_s21 = sphi %s2070_s21, %s18_s21   ;;  %s207_s24 = int_to_ptr.hbm [resolvable:$true] %s206_s24 }
   0x3   : > { %p1432_p0 = scmp.ge.s32.totalorder %s2027_s21, 1  ;;  %p180_p1 = scmp.lt.s32.totalorder %s2027_s21, 3 }
   0x4   : > { %p1899_p2 = scmp.eq.s32.totalorder %s2079_s25, 0  ;;  %s2029_s27 = smov [#allocation4]  }
   0x5   : > { %p2084_p3 = pnand %p1432_p0, %p180_p1  ;;  %s208_s28 = sshll.u32 %s2029_s27, 4  ;;  %s209_s28 = int_to_ptr.vmem [resolvable:$true] %s208_s28 }
   0x6   : > { %s191_s7 = sshll.u32 %s2267_s1, 4  ;;  %s2030_s8 = smov [#allocation2]   ;;  %s192_s7 = int_to_ptr.hbm [resolvable:$true] %s191_s7 }
   0x7   : > { %p1889_p4 = pneg %p2084_p3  ;;  %s193_s9 = sshll.u32 %s2030_s8, 4  ;;  %s194_s9 = int_to_ptr.vmem [resolvable:$true] %s193_s9 }
   0x8   : > { %s221_s12 = sshll.u32 %s2270_s4, 4  ;;  %s2031_s13 = smov 64   ;;  %s222_s12 = int_to_ptr.hbm [resolvable:$true] %s221_s12 }
   0x9   : > { %p1890_p5 = pnand %p1899_p2, %p1889_p4  ;;  %s2032_s14 = smov 4  }
   0xa   : > { %s2033_s15 = smov [#allocation6]   ;;  %247 = sbr.rel (%p2084_p3) target bundleno = 399 (0x18f), region = 44 }
   0xb   : > { %1895 = dma.hbm_to_vmem [thread:$0]  (!%p1890_p5), %s207_s24, 16, %s209_s28, [#allocation5]  }
   0xc   : > { %1892 = dma.hbm_to_vmem [thread:$0]  (!%p1890_p5), %s192_s7, 9216, %s194_s9, [#allocation3], %s2031_s13, %s2031_s13, %s2032_s14  }
   0xd   : > { %s223_s16 = sshll.u32 %s2033_s15, 4  ;;  %s224_s16 = int_to_ptr.vmem [resolvable:$true] %s223_s16 }
   0xe   : > { %1898 = dma.hbm_to_vmem [thread:$0]  (!%p1890_p5), %s222_s12, 16, %s224_s16, [#allocation5]  }
   0xf   : > { %2018 = dma.done.wait (%p1899_p2), [#allocation3], 9216  }
  0x10   : > { %2020 = vsyncadd (%p1899_p2), [#allocation3], 4294958080 }
  0x11   : > { %2022 = dma.done.wait (%p1899_p2), [#allocation5], 32  }
  0x12   : > { %2024 = vsyncadd (%p1899_p2), [#allocation5], 4294967264  ;;  %p288_p6 = scmp.lt.s32.totalorder %s2079_s25, 1  ;;  %v1780_v0 = vld [vmem:[#allocation2 + $0x78] sm:$0xff]  ;;  %v1779_v4 = vld [vmem:[#allocation2 + $0x70] sm:$0xff]  ;;  %vm517_vm1 = vcmask 1046528  }
  0x13   : > { %v1772_v1 = vld [vmem:[#allocation2 + $0x38] sm:$0xff]  ;;  %411 = vmatpush.bf16.msra.mxu0 %v1780_v0  ;;  %v1771_v5 = vld [vmem:[#allocation2 + $0x30] sm:$0xff]  ;;  %v1778_v8 = vld [vmem:[#allocation2 + $0x68] sm:$0xff]  ;;  %vm345_vm0 = vsmask.f32 7424  ;;  %vm618_vm2 = vcmask 1044480  }
  0x14   : > { %s2275_s25 = smov (!%p288_p6, %s2079_s25), 1  ;;  %v1788_v2 = vld [vmem:[#allocation2 + $0xb8] sm:$0xff]  ;;  %477 = vmatpush.bf16.msra.mxu1 %v1772_v1  ;;  %v1787_v6 = vld [vmem:[#allocation2 + $0xb0] sm:$0xff]  ;;  %v1770_v9 = vld [vmem:[#allocation2 + $0x28] sm:$0xff]  ;;  %vm713_vm3 = vsmask.f32 4352 }
  0x15   : > { %v1796_v3 = vld [vmem:[#allocation2 + $0xf8] sm:$0xff]  ;;  %571 = vmatpush.bf16.msra.mxu2 %v1788_v2  ;;  %v1795_v7 = vld [vmem:[#allocation2 + $0xf0] sm:$0xff]  ;;  %s1875_s17 = smul.u32 20, %s2275_s25  ;;  %v1786_v10 = vld [vmem:[#allocation2 + $0xa8] sm:$0xff]  ;;  %vm921_vm4 = vcmask 1045504   ;;  %vm1303_vm6 = vcmask 1040384  }
  0x16   : > { %672 = vmatpush.bf16.msra.mxu3 %v1796_v3  ;;  %v1794_v11 = vld [vmem:[#allocation2 + $0xe8] sm:$0xff]  ;;  %v1777_v12 = vld [vmem:[#allocation2 + $0x60] sm:$0xff]  ;;  %v1776_v28 = vld [vmem:[#allocation2 + $0x58] sm:$0xff]  ;;  %vm1016_vm5 = vsmask.f32 5376  ;;  %s1876_s22 = smul.u32 12, %s2275_s25 }
  0x17   : > { %412 = vmatpush.bf16.msra.mxu0 %v1779_v4  ;;  %s2116_s20 = scalar_lea.vmem %s2266_s0, %s1875_s17  ;;  %v1769_v13 = vld [vmem:[#allocation2 + $0x20] sm:$0xff]  ;;  %v1768_v29 = vld [vmem:[#allocation2 + $0x18] sm:$0xff]  ;;  %v1775_v38 = vld [vmem:[#allocation2 + $0x50] sm:$0xff] }
  0x18   : > { %478 = vmatpush.bf16.msra.mxu1 %v1771_v5  ;;  %v1785_v14 = vld [vmem:[#allocation2 + $0xa0] sm:$0xff]  ;;  %v2124_v19 = vld [vmem:[%s2116_s20 + $0x8] sm:$0xff]   ;;  %v1784_v32 = vld [vmem:[#allocation2 + $0x98] sm:$0xff]  ;;  %s297_s26 = scalar_lea.vmem %s2272_s6, %s1876_s22 }
  0x19   : > { %572 = vmatpush.bf16.msra.mxu2 %v1787_v6  ;;  %v2119_v15 = vld [vmem:[%s2116_s20] sm:$0xff]   ;;  %v325_v20 = vld [vmem:[%s2116_s20 + $0xc] sm:$0x1]  ;;  %v303_v21 = vunpack.c.l.bf16 %v2124_v19  ;;  %v1792_v33 = vld [vmem:[#allocation2 + $0xd8] sm:$0xff] }
  0x1a   : > { %673 = vmatpush.bf16.msra.mxu3 %v1795_v7  ;;  %v1793_v16 = vld [vmem:[#allocation2 + $0xe0] sm:$0xff]  ;;  %v1847_v17 = vunpack.c.l.bf16 %v2119_v15  ;;  %v1848_v18 = vunpack.c.h.bf16 %v2119_v15  ;;  %v326_v22 = vunpack.c.l.bf16 %v325_v20  ;;  %v593_v27 = vld [vmem:[%s2116_s20 + $0xc] sm:$0x7]  ;;  %v1767_v39 = vld [vmem:[#allocation2 + $0x10] sm:$0xff] }
  0x1b   : > { %413 = vmatpush.bf16.msra.mxu0 %v1778_v8  ;;  %v495_v23 = vld [vmem:[%s2116_s20] sm:$0xe]  ;;  %v2139_v30 = vmax.f32 %v303_v21, 0.0  ;;  %v595_v37 = vunpack.c.l.bf16 %v593_v27  ;;  %v1783_v42 = vld [vmem:[#allocation2 + $0x90] sm:$0xff]  ;;  %v1774_v47 = vld [vmem:[#allocation2 + $0x48] sm:$0xff] }
  0x1c   : > { %479 = vmatpush.bf16.msra.mxu1 %v1770_v9  ;;  %v2130_v24 = vld [vmem:[%s2116_s20] sm:$0x8]  ;;  %v304_v25 = vmax.f32 %v1847_v17, 0.0  ;;  %v2134_v26 = vmax.f32 %v1848_v18, 0.0  ;;  %v327_v31 = vmax.f32 %v326_v22, 0.0  ;;  %v496_v35 = vunpack.c.l.bf16 %v495_v23  ;;  %v1791_v43 = vld [vmem:[#allocation2 + $0xd0] sm:$0xff] }
  0x1d   : > { %573 = vmatpush.bf16.msra.mxu2 %v1786_v10  ;;  %v594_v36 = vunpack.c.l.bf16 %v2130_v24  ;;  %v597_v46 = vmax.f32 %v595_v37, 0.0  ;;  %v1766_v48 = vld [vmem:[#allocation2 + $0x8] sm:$0xff]  ;;  %v1773_v57 = vld [vmem:[#allocation2 + $0x40] sm:$0xff]  ;;  %v1804_v3 = vld [vmem:[#allocation2 + $0x138] sm:$0xff]  ;;  %v694_v23 = vunpack.c.h.bf16 %v2124_v19 }
  0x1e   : > { %674 = vmatpush.bf16.msra.mxu3 %v1794_v11  ;;  %v2142_v34 = vpack.c.bf16 %v2134_v26, %v304_v25  ;;  %v2146_v40 = vpack.c.bf16 %v327_v31, %v2139_v30  ;;  %v497_v44 = vmax.f32 %v496_v35, 0.0  ;;  %v1782_v52 = vld [vmem:[#allocation2 + $0x88] sm:$0xff]  ;;  %v1765_v58 = vld [vmem:[#allocation2] sm:$0xff]  ;;  %v1820_v4 = vld [vmem:[#allocation2 + $0x1b8] sm:$0xff] }
  0x1f   : > { %414 = vmatpush.bf16.msra.mxu0 %v1777_v12  ;;  %v596_v45 = vmax.f32 %v594_v36, 0.0  ;;  %v1790_v53 = vld [vmem:[#allocation2 + $0xc8] sm:$0xff]  ;;  %v599_v56 = vpack.c.bf16 %v597_v46, %v2139_v30  ;;  %v1781_v61 = vld [vmem:[#allocation2 + $0x80] sm:$0xff]  ;;  %v1812_v8 = vld [vmem:[#allocation2 + $0x178] sm:$0xff] }
  0x20   : > { %480 = vmatpush.bf16.msra.mxu1 %v1769_v13  ;;  %v349_v41 = vshll.u32 %v2142_v34, 16  ;;  %v347_v49 = vshrl.u32 %v2142_v34, 16  ;;  %v354_v51 = vshll.u32 %v2146_v40, 16  ;;  %v498_v54 = vpack.c.bf16 %v2134_v26, %v497_v44  ;;  %v1789_v62 = vld [vmem:[#allocation2 + $0xc0] sm:$0xff]  ;;  %v1828_v9 = vld [vmem:[#allocation2 + $0x1f8] sm:$0xff]  ;;  %v1803_v10 = vld [vmem:[#allocation2 + $0x130] sm:$0xff] }
  0x21   : > { %574 = vmatpush.bf16.msra.mxu2 %v1785_v14  ;;  %v2155_v55 = vpack.c.bf16 %v2134_v26, %v596_v45  ;;  %v519_v0 = vrot.slane %v2146_v40, 1  ;;  %v2162_v2 = vrot.slane %v599_v56, 3  ;;  %v1819_v11 = vld [vmem:[#allocation2 + $0x1b0] sm:$0xff]  ;;  %v1802_v14 = vld [vmem:[#allocation2 + $0x128] sm:$0xff]  ;;  %v889_v17 = vld [vmem:[%s2116_s20 + $0x4] sm:$0xc] }
  0x22   : > { %675 = vmatpush.bf16.msra.mxu3 %v1793_v16  ;;  %v351_v50 = vrot.slane %v349_v41, 1  ;;  %v2158_v60 = vrot.slane %v354_v51, 1  ;;  %v518_v63 = vrot.slane %v498_v54, 1  ;;  %v1811_v12 = vld [vmem:[#allocation2 + $0x170] sm:$0xff]  ;;  %v1818_v16 = vld [vmem:[#allocation2 + $0x1a8] sm:$0xff]  ;;  %v358_v35 = vshrl.u32 %v2146_v40, 16 }
  0x23   : > { %415 = vmatpush.bf16.msra.mxu0 %v1776_v28  ;;  %v619_v1 = vrot.slane %v2155_v55, 3  ;;  %v1827_v13 = vld [vmem:[#allocation2 + $0x1f0] sm:$0xff]  ;;  %v1858_v20 = vld [vmem:[%s2116_s20 + $0x8] sm:$0xff]   ;;  %v1801_v28 = vld [vmem:[#allocation2 + $0x120] sm:$0xff] }
  0x24   : > { %481 = vmatpush.bf16.msra.mxu1 %v1768_v29  ;;  %v352_v59 = vor.u32 %v351_v50, %v347_v49  ;;  %v520_v6 = vsel %vm517_vm1, %v518_v63, %v519_v0  ;;  %v996_v22 = vld [vmem:[%s2116_s20 + $0x10] sm:$0x7]  ;;  %v1810_v25 = vld [vmem:[#allocation2 + $0x168] sm:$0xff]  ;;  %v1817_v29 = vld [vmem:[#allocation2 + $0x1a0] sm:$0xff]  ;;  %v1851_v31 = vunpack.c.l.bf16 %v1858_v20  ;;  %v308_v49 = vpack.c.bf16 %v2139_v30, %v2139_v30 }
  0x25   : > { %575 = vmatpush.bf16.msra.mxu2 %v1784_v32  ;;  %v621_v7 = vsel %vm618_vm2, %v619_v1, %v2162_v2  ;;  %v1826_v27 = vld [vmem:[#allocation2 + $0x1e8] sm:$0xff]  ;;  %v1852_v32 = vunpack.c.h.bf16 %v1858_v20  ;;  %v1809_v37 = vld [vmem:[#allocation2 + $0x160] sm:$0xff]  ;;  %v1800_v41 = vld [vmem:[#allocation2 + $0x118] sm:$0xff] }
  0x26   : > { %676 = vmatpush.bf16.msra.mxu3 %v1792_v33  ;;  %v357_v5 = vsel %vm345_vm0, %v352_v59, %v2158_v60  ;;  %v893_v33 = vunpack.c.l.bf16 %v889_v17  ;;  %v2181_v45 = vmax.f32 %v1851_v31, 0.0  ;;  %v1808_v51 = vld [vmem:[#allocation2 + $0x158] sm:$0xff]  ;;  %v1799_v54 = vld [vmem:[#allocation2 + $0x110] sm:$0xff]  ;;  %v715_v59 = vshrl.u32 %v2155_v55, 16  ;;  %v1821_v31 = vld [vmem:[#allocation2 + $0x1c0] sm:$0xff] }
  0x27   : > { %416 = vmatpush.bf16.msra.mxu0 %v1775_v38  ;;  %v2178_v38 = vmax.f32 %v694_v23, 0.0  ;;  %v2183_v46 = vmax.f32 %v1852_v32, 0.0  ;;  %v1815_v56 = vld [vmem:[#allocation2 + $0x190] sm:$0xff] }
  0x28   : > { %482 = vmatpush.bf16.msra.mxu1 %v1767_v39  ;;  %v1825_v39 = vld [vmem:[#allocation2 + $0x1e0] sm:$0xff]  ;;  %v897_v44 = vmax.f32 %v893_v33, 0.0  ;;  %v1807_v63 = vld [vmem:[#allocation2 + $0x150] sm:$0xff] }
  0x29   : > { %576 = vmatpush.bf16.msra.mxu2 %v1783_v42  ;;  %v1816_v42 = vld [vmem:[#allocation2 + $0x198] sm:$0xff]  ;;  %v696_v50 = vpack.c.bf16 %v2178_v38, %v2139_v30  ;;  %v1823_v1 = vld [vmem:[#allocation2 + $0x1d0] sm:$0xff] }
  0x2a   : > { %677 = vmatpush.bf16.msra.mxu3 %v1791_v43  ;;  %v892_v43 = vld [vmem:[%s2116_s20 + $0x10] sm:$0x3] }
  0x2b   : > { %417 = vmatpush.bf16.msra.mxu0 %v1774_v47 }
  0x2c   : > { %483 = vmatpush.bf16.msra.mxu1 %v1766_v48  ;;  %v360_v48 = vor.u32 %v358_v35, %v2158_v60  ;;  %v718_v60 = vshll.u32 %v2155_v55, 16  ;;  %v717_v55 = vrot.slane %v715_v59, 3 }
  0x2d   : > { %577 = vmatpush.bf16.msra.mxu2 %v1782_v52  ;;  %v1824_v52 = vld [vmem:[#allocation2 + $0x1d8] sm:$0xff] }
  0x2e   : > { %678 = vmatpush.bf16.msra.mxu3 %v1790_v53  ;;  %v896_v53 = vunpack.c.l.bf16 %v892_v43 }
  0x2f   : > { %418 = vmatpush.bf16.msra.mxu0 %v1773_v57  ;;  %v2191_v57 = vpack.c.bf16 %v2181_v45, %v897_v44  ;;  %v1834_v44 = vld [vmem:[#allocation2 + $0x228] sm:$0xff] }
  0x30   : > { %484 = vmatpush.bf16.msra.mxu1 %v1765_v58 }
  0x31   : > { %578 = vmatpush.bf16.msra.mxu2 %v1781_v61  ;;  %v723_v61 = vshrl.u32 %v696_v50, 16  ;;  %v1018_v40 = vshrl.u32 %v2191_v57, 16  ;;  %v922_v32 = vrot.slane %v2191_v57, 2 }
  0x32   : > { %679 = vmatpush.bf16.msra.mxu3 %v1789_v62  ;;  %419 = vmatmul.bf16.vlgmr.msra.gmra.mxu0 %v357_v5  ;;  %v726_v62 = vshll.u32 %v696_v50, 16  ;;  %v1814_v5 = vld [vmem:[#allocation2 + $0x188] sm:$0xff] }
  0x33   : > { %781 = vmatpush.bf16.msrb.mxu0 %v1804_v3  ;;  %485 = vmatmul.bf16.vlgmr.msra.gmra.mxu1 %v2142_v34  ;;  %v997_v34 = vunpack.c.l.bf16 %v996_v22  ;;  %v900_v3 = vmax.f32 %v896_v53, 0.0  ;;  %v1830_v50 = vld [vmem:[#allocation2 + $0x208] sm:$0xff] }
  0x34   : > { %579 = vmatmul.bf16.vlgmr.msra.gmra.mxu2 %v520_v6  ;;  %868 = vmatpush.bf16.msrb.mxu1 %v1812_v8  ;;  %v725_v8 = vrot.slane %v723_v61, 3 }
  0x35   : > { %975 = vmatpush.bf16.msrb.mxu2 %v1820_v4  ;;  %680 = vmatmul.bf16.vlgmr.msra.gmra.mxu3 %v621_v7  ;;  %v998_v47 = vmax.f32 %v997_v34, 0.0  ;;  %v1798_v4 = vld [vmem:[#allocation2 + $0x108] sm:$0xff]  ;;  %v720_v7 = vrot.slane %v718_v60, 4 }
  0x36   : > { %1084 = vmatpush.bf16.msrb.mxu3 %v1828_v9  ;;  %v728_v9 = vrot.slane %v726_v62, 4 }
  0x37   : > { %782 = vmatpush.bf16.msrb.mxu0 %v1803_v10  ;;  %v2194_v58 = vpack.c.bf16 %v998_v47, %v2183_v46  ;;  %v1806_v10 = vld [vmem:[#allocation2 + $0x148] sm:$0xff]  ;;  %v1832_v47 = vld [vmem:[#allocation2 + $0x218] sm:$0xff] }
  0x38   : > { %869 = vmatpush.bf16.msrb.mxu1 %v1811_v12  ;;  %v902_v12 = vpack.c.bf16 %v900_v3, %v2183_v46  ;;  %v1833_v46 = vld [vmem:[#allocation2 + $0x220] sm:$0xff] }
  0x39   : > { %976 = vmatpush.bf16.msrb.mxu2 %v1819_v11  ;;  %v1029_v6 = vshll.u32 %v2194_v58, 16  ;;  %v1822_v11 = vld [vmem:[#allocation2 + $0x1c8] sm:$0xff] }
  0x3a   : > { %1085 = vmatpush.bf16.msrb.mxu3 %v1827_v13  ;;  %v1797_v13 = vld [vmem:[#allocation2 + $0x100] sm:$0xff]  ;;  %v923_v33 = vrot.slane %v902_v12, 2 }
  0x3b   : > { %783 = vmatpush.bf16.msrb.mxu0 %v1802_v14  ;;  %v1813_v14 = vld [vmem:[#allocation2 + $0x180] sm:$0xff]  ;;  %v1031_v22 = vrot.slane %v1029_v6, 3 }
  0x3c   : > { %870 = vmatpush.bf16.msrb.mxu1 %v1810_v25  ;;  %v1836_v25 = vld [vmem:[#allocation2 + $0x238] sm:$0xff] }
  0x3d   : > { %977 = vmatpush.bf16.msrb.mxu2 %v1818_v16  ;;  %v1020_v16 = vrot.slane %v1018_v40, 2 }
  0x3e   : > { %1086 = vmatpush.bf16.msrb.mxu3 %v1826_v27  ;;  %v721_v27 = vor.u32 %v720_v7, %v717_v55  ;;  %v1841_v7 = vld [vmem:[%s2269_s3 + $0x20] sm:$0xff] }
  0x3f   : > { %784 = vmatpush.bf16.msrb.mxu0 %v1801_v28  ;;  %v729_v28 = vor.u32 %v728_v9, %v725_v8 }
  0x40   : > { %871 = vmatpush.bf16.msrb.mxu1 %v1809_v37  ;;  %v1835_v37 = vld [vmem:[#allocation2 + $0x230] sm:$0xff] }
  0x41   : > { %978 = vmatpush.bf16.msrb.mxu2 %v1817_v29  ;;  %v1805_v29 = vld [vmem:[#allocation2 + $0x140] sm:$0xff] }
  0x42   : > { %1087 = vmatpush.bf16.msrb.mxu3 %v1825_v39  ;;  %424 = vmatmul.bf16.gmra.mxu0 %v360_v48  ;;  %v730_v39 = vsel %vm713_vm3, %v721_v27, %v729_v28  ;;  %v1105_v48 = vld [vmem:[%s2116_s20 + $0x4] sm:$0x8] }
  0x43   : > { %785 = vmatpush.bf16.msrb.mxu0 %v1800_v41  ;;  %490 = vmatmul.bf16.gmra.mxu1 %v308_v49  ;;  %v802_v41 = vpack.c.bf16 %v2139_v30, %v2134_v26  ;;  %v1831_v26 = vld [vmem:[#allocation2 + $0x210] sm:$0xff]  ;;  %v803_v30 = vpack.c.bf16 %v2178_v38, %v2178_v38  ;;  %v1106_v49 = vunpack.c.l.bf16 %v1105_v48 }
  0x44   : > { %584 = vmatmul.bf16.gmra.mxu2 %v519_v0  ;;  %872 = vmatpush.bf16.msrb.mxu1 %v1808_v51  ;;  %v1021_v0 = vshll.u32 %v2191_v57, 16 }
  0x45   : > { %979 = vmatpush.bf16.msrb.mxu2 %v1816_v42  ;;  %685 = vmatmul.bf16.gmra.mxu3 %v2162_v2  ;;  %v1026_v2 = vshrl.u32 %v2194_v58, 16  ;;  %v924_v42 = vsel %vm921_vm4, %v922_v32, %v923_v33  ;;  %v1107_v51 = vmax.f32 %v1106_v49, 0.0 }
  0x46   : > { %1088 = vmatpush.bf16.msrb.mxu3 %v1824_v52  ;;  %v1023_v17 = vrot.slane %v1021_v0, 3  ;;  %v1829_v52 = vld [vmem:[#allocation2 + $0x200] sm:$0xff] }
  0x47   : > { %786 = vmatpush.bf16.msrb.mxu0 %v1799_v54  ;;  %v1028_v20 = vrot.slane %v1026_v2, 2  ;;  %v1108_v53 = vpack.c.bf16 %v2181_v45, %v1107_v51  ;;  %v1844_v45 = vld [vmem:[%s2269_s3 + $0x38] sm:$0xff]  ;;  %v1842_v2 = vld [vmem:[%s2269_s3 + $0x28] sm:$0xff] }
  0x48   : > { %873 = vmatpush.bf16.msrb.mxu1 %v1807_v63  ;;  %v1024_v34 = vor.u32 %v1023_v17, %v1020_v16  ;;  %v1838_v16 = vld [vmem:[%s2269_s3 + $0x8] sm:$0xff] }
  0x49   : > { %980 = vmatpush.bf16.msrb.mxu2 %v1815_v56  ;;  %v1032_v35 = vor.u32 %v1031_v22, %v1028_v20  ;;  %v1127_v54 = vrot.slane %v1108_v53, 3  ;;  %v1128_v56 = vrot.slane %v2194_v58, 3 }
  0x4a   : > { %1089 = vmatpush.bf16.msrb.mxu3 %v1823_v1 }
  0x4b   : > { %787 = vmatpush.bf16.msrb.mxu0 %v1798_v4  ;;  %v1033_v43 = vsel %vm1016_vm5, %v1024_v34, %v1032_v35  ;;  %v1129_v38 = vsel %vm618_vm2, %v1127_v54, %v1128_v56  ;;  %v1319_v34 = vld [vmem:[%s2271_s5 + $0x10] sm:$0xff] }
  0x4c   : > { %874 = vmatpush.bf16.msrb.mxu1 %v1806_v10  ;;  %v1840_v10 = vld [vmem:[%s2269_s3 + $0x18] sm:$0xff] }
  0x4d   : > { %981 = vmatpush.bf16.msrb.mxu2 %v1814_v5  ;;  %v1843_v5 = vld [vmem:[%s2269_s3 + $0x30] sm:$0xff] }
  0x4e   : > { %1090 = vmatpush.bf16.msrb.mxu3 %v1822_v11 }
  0x4f   : > { %788 = vmatpush.bf16.msrb.mxu0 %v1797_v13  ;;  %v1839_v13 = vld [vmem:[%s2269_s3 + $0x10] sm:$0xff] }
  0x50   : > { %875 = vmatpush.bf16.msrb.mxu1 %v1805_v29 }
  0x51   : > { %982 = vmatpush.bf16.msrb.mxu2 %v1813_v14 }
  0x52   : > { %1091 = vmatpush.bf16.msrb.mxu3 %v1821_v31  ;;  %789 = vmatmul.bf16.vlgmr.msrb.gmra.mxu0 %v730_v39 }
  0x53   : > { %1180 = vmatpush.bf16.msra.mxu0 %v1836_v25  ;;  %876 = vmatmul.bf16.vlgmr.msrb.gmra.mxu1 %v802_v41 }
  0x54   : > { %983 = vmatmul.bf16.vlgmr.msrb.gmra.mxu2 %v924_v42  ;;  %1281 = vmatpush.bf16.msra.mxu1 %v1844_v45 }
  0x55   : > { %1859 = vmatpush.bf16.msra.mxu2 %v1836_v25  ;;  %1092 = vmatmul.bf16.vlgmr.msrb.gmra.mxu3 %v1033_v43  ;;  %v1837_v25 = vld [vmem:[%s2269_s3] sm:$0xff] }
  0x56   : > { %1867 = vmatpush.bf16.msra.mxu3 %v1844_v45 }
  0x57   : > { %1181 = vmatpush.bf16.msra.mxu0 %v1835_v37 }
  0x58   : > { %1282 = vmatpush.bf16.msra.mxu1 %v1843_v5 }
  0x59   : > { %1860 = vmatpush.bf16.msra.mxu2 %v1835_v37 }
  0x5a   : > { %1868 = vmatpush.bf16.msra.mxu3 %v1843_v5 }
  0x5b   : > { %1182 = vmatpush.bf16.msra.mxu0 %v1834_v44 }
  0x5c   : > { %1283 = vmatpush.bf16.msra.mxu1 %v1842_v2 }
  0x5d   : > { %1861 = vmatpush.bf16.msra.mxu2 %v1834_v44 }
  0x5e   : > { %1869 = vmatpush.bf16.msra.mxu3 %v1842_v2 }
  0x5f   : > { %1183 = vmatpush.bf16.msra.mxu0 %v1833_v46 }
  0x60   : > { %1284 = vmatpush.bf16.msra.mxu1 %v1841_v7 }
  0x61   : > { %1862 = vmatpush.bf16.msra.mxu2 %v1833_v46 }
  0x62   : > { %794 = vmatmul.bf16.gmra.mxu0 %v729_v28  ;;  %1870 = vmatpush.bf16.msra.mxu3 %v1841_v7 }
  0x63   : > { %1184 = vmatpush.bf16.msra.mxu0 %v1832_v47  ;;  %881 = vmatmul.bf16.gmra.mxu1 %v803_v30 }
  0x64   : > { %988 = vmatmul.bf16.gmra.mxu2 %v923_v33  ;;  %1285 = vmatpush.bf16.msra.mxu1 %v1840_v10  ;;  %v1317_v33 = vld [vmem:[%s2271_s5] sm:$0xff] }
  0x65   : > { %1863 = vmatpush.bf16.msra.mxu2 %v1832_v47  ;;  %1097 = vmatmul.bf16.gmra.mxu3 %v1032_v35  ;;  %v2034_v35 = vmov 0  }
  0x66   : > { %1871 = vmatpush.bf16.msra.mxu3 %v1840_v10  ;;  %1919 = vset.pattern.permute.xlu0 %v2034_v35 }
  0x67   : > { %1185 = vmatpush.bf16.msra.mxu0 %v1831_v26  ;;  %1920 = vset.pattern.permute.xlu1 %v2034_v35 }
  0x68   : > { %1286 = vmatpush.bf16.msra.mxu1 %v1839_v13  ;;  %1322 = vperm.xlu0 %1919, %v1317_v33  }
  0x69   : > { %1864 = vmatpush.bf16.msra.mxu2 %v1831_v26  ;;  %1332 = vperm.xlu1 %1920, %v1319_v34   ;;  %v1318_v26 = vld [vmem:[%s2271_s5 + $0x8] sm:$0xff] }
  0x6a   : > { %1872 = vmatpush.bf16.msra.mxu3 %v1839_v13 }
  0x6b   : > { %1186 = vmatpush.bf16.msra.mxu0 %v1830_v50 }
  0x6c   : > { %1287 = vmatpush.bf16.msra.mxu1 %v1838_v16 }
  0x6d   : > { %1865 = vmatpush.bf16.msra.mxu2 %v1830_v50 }
  0x6e   : > { %1873 = vmatpush.bf16.msra.mxu3 %v1838_v16  ;;  %v1922_v16 = vld [vmem:[#allocation6] ss:$0 sm:$0xff] }
  0x6f   : > { %1187 = vmatpush.bf16.msra.mxu0 %v1829_v52 }
  0x70   : > { %1288 = vmatpush.bf16.msra.mxu1 %v1837_v25  ;;  %1327 = vperm.xlu0 %1919, %v1318_v26  }
  0x71   : > { %1866 = vmatpush.bf16.msra.mxu2 %v1829_v52 }
  0x72   : > { %1188 = vmatmul.bf16.vlgmr.msra.gmra.mxu0 %v1129_v38  ;;  %1874 = vmatpush.bf16.msra.mxu3 %v1837_v25  ;;  %v1304_v25 = vrot.slane %v594_v36, 7 }
  0x74   : > { %1193 = vmatmul.bf16.vlgmr.msra.gmra.mxu2 %v1128_v56 }
  0xaf   : > { %v420_v57 = vpop.f32.mrf.mxu0 }
  0xb0   : > { %v486_v59 = vpop.f32.mrf.mxu1 }
  0xb1   : > { %v487_v31 = vadd.f32 %v486_v59, %v420_v57 }
  0xb7   : > { %v580_v60 = vpop.f32.mrf.mxu2  ;;  %v422_v62 = vpop.f32.mrf.mxu0 }
  0xb8   : > { %v681_v61 = vpop.f32.mrf.mxu3  ;;  %v488_v63 = vpop.f32.mrf.mxu1  ;;  %v589_v37 = vadd.f32 %v580_v60, %v487_v31 }
  0xb9   : > { %v489_v41 = vadd.f32 %v488_v63, %v422_v62 }
  0xba   : > { %v690_v43 = vadd.f32 %v681_v61, %v589_v37 }
  0xbf   : > { %v582_v1 = vpop.f32.mrf.mxu2  ;;  %v425_v4 = vpop.f32.mrf.mxu0 }
  0xc0   : > { %v2215_v3 = vpop.f32.mrf.mxu3  ;;  %v491_v58 = vpop.f32.mrf.mxu1  ;;  %v590_v44 = vadd.f32 %v582_v1, %v489_v41 }
  0xc1   : > { %v492_v39 = vadd.f32 %v491_v58, %v425_v4  ;;  %v1921_v4 = vld [vmem:[#allocation4] ss:$0 sm:$0xff] }
  0xc2   : > { %v691_v51 = vadd.f32 %v2215_v3, %v590_v44 }
  0xc7   : > { %v585_v40 = vpop.f32.mrf.mxu2  ;;  %v427_v6 = vpop.f32.mrf.mxu0 }
  0xc8   : > { %v686_v0 = vpop.f32.mrf.mxu3  ;;  %v493_v55 = vpop.f32.mrf.mxu1  ;;  %v591_v42 = vadd.f32 %v585_v40, %v492_v39 }
  0xca   : > { %v692_v50 = vadd.f32 %v686_v0, %v591_v42 }
  0xcf   : > { %v587_v8 = vpop.f32.mrf.mxu2  ;;  %v790_v11 = vpop.f32.mrf.mxu0 }
  0xd0   : > { %v688_v9 = vpop.f32.mrf.mxu3  ;;  %v877_v12 = vpop.f32.mrf.mxu1  ;;  %v799_v30 = vadd.f32 %v790_v11, %v690_v43 }
  0xd2   : > { %v886_v53 = vadd.f32 %v877_v12, %v799_v30 }
  0xd7   : > { %v984_v14 = vpop.f32.mrf.mxu2  ;;  %v792_v17 = vpop.f32.mrf.mxu0 }
  0xd8   : > { %v1093_v20 = vpop.f32.mrf.mxu3  ;;  %v879_v22 = vpop.f32.mrf.mxu1  ;;  %v800_v54 = vadd.f32 %v792_v17, %v691_v51  ;;  %v993_v56 = vadd.f32 %v984_v14, %v886_v53  ;;  %v1307_v17 = vrot.slane %v303_v21, 7 }
  0xda   : > { %v887_v61 = vadd.f32 %v879_v22, %v800_v54  ;;  %v1102_v63 = vadd.f32 %v1093_v20, %v993_v56  ;;  %v1309_v20 = vrot.slane %v694_v23, 7  ;;  %v1323_v22 = vpop.permute.xlu0 %1322 }
  0xdb   : > { %v1333_v34 = vpop.permute.xlu1 %1332 }
  0xdc   : > { %v1310_v31 = vsel %vm1303_vm6, %v1307_v17, %v1309_v20 }
  0xdf   : > { %v986_v27 = vpop.f32.mrf.mxu2  ;;  %v795_v28 = vpop.f32.mrf.mxu0 }
  0xe0   : > { %v1095_v29 = vpop.f32.mrf.mxu3  ;;  %v882_v32 = vpop.f32.mrf.mxu1  ;;  %v801_v52 = vadd.f32 %v795_v28, %v692_v50  ;;  %v994_v1 = vadd.f32 %v986_v27, %v887_v61  ;;  %v1305_v27 = vrot.slane %v1848_v18, 7 }
  0xe2   : > { %v888_v57 = vadd.f32 %v882_v32, %v801_v52  ;;  %v1103_v5 = vadd.f32 %v1095_v29, %v994_v1  ;;  %v1306_v32 = vsel %vm1303_vm6, %v1304_v25, %v1305_v27  ;;  %v1308_v37 = vsel %vm1303_vm6, %v1305_v27, %v1307_v17  ;;  %v1328_v18 = vpop.permute.xlu0 %1327 }
  0xe7   : > { %v989_v46 = vpop.f32.mrf.mxu2  ;;  %v797_v47 = vpop.f32.mrf.mxu0 }
  0xe8   : > { %v1098_v48 = vpop.f32.mrf.mxu3  ;;  %v884_v49 = vpop.f32.mrf.mxu1  ;;  %v995_v62 = vadd.f32 %v989_v46, %v888_v57 }
  0xea   : > { %v1104_v58 = vadd.f32 %v1098_v48, %v995_v62 }
  0xef   : > { %v991_v38 = vpop.f32.mrf.mxu2  ;;  %v1189_v59 = vpop.f32.mrf.mxu0 }
  0xf0   : > { %v1100_v60 = vpop.f32.mrf.mxu3  ;;  %v1198_v45 = vadd.f32 %v1189_v59, %v1102_v63 }
  0xf2   : > { %v1205_v2 = vadd.f32 %v1921_v4, %v1198_v45 }
  0xf4   : > { %v1208_v9 = vmax.f32 %v1205_v2, 0.0 }
  0xf7   : > { %v1194_v40 = vpop.f32.mrf.mxu2  ;;  %v1191_v3 = vpop.f32.mrf.mxu0 }
  0xf8   : > { %v1200_v0 = vadd.f32 %v1194_v40, %v1104_v58  ;;  %v1199_v6 = vadd.f32 %v1191_v3, %v1103_v5 }
  0xfa   : > { %v1207_v55 = vadd.f32 %v1921_v4, %v1200_v0  ;;  %v1206_v7 = vadd.f32 %v1921_v4, %v1199_v6 }
  0xfc   : > { %v1210_v8 = vmax.f32 %v1207_v55, 0.0  ;;  %v1209_v10 = vmax.f32 %v1206_v7, 0.0 }
  0xfe   : > { %v1212_v11 = vpack.c.bf16 %v1210_v8, %v1210_v8  ;;  %v1211_v12 = vpack.c.bf16 %v1209_v10, %v1208_v9 }
  0xff   : > { %v1196_v13 = vpop.f32.mrf.mxu2 }
 0x100   : > { %1294 = vmatmul.bf16.vlgmr.msra.gmra.mxu3 %v1212_v11  ;;  %1289 = vmatmul.bf16.vlgmr.msra.gmra.mxu1 %v1211_v12 }
 0x17d   : > { %v1290_v14 = vpop.f32.mrf.mxu1 }
 0x17e   : > { %v1291_v28 = vadd.f32 %v1922_v16, %v1290_v14 }
 0x180   : > { %v1314_v19 = vadd.f32 %v1306_v32, %v1291_v28 }
 0x182   : > { %v1335_v36 = vmul.f32 %v1323_v22, %v1314_v19 }
 0x183   : > { %v1295_v29 = vpop.f32.mrf.mxu3 }
 0x184   : > { %v1296_v33 = vadd.f32 %v1922_v16, %v1295_v29 }
 0x185   : > { %v1292_v21 = vpop.f32.mrf.mxu1 }
 0x186   : > { %v1316_v35 = vadd.f32 %v1310_v31, %v1296_v33  ;;  %v1293_v23 = vadd.f32 %v1922_v16, %v1292_v21 }
 0x188   : > { %v1337_v39 = vmul.f32 %v1333_v34, %v1316_v35  ;;  %v1315_v15 = vadd.f32 %v1308_v37, %v1293_v23 }
 0x18a   : > { %v1340_v24 = vpack.c.bf16 %v1337_v39, %v1337_v39  ;;  %v1336_v41 = vmul.f32 %v1328_v18, %v1315_v15 }
 0x18b   : > { %v1297_v42 = vpop.f32.mrf.mxu3 }
 0x18c   : > { %1343 = vst [vmem:[%s297_s26 + $0x8] sm:$0xf] %v1340_v24  ;;  %v1856_v43 = vpack.c.bf16 %v1336_v41, %v1335_v36 }
 0x18e   : > { %1857 = vst [vmem:[%s297_s26] sm:$0xff] %v1856_v43  }
 0x18f PF: > { %s18_s21 = sadd.s32 1, %s2027_s21  }
 0x190   : > { %p15_p7 = scmp.ge.s32.totalorder %s18_s21, 4  }
 0x192   :  { %17 = sbr.rel (!%p15_p7) target bundleno = 2 (0x2), region = 87 }
 0x197   :  { %1365 = vsyncpa [#allocation3], 1 }
 0x198   :  { %1367 = vsyncpa [#allocation3 + $0x1], 1 }
 0x199   :  { %1368 = vsyncpa [#allocation5], 1 }

// kernel: vqvae_forward.23
= control target key start
LH: loop header
LB: loop body
LE: loop exit
PB: predicated region body
PF: predicated region fallthrough
CT: control target
= control target key end

     0   :  { %s2367_s15 = smov 0   ;;  %s2369_s16 = smov 0   ;;  %s2912_s0 = inlined_call_operand.vmem [shape: bf16[2,110,128], index: 0, kind: input, shape index: {}]   ;;  %s2913_s1 = inlined_call_operand.vmem [shape: bf16[1152,128], index: 1, kind: input, shape index: {}]   ;;  %s2914_s2 = inlined_call_operand.vmem [shape: f32[1,128], index: 2, kind: input, shape index: {}]   ;;  %s2915_s3 = inlined_call_operand.vmem [shape: f32[80,1], index: 3, kind: input, shape index: {}]   ;;  %s2916_s4 = inlined_call_operand.vmem [shape: bf16[2,80,128], index: 4, kind: output, shape index: {}]  }
   0x1   :  { %s2371_s17 = smov 0  }
   0x2 LB: > { %s23_s18 = sadd.s32 1, %s2335_s16  ;;  %p1809_p0 = scmp.ge.s32.totalorder %s2339_s17, 1  ;;  %s2339_s17 = sphi %s2371_s17, %s14_s17   ;;  %s2335_s16 = sphi %s2369_s16, %s2918_s16   ;;  %s2331_s15 = sphi %s2367_s15, %s2917_s15  }
   0x3   : > { %p24_p1 = scmp.ge.s32.totalorder %s23_s18, 2  ;;  %p193_p2 = scmp.lt.s32.totalorder %s2339_s17, 3 }
   0x5   : > { %s2920_s18 = smov (%p24_p1, %s23_s18), 0  ;;  %p194_p3 = pnand %p1809_p0, %p193_p2 }
   0x6   : > { %p229_p4 = scmp.lt.s32.totalorder (!%p194_p3), %s2331_s15, 1 }
   0x7   : > { %197 = sbr.rel (%p194_p3) target bundleno = 376 (0x178), region = 36 }
   0xc   : > { %v2169_v0 = vld [vmem:[%s2913_s1 + $0x78] sm:$0xff]  ;;  %v2168_v1 = vld [vmem:[%s2913_s1 + $0x70] sm:$0xff]  ;;  %s2922_s15 = smov (!%p229_p4, %s2331_s15), 1  ;;  %v2167_v4 = vld [vmem:[%s2913_s1 + $0x68] sm:$0xff]  ;;  %vm320_vm0 = vsmask.f32 7424 }
   0xd   : > { %418 = vmatpush.bf16.msra.mxu0 %v2169_v0  ;;  %2270 = vmatpush.bf16.msra.mxu1 %v2169_v0  ;;  %v2189_v2 = vld [vmem:[%s2913_s1 + $0xf8] sm:$0xff]  ;;  %v2188_v3 = vld [vmem:[%s2913_s1 + $0xf0] sm:$0xff]  ;;  %s2286_s29 = smul.u32 56, %s2922_s15  ;;  %v2187_v5 = vld [vmem:[%s2913_s1 + $0xe8] sm:$0xff]  ;;  %vm559_vm1 = vcmask 1046528   ;;  %vm1022_vm4 = vcmask 1045504  }
   0xe   : > { %2271 = vmatpush.bf16.msra.mxu2 %v2169_v0  ;;  %787 = vmatpush.bf16.msra.mxu3 %v2189_v2  ;;  %v2166_v6 = vld [vmem:[%s2913_s1 + $0x60] sm:$0xff]  ;;  %v2165_v9 = vld [vmem:[%s2913_s1 + $0x58] sm:$0xff]  ;;  %v2164_v17 = vld [vmem:[%s2913_s1 + $0x50] sm:$0xff]  ;;  %vm851_vm2 = vsmask.f32 6400  ;;  %vm1485_vm5 = vcmask 1044480  }
   0xf   : > { %s2412_s10 = scalar_lea.vmem %s2912_s0, %s2286_s29  ;;  %v2186_v7 = vld [vmem:[%s2913_s1 + $0xe0] sm:$0xff]  ;;  %v2185_v14 = vld [vmem:[%s2913_s1 + $0xd8] sm:$0xff]  ;;  %v2184_v24 = vld [vmem:[%s2913_s1 + $0xd0] sm:$0xff]  ;;  %vm1314_vm3 = vsmask.f32 5376  ;;  %s2287_s19 = smul.u32 40, %s2922_s15 }
  0x10   : > { %v275_v8 = vld [vmem:[%s2412_s10 + $0x28] sm:$0x1]  ;;  %v2422_v10 = vld [vmem:[%s2412_s10] sm:$0xff]   ;;  %v2425_v11 = vld [vmem:[%s2412_s10 + $0x10] sm:$0xff] }
  0x11   : > { %419 = vmatpush.bf16.msra.mxu0 %v2168_v1  ;;  %2272 = vmatpush.bf16.msra.mxu1 %v2168_v1  ;;  %v2428_v12 = vld [vmem:[%s2412_s10 + $0x20] sm:$0xff]  ;;  %v313_v13 = vunpack.c.l.b16 %v275_v8  ;;  %v2434_v15 = vld [vmem:[%s2412_s10 + $0x8] sm:$0xff]  ;;  %v324_v16 = vshll.u32 %v2422_v10, 16  ;;  %v2441_v18 = vld [vmem:[%s2412_s10 + $0x18] sm:$0xff]  ;;  %v337_v19 = vshll.u32 %v2425_v11, 16  ;;  %v322_v25 = vshrl.u32 %v2422_v10, 16  ;;  %s2881_s22 = scalar_lea.vmem %s2916_s4, %s2287_s19 }
  0x12   : > { %2273 = vmatpush.bf16.msra.mxu2 %v2168_v1  ;;  %788 = vmatpush.bf16.msra.mxu3 %v2188_v3  ;;  %v353_v21 = vshll.u32 %v2428_v12, 16  ;;  %v668_v22 = vld [vmem:[%s2412_s10 + $0x4] sm:$0xe]  ;;  %v2449_v23 = vld [vmem:[%s2412_s10 + $0x8] sm:$0xff]   ;;  %v329_v27 = vshll.u32 %v2434_v15, 16  ;;  %v341_v28 = vshrl.u32 %v2425_v11, 16 }
  0x13   : > { %v2444_v20 = vpack.c.b16 %v313_v13, %v313_v13  ;;  %v326_v26 = vrot.slane %v324_v16, 1  ;;  %v2163_v29 = vld [vmem:[%s2913_s1 + $0x48] sm:$0xff]  ;;  %v2460_v30 = vrot.slane %v337_v19, 1  ;;  %v345_v31 = vshll.u32 %v2441_v18, 16  ;;  %v2162_v39 = vld [vmem:[%s2913_s1 + $0x40] sm:$0xff]  ;;  %v2161_v45 = vld [vmem:[%s2913_s1 + $0x38] sm:$0xff] }
  0x14   : > { %v706_v32 = vunpack.c.l.b16 %v668_v22  ;;  %v707_v33 = vunpack.c.l.b16 %v2449_v23  ;;  %v2464_v34 = vrot.slane %v353_v21, 1  ;;  %v357_v35 = vshrl.u32 %v2428_v12, 16  ;;  %v2183_v37 = vld [vmem:[%s2913_s1 + $0xc8] sm:$0xff]  ;;  %v2177_v48 = vld [vmem:[%s2913_s1 + $0xb8] sm:$0xff]  ;;  %v2182_v52 = vld [vmem:[%s2913_s1 + $0xc0] sm:$0xff] }
  0x15   : > { %420 = vmatpush.bf16.msra.mxu0 %v2167_v4  ;;  %2274 = vmatpush.bf16.msra.mxu1 %v2167_v4  ;;  %v361_v36 = vshll.u32 %v2444_v20, 16  ;;  %v331_v38 = vrot.slane %v329_v27, 1  ;;  %v327_v40 = vor.u32 %v326_v26, %v322_v25  ;;  %v343_v41 = vor.u32 %v341_v28, %v2460_v30  ;;  %v2476_v43 = vld [vmem:[%s2412_s10 + $0xc] sm:$0xff]  ;;  %v2197_v49 = vld [vmem:[%s2913_s1 + $0x138] sm:$0xff]  ;;  %v2158_v3 = vld [vmem:[%s2913_s1 + $0x20] sm:$0xff] }
  0x16   : > { %2275 = vmatpush.bf16.msra.mxu2 %v2167_v4  ;;  %789 = vmatpush.bf16.msra.mxu3 %v2187_v5  ;;  %v347_v42 = vrot.slane %v345_v31, 1  ;;  %v2480_v44 = vpack.c.b16 %v707_v33, %v706_v32  ;;  %v359_v46 = vor.u32 %v357_v35, %v2464_v34  ;;  %v724_v54 = vrot.slane %v2476_v43, 1  ;;  %v2160_v56 = vld [vmem:[%s2913_s1 + $0x30] sm:$0xff]  ;;  %v2225_v57 = vld [vmem:[%s2913_s1 + $0x1f8] sm:$0xff]  ;;  %v2159_v61 = vld [vmem:[%s2913_s1 + $0x28] sm:$0xff] }
  0x17   : > { %v363_v47 = vrot.slane %v361_v36, 1  ;;  %v332_v50 = vsel %vm320_vm0, %v327_v40, %v331_v38  ;;  %v2176_v58 = vld [vmem:[%s2913_s1 + $0xb0] sm:$0xff]  ;;  %v2175_v63 = vld [vmem:[%s2913_s1 + $0xa8] sm:$0xff]  ;;  %v333_v1 = vshrl.u32 %v2434_v15, 16  ;;  %v349_v2 = vshrl.u32 %v2441_v18, 16  ;;  %v2174_v4 = vld [vmem:[%s2913_s1 + $0xa0] sm:$0xff] }
  0x18   : > { %v348_v51 = vsel %vm320_vm0, %v343_v41, %v347_v42  ;;  %v723_v53 = vrot.slane %v2480_v44, 1  ;;  %v2196_v59 = vld [vmem:[%s2913_s1 + $0x130] sm:$0xff]  ;;  %v2195_v0 = vld [vmem:[%s2913_s1 + $0x128] sm:$0xff]  ;;  %v2194_v5 = vld [vmem:[%s2913_s1 + $0x120] sm:$0xff]  ;;  %v853_v27 = vshrl.u32 %v2480_v44, 16  ;;  %v864_v31 = vshll.u32 %v2476_v43, 16 }
  0x19   : > { %421 = vmatpush.bf16.msra.mxu0 %v2166_v6  ;;  %2276 = vmatpush.bf16.msra.mxu1 %v2166_v6  ;;  %v364_v55 = vsel %vm320_vm0, %v359_v46, %v363_v47  ;;  %v2224_v62 = vld [vmem:[%s2913_s1 + $0x1f0] sm:$0xff]  ;;  %v2173_v13 = vld [vmem:[%s2913_s1 + $0x98] sm:$0xff]  ;;  %v2263_v25 = vld [vmem:[%s2412_s10] sm:$0xf0]  ;;  %v561_v46 = vrot.slane %v2434_v15, 1 }
  0x1a   : > { %2277 = vmatpush.bf16.msra.mxu2 %v2166_v6  ;;  %790 = vmatpush.bf16.msra.mxu3 %v2186_v7  ;;  %v725_v60 = vsel %vm559_vm1, %v723_v53, %v724_v54  ;;  %v335_v6 = vor.u32 %v333_v1, %v331_v38  ;;  %v351_v7 = vor.u32 %v349_v2, %v347_v42  ;;  %v2537_v8 = vld [vmem:[%s2412_s10 + $0x14] sm:$0xff]  ;;  %v2264_v26 = vld [vmem:[%s2412_s10] sm:$0xe]  ;;  %v2223_v28 = vld [vmem:[%s2913_s1 + $0x1e8] sm:$0xff]  ;;  %v855_v38 = vrot.slane %v853_v27, 1 }
  0x1b   : > { %v726_v19 = vrot.slane %v2537_v8, 1  ;;  %v2156_v21 = vld [vmem:[%s2913_s1 + $0x10] sm:$0xff]  ;;  %v2171_v35 = vld [vmem:[%s2913_s1 + $0x88] sm:$0xff]  ;;  %v866_v41 = vrot.slane %v864_v31, 2  ;;  %v2154_v42 = vld [vmem:[%s2913_s1] sm:$0xff] }
  0x1c   : > { %v340_v16 = vsel %vm320_vm0, %v335_v6, %v2460_v30  ;;  %v2172_v22 = vld [vmem:[%s2913_s1 + $0x90] sm:$0xff]  ;;  %v861_v30 = vshrl.u32 %v2476_v43, 16  ;;  %v2191_v36 = vld [vmem:[%s2913_s1 + $0x108] sm:$0xff]  ;;  %v2190_v47 = vld [vmem:[%s2913_s1 + $0x100] sm:$0xff] }
  0x1d   : > { %422 = vmatpush.bf16.msra.mxu0 %v2165_v9  ;;  %2278 = vmatpush.bf16.msra.mxu1 %v2165_v9  ;;  %v727_v32 = vsel %vm559_vm1, %v724_v54, %v726_v19  ;;  %v2603_v53 = vld [vmem:[%s2412_s10 + $0x1c] sm:$0xff]  ;;  %v2200_v27 = vld [vmem:[%s2913_s1 + $0x150] sm:$0xff] }
  0x1e   : > { %2279 = vmatpush.bf16.msra.mxu2 %v2165_v9  ;;  %791 = vmatpush.bf16.msra.mxu3 %v2185_v14  ;;  %v2157_v9 = vld [vmem:[%s2913_s1 + $0x18] sm:$0xff]  ;;  %v863_v40 = vrot.slane %v861_v30, 1  ;;  %v2202_v6 = vld [vmem:[%s2913_s1 + $0x160] sm:$0xff]  ;;  %v2228_v31 = vld [vmem:[%s2913_s1 + $0x210] sm:$0xff] }
  0x1f   : > { %v2193_v14 = vld [vmem:[%s2913_s1 + $0x118] sm:$0xff] }
  0x20   : > { %v2221_v2 = vld [vmem:[%s2913_s1 + $0x1d8] sm:$0xff] }
  0x21   : > { %423 = vmatpush.bf16.msra.mxu0 %v2164_v17  ;;  %2280 = vmatpush.bf16.msra.mxu1 %v2164_v17 }
  0x22   : > { %2281 = vmatpush.bf16.msra.mxu2 %v2164_v17  ;;  %792 = vmatpush.bf16.msra.mxu3 %v2184_v24  ;;  %v356_v17 = vsel %vm320_vm0, %v351_v7, %v2464_v34  ;;  %v2192_v24 = vld [vmem:[%s2913_s1 + $0x110] sm:$0xff]  ;;  %v2155_v34 = vld [vmem:[%s2913_s1 + $0x8] sm:$0xff]  ;;  %v2230_v7 = vld [vmem:[%s2913_s1 + $0x220] sm:$0xff] }
  0x25   : > { %424 = vmatpush.bf16.msra.mxu0 %v2163_v29  ;;  %2282 = vmatpush.bf16.msra.mxu1 %v2163_v29 }
  0x26   : > { %2283 = vmatpush.bf16.msra.mxu2 %v2163_v29  ;;  %793 = vmatpush.bf16.msra.mxu3 %v2183_v37  ;;  %v856_v29 = vshll.u32 %v2480_v44, 16  ;;  %v2265_v37 = vor.u32 %v2264_v26, %v2263_v25  ;;  %v2170_v44 = vld [vmem:[%s2913_s1 + $0x80] sm:$0xff]  ;;  %v2229_v25 = vld [vmem:[%s2913_s1 + $0x218] sm:$0xff]  ;;  %v2220_v26 = vld [vmem:[%s2913_s1 + $0x1d0] sm:$0xff] }
  0x29   : > { %425 = vmatpush.bf16.msra.mxu0 %v2162_v39  ;;  %2284 = vmatpush.bf16.msra.mxu1 %v2162_v39 }
  0x2a   : > { %2285 = vmatpush.bf16.msra.mxu2 %v2162_v39  ;;  %794 = vmatpush.bf16.msra.mxu3 %v2182_v52  ;;  %v858_v39 = vrot.slane %v856_v29, 2  ;;  %v2233_v52 = vld [vmem:[%s2913_s1 + $0x238] sm:$0xff]  ;;  %v882_v29 = vshll.u32 %v2603_v53, 16 }
  0x2c   : > { %426 = vmatmul.bf16.vlgmr.msra.gmra.mxu0 %v332_v50  ;;  %436 = vmatmul.bf16.vlgmr.msra.gmra.mxu1 %v348_v51  ;;  %v859_v50 = vor.u32 %v858_v39, %v855_v38  ;;  %v867_v51 = vor.u32 %v866_v41, %v863_v40  ;;  %v565_v38 = vrot.slane %v2441_v18, 1 }
  0x2d   : > { %505 = vmatpush.bf16.msrb.mxu1 %v2161_v45  ;;  %958 = vmatpush.bf16.msrb.mxu0 %v2197_v49  ;;  %v560_v45 = vrot.slane %v2265_v37, 1  ;;  %v2205_v49 = vld [vmem:[%s2913_s1 + $0x178] sm:$0xff] }
  0x2e   : > { %624 = vmatpush.bf16.msrb.mxu2 %v2177_v48  ;;  %1421 = vmatpush.bf16.msrb.mxu3 %v2225_v57  ;;  %v2217_v48 = vld [vmem:[%s2913_s1 + $0x1b8] sm:$0xff]  ;;  %v2204_v57 = vld [vmem:[%s2913_s1 + $0x170] sm:$0xff] }
  0x2f   : > { %446 = vmatmul.bf16.vlgmr.msra.gmra.mxu2 %v364_v55  ;;  %795 = vmatmul.bf16.vlgmr.msra.gmra.mxu3 %v725_v60  ;;  %v562_v54 = vsel %vm559_vm1, %v560_v45, %v561_v46  ;;  %v868_v55 = vsel %vm851_vm2, %v859_v50, %v867_v51  ;;  %v2222_v60 = vld [vmem:[%s2913_s1 + $0x1e0] sm:$0xff] }
  0x31   : > { %506 = vmatpush.bf16.msrb.mxu1 %v2160_v56  ;;  %959 = vmatpush.bf16.msrb.mxu0 %v2196_v59  ;;  %v2216_v56 = vld [vmem:[%s2913_s1 + $0x1b0] sm:$0xff] }
  0x32   : > { %625 = vmatpush.bf16.msrb.mxu2 %v2176_v58  ;;  %1422 = vmatpush.bf16.msrb.mxu3 %v2224_v62  ;;  %v728_v58 = vrot.slane %v2603_v53, 1  ;;  %v2232_v59 = vld [vmem:[%s2913_s1 + $0x230] sm:$0xff]  ;;  %v873_v62 = vshll.u32 %v2537_v8, 16 }
  0x34   : > { %v729_v1 = vsel %vm559_vm1, %v726_v19, %v728_v58 }
  0x35   : > { %507 = vmatpush.bf16.msrb.mxu1 %v2159_v61  ;;  %960 = vmatpush.bf16.msrb.mxu0 %v2195_v0  ;;  %v870_v61 = vshrl.u32 %v2537_v8, 16  ;;  %v2203_v0 = vld [vmem:[%s2913_s1 + $0x168] sm:$0xff] }
  0x36   : > { %626 = vmatpush.bf16.msrb.mxu2 %v2175_v63  ;;  %1423 = vmatpush.bf16.msrb.mxu3 %v2223_v28  ;;  %v2215_v63 = vld [vmem:[%s2913_s1 + $0x1a8] sm:$0xff]  ;;  %v879_v28 = vshrl.u32 %v2603_v53, 16 }
  0x39   : > { %508 = vmatpush.bf16.msrb.mxu1 %v2158_v3  ;;  %961 = vmatpush.bf16.msrb.mxu0 %v2194_v5  ;;  %v872_v3 = vrot.slane %v870_v61, 1  ;;  %v2214_v5 = vld [vmem:[%s2913_s1 + $0x1a0] sm:$0xff] }
  0x3a   : > { %627 = vmatpush.bf16.msrb.mxu2 %v2174_v4  ;;  %1424 = vmatpush.bf16.msrb.mxu3 %v2222_v60  ;;  %v875_v4 = vrot.slane %v873_v62, 2  ;;  %v831_v60 = vld [vmem:[%s2412_s10 + $0x2c] sm:$0x3] }
  0x3c   : > { %431 = vmatmul.bf16.gmra.mxu0 %v340_v16  ;;  %441 = vmatmul.bf16.gmra.mxu1 %v356_v17  ;;  %v2652_v16 = vld [vmem:[%s2412_s10 + $0x24] sm:$0xff]  ;;  %v2201_v17 = vld [vmem:[%s2913_s1 + $0x158] sm:$0xff] }
  0x3d   : > { %509 = vmatpush.bf16.msrb.mxu1 %v2157_v9  ;;  %962 = vmatpush.bf16.msrb.mxu0 %v2193_v14  ;;  %v563_v9 = vrot.slane %v2425_v11, 1  ;;  %v2213_v14 = vld [vmem:[%s2913_s1 + $0x198] sm:$0xff]  ;;  %v891_v50 = vshll.u32 %v2652_v16, 16 }
  0x3e   : > { %628 = vmatpush.bf16.msrb.mxu2 %v2173_v13  ;;  %1425 = vmatpush.bf16.msrb.mxu3 %v2221_v2  ;;  %v876_v13 = vor.u32 %v875_v4, %v872_v3  ;;  %v849_v2 = vunpack.c.l.b16 %v831_v60 }
  0x3f   : > { %800 = vmatmul.bf16.gmra.mxu3 %v727_v32  ;;  %v564_v19 = vsel %vm559_vm1, %v561_v46, %v563_v9  ;;  %v678_v32 = vld [vmem:[%s2412_s10 + $0x2c] sm:$0x1]  ;;  %v566_v41 = vsel %vm559_vm1, %v563_v9, %v565_v38  ;;  %v2226_v9 = vld [vmem:[%s2913_s1 + $0x200] sm:$0xff] }
  0x40   : > { %v716_v37 = vunpack.c.l.b16 %v678_v32 }
  0x41   : > { %510 = vmatpush.bf16.msrb.mxu1 %v2156_v21  ;;  %963 = vmatpush.bf16.msrb.mxu0 %v2192_v24  ;;  %v877_v21 = vsel %vm851_vm2, %v867_v51, %v876_v13  ;;  %v2212_v24 = vld [vmem:[%s2913_s1 + $0x190] sm:$0xff]  ;;  %v2210_v51 = vld [vmem:[%s2913_s1 + $0x180] sm:$0xff] }
  0x42   : > { %629 = vmatpush.bf16.msrb.mxu2 %v2172_v22  ;;  %v730_v22 = vrot.slane %v2652_v16, 1  ;;  %1426 = vmatpush.bf16.msrb.mxu3 %v2220_v26  ;;  %v722_v40 = vpack.c.b16 %v716_v37, %v716_v37  ;;  %v1465_v37 = vld [vmem:[%s2412_s10 + $0x8] sm:$0x8] }
  0x44   : > { %v731_v30 = vsel %vm559_vm1, %v728_v58, %v730_v22  ;;  %v732_v45 = vrot.slane %v722_v40, 1 }
  0x45   : > { %511 = vmatpush.bf16.msrb.mxu1 %v2155_v34  ;;  %964 = vmatpush.bf16.msrb.mxu0 %v2191_v36  ;;  %v2219_v34 = vld [vmem:[%s2913_s1 + $0x1c8] sm:$0xff]  ;;  %v884_v36 = vrot.slane %v882_v29, 2 }
  0x46   : > { %630 = vmatpush.bf16.msrb.mxu2 %v2171_v35  ;;  %v881_v35 = vrot.slane %v879_v28, 1  ;;  %1427 = vmatpush.bf16.msrb.mxu3 %v2219_v34 }
  0x48   : > { %v885_v39 = vor.u32 %v884_v36, %v881_v35  ;;  %v1002_v35 = vld [vmem:[%s2412_s10 + $0x4] sm:$0xc] }
  0x49   : > { %512 = vmatpush.bf16.msrb.mxu1 %v2154_v42  ;;  %965 = vmatpush.bf16.msrb.mxu0 %v2190_v47  ;;  %v1131_v42 = vld [vmem:[%s2412_s10 + $0x8] sm:$0xc]  ;;  %v1170_v47 = vunpack.c.h.b16 %v2449_v23 }
  0x4a   : > { %631 = vmatpush.bf16.msrb.mxu2 %v2170_v44  ;;  %v886_v44 = vsel %vm851_vm2, %v876_v13, %v885_v39  ;;  %v1169_v46 = vunpack.c.l.b16 %v1131_v42 }
  0x4c   : > { %513 = vmatmul.bf16.vlgmr.msrb.gmra.mxu1 %v2422_v10  ;;  %966 = vmatmul.bf16.vlgmr.msrb.gmra.mxu0 %v868_v55  ;;  %v2231_v10 = vld [vmem:[%s2913_s1 + $0x228] sm:$0xff]  ;;  %v2198_v55 = vld [vmem:[%s2913_s1 + $0x140] sm:$0xff] }
  0x4d   : > { %1087 = vmatpush.bf16.msra.mxu1 %v2205_v49  ;;  %1550 = vmatpush.bf16.msra.mxu0 %v2233_v52  ;;  %v888_v49 = vshrl.u32 %v2652_v16, 16  ;;  %v2227_v52 = vld [vmem:[%s2913_s1 + $0x208] sm:$0xff] }
  0x4e   : > { %1250 = vmatpush.bf16.msra.mxu2 %v2217_v48  ;;  %v2199_v48 = vld [vmem:[%s2913_s1 + $0x148] sm:$0xff] }
  0x4f   : > { %632 = vmatmul.bf16.vlgmr.msrb.gmra.mxu2 %v562_v54  ;;  %805 = vmatmul.bf16.gmra.mxu3 %v729_v1  ;;  %v2218_v54 = vld [vmem:[%s2913_s1 + $0x1c0] sm:$0xff]  ;;  %v890_v58 = vrot.slane %v888_v49, 1  ;;  %v567_v1 = vrot.slane %v2428_v12, 1 }
  0x50   : > { %1428 = vmatpush.bf16.msrb.mxu3 %v2218_v54 }
  0x51   : > { %1088 = vmatpush.bf16.msra.mxu1 %v2204_v57  ;;  %1551 = vmatpush.bf16.msra.mxu0 %v2232_v59  ;;  %v2715_v57 = vpack.c.b16 %v1170_v47, %v1169_v46  ;;  %v893_v59 = vrot.slane %v891_v50, 2 }
  0x52   : > { %1251 = vmatpush.bf16.msra.mxu2 %v2216_v56  ;;  %v2711_v56 = vld [vmem:[%s2412_s10 + $0x10] sm:$0xff] }
  0x53   : > { %v1316_v61 = vshrl.u32 %v2715_v57, 16  ;;  %v1319_v62 = vshll.u32 %v2715_v57, 16  ;;  %v1187_v49 = vrot.slane %v2711_v56, 2 }
  0x55   : > { %1089 = vmatpush.bf16.msra.mxu1 %v2203_v0  ;;  %1552 = vmatpush.bf16.msra.mxu0 %v2231_v10  ;;  %v1327_v0 = vshll.u32 %v2711_v56, 16  ;;  %v894_v10 = vor.u32 %v893_v59, %v890_v58  ;;  %v1318_v3 = vrot.slane %v1316_v61, 2  ;;  %v1321_v4 = vrot.slane %v1319_v62, 3  ;;  %v1609_v58 = vld [vmem:[%s2915_s3 + $0x8] sm:$0xff]  ;;  %v1610_v59 = vld [vmem:[%s2915_s3 + $0x10] sm:$0xff] }
  0x56   : > { %1252 = vmatpush.bf16.msra.mxu2 %v2215_v63  ;;  %v1324_v63 = vshrl.u32 %v2711_v56, 16 }
  0x57   : > { %v895_v13 = vsel %vm851_vm2, %v885_v39, %v894_v10  ;;  %v1483_v39 = vunpack.c.l.b16 %v1465_v37  ;;  %v1614_v37 = vld [vmem:[%s2915_s3 + $0x30] sm:$0xff] }
  0x59   : > { %1090 = vmatpush.bf16.msra.mxu1 %v2202_v6  ;;  %1553 = vmatpush.bf16.msra.mxu0 %v2230_v7  ;;  %v1329_v6 = vrot.slane %v1327_v0, 3  ;;  %v568_v7 = vsel %vm559_vm1, %v565_v38, %v567_v1  ;;  %v1020_v38 = vunpack.c.l.b16 %v1002_v35 }
  0x5a   : > { %1253 = vmatpush.bf16.msra.mxu2 %v2214_v5  ;;  %v1326_v5 = vrot.slane %v1324_v63, 2  ;;  %v1026_v63 = vrot.slane %v2537_v8, 2  ;;  %v1611_v8 = vld [vmem:[%s2915_s3 + $0x18] sm:$0xff] }
  0x5b   : > { %v1021_v42 = vpack.c.b16 %v707_v33, %v1020_v38  ;;  %v1024_v33 = vrot.slane %v2476_v43, 2 }
  0x5c   : > { %518 = vmatmul.bf16.gmra.mxu1 %v2434_v15  ;;  %971 = vmatmul.bf16.gmra.mxu0 %v877_v21  ;;  %v2211_v15 = vld [vmem:[%s2913_s1 + $0x188] sm:$0xff] }
  0x5d   : > { %1091 = vmatpush.bf16.msra.mxu1 %v2201_v17  ;;  %1554 = vmatpush.bf16.msra.mxu0 %v2229_v25  ;;  %v1322_v17 = vor.u32 %v1321_v4, %v1318_v3  ;;  %v2735_v25 = vld [vmem:[%s2412_s10 + $0x18] sm:$0xff]  ;;  %v1023_v50 = vrot.slane %v1021_v42, 2  ;;  %v1294_v3 = vld [vmem:[%s2412_s10 + $0x30] sm:$0x7] }
  0x5e   : > { %1254 = vmatpush.bf16.msra.mxu2 %v2213_v14  ;;  %v2728_v14 = vpack.c.b16 %v849_v2, %v849_v2  ;;  %v1333_v28 = vshrl.u32 %v2735_v25, 16  ;;  %v1336_v29 = vshll.u32 %v2735_v25, 16  ;;  %v1189_v62 = vrot.slane %v2735_v25, 2 }
  0x5f   : > { %637 = vmatmul.bf16.gmra.mxu2 %v564_v19  ;;  %810 = vmatmul.bf16.gmra.mxu3 %v731_v30  ;;  %v1330_v19 = vor.u32 %v1329_v6, %v1326_v5  ;;  %v1489_v0 = vrot.slane %v2735_v25, 3  ;;  %v1027_v6 = vsel %vm1022_vm4, %v1024_v33, %v1026_v63 }
  0x60   : > { %v897_v21 = vshrl.u32 %v2728_v14, 16  ;;  %v1190_v2 = vsel %vm1022_vm4, %v1187_v49, %v1189_v62 }
  0x61   : > { %1092 = vmatpush.bf16.msra.mxu1 %v2200_v27  ;;  %1555 = vmatpush.bf16.msra.mxu0 %v2228_v31  ;;  %v1338_v31 = vrot.slane %v1336_v29, 3 }
  0x62   : > { %1255 = vmatpush.bf16.msra.mxu2 %v2212_v24  ;;  %v1331_v24 = vsel %vm1314_vm3, %v1322_v17, %v1330_v19  ;;  %v899_v26 = vrot.slane %v897_v21, 1 }
  0x65   : > { %1093 = vmatpush.bf16.msra.mxu1 %v2199_v48  ;;  %1556 = vmatpush.bf16.msra.mxu0 %v2227_v52  ;;  %v1186_v48 = vrot.slane %v2715_v57, 2 }
  0x66   : > { %1256 = vmatpush.bf16.msra.mxu2 %v2211_v15  ;;  %v1335_v15 = vrot.slane %v1333_v28, 2  ;;  %v1028_v28 = vrot.slane %v2603_v53, 2 }
  0x67   : > { %v1188_v54 = vsel %vm1022_vm4, %v1186_v48, %v1187_v49  ;;  %v1141_v49 = vld [vmem:[%s2412_s10 + $0x30] sm:$0x3] }
  0x68   : > { %v1339_v36 = vor.u32 %v1338_v31, %v1335_v15 }
  0x69   : > { %1094 = vmatpush.bf16.msra.mxu1 %v2198_v55  ;;  %1557 = vmatpush.bf16.msra.mxu0 %v2226_v9 }
  0x6a   : > { %1257 = vmatpush.bf16.msra.mxu2 %v2210_v51  ;;  %v1340_v40 = vsel %vm1314_vm3, %v1330_v19, %v1339_v36 }
  0x6c   : > { %523 = vmatmul.bf16.gmra.mxu1 %v2425_v11  ;;  %976 = vmatmul.bf16.gmra.mxu0 %v886_v44  ;;  %v733_v11 = vsel %vm559_vm1, %v730_v22, %v732_v45  ;;  %v900_v22 = vshll.u32 %v2728_v14, 16  ;;  %v1484_v44 = vpack.c.b16 %v1170_v47, %v1483_v39  ;;  %v1487_v47 = vrot.slane %v2711_v56, 3  ;;  %v2770_v56 = vld [vmem:[%s2412_s10 + $0x28] sm:$0xff] }
  0x6d   : > { %v1351_v60 = vshrl.u32 %v2770_v56, 16  ;;  %v1354_v61 = vshll.u32 %v2770_v56, 16  ;;  %v1193_v42 = vrot.slane %v2770_v56, 2 }
  0x6e   : > { %v902_v27 = vrot.slane %v900_v22, 2  ;;  %v1486_v23 = vrot.slane %v1484_v44, 3 }
  0x6f   : > { %642 = vmatmul.bf16.gmra.mxu2 %v566_v41  ;;  %815 = vmatmul.bf16.gmra.mxu3 %v733_v11  ;;  %v2747_v41 = vld [vmem:[%s2412_s10 + $0x20] sm:$0xff]  ;;  %v1025_v11 = vsel %vm1022_vm4, %v1023_v50, %v1024_v33 }
  0x70   : > { %v903_v30 = vor.u32 %v902_v27, %v899_v26  ;;  %v1342_v45 = vshrl.u32 %v2747_v41, 16  ;;  %v1345_v46 = vshll.u32 %v2747_v41, 16  ;;  %v1488_v55 = vsel %vm1485_vm5, %v1486_v23, %v1487_v47 }
  0x71   : > { %v1191_v26 = vrot.slane %v2747_v41, 2  ;;  %v1491_v29 = vrot.slane %v2747_v41, 3  ;;  %v1617_v41 = vld [vmem:[%s2915_s3 + $0x48] sm:$0xff] }
  0x72   : > { %v904_v34 = vsel %vm851_vm2, %v894_v10, %v903_v30  ;;  %v1344_v51 = vrot.slane %v1342_v45, 2  ;;  %v1347_v52 = vrot.slane %v1345_v46, 3  ;;  %v1356_v10 = vrot.slane %v1354_v61, 3  ;;  %v1613_v61 = vld [vmem:[%s2915_s3 + $0x28] sm:$0xff] }
  0x73   : > { %v1192_v15 = vsel %vm1022_vm4, %v1189_v62, %v1191_v26  ;;  %v1492_v35 = vsel %vm1485_vm5, %v1489_v0, %v1491_v29  ;;  %v1030_v45 = vrot.slane %v2652_v16, 2  ;;  %v1493_v46 = vrot.slane %v2770_v56, 3  ;;  %v1615_v16 = vld [vmem:[%s2915_s3 + $0x38] sm:$0xff] }
  0x74   : > { %v1348_v57 = vor.u32 %v1347_v52, %v1344_v51  ;;  %v1194_v48 = vsel %vm1022_vm4, %v1191_v26, %v1193_v42  ;;  %v1612_v52 = vld [vmem:[%s2915_s3 + $0x20] sm:$0xff] }
  0x75   : > { %v1031_v23 = vsel %vm1022_vm4, %v1028_v28, %v1030_v45 }
  0x76   : > { %v1349_v43 = vsel %vm1314_vm3, %v1339_v36, %v1348_v57 }
  0x7c   : > { %528 = vmatmul.bf16.gmra.mxu1 %v2441_v18  ;;  %981 = vmatmul.bf16.gmra.mxu0 %v895_v13  ;;  %v569_v18 = vrot.slane %v2444_v20, 1  ;;  %v2341_v20 = vmov 0   ;;  %v1312_v13 = vunpack.c.l.b16 %v1294_v3 }
  0x7d   : > { %2313 = vset.pattern.permute.xlu0 %v2341_v20  ;;  %2314 = vset.pattern.permute.xlu1 %v2341_v20 }
  0x7e   : > { %v570_v32 = vsel %vm559_vm1, %v567_v1, %v569_v18  ;;  %2315 = vset.pattern.permute.xlu2 %v2341_v20  ;;  %1630 = vperm.xlu1 %2314, %v1610_v59   ;;  %v1353_v1 = vrot.slane %v1351_v60, 2  ;;  %v2790_v19 = vpack.c.b16 %v1312_v13, %v1312_v13 }
  0x7f   : > { %647 = vmatmul.bf16.gmra.mxu2 %v568_v7  ;;  %1429 = vmatmul.bf16.vlgmr.msrb.gmra.mxu3 %v1331_v24  ;;  %v1490_v7 = vsel %vm1485_vm5, %v1487_v47, %v1489_v0  ;;  %v1494_v47 = vsel %vm1485_vm5, %v1491_v29, %v1493_v46  ;;  %v1616_v29 = vld [vmem:[%s2915_s3 + $0x40] sm:$0xff] }
  0x80   : > { %v1357_v9 = vor.u32 %v1356_v10, %v1353_v1  ;;  %v1360_v24 = vshrl.u32 %v2790_v19, 16  ;;  %v1363_v25 = vshll.u32 %v2790_v19, 16  ;;  %1640 = vperm.xlu2 %2315, %v1612_v52   ;;  %v1032_v10 = vrot.slane %v2728_v14, 2 }
  0x82   : > { %v1358_v17 = vsel %vm1314_vm3, %v1348_v57, %v1357_v9  ;;  %v1362_v18 = vrot.slane %v1360_v24, 2  ;;  %v1365_v30 = vrot.slane %v1363_v25, 3  ;;  %v1033_v13 = vsel %vm1022_vm4, %v1030_v45, %v1032_v10 }
  0x84   : > { %v1366_v36 = vor.u32 %v1365_v30, %v1362_v18 }
  0x86   : > { %1635 = vperm.xlu1 %2314, %v1611_v8   ;;  %v1367_v39 = vsel %vm1314_vm3, %v1357_v9, %v1366_v36 }
  0x88   : > { %1645 = vperm.xlu2 %2315, %v1613_v61  }
  0x8c   : > { %533 = vmatmul.bf16.gmra.mxu1 %v2428_v12  ;;  %986 = vmatmul.bf16.gmra.mxu0 %v904_v34  ;;  %v1608_v12 = vld [vmem:[%s2915_s3] sm:$0xff]  ;;  %v1029_v34 = vsel %vm1022_vm4, %v1026_v63, %v1028_v28 }
  0x8d   : > { %1620 = vperm.xlu0 %2313, %v1608_v12  }
  0x8e   : > { %1655 = vperm.xlu1 %2314, %v1615_v16  }
  0x8f   : > { %652 = vmatmul.bf16.gmra.mxu2 %v570_v32  ;;  %1434 = vmatmul.bf16.gmra.mxu3 %v1340_v40 }
  0x90   : > { %1660 = vperm.xlu2 %2315, %v1616_v29  }
  0x95   : > { %1625 = vperm.xlu0 %2313, %v1609_v58  }
  0x9c   : > { %1095 = vmatmul.bf16.vlgmr.msra.gmra.mxu1 %v1025_v11  ;;  %1558 = vmatmul.bf16.vlgmr.msra.gmra.mxu0 %v1488_v55 }
  0x9d   : > { %1650 = vperm.xlu0 %2313, %v1614_v37  }
  0x9f   : > { %1258 = vmatmul.bf16.vlgmr.msra.gmra.mxu2 %v1188_v54  ;;  %1439 = vmatmul.bf16.gmra.mxu3 %v1349_v43  ;;  %v1179_v54 = vunpack.c.l.b16 %v1141_v49 }
  0xa1   : > { %v1185_v58 = vpack.c.b16 %v1179_v54, %v1179_v54 }
  0xa3   : > { %v1195_v63 = vrot.slane %v1185_v58, 2 }
  0xa5   : > { %1665 = vperm.xlu0 %2313, %v1617_v41  }
  0xa9   : > { %v427_v4 = vpop.f32.mrf.mxu0  ;;  %v2782_v5 = vpop.f32.mrf.mxu1 }
  0xac   : > { %1100 = vmatmul.bf16.gmra.mxu1 %v1027_v6  ;;  %1563 = vmatmul.bf16.gmra.mxu0 %v1490_v7 }
  0xaf   : > { %1263 = vmatmul.bf16.gmra.mxu2 %v1190_v2  ;;  %1444 = vmatmul.bf16.gmra.mxu3 %v1358_v17  ;;  %v1495_v2 = vrot.slane %v2790_v19, 3 }
  0xb1   : > { %v429_v21 = vpop.f32.mrf.mxu0  ;;  %v2792_v22 = vpop.f32.mrf.mxu1  ;;  %v1496_v8 = vsel %vm1485_vm5, %v1493_v46, %v1495_v2 }
  0xb2   : > { %v796_v27 = vpop.f32.mrf.mxu3  ;;  %v2807_v53 = vpop.f32.mrf.mxu2 }
  0xb9   : > { %v432_v31 = vpop.f32.mrf.mxu0  ;;  %v2800_v32 = vpop.f32.mrf.mxu1 }
  0xba   : > { %v798_v38 = vpop.f32.mrf.mxu3  ;;  %v2816_v12 = vpop.f32.mrf.mxu2 }
  0xbc   : > { %1105 = vmatmul.bf16.gmra.mxu1 %v1029_v34  ;;  %1568 = vmatmul.bf16.gmra.mxu0 %v1492_v35 }
  0xbf   : > { %1268 = vmatmul.bf16.gmra.mxu2 %v1192_v15  ;;  %1449 = vmatmul.bf16.gmra.mxu3 %v1367_v39 }
  0xc1   : > { %v434_v40 = vpop.f32.mrf.mxu0  ;;  %v2810_v20 = vpop.f32.mrf.mxu1 }
  0xc2   : > { %v801_v44 = vpop.f32.mrf.mxu3 }
  0xc9   : > { %v514_v50 = vpop.f32.mrf.mxu1  ;;  %v967_v33 = vpop.f32.mrf.mxu0 }
  0xca   : > { %v515_v51 = vadd.f32 %v514_v50, %v427_v4  ;;  %v803_v11 = vpop.f32.mrf.mxu3  ;;  %v1196_v4 = vsel %vm1022_vm4, %v1193_v42, %v1195_v63 }
  0xcc   : > { %1110 = vmatmul.bf16.gmra.mxu1 %v1031_v23  ;;  %1573 = vmatmul.bf16.gmra.mxu0 %v1494_v47 }
  0xcf   : > { %1273 = vmatmul.bf16.gmra.mxu2 %v1194_v48 }
  0xd1   : > { %v516_v56 = vpop.f32.mrf.mxu1  ;;  %v969_v59 = vpop.f32.mrf.mxu0 }
  0xd2   : > { %v633_v55 = vpop.f32.mrf.mxu2  ;;  %v517_v60 = vadd.f32 %v516_v56, %v429_v21  ;;  %v806_v0 = vpop.f32.mrf.mxu3 }
  0xd3   : > { %v658_v57 = vadd.f32 %v633_v55, %v515_v51 }
  0xd5   : > { %v821_v43 = vadd.f32 %v796_v27, %v658_v57 }
  0xd7   : > { %v2833_v62 = vadd.f32 %v967_v33, %v821_v43 }
  0xd9   : > { %v519_v7 = vpop.f32.mrf.mxu1  ;;  %v972_v9 = vpop.f32.mrf.mxu0 }
  0xda   : > { %v635_v1 = vpop.f32.mrf.mxu2  ;;  %v520_v17 = vadd.f32 %v519_v7, %v432_v31  ;;  %v808_v24 = vpop.f32.mrf.mxu3 }
  0xdb   : > { %v659_v3 = vadd.f32 %v635_v1, %v517_v60 }
  0xdc   : > { %1115 = vmatmul.bf16.gmra.mxu1 %v1033_v13  ;;  %1578 = vmatmul.bf16.gmra.mxu0 %v1496_v8 }
  0xdd   : > { %v822_v6 = vadd.f32 %v798_v38, %v659_v3 }
  0xdf   : > { %1278 = vmatmul.bf16.gmra.mxu2 %v1196_v4  ;;  %v2840_v21 = vadd.f32 %v969_v59, %v822_v6 }
  0xe1   : > { %v521_v26 = vpop.f32.mrf.mxu1  ;;  %v974_v27 = vpop.f32.mrf.mxu0 }
  0xe2   : > { %v638_v14 = vpop.f32.mrf.mxu2  ;;  %v522_v28 = vadd.f32 %v521_v26, %v434_v40  ;;  %v811_v30 = vpop.f32.mrf.mxu3 }
  0xe3   : > { %v660_v25 = vadd.f32 %v638_v14, %v520_v17 }
  0xe5   : > { %v823_v19 = vadd.f32 %v801_v44, %v660_v25 }
  0xe7   : > { %v2845_v18 = vadd.f32 %v972_v9, %v823_v19 }
  0xe9   : > { %v524_v35 = vpop.f32.mrf.mxu1  ;;  %v977_v36 = vpop.f32.mrf.mxu0 }
  0xea   : > { %v640_v15 = vpop.f32.mrf.mxu2  ;;  %v525_v37 = vadd.f32 %v524_v35, %v2782_v5  ;;  %v813_v40 = vpop.f32.mrf.mxu3  ;;  %v2872_v35 = vld [vmem:[%s2914_s2] ss:$0 sm:$0xff] }
  0xeb   : > { %v661_v31 = vadd.f32 %v640_v15, %v522_v28 }
  0xed   : > { %v824_v34 = vadd.f32 %v803_v11, %v661_v31 }
  0xef   : > { %v2848_v38 = vadd.f32 %v974_v27, %v824_v34 }
  0xf1   : > { %v526_v44 = vpop.f32.mrf.mxu1  ;;  %v979_v45 = vpop.f32.mrf.mxu0 }
  0xf2   : > { %v643_v39 = vpop.f32.mrf.mxu2  ;;  %v527_v46 = vadd.f32 %v526_v44, %v2792_v22  ;;  %v816_v23 = vpop.f32.mrf.mxu3 }
  0xf3   : > { %v662_v41 = vadd.f32 %v643_v39, %v525_v37 }
  0xf5   : > { %v825_v42 = vadd.f32 %v806_v0, %v662_v41 }
  0xf7   : > { %v2851_v48 = vadd.f32 %v977_v36, %v825_v42 }
  0xf9   : > { %v529_v47 = vpop.f32.mrf.mxu1  ;;  %v982_v51 = vpop.f32.mrf.mxu0 }
  0xfa   : > { %v645_v49 = vpop.f32.mrf.mxu2  ;;  %v530_v5 = vadd.f32 %v529_v47, %v2800_v32  ;;  %v818_v22 = vpop.f32.mrf.mxu3 }
  0xfb   : > { %v663_v50 = vadd.f32 %v645_v49, %v527_v46  ;;  %v1631_v47 = vpop.permute.xlu1 %1630 }
  0xfd   : > { %v826_v33 = vadd.f32 %v808_v24, %v663_v50 }
  0xff   : > { %v2854_v52 = vadd.f32 %v979_v45, %v826_v33  ;;  %v1621_v27 = vpop.permute.xlu0 %1620 }
 0x101   : > { %v531_v55 = vpop.f32.mrf.mxu1  ;;  %v984_v57 = vpop.f32.mrf.mxu0 }
 0x102   : > { %v648_v16 = vpop.f32.mrf.mxu2  ;;  %v532_v58 = vadd.f32 %v531_v55, %v2810_v20  ;;  %v1430_v1 = vpop.f32.mrf.mxu3 }
 0x103   : > { %v664_v54 = vadd.f32 %v648_v16, %v530_v5 }
 0x105   : > { %v827_v11 = vadd.f32 %v811_v30, %v664_v54 }
 0x107   : > { %v2857_v43 = vadd.f32 %v982_v51, %v827_v11  ;;  %v1626_v44 = vpop.permute.xlu0 %1625 }
 0x109   : > { %v534_v61 = vpop.f32.mrf.mxu1  ;;  %v987_v63 = vpop.f32.mrf.mxu0 }
 0x10a   : > { %v650_v56 = vpop.f32.mrf.mxu2  ;;  %v535_v0 = vadd.f32 %v534_v61, %v2807_v53  ;;  %v1432_v8 = vpop.f32.mrf.mxu3 }
 0x10b   : > { %v665_v59 = vadd.f32 %v650_v56, %v532_v58 }
 0x10d   : > { %v828_v60 = vadd.f32 %v813_v40, %v665_v59 }
 0x10f   : > { %v2860_v32 = vadd.f32 %v984_v57, %v828_v60 }
 0x111   : > { %v536_v4 = vpop.f32.mrf.mxu1  ;;  %v989_v6 = vpop.f32.mrf.mxu0 }
 0x112   : > { %v653_v10 = vpop.f32.mrf.mxu2  ;;  %v537_v20 = vadd.f32 %v536_v4, %v2816_v12  ;;  %v1435_v28 = vpop.f32.mrf.mxu3 }
 0x113   : > { %v666_v2 = vadd.f32 %v653_v10, %v535_v0 }
 0x115   : > { %v829_v3 = vadd.f32 %v816_v23, %v666_v2 }
 0x117   : > { %v2863_v7 = vadd.f32 %v987_v63, %v829_v3  ;;  %v1636_v63 = vpop.permute.xlu1 %1635 }
 0x119   : > { %v1096_v24 = vpop.f32.mrf.mxu1  ;;  %v1559_v14 = vpop.f32.mrf.mxu0 }
 0x11a   : > { %v655_v9 = vpop.f32.mrf.mxu2  ;;  %v1121_v53 = vadd.f32 %v1096_v24, %v2833_v62  ;;  %v1437_v45 = vpop.f32.mrf.mxu3 }
 0x11b   : > { %v667_v13 = vadd.f32 %v655_v9, %v537_v20 }
 0x11d   : > { %v830_v17 = vadd.f32 %v818_v22, %v667_v13 }
 0x11f   : > { %v2866_v25 = vadd.f32 %v989_v6, %v830_v17  ;;  %v1641_v6 = vpop.permute.xlu2 %1640 }
 0x121   : > { %v1098_v29 = vpop.f32.mrf.mxu1  ;;  %v1561_v30 = vpop.f32.mrf.mxu0 }
 0x122   : > { %v1259_v19 = vpop.f32.mrf.mxu2  ;;  %v1122_v15 = vadd.f32 %v1098_v29, %v2840_v21  ;;  %v1440_v11 = vpop.f32.mrf.mxu3 }
 0x123   : > { %v1284_v26 = vadd.f32 %v1259_v19, %v1121_v53 }
 0x125   : > { %v1455_v12 = vadd.f32 %v1430_v1, %v1284_v26 }
 0x127   : > { %v1584_v34 = vadd.f32 %v1559_v14, %v1455_v12 }
 0x129   : > { %v1101_v37 = vpop.f32.mrf.mxu1  ;;  %v1564_v39 = vpop.f32.mrf.mxu0  ;;  %v1598_v41 = vadd.f32 %v2872_v35, %v1584_v34 }
 0x12a   : > { %v1261_v31 = vpop.f32.mrf.mxu2  ;;  %v1123_v40 = vadd.f32 %v1101_v37, %v2845_v18  ;;  %v1442_v3 = vpop.f32.mrf.mxu3 }
 0x12b   : > { %v1285_v62 = vadd.f32 %v1261_v31, %v1122_v15  ;;  %v1668_v49 = vmul.f32 %v1621_v27, %v1598_v41 }
 0x12d   : > { %v1456_v36 = vadd.f32 %v1432_v8, %v1285_v62 }
 0x12f   : > { %v1585_v42 = vadd.f32 %v1561_v30, %v1456_v36  ;;  %v1646_v30 = vpop.permute.xlu2 %1645 }
 0x131   : > { %v1599_v21 = vadd.f32 %v2872_v35, %v1585_v42  ;;  %v1103_v51 = vpop.f32.mrf.mxu1  ;;  %v1566_v18 = vpop.f32.mrf.mxu0 }
 0x132   : > { %v1264_v46 = vpop.f32.mrf.mxu2  ;;  %v1124_v16 = vadd.f32 %v1103_v51, %v2848_v38  ;;  %v1445_v53 = vpop.f32.mrf.mxu3 }
 0x133   : > { %v1669_v50 = vmul.f32 %v1626_v44, %v1599_v21  ;;  %v1286_v33 = vadd.f32 %v1264_v46, %v1123_v40 }
 0x135   : > { %v2241_v23 = vpack.c.bf16 %v1669_v50, %v1668_v49  ;;  %v1457_v5 = vadd.f32 %v1435_v28, %v1286_v33  ;;  %v1656_v33 = vpop.permute.xlu1 %1655 }
 0x137   : > { %2242 = vst [vmem:[%s2881_s22] sm:$0xff] %v2241_v23   ;;  %v1586_v55 = vadd.f32 %v1564_v39, %v1457_v5  ;;  %v1651_v23 = vpop.permute.xlu0 %1650 }
 0x139   : > { %v1106_v22 = vpop.f32.mrf.mxu1  ;;  %v1569_v56 = vpop.f32.mrf.mxu0  ;;  %v1600_v59 = vadd.f32 %v2872_v35, %v1586_v55 }
 0x13a   : > { %v1266_v54 = vpop.f32.mrf.mxu2  ;;  %v1125_v60 = vadd.f32 %v1106_v22, %v2851_v48  ;;  %v1447_v41 = vpop.f32.mrf.mxu3 }
 0x13b   : > { %v1287_v57 = vadd.f32 %v1266_v54, %v1124_v16  ;;  %v1670_v10 = vmul.f32 %v1631_v47, %v1600_v59 }
 0x13d   : > { %v1458_v58 = vadd.f32 %v1437_v45, %v1287_v57 }
 0x13f   : > { %v1587_v61 = vadd.f32 %v1566_v18, %v1458_v58 }
 0x141   : > { %v1601_v0 = vadd.f32 %v2872_v35, %v1587_v61  ;;  %v1108_v20 = vpop.f32.mrf.mxu1  ;;  %v1571_v9 = vpop.f32.mrf.mxu0 }
 0x142   : > { %v1269_v1 = vpop.f32.mrf.mxu2  ;;  %v1126_v8 = vadd.f32 %v1108_v20, %v2854_v52  ;;  %v1450_v51 = vpop.f32.mrf.mxu3 }
 0x143   : > { %v1671_v2 = vmul.f32 %v1636_v63, %v1601_v0  ;;  %v1288_v38 = vadd.f32 %v1269_v1, %v1125_v60 }
 0x145   : > { %v2246_v4 = vpack.c.bf16 %v1671_v2, %v1670_v10  ;;  %v1459_v13 = vadd.f32 %v1440_v11, %v1288_v38  ;;  %v1666_v10 = vpop.permute.xlu0 %1665  ;;  %v1661_v2 = vpop.permute.xlu2 %1660 }
 0x147   : > { %2266 = vst [vmem:[%s2881_s22 + $0x8] sm:$0xff] %v2246_v4   ;;  %v1588_v24 = vadd.f32 %v1569_v56, %v1459_v13 }
 0x149   : > { %v1111_v19 = vpop.f32.mrf.mxu1  ;;  %v1602_v26 = vadd.f32 %v2872_v35, %v1588_v24  ;;  %v1574_v29 = vpop.f32.mrf.mxu0 }
 0x14a   : > { %v1271_v17 = vpop.f32.mrf.mxu2  ;;  %v1127_v27 = vadd.f32 %v1111_v19, %v2857_v43  ;;  %v1452_v60 = vpop.f32.mrf.mxu3 }
 0x14b   : > { %v1289_v48 = vadd.f32 %v1271_v17, %v1126_v8  ;;  %v1672_v31 = vmul.f32 %v1641_v6, %v1602_v26 }
 0x14d   : > { %v1460_v14 = vadd.f32 %v1442_v3, %v1289_v48 }
 0x14f   : > { %v1589_v28 = vadd.f32 %v1571_v9, %v1460_v14 }
 0x151   : > { %v1603_v12 = vadd.f32 %v2872_v35, %v1589_v28  ;;  %v1113_v36 = vpop.f32.mrf.mxu1  ;;  %v1576_v40 = vpop.f32.mrf.mxu0 }
 0x152   : > { %v1274_v15 = vpop.f32.mrf.mxu2  ;;  %v1128_v39 = vadd.f32 %v1113_v36, %v2860_v32 }
 0x153   : > { %v1673_v34 = vmul.f32 %v1646_v30, %v1603_v12  ;;  %v1290_v52 = vadd.f32 %v1274_v15, %v1127_v27 }
 0x155   : > { %v2251_v62 = vpack.c.bf16 %v1673_v34, %v1672_v31  ;;  %v1461_v37 = vadd.f32 %v1445_v53, %v1290_v52 }
 0x157   : > { %2267 = vst [vmem:[%s2881_s22 + $0x10] sm:$0xff] %v2251_v62   ;;  %v1590_v44 = vadd.f32 %v1574_v29, %v1461_v37 }
 0x159   : > { %v1116_v21 = vpop.f32.mrf.mxu1  ;;  %v1604_v50 = vadd.f32 %v2872_v35, %v1590_v44  ;;  %v1579_v54 = vpop.f32.mrf.mxu0 }
 0x15a   : > { %v1276_v42 = vpop.f32.mrf.mxu2  ;;  %v1129_v46 = vadd.f32 %v1116_v21, %v2863_v7 }
 0x15b   : > { %v1291_v43 = vadd.f32 %v1276_v42, %v1128_v39  ;;  %v1674_v32 = vmul.f32 %v1651_v23, %v1604_v50 }
 0x15d   : > { %v1462_v45 = vadd.f32 %v1447_v41, %v1291_v43 }
 0x15f   : > { %v1591_v49 = vadd.f32 %v1576_v40, %v1462_v45 }
 0x161   : > { %v1605_v47 = vadd.f32 %v2872_v35, %v1591_v49  ;;  %v1118_v57 = vpop.f32.mrf.mxu1  ;;  %v1581_v63 = vpop.f32.mrf.mxu0 }
 0x162   : > { %v1279_v18 = vpop.f32.mrf.mxu2  ;;  %v1130_v7 = vadd.f32 %v1118_v57, %v2866_v25 }
 0x163   : > { %v1675_v5 = vmul.f32 %v1656_v33, %v1605_v47  ;;  %v1292_v16 = vadd.f32 %v1279_v18, %v1129_v46 }
 0x165   : > { %v2256_v11 = vpack.c.bf16 %v1675_v5, %v1674_v32  ;;  %v1463_v55 = vadd.f32 %v1450_v51, %v1292_v16 }
 0x167   : > { %2268 = vst [vmem:[%s2881_s22 + $0x18] sm:$0xff] %v2256_v11   ;;  %v1592_v58 = vadd.f32 %v1579_v54, %v1463_v55 }
 0x169   : > { %v1606_v22 = vadd.f32 %v2872_v35, %v1592_v58 }
 0x16a   : > { %v1281_v56 = vpop.f32.mrf.mxu2 }
 0x16b   : > { %v1293_v59 = vadd.f32 %v1281_v56, %v1130_v7  ;;  %v1676_v38 = vmul.f32 %v1661_v2, %v1606_v22 }
 0x16d   : > { %v1464_v61 = vadd.f32 %v1452_v60, %v1293_v59 }
 0x16f   : > { %v1593_v0 = vadd.f32 %v1581_v63, %v1464_v61 }
 0x171   : > { %v1607_v1 = vadd.f32 %v2872_v35, %v1593_v0 }
 0x173   : > { %v1677_v3 = vmul.f32 %v1666_v10, %v1607_v1 }
 0x175   : > { %v2261_v4 = vpack.c.bf16 %v1677_v3, %v1676_v38 }
 0x177   : > { %2269 = vst [vmem:[%s2881_s22 + $0x20] sm:$0xff] %v2261_v4  }
 0x178 PF: > { %s14_s17 = sadd.s32 1, %s2339_s17   ;;  %s2917_s15 = smov %s2335_s16 }
 0x179   : > { %p11_p5 = scmp.ge.s32.totalorder %s14_s17, 4   ;;  %s2918_s16 = smov %s2920_s18 }
 0x17b   :  { %13 = sbr.rel (!%p11_p5) target bundleno = 2 (0x2), region = 72 }

</bundles_post_ra>
